<compile_context>
chip_gen: v7x
topology: tpu7x:2x2x1
jax: 0.10.0
libtpu: 0.0.40
codegen_flags: <defaults>
</compile_context>

<pallas_src>
import jax
import jax.numpy as jnp
from jax.experimental import pallas as pl
from jax.experimental.pallas import tpu as pltpu

# ---- synthetic architecture sizes (small, consistent with the module) --------
EMB = 32                  # point_net_embedding_dim (small test size)
PN_H1, PN_H2 = 16, 32     # simplified PointNet shared-MLP widths: 3 -> 16 -> 32 -> EMB
HEAD_H1, HEAD_H2 = 64, 32 # DEFAULT_HEAD_HIDDEN_LAYER_SIZES (synthetic)
OUT_DIM = 9               # six_d=False -> raw 3x3 rotation matrix
OUT_PAD = 128             # lane-dense padded output width (wrapper slices [:, :9])


def _fused_kernel(x_ref, z_ref,
                  w1, b1, w2, b2, w3, b3,
                  wh1a, wh1b, bh1, wh2, bh2, wh3p, bh3p,
                  out_ref):
    """One batch tile: siamese PointNet embeddings -> split-weight head -> (TB, 128)."""
    tb, n, _ = x_ref.shape

    def point_net(pts):  # pts: (TB, N, 3) f32 block
        # Flatten batch & point axes into one big 2D matmul per layer.
        # (layout-preserving collapse of leading dims; N is a multiple of 8)
        flat = pts.reshape(tb * n, 3)
        h = jnp.dot(flat.astype(jnp.bfloat16), w1[...],
                    preferred_element_type=jnp.float32) + b1[...]
        h = jnp.maximum(h, 0.0)
        h = jnp.dot(h.astype(jnp.bfloat16), w2[...],
                    preferred_element_type=jnp.float32) + b2[...]
        h = jnp.maximum(h, 0.0)
        h = jnp.dot(h.astype(jnp.bfloat16), w3[...],
                    preferred_element_type=jnp.float32) + b3[...]
        emb = jnp.max(h.reshape(tb, n, EMB), axis=1)   # symmetric max-pool over points
        return jnp.maximum(emb, 0.0)                   # final_activation = ReLU

    x_emb = point_net(x_ref[...])                      # (TB, EMB)
    z_emb = point_net(z_ref[...])                      # (TB, EMB)

    # Siamese concat folded into split first-layer weights (no cross-lane shuffle).
    h = jnp.maximum(
        jnp.dot(x_emb, wh1a[...], preferred_element_type=jnp.float32)
        + jnp.dot(z_emb, wh1b[...], preferred_element_type=jnp.float32)
        + bh1[...], 0.0)
    h = jnp.maximum(
        jnp.dot(h, wh2[...], preferred_element_type=jnp.float32) + bh2[...], 0.0)
    # Final layer padded to a lane-dense 128-wide slab (cols 9: are zero).
    out_ref[...] = jnp.dot(h, wh3p[...],
                           preferred_element_type=jnp.float32) + bh3p[...]


def init_params(key):
    """Deterministic synthetic weights (biases stored as (1, d) for clean broadcasting)."""
    ks = jax.random.split(key, 6)

    def lin(k, din, dout):
        scale = 1.0 / jnp.sqrt(jnp.float32(din))
        w = jax.random.uniform(k, (din, dout), jnp.float32, -scale, scale)
        b = jnp.full((1, dout), 0.01, jnp.float32)
        return w, b

    w1, b1 = lin(ks[0], 3, PN_H1)
    w2, b2 = lin(ks[1], PN_H1, PN_H2)
    w3, b3 = lin(ks[2], PN_H2, EMB)
    wh1, bh1 = lin(ks[3], 2 * EMB, HEAD_H1)
    wh2, bh2 = lin(ks[4], HEAD_H1, HEAD_H2)
    wh3, bh3 = lin(ks[5], HEAD_H2, OUT_DIM)
    return (w1, b1, w2, b2, w3, b3, wh1, bh1, wh2, bh2, wh3, bh3)


def _choose_batch_tile(B, N):
    """Batch tile sized so the per-step working set stays well under ~8 MiB.

    Sized for the tightest generation (v7x: 64 MiB physical VMEM, 32 MiB default
    scoped limit); v5e/v6e have more headroom. Rough per-batch-element footprint:
    x+z input tiles (lane-padded, double-buffered) + the f32 activation slabs.
    """
    budget = 8 * 1024 * 1024
    per_b = 2 * 2 * (N * 128 * 4) + 3 * (N * 64 * 4)
    tb = max(1, min(B, budget // max(per_b, 1)))
    if B <= 8:
        return B                       # single block equals the full batch dim
    return max(8, (tb // 8) * 8)       # multiple of 8 keeps blocks sublane-aligned


def pointnet_rotation_regression(x_ncl, z_ncl, params, batch_tile=None):
    """x_ncl, z_ncl: (B, 3, N) point clouds (PyTorch NCL). Returns (raw, projected)."""
    x = jnp.transpose(x_ncl, (0, 2, 1)).astype(jnp.float32)   # (B, N, 3)
    z = jnp.transpose(z_ncl, (0, 2, 1)).astype(jnp.float32)
    B, N, _ = x.shape

    (w1, b1, w2, b2, w3, b3, wh1, bh1, wh2, bh2, wh3, bh3) = params

    # bf16 MXU inputs for the large shared-MLP matmuls (f32 accumulate in-kernel);
    # biases / elementwise math stay f32.
    w1b = w1.astype(jnp.bfloat16)
    w2b = w2.astype(jnp.bfloat16)
    w3b = w3.astype(jnp.bfloat16)
    # Fold the siamese concat into two half weights (no in-kernel lane shuffle).
    wh1a, wh1b_ = wh1[:EMB], wh1[EMB:]
    # Lane-dense output: pad the 9-wide final layer to OUT_PAD columns with zeros.
    wh3p = jnp.zeros((HEAD_H2, OUT_PAD), jnp.float32).at[:, :OUT_DIM].set(wh3)
    bh3p = jnp.zeros((1, OUT_PAD), jnp.float32).at[:, :OUT_DIM].set(bh3)

    kparams = (w1b, b1, w2b, b2, w3b, b3, wh1a, wh1b_, bh1, wh2, bh2, wh3p, bh3p)

    TB = batch_tile if batch_tile is not None else _choose_batch_tile(B, N)
    grid = (pl.cdiv(B, TB),)

    flops = (2 * 2 * B * N * (3 * PN_H1 + PN_H1 * PN_H2 + PN_H2 * EMB)
             + 2 * B * (2 * EMB * HEAD_H1 + HEAD_H1 * HEAD_H2 + HEAD_H2 * OUT_PAD))
    bytes_accessed = (int(x.size) * 4 + int(z.size) * 4 + B * OUT_PAD * 4
                      + sum(int(p.size) * p.dtype.itemsize for p in kparams))

    out = pl.pallas_call(
        _fused_kernel,
        out_shape=jax.ShapeDtypeStruct((B, OUT_PAD), jnp.float32),
        grid_spec=pltpu.PrefetchScalarGridSpec(
            num_scalar_prefetch=0,
            grid=grid,
            in_specs=[pl.BlockSpec((TB, N, 3), lambda i: (i, 0, 0)),
                      pl.BlockSpec((TB, N, 3), lambda i: (i, 0, 0))]
                     + [pl.BlockSpec(p.shape, lambda i: (0, 0)) for p in kparams],
            out_specs=pl.BlockSpec((TB, OUT_PAD), lambda i: (i, 0)),
        ),
        compiler_params=pltpu.CompilerParams(
            dimension_semantics=("parallel",)),
        cost_estimate=pl.CostEstimate(flops=flops, transcendentals=0,
                                      bytes_accessed=bytes_accessed),
    )(x, z, *kparams)

    raw_matrix = out[:, :OUT_DIM].reshape(B, 3, 3)
    # projection == identity (six_d=False, svd=False)
    # TODO(synk): svd / gram_schmidt / multi_head projection branches not implemented
    # (SVD has no clean Pallas equivalent); defaults use the identity projection.
    return raw_matrix, raw_matrix


def _reference_forward(x_ncl, z_ncl, params):
    """Pure-JAX f32 reference of the module forward (identity projection)."""
    (w1, b1, w2, b2, w3, b3, wh1, bh1, wh2, bh2, wh3, bh3) = params

    def pn(p_ncl):
        p = jnp.transpose(p_ncl, (0, 2, 1)).astype(jnp.float32)
        h = jax.nn.relu(p @ w1 + b1)
        h = jax.nn.relu(h @ w2 + b2)
        h = h @ w3 + b3
        return jax.nn.relu(jnp.max(h, axis=1))

    feat = jnp.concatenate([pn(x_ncl), pn(z_ncl)], axis=-1)
    h = jax.nn.relu(feat @ wh1 + bh1)
    h = jax.nn.relu(h @ wh2 + bh2)
    out = h @ wh3 + bh3
    return out.reshape(x_ncl.shape[0], 3, 3)


if __name__ == "__main__":
    key = jax.random.PRNGKey(0)
    k_x, k_z, k_p = jax.random.split(key, 3)

    B, C, N = 16, 3, 128   # small shapes; N multiple of 128 keeps point loads lane-friendly
    x = jax.random.normal(k_x, (B, C, N), jnp.float32)
    z = jax.random.normal(k_z, (B, C, N), jnp.float32)
    params = init_params(k_p)

    # batch_tile=8 -> grid of 2 steps, exercising the pipelined batch grid.
    raw, proj = pointnet_rotation_regression(x, z, params, batch_tile=8)
    jax.block_until_ready((raw, proj))

    assert raw.shape == (B, 3, 3) and proj.shape == (B, 3, 3)
    assert bool(jnp.all(jnp.isfinite(raw)))
    assert bool(jnp.all(raw == proj))

    ref = _reference_forward(x, z, params)
    assert bool(jnp.allclose(raw, ref, rtol=5e-2, atol=5e-2)), "kernel/reference mismatch"

    print("KERNEL_OK")
</pallas_src>

<mosaic_0001>
module attributes {stable_mosaic.version = 11 : i64} {
  func.func @_fused_kernel(%arg0: i32, %arg1: memref<8x128x3xf32, #tpu.memory_space<vmem>>, %arg2: memref<8x128x3xf32, #tpu.memory_space<vmem>>, %arg3: memref<3x16xbf16, #tpu.memory_space<vmem>>, %arg4: memref<1x16xf32, #tpu.memory_space<vmem>>, %arg5: memref<16x32xbf16, #tpu.memory_space<vmem>>, %arg6: memref<1x32xf32, #tpu.memory_space<vmem>>, %arg7: memref<32x32xbf16, #tpu.memory_space<vmem>>, %arg8: memref<1x32xf32, #tpu.memory_space<vmem>>, %arg9: memref<32x64xf32, #tpu.memory_space<vmem>>, %arg10: memref<32x64xf32, #tpu.memory_space<vmem>>, %arg11: memref<1x64xf32, #tpu.memory_space<vmem>>, %arg12: memref<64x32xf32, #tpu.memory_space<vmem>>, %arg13: memref<1x32xf32, #tpu.memory_space<vmem>>, %arg14: memref<32x128xf32, #tpu.memory_space<vmem>>, %arg15: memref<1x128xf32, #tpu.memory_space<vmem>>, %arg16: memref<8x128xf32, #tpu.memory_space<vmem>>) attributes {dimension_semantics = [#tpu.dimension_semantics<parallel>], iteration_bounds = array<i64: 2>, scalar_prefetch = 0 : i64, scratch_operands = 0 : i64, tpu.core_type = #tpu.core_type<tc>, window_params = [{transform_indices = @transform_0, window_bounds = array<i64: 8, 128, 3>}, {transform_indices = @transform_1, window_bounds = array<i64: 8, 128, 3>}, {pipeline_mode = #tpu.pipeline_mode<synchronous>, transform_indices = @transform_2, window_bounds = array<i64: 3, 16>}, {pipeline_mode = #tpu.pipeline_mode<synchronous>, transform_indices = @transform_3, window_bounds = array<i64: 1, 16>}, {pipeline_mode = #tpu.pipeline_mode<synchronous>, transform_indices = @transform_4, window_bounds = array<i64: 16, 32>}, {pipeline_mode = #tpu.pipeline_mode<synchronous>, transform_indices = @transform_5, window_bounds = array<i64: 1, 32>}, {pipeline_mode = #tpu.pipeline_mode<synchronous>, transform_indices = @transform_6, window_bounds = array<i64: 32, 32>}, {pipeline_mode = #tpu.pipeline_mode<synchronous>, transform_indices = @transform_7, window_bounds = array<i64: 1, 32>}, {pipeline_mode = #tpu.pipeline_mode<synchronous>, transform_indices = @transform_8, window_bounds = array<i64: 32, 64>}, {pipeline_mode = #tpu.pipeline_mode<synchronous>, transform_indices = @transform_9, window_bounds = array<i64: 32, 64>}, {pipeline_mode = #tpu.pipeline_mode<synchronous>, transform_indices = @transform_10, window_bounds = array<i64: 1, 64>}, {pipeline_mode = #tpu.pipeline_mode<synchronous>, transform_indices = @transform_11, window_bounds = array<i64: 64, 32>}, {pipeline_mode = #tpu.pipeline_mode<synchronous>, transform_indices = @transform_12, window_bounds = array<i64: 1, 32>}, {pipeline_mode = #tpu.pipeline_mode<synchronous>, transform_indices = @transform_13, window_bounds = array<i64: 32, 128>}, {pipeline_mode = #tpu.pipeline_mode<synchronous>, transform_indices = @transform_14, window_bounds = array<i64: 1, 128>}, {transform_indices = @transform_15, window_bounds = array<i64: 8, 128>}]} {
    %c0 = arith.constant 0 : index
    %c0_0 = arith.constant 0 : index
    %c0_1 = arith.constant 0 : index
    %0 = vector.load %arg1[%c0, %c0_0, %c0_1] : memref<8x128x3xf32, #tpu.memory_space<vmem>>, vector<8x128x3xf32>
    %1 = vector.shape_cast %0 : vector<8x128x3xf32> to vector<1024x3xf32>
    %2 = arith.truncf %1 : vector<1024x3xf32> to vector<1024x3xbf16>
    %c0_2 = arith.constant 0 : index
    %c0_3 = arith.constant 0 : index
    %3 = vector.load %arg3[%c0_2, %c0_3] : memref<3x16xbf16, #tpu.memory_space<vmem>>, vector<3x16xbf16>
    %cst = arith.constant dense<0.000000e+00> : vector<1024x16xf32>
    %4 = tpu.matmul %2, %3, %cst {dimension_numbers = #tpu.dot_dimension_numbers<[1], [0], [0], [1], [0, 0, 1, 1], [], []>} : vector<1024x3xbf16>, vector<3x16xbf16>, vector<1024x16xf32> -> vector<1024x16xf32>
    %c0_4 = arith.constant 0 : index
    %c0_5 = arith.constant 0 : index
    %5 = vector.load %arg4[%c0_4, %c0_5] : memref<1x16xf32, #tpu.memory_space<vmem>>, vector<1x16xf32>
    %6 = vector.broadcast %5 : vector<1x16xf32> to vector<1024x16xf32>
    %7 = arith.addf %4, %6 : vector<1024x16xf32>
    %cst_6 = arith.constant 0.000000e+00 : f32
    %8 = vector.broadcast %cst_6 : f32 to vector<1024x16xf32>
    %9 = arith.maximumf %7, %8 : vector<1024x16xf32>
    %10 = arith.truncf %9 : vector<1024x16xf32> to vector<1024x16xbf16>
    %c0_7 = arith.constant 0 : index
    %c0_8 = arith.constant 0 : index
    %11 = vector.load %arg5[%c0_7, %c0_8] : memref<16x32xbf16, #tpu.memory_space<vmem>>, vector<16x32xbf16>
    %cst_9 = arith.constant dense<0.000000e+00> : vector<1024x32xf32>
    %12 = tpu.matmul %10, %11, %cst_9 {dimension_numbers = #tpu.dot_dimension_numbers<[1], [0], [0], [1], [0, 0, 1, 1], [], []>} : vector<1024x16xbf16>, vector<16x32xbf16>, vector<1024x32xf32> -> vector<1024x32xf32>
    %c0_10 = arith.constant 0 : index
    %c0_11 = arith.constant 0 : index
    %13 = vector.load %arg6[%c0_10, %c0_11] : memref<1x32xf32, #tpu.memory_space<vmem>>, vector<1x32xf32>
    %14 = vector.broadcast %13 : vector<1x32xf32> to vector<1024x32xf32>
    %15 = arith.addf %12, %14 : vector<1024x32xf32>
    %cst_12 = arith.constant 0.000000e+00 : f32
    %16 = vector.broadcast %cst_12 : f32 to vector<1024x32xf32>
    %17 = arith.maximumf %15, %16 : vector<1024x32xf32>
    %18 = arith.truncf %17 : vector<1024x32xf32> to vector<1024x32xbf16>
    %c0_13 = arith.constant 0 : index
    %c0_14 = arith.constant 0 : index
    %19 = vector.load %arg7[%c0_13, %c0_14] : memref<32x32xbf16, #tpu.memory_space<vmem>>, vector<32x32xbf16>
    %cst_15 = arith.constant dense<0.000000e+00> : vector<1024x32xf32>
    %20 = tpu.matmul %18, %19, %cst_15 {dimension_numbers = #tpu.dot_dimension_numbers<[1], [0], [0], [1], [0, 0, 1, 1], [], []>} : vector<1024x32xbf16>, vector<32x32xbf16>, vector<1024x32xf32> -> vector<1024x32xf32>
    %c0_16 = arith.constant 0 : index
    %c0_17 = arith.constant 0 : index
    %21 = vector.load %arg8[%c0_16, %c0_17] : memref<1x32xf32, #tpu.memory_space<vmem>>, vector<1x32xf32>
    %22 = vector.broadcast %21 : vector<1x32xf32> to vector<1024x32xf32>
    %23 = arith.addf %20, %22 : vector<1024x32xf32>
    %24 = vector.shape_cast %23 : vector<1024x32xf32> to vector<8x128x32xf32>
    %cst_18 = arith.constant dense<0xFF800000> : vector<8x32xf32>
    %25 = vector.multi_reduction <maximumf>, %24, %cst_18 [1] : vector<8x128x32xf32> to vector<8x32xf32>
    %cst_19 = arith.constant 0.000000e+00 : f32
    %26 = vector.broadcast %cst_19 : f32 to vector<8x32xf32>
    %27 = arith.maximumf %25, %26 : vector<8x32xf32>
    %c0_20 = arith.constant 0 : index
    %c0_21 = arith.constant 0 : index
    %c0_22 = arith.constant 0 : index
    %28 = vector.load %arg2[%c0_20, %c0_21, %c0_22] : memref<8x128x3xf32, #tpu.memory_space<vmem>>, vector<8x128x3xf32>
    %29 = vector.shape_cast %28 : vector<8x128x3xf32> to vector<1024x3xf32>
    %30 = arith.truncf %29 : vector<1024x3xf32> to vector<1024x3xbf16>
    %c0_23 = arith.constant 0 : index
    %c0_24 = arith.constant 0 : index
    %31 = vector.load %arg3[%c0_23, %c0_24] : memref<3x16xbf16, #tpu.memory_space<vmem>>, vector<3x16xbf16>
    %cst_25 = arith.constant dense<0.000000e+00> : vector<1024x16xf32>
    %32 = tpu.matmul %30, %31, %cst_25 {dimension_numbers = #tpu.dot_dimension_numbers<[1], [0], [0], [1], [0, 0, 1, 1], [], []>} : vector<1024x3xbf16>, vector<3x16xbf16>, vector<1024x16xf32> -> vector<1024x16xf32>
    %c0_26 = arith.constant 0 : index
    %c0_27 = arith.constant 0 : index
    %33 = vector.load %arg4[%c0_26, %c0_27] : memref<1x16xf32, #tpu.memory_space<vmem>>, vector<1x16xf32>
    %34 = vector.broadcast %33 : vector<1x16xf32> to vector<1024x16xf32>
    %35 = arith.addf %32, %34 : vector<1024x16xf32>
    %cst_28 = arith.constant 0.000000e+00 : f32
    %36 = vector.broadcast %cst_28 : f32 to vector<1024x16xf32>
    %37 = arith.maximumf %35, %36 : vector<1024x16xf32>
    %38 = arith.truncf %37 : vector<1024x16xf32> to vector<1024x16xbf16>
    %c0_29 = arith.constant 0 : index
    %c0_30 = arith.constant 0 : index
    %39 = vector.load %arg5[%c0_29, %c0_30] : memref<16x32xbf16, #tpu.memory_space<vmem>>, vector<16x32xbf16>
    %cst_31 = arith.constant dense<0.000000e+00> : vector<1024x32xf32>
    %40 = tpu.matmul %38, %39, %cst_31 {dimension_numbers = #tpu.dot_dimension_numbers<[1], [0], [0], [1], [0, 0, 1, 1], [], []>} : vector<1024x16xbf16>, vector<16x32xbf16>, vector<1024x32xf32> -> vector<1024x32xf32>
    %c0_32 = arith.constant 0 : index
    %c0_33 = arith.constant 0 : index
    %41 = vector.load %arg6[%c0_32, %c0_33] : memref<1x32xf32, #tpu.memory_space<vmem>>, vector<1x32xf32>
    %42 = vector.broadcast %41 : vector<1x32xf32> to vector<1024x32xf32>
    %43 = arith.addf %40, %42 : vector<1024x32xf32>
    %cst_34 = arith.constant 0.000000e+00 : f32
    %44 = vector.broadcast %cst_34 : f32 to vector<1024x32xf32>
    %45 = arith.maximumf %43, %44 : vector<1024x32xf32>
    %46 = arith.truncf %45 : vector<1024x32xf32> to vector<1024x32xbf16>
    %c0_35 = arith.constant 0 : index
    %c0_36 = arith.constant 0 : index
    %47 = vector.load %arg7[%c0_35, %c0_36] : memref<32x32xbf16, #tpu.memory_space<vmem>>, vector<32x32xbf16>
    %cst_37 = arith.constant dense<0.000000e+00> : vector<1024x32xf32>
    %48 = tpu.matmul %46, %47, %cst_37 {dimension_numbers = #tpu.dot_dimension_numbers<[1], [0], [0], [1], [0, 0, 1, 1], [], []>} : vector<1024x32xbf16>, vector<32x32xbf16>, vector<1024x32xf32> -> vector<1024x32xf32>
    %c0_38 = arith.constant 0 : index
    %c0_39 = arith.constant 0 : index
    %49 = vector.load %arg8[%c0_38, %c0_39] : memref<1x32xf32, #tpu.memory_space<vmem>>, vector<1x32xf32>
    %50 = vector.broadcast %49 : vector<1x32xf32> to vector<1024x32xf32>
    %51 = arith.addf %48, %50 : vector<1024x32xf32>
    %52 = vector.shape_cast %51 : vector<1024x32xf32> to vector<8x128x32xf32>
    %cst_40 = arith.constant dense<0xFF800000> : vector<8x32xf32>
    %53 = vector.multi_reduction <maximumf>, %52, %cst_40 [1] : vector<8x128x32xf32> to vector<8x32xf32>
    %cst_41 = arith.constant 0.000000e+00 : f32
    %54 = vector.broadcast %cst_41 : f32 to vector<8x32xf32>
    %55 = arith.maximumf %53, %54 : vector<8x32xf32>
    %c0_42 = arith.constant 0 : index
    %c0_43 = arith.constant 0 : index
    %56 = vector.load %arg9[%c0_42, %c0_43] : memref<32x64xf32, #tpu.memory_space<vmem>>, vector<32x64xf32>
    %cst_44 = arith.constant dense<0.000000e+00> : vector<8x64xf32>
    %57 = tpu.matmul %27, %56, %cst_44 {dimension_numbers = #tpu.dot_dimension_numbers<[1], [0], [0], [1], [0, 0, 1, 1], [], []>} : vector<8x32xf32>, vector<32x64xf32>, vector<8x64xf32> -> vector<8x64xf32>
    %c0_45 = arith.constant 0 : index
    %c0_46 = arith.constant 0 : index
    %58 = vector.load %arg10[%c0_45, %c0_46] : memref<32x64xf32, #tpu.memory_space<vmem>>, vector<32x64xf32>
    %cst_47 = arith.constant dense<0.000000e+00> : vector<8x64xf32>
    %59 = tpu.matmul %55, %58, %cst_47 {dimension_numbers = #tpu.dot_dimension_numbers<[1], [0], [0], [1], [0, 0, 1, 1], [], []>} : vector<8x32xf32>, vector<32x64xf32>, vector<8x64xf32> -> vector<8x64xf32>
    %60 = arith.addf %57, %59 : vector<8x64xf32>
    %c0_48 = arith.constant 0 : index
    %c0_49 = arith.constant 0 : index
    %61 = vector.load %arg11[%c0_48, %c0_49] : memref<1x64xf32, #tpu.memory_space<vmem>>, vector<1x64xf32>
    %62 = vector.broadcast %61 : vector<1x64xf32> to vector<8x64xf32>
    %63 = arith.addf %60, %62 : vector<8x64xf32>
    %cst_50 = arith.constant 0.000000e+00 : f32
    %64 = vector.broadcast %cst_50 : f32 to vector<8x64xf32>
    %65 = arith.maximumf %63, %64 : vector<8x64xf32>
    %c0_51 = arith.constant 0 : index
    %c0_52 = arith.constant 0 : index
    %66 = vector.load %arg12[%c0_51, %c0_52] : memref<64x32xf32, #tpu.memory_space<vmem>>, vector<64x32xf32>
    %cst_53 = arith.constant dense<0.000000e+00> : vector<8x32xf32>
    %67 = tpu.matmul %65, %66, %cst_53 {dimension_numbers = #tpu.dot_dimension_numbers<[1], [0], [0], [1], [0, 0, 1, 1], [], []>} : vector<8x64xf32>, vector<64x32xf32>, vector<8x32xf32> -> vector<8x32xf32>
    %c0_54 = arith.constant 0 : index
    %c0_55 = arith.constant 0 : index
    %68 = vector.load %arg13[%c0_54, %c0_55] : memref<1x32xf32, #tpu.memory_space<vmem>>, vector<1x32xf32>
    %69 = vector.broadcast %68 : vector<1x32xf32> to vector<8x32xf32>
    %70 = arith.addf %67, %69 : vector<8x32xf32>
    %cst_56 = arith.constant 0.000000e+00 : f32
    %71 = vector.broadcast %cst_56 : f32 to vector<8x32xf32>
    %72 = arith.maximumf %70, %71 : vector<8x32xf32>
    %c0_57 = arith.constant 0 : index
    %c0_58 = arith.constant 0 : index
    %73 = vector.load %arg14[%c0_57, %c0_58] : memref<32x128xf32, #tpu.memory_space<vmem>>, vector<32x128xf32>
    %cst_59 = arith.constant dense<0.000000e+00> : vector<8x128xf32>
    %74 = tpu.matmul %72, %73, %cst_59 {dimension_numbers = #tpu.dot_dimension_numbers<[1], [0], [0], [1], [0, 0, 1, 1], [], []>} : vector<8x32xf32>, vector<32x128xf32>, vector<8x128xf32> -> vector<8x128xf32>
    %c0_60 = arith.constant 0 : index
    %c0_61 = arith.constant 0 : index
    %75 = vector.load %arg15[%c0_60, %c0_61] : memref<1x128xf32, #tpu.memory_space<vmem>>, vector<1x128xf32>
    %76 = vector.broadcast %75 : vector<1x128xf32> to vector<8x128xf32>
    %77 = arith.addf %74, %76 : vector<8x128xf32>
    %c0_62 = arith.constant 0 : index
    %c0_63 = arith.constant 0 : index
    %78 = vector.load %arg16[%c0_62, %c0_63] : memref<8x128xf32, #tpu.memory_space<vmem>>, vector<8x128xf32>
    tpu.vector_store %arg16[%c0_62, %c0_63], %77 {strides = array<i32>} : memref<8x128xf32, #tpu.memory_space<vmem>>, vector<8x128xf32>,
    return
  }
  func.func @transform_0(%arg0: i32) -> (i32, i32, i32) {
    %c0_i32 = arith.constant 0 : i32
    %c0_i32_0 = arith.constant 0 : i32
    %c0_i32_1 = arith.constant 0 : i32
    return %arg0, %c0_i32, %c0_i32_0 : i32, i32, i32
  }
  func.func @transform_1(%arg0: i32) -> (i32, i32, i32) {
    %c0_i32 = arith.constant 0 : i32
    %c0_i32_0 = arith.constant 0 : i32
    %c0_i32_1 = arith.constant 0 : i32
    return %arg0, %c0_i32, %c0_i32_0 : i32, i32, i32
  }
  func.func @transform_2(%arg0: i32) -> (i32, i32) {
    %c0_i32 = arith.constant 0 : i32
    %c0_i32_0 = arith.constant 0 : i32
    %c0_i32_1 = arith.constant 0 : i32
    return %c0_i32, %c0_i32_0 : i32, i32
  }
  func.func @transform_3(%arg0: i32) -> (i32, i32) {
    %c0_i32 = arith.constant 0 : i32
    %c0_i32_0 = arith.constant 0 : i32
    %c0_i32_1 = arith.constant 0 : i32
    return %c0_i32, %c0_i32_0 : i32, i32
  }
  func.func @transform_4(%arg0: i32) -> (i32, i32) {
    %c0_i32 = arith.constant 0 : i32
    %c0_i32_0 = arith.constant 0 : i32
    %c0_i32_1 = arith.constant 0 : i32
    return %c0_i32, %c0_i32_0 : i32, i32
  }
  func.func @transform_5(%arg0: i32) -> (i32, i32) {
    %c0_i32 = arith.constant 0 : i32
    %c0_i32_0 = arith.constant 0 : i32
    %c0_i32_1 = arith.constant 0 : i32
    return %c0_i32, %c0_i32_0 : i32, i32
  }
  func.func @transform_6(%arg0: i32) -> (i32, i32) {
    %c0_i32 = arith.constant 0 : i32
    %c0_i32_0 = arith.constant 0 : i32
    %c0_i32_1 = arith.constant 0 : i32
    return %c0_i32, %c0_i32_0 : i32, i32
  }
  func.func @transform_7(%arg0: i32) -> (i32, i32) {
    %c0_i32 = arith.constant 0 : i32
    %c0_i32_0 = arith.constant 0 : i32
    %c0_i32_1 = arith.constant 0 : i32
    return %c0_i32, %c0_i32_0 : i32, i32
  }
  func.func @transform_8(%arg0: i32) -> (i32, i32) {
    %c0_i32 = arith.constant 0 : i32
    %c0_i32_0 = arith.constant 0 : i32
    %c0_i32_1 = arith.constant 0 : i32
    return %c0_i32, %c0_i32_0 : i32, i32
  }
  func.func @transform_9(%arg0: i32) -> (i32, i32) {
    %c0_i32 = arith.constant 0 : i32
    %c0_i32_0 = arith.constant 0 : i32
    %c0_i32_1 = arith.constant 0 : i32
    return %c0_i32, %c0_i32_0 : i32, i32
  }
  func.func @transform_10(%arg0: i32) -> (i32, i32) {
    %c0_i32 = arith.constant 0 : i32
    %c0_i32_0 = arith.constant 0 : i32
    %c0_i32_1 = arith.constant 0 : i32
    return %c0_i32, %c0_i32_0 : i32, i32
  }
  func.func @transform_11(%arg0: i32) -> (i32, i32) {
    %c0_i32 = arith.constant 0 : i32
    %c0_i32_0 = arith.constant 0 : i32
    %c0_i32_1 = arith.constant 0 : i32
    return %c0_i32, %c0_i32_0 : i32, i32
  }
  func.func @transform_12(%arg0: i32) -> (i32, i32) {
    %c0_i32 = arith.constant 0 : i32
    %c0_i32_0 = arith.constant 0 : i32
    %c0_i32_1 = arith.constant 0 : i32
    return %c0_i32, %c0_i32_0 : i32, i32
  }
  func.func @transform_13(%arg0: i32) -> (i32, i32) {
    %c0_i32 = arith.constant 0 : i32
    %c0_i32_0 = arith.constant 0 : i32
    %c0_i32_1 = arith.constant 0 : i32
    return %c0_i32, %c0_i32_0 : i32, i32
  }
  func.func @transform_14(%arg0: i32) -> (i32, i32) {
    %c0_i32 = arith.constant 0 : i32
    %c0_i32_0 = arith.constant 0 : i32
    %c0_i32_1 = arith.constant 0 : i32
    return %c0_i32, %c0_i32_0 : i32, i32
  }
  func.func @transform_15(%arg0: i32) -> (i32, i32) {
    %c0_i32 = arith.constant 0 : i32
    %c0_i32_0 = arith.constant 0 : i32
    return %arg0, %c0_i32 : i32, i32
  }
}

</mosaic_0001>

<bundles_post_ra>
// kernel: tpu_custom_call.1
= control target key start
LH: loop header
LB: loop body
LE: loop exit
PB: predicated region body
PF: predicated region fallthrough
CT: control target
= control target key end

     0   :  { %s11153_s0 = inlined_call_operand.vmem [shape: f32[16,128,3], index: 0, kind: input, shape index: {}]   ;;  %s11154_s1 = inlined_call_operand.vmem [shape: f32[16,128,3], index: 1, kind: input, shape index: {}]   ;;  %s11155_s2 = inlined_call_operand.vmem [shape: bf16[3,16], index: 2, kind: input, shape index: {}]   ;;  %s11156_s3 = inlined_call_operand.vmem [shape: f32[1,16], index: 3, kind: input, shape index: {}]   ;;  %s11157_s4 = inlined_call_operand.vmem [shape: bf16[16,32], index: 4, kind: input, shape index: {}]   ;;  %s11158_s5 = inlined_call_operand.vmem [shape: f32[1,32], index: 5, kind: input, shape index: {}]   ;;  %s11159_s6 = inlined_call_operand.vmem [shape: bf16[32,32], index: 6, kind: input, shape index: {}]   ;;  %s11160_s7 = inlined_call_operand.vmem [shape: f32[1,32], index: 7, kind: input, shape index: {}]   ;;  %s11161_s8 = inlined_call_operand.vmem [shape: f32[32,64], index: 8, kind: input, shape index: {}]   ;;  %s11162_s9 = inlined_call_operand.vmem [shape: f32[32,64], index: 9, kind: input, shape index: {}]   ;;  %s11163_s10 = inlined_call_operand.vmem [shape: f32[1,64], index: 10, kind: input, shape index: {}]   ;;  %s11164_s11 = inlined_call_operand.vmem [shape: f32[64,32], index: 11, kind: input, shape index: {}]   ;;  %s11165_s12 = inlined_call_operand.vmem [shape: f32[1,32], index: 12, kind: input, shape index: {}]   ;;  %s11166_s13 = inlined_call_operand.vmem [shape: f32[32,128], index: 13, kind: input, shape index: {}]   ;;  %s11167_s14 = inlined_call_operand.vmem [shape: f32[1,128], index: 14, kind: input, shape index: {}]   ;;  %s11168_s15 = inlined_call_operand.hbm [shape: f32[16,128], index: 15, kind: output, shape index: {}]  }
   0x1   :  { %11169 = sst [smem:[#allocation5_spill]] %s11153_s0 }
   0x2   :  { %11170 = sst [smem:[#allocation6_spill]] %s11154_s1 }
   0x3   :  { %11171 = sst [smem:[#allocation7_spill]] %s11155_s2 }
   0x4   :  { %11172 = sst [smem:[#allocation8_spill]] %s11156_s3 }
   0x5   :  { %11173 = sst [smem:[#allocation9_spill]] %s11157_s4 }
   0x6   :  { %20 = vsyncpa [#allocation3], 0 }
   0x7   :  { %22 = vsyncpa [#allocation3 + $0x1], 0  ;;  %s9125_s18 = smov 0   ;;  %s9127_s19 = smov 0  }
   0x8   :  { %s9129_s20 = smov 0   ;;  %s9131_s21 = smov 0  }
   0x9 LB: > { %s9146_s22 = sadd.s32 4294967295, %s9038_s21   ;;  %s7220_s23 = sadd.s32 4294967294, %s9038_s21   ;;  %s9038_s21 = sphi %s9131_s21, %s11184_s21   ;;  %s9034_s20 = sphi %s9129_s20, %s11183_s20   ;;  %s9030_s19 = sphi %s9127_s19, %s11182_s19   ;;  %s9026_s18 = sphi %s9125_s18, %s11181_s18  }
   0xa   : > { %s9150_s24 = sadd.s32 1, %s9038_s21   ;;  %s360_s25 = sadd.s32 1, %s9034_s20 }
   0xb   : > { %s357_s26 = ssub.s32 %s9038_s21, %s9150_s24  ;;  %p370_p0 = scmp.ne.s32.totalorder %s9034_s20, %s9030_s19 }
   0xc   : > { %p358_p1 = scmp.eq.s32.totalorder %s357_s26, 0  ;;  %p371_p2 = scmp.eq.s32.totalorder %s9146_s22, 1 }
   0xd   : > { %p376_p3 = scmp.ne.s32.totalorder %s9030_s19, %s9026_s18  ;;  %p377_p4 = scmp.eq.s32.totalorder %s7220_s23, 1 }
   0xe   : > { %s9161_s27 = scalar_select %p358_p1, %s9034_s20, %s360_s25  }
   0xf   : > { %p9163_p5 = por %p371_p2, %p370_p0  ;;  %p9167_p6 = por %p377_p4, %p376_p3 }
  0x10   : > { %p7223_p7 = scmp.ge.s32.totalorder %s9038_s21, 1  ;;  %p454_p8 = scmp.lt.s32.totalorder %s9038_s21, 3 }
  0x12   : > { %p455_p9 = pnand %p7223_p7, %p454_p8 }
  0x13   : > { %s11176_s2 = sld [smem:[#allocation7_spill]] (!%p455_p9)  ;;  %vm917_vm0 = vcmask (!%p455_p9), 1040384   ;;  %vm918_vm1 = vcmask (!%p455_p9), 1041408   ;;  %s7225_s17 = sshll.u32 (!%p455_p9), %s9146_s22, 3  ;;  %v9040_v1 = vmov (!%p455_p9), 65535   ;;  %vm724_vm2 = vcmask (!%p455_p9), 23552  }
  0x14   : > { %458 = sbr.rel (%p455_p9) target bundleno = 2105 (0x839), region = 80  ;;  %v919_v2 = vsel (!%p455_p9), %vm917_vm0, 4294967295, %v9040_v1  ;;  %p510_p10 = scmp.lt.s32.totalorder (!%p455_p9), %s7225_s17, 15  ;;  %v9244_v56 = vld [vmem:[%s11159_s6] sm:$0xff] (!%p455_p9)   ;;  %vm1676_vm3 = vcmask (!%p455_p9), 130048   ;;  %vm2629_vm4 = vcmask (!%p455_p9), 261120  }
  0x15   : > { %v920_v3 = vsel (!%p455_p9), %vm918_vm1, %v919_v2, 0  ;;  %s11177_s0 = sld [smem:[#allocation5_spill]] (!%p455_p9)  ;;  %s11178_s4 = sld [smem:[#allocation9_spill]] (!%p455_p9)  ;;  %vm6778_vm5 = vcmask (!%p455_p9), 1041409   ;;  %vm6780_vm6 = vcmask (!%p455_p9), 1042434   ;;  %vm6782_vm7 = vcmask (!%p455_p9), 1043459  }
  0x16   : > { %s11179_s3 = sld [smem:[#allocation8_spill]] (!%p455_p9)  ;;  %s11180_s1 = sld [smem:[#allocation6_spill]] (!%p455_p9)  ;;  %vm6784_vm8 = vcmask (!%p455_p9), 1044484   ;;  %vm6786_vm9 = vcmask (!%p455_p9), 1045509   ;;  %vm6788_vm10 = vcmask (!%p455_p9), 1046534   ;;  %vm6790_vm11 = vcmask (!%p455_p9), 1047559  }
  0x17   : > { %vm9042_vm12 = vmmov (!%p455_p9), 0   ;;  %vm6975_vm13 = vcmask (!%p455_p9), 523264   ;;  %s506_s16 = sand.u32 (!%p455_p9), 1, %s9030_s19  }
  0x18   : > { %s7224_s25 = sshll.u32 (!%p455_p9), %s506_s16, 3 }
  0x19   : > { %v716_v0 = vld [vmem:[%s11176_s2] sm:$0x3] (!%p455_p9)  ;;  %s508_s26 = scalar_lea.vmem (!%p455_p9), [#allocation2], %s7224_s25 }
  0x1a   : > { %v9177_v4 = vand.u32 (!%p455_p9), %v920_v3, %v716_v0  ;;  %s7149_s2 = sshll.u32 (!%p455_p9), %s508_s26, 4  ;;  %s11113_s2 = int_to_ptr.vmem [resolvable:$true] %s7149_s2 }
  0x1b   : > { %s11186_s17 = smov (!%p510_p10, %s7225_s17), 15 }
  0x1c   : > { %8050 = vmatprep.subr.bf16.mxu0 %v9177_v4  ;;  %s7632_s23 = sshll.u32 %s11186_s17, 7 }
  0x1d   : > { %8051 = vmatpush3.bf16.msra.mxu0 %v9177_v4  ;;  %s9189_s30 = scalar_lea.vmem %s11177_s0, %s7632_s23 }
  0x1e   : > { %v524_v5 = vld [vmem:[%s9189_s30] sm:$0xff]  ;;  %v525_v6 = vld [vmem:[%s9189_s30 + $0x8] sm:$0xff]  ;;  %v526_v7 = vld [vmem:[%s9189_s30 + $0x10] sm:$0xff]  ;;  %8310 = vmatprep.subr.bf16.mxu0 %v9244_v56 }
  0x1f   : > { %v652_v8 = vpack.c.bf16 %v525_v6, %v524_v5  ;;  %v527_v9 = vld [vmem:[%s9189_s30 + $0x18] sm:$0xff]  ;;  %v528_v10 = vld [vmem:[%s9189_s30 + $0x20] sm:$0xff]  ;;  %v529_v11 = vld [vmem:[%s9189_s30 + $0x28] sm:$0xff] }
  0x20   : > { %v653_v12 = vpack.c.bf16 %v527_v9, %v526_v7  ;;  %v654_v13 = vpack.c.bf16 %v529_v11, %v528_v10  ;;  %v530_v14 = vld [vmem:[%s9189_s30 + $0x30] sm:$0xff]  ;;  %v531_v15 = vld [vmem:[%s9189_s30 + $0x38] sm:$0xff]  ;;  %v532_v16 = vld [vmem:[%s9189_s30 + $0x40] sm:$0xff] }
  0x21   : > { %8052 = vmatprep.mubr.msk.bf16.mxu0 %vm724_vm2, %v652_v8  ;;  %v533_v17 = vld [vmem:[%s9189_s30 + $0x48] sm:$0xff]  ;;  %v655_v18 = vpack.c.bf16 %v531_v15, %v530_v14  ;;  %v534_v20 = vld [vmem:[%s9189_s30 + $0x50] sm:$0xff]  ;;  %v535_v21 = vld [vmem:[%s9189_s30 + $0x58] sm:$0xff] }
  0x22   : > { %8053 = vmatmul.mubr.msk.bf16.vlgmr.msra.gmra.mrb[0].mxu0 %vm724_vm2, %v653_v12  ;;  %v656_v19 = vpack.c.bf16 %v533_v17, %v532_v16  ;;  %v536_v22 = vld [vmem:[%s9189_s30 + $0x60] sm:$0xff]  ;;  %v537_v23 = vld [vmem:[%s9189_s30 + $0x68] sm:$0xff]  ;;  %v657_v24 = vpack.c.bf16 %v535_v21, %v534_v20  ;;  %v538_v26 = vld [vmem:[%s9189_s30 + $0x70] sm:$0xff] }
  0x23   : > { %8056 = vmatprep.mubr.msk.bf16.mxu0 %vm724_vm2, %v654_v13  ;;  %v658_v25 = vpack.c.bf16 %v537_v23, %v536_v22  ;;  %v539_v27 = vld [vmem:[%s9189_s30 + $0x78] sm:$0xff]  ;;  %v540_v28 = vld [vmem:[%s9189_s30 + $0x80] sm:$0xff]  ;;  %v541_v29 = vld [vmem:[%s9189_s30 + $0x88] sm:$0xff]  ;;  %8311 = vmatpush3.bf16.msra.mxu0 %v9244_v56 }
  0x24   : > { %v659_v30 = vpack.c.bf16 %v539_v27, %v538_v26  ;;  %v660_v31 = vpack.c.bf16 %v541_v29, %v540_v28  ;;  %v542_v32 = vld [vmem:[%s9189_s30 + $0x90] sm:$0xff]  ;;  %v543_v33 = vld [vmem:[%s9189_s30 + $0x98] sm:$0xff]  ;;  %v544_v34 = vld [vmem:[%s9189_s30 + $0xa0] sm:$0xff] }
  0x25   : > { %v545_v35 = vld [vmem:[%s9189_s30 + $0xa8] sm:$0xff]  ;;  %v661_v36 = vpack.c.bf16 %v543_v33, %v542_v32  ;;  %v546_v38 = vld [vmem:[%s9189_s30 + $0xb0] sm:$0xff]  ;;  %v547_v39 = vld [vmem:[%s9189_s30 + $0xb8] sm:$0xff] }
  0x26   : > { %v662_v37 = vpack.c.bf16 %v545_v35, %v544_v34  ;;  %v548_v40 = vld [vmem:[%s9189_s30 + $0xc0] sm:$0xff]  ;;  %v549_v41 = vld [vmem:[%s9189_s30 + $0xc8] sm:$0xff]  ;;  %v663_v42 = vpack.c.bf16 %v547_v39, %v546_v38  ;;  %v550_v44 = vld [vmem:[%s9189_s30 + $0xd0] sm:$0xff] }
  0x27   : > { %v664_v43 = vpack.c.bf16 %v549_v41, %v548_v40  ;;  %v551_v45 = vld [vmem:[%s9189_s30 + $0xd8] sm:$0xff]  ;;  %v552_v46 = vld [vmem:[%s9189_s30 + $0xe0] sm:$0xff]  ;;  %v553_v47 = vld [vmem:[%s9189_s30 + $0xe8] sm:$0xff] }
  0x28   : > { %v665_v48 = vpack.c.bf16 %v551_v45, %v550_v44  ;;  %v666_v49 = vpack.c.bf16 %v553_v47, %v552_v46  ;;  %v554_v50 = vld [vmem:[%s9189_s30 + $0xf0] sm:$0xff]  ;;  %v555_v51 = vld [vmem:[%s9189_s30 + $0xf8] sm:$0xff]  ;;  %v556_v52 = vld [vmem:[%s9189_s30 + $0x100] sm:$0xff] }
  0x29   : > { %v557_v53 = vld [vmem:[%s9189_s30 + $0x108] sm:$0xff]  ;;  %v667_v54 = vpack.c.bf16 %v555_v51, %v554_v50  ;;  %v558_v57 = vld [vmem:[%s9189_s30 + $0x110] sm:$0xff]  ;;  %v559_v58 = vld [vmem:[%s9189_s30 + $0x118] sm:$0xff] }
  0x2a   : > { %8057 = vmatmul.mubr.msk.bf16.gmra.mrb[4].mxu0 %vm724_vm2, %v655_v18  ;;  %v668_v55 = vpack.c.bf16 %v557_v53, %v556_v52  ;;  %v560_v59 = vld [vmem:[%s9189_s30 + $0x120] sm:$0xff]  ;;  %v561_v60 = vld [vmem:[%s9189_s30 + $0x128] sm:$0xff]  ;;  %v669_v61 = vpack.c.bf16 %v559_v58, %v558_v57  ;;  %v562_v63 = vld [vmem:[%s9189_s30 + $0x130] sm:$0xff] }
  0x2b   : > { %8060 = vmatprep.mubr.msk.bf16.mxu0 %vm724_vm2, %v656_v19  ;;  %v670_v62 = vpack.c.bf16 %v561_v60, %v560_v59  ;;  %v563_v0 = vld [vmem:[%s9189_s30 + $0x138] sm:$0xff]  ;;  %v564_v1 = vld [vmem:[%s9189_s30 + $0x140] sm:$0xff]  ;;  %v565_v2 = vld [vmem:[%s9189_s30 + $0x148] sm:$0xff] }
  0x2c   : > { %v671_v3 = vpack.c.bf16 %v563_v0, %v562_v63  ;;  %v672_v5 = vpack.c.bf16 %v565_v2, %v564_v1  ;;  %v566_v6 = vld [vmem:[%s9189_s30 + $0x150] sm:$0xff]  ;;  %v567_v7 = vld [vmem:[%s9189_s30 + $0x158] sm:$0xff]  ;;  %v568_v8 = vld [vmem:[%s9189_s30 + $0x160] sm:$0xff] }
  0x2d   : > { %v569_v9 = vld [vmem:[%s9189_s30 + $0x168] sm:$0xff]  ;;  %v673_v10 = vpack.c.bf16 %v567_v7, %v566_v6  ;;  %v570_v12 = vld [vmem:[%s9189_s30 + $0x170] sm:$0xff]  ;;  %v571_v13 = vld [vmem:[%s9189_s30 + $0x178] sm:$0xff] }
  0x2e   : > { %v674_v11 = vpack.c.bf16 %v569_v9, %v568_v8  ;;  %v572_v14 = vld [vmem:[%s9189_s30 + $0x180] sm:$0xff]  ;;  %v573_v15 = vld [vmem:[%s9189_s30 + $0x188] sm:$0xff]  ;;  %v675_v16 = vpack.c.bf16 %v571_v13, %v570_v12  ;;  %v574_v19 = vld [vmem:[%s9189_s30 + $0x190] sm:$0xff] }
  0x2f   : > { %v676_v17 = vpack.c.bf16 %v573_v15, %v572_v14  ;;  %v9275_v18 = vld [vmem:[%s11178_s4] sm:$0xff]   ;;  %v575_v20 = vld [vmem:[%s9189_s30 + $0x198] sm:$0xff]  ;;  %v577_v22 = vld [vmem:[%s9189_s30 + $0x1a8] sm:$0xff] }
  0x30   : > { %v576_v21 = vld [vmem:[%s9189_s30 + $0x1a0] sm:$0xff]  ;;  %8180 = vmatprep.subr.bf16.mxu1 %v9275_v18  ;;  %v677_v23 = vpack.c.bf16 %v575_v20, %v574_v19  ;;  %v579_v26 = vld [vmem:[%s9189_s30 + $0x1b8] sm:$0xff]  ;;  %v581_v28 = vld [vmem:[%s9189_s30 + $0x1c8] sm:$0xff] }
  0x31   : > { %8181 = vmatpush3.bf16.msra.mxu1 %v9275_v18  ;;  %v580_v27 = vld [vmem:[%s9189_s30 + $0x1c0] sm:$0xff]  ;;  %v583_v32 = vld [vmem:[%s9189_s30 + $0x1d8] sm:$0xff]  ;;  %v585_v34 = vld [vmem:[%s9189_s30 + $0x1e8] sm:$0xff] }
  0x32   : > { %8061 = vmatmul.mubr.msk.bf16.gmra.mrb[8].mxu0 %vm724_vm2, %v657_v24  ;;  %8442 = vmatprep.subr.bf16.mxu1 %v9177_v4  ;;  %v678_v24 = vpack.c.bf16 %v577_v22, %v576_v21  ;;  %v584_v33 = vld [vmem:[%s9189_s30 + $0x1e0] sm:$0xff]  ;;  %v587_v38 = vld [vmem:[%s9189_s30 + $0x1f8] sm:$0xff]  ;;  %v589_v40 = vld [vmem:[%s9189_s30 + $0x208] sm:$0xff] }
  0x33   : > { %8064 = vmatprep.mubr.msk.bf16.mxu0 %vm724_vm2, %v658_v25  ;;  %v578_v25 = vld [vmem:[%s9189_s30 + $0x1b0] sm:$0xff]  ;;  %v588_v39 = vld [vmem:[%s9189_s30 + $0x200] sm:$0xff]  ;;  %v591_v44 = vld [vmem:[%s9189_s30 + $0x218] sm:$0xff] }
  0x34   : > { %v679_v29 = vpack.c.bf16 %v579_v26, %v578_v25  ;;  %v592_v45 = vld [vmem:[%s9189_s30 + $0x220] sm:$0xff]  ;;  %v593_v46 = vld [vmem:[%s9189_s30 + $0x228] sm:$0xff]  ;;  %v595_v50 = vld [vmem:[%s9189_s30 + $0x238] sm:$0xff] }
  0x35   : > { %v596_v51 = vld [vmem:[%s9189_s30 + $0x240] sm:$0xff]  ;;  %v597_v52 = vld [vmem:[%s9189_s30 + $0x248] sm:$0xff]  ;;  %v599_v57 = vld [vmem:[%s9189_s30 + $0x258] sm:$0xff] }
  0x36   : > { %v600_v58 = vld [vmem:[%s9189_s30 + $0x260] sm:$0xff]  ;;  %v601_v59 = vld [vmem:[%s9189_s30 + $0x268] sm:$0xff]  ;;  %v603_v63 = vld [vmem:[%s9189_s30 + $0x278] sm:$0xff] }
  0x37   : > { %v604_v0 = vld [vmem:[%s9189_s30 + $0x280] sm:$0xff]  ;;  %v605_v1 = vld [vmem:[%s9189_s30 + $0x288] sm:$0xff]  ;;  %v607_v6 = vld [vmem:[%s9189_s30 + $0x298] sm:$0xff] }
  0x38   : > { %v608_v7 = vld [vmem:[%s9189_s30 + $0x2a0] sm:$0xff]  ;;  %v609_v8 = vld [vmem:[%s9189_s30 + $0x2a8] sm:$0xff]  ;;  %v611_v12 = vld [vmem:[%s9189_s30 + $0x2b8] sm:$0xff] }
  0x39   : > { %v612_v13 = vld [vmem:[%s9189_s30 + $0x2c0] sm:$0xff]  ;;  %v613_v14 = vld [vmem:[%s9189_s30 + $0x2c8] sm:$0xff]  ;;  %v615_v19 = vld [vmem:[%s9189_s30 + $0x2d8] sm:$0xff] }
  0x3a   : > { %8065 = vmatmul.mubr.msk.bf16.gmra.mrb[12].mxu0 %vm724_vm2, %v659_v30  ;;  %v680_v30 = vpack.c.bf16 %v581_v28, %v580_v27  ;;  %v616_v20 = vld [vmem:[%s9189_s30 + $0x2e0] sm:$0xff]  ;;  %v617_v21 = vld [vmem:[%s9189_s30 + $0x2e8] sm:$0xff]  ;;  %v619_v25 = vld [vmem:[%s9189_s30 + $0x2f8] sm:$0xff] }
  0x3b   : > { %8068 = vmatprep.mubr.msk.bf16.mxu0 %vm724_vm2, %v660_v31  ;;  %v582_v31 = vld [vmem:[%s9189_s30 + $0x1d0] sm:$0xff]  ;;  %v620_v26 = vld [vmem:[%s9189_s30 + $0x300] sm:$0xff]  ;;  %v621_v27 = vld [vmem:[%s9189_s30 + $0x308] sm:$0xff] }
  0x3c   : > { %v681_v35 = vpack.c.bf16 %v583_v32, %v582_v31  ;;  %v623_v31 = vld [vmem:[%s9189_s30 + $0x318] sm:$0xff]  ;;  %v624_v32 = vld [vmem:[%s9189_s30 + $0x320] sm:$0xff] }
  0x42   : > { %8069 = vmatmul.mubr.msk.bf16.gmra.mrb[16].mxu0 %vm724_vm2, %v661_v36  ;;  %v682_v36 = vpack.c.bf16 %v585_v34, %v584_v33  ;;  %v625_v33 = vld [vmem:[%s9189_s30 + $0x328] sm:$0xff] }
  0x43   : > { %8072 = vmatprep.mubr.msk.bf16.mxu0 %vm724_vm2, %v662_v37  ;;  %v586_v37 = vld [vmem:[%s9189_s30 + $0x1f0] sm:$0xff] }
  0x44   : > { %v683_v41 = vpack.c.bf16 %v587_v38, %v586_v37  ;;  %v626_v37 = vld [vmem:[%s9189_s30 + $0x330] sm:$0xff]  ;;  %v627_v38 = vld [vmem:[%s9189_s30 + $0x338] sm:$0xff] }
  0x4a   : > { %8073 = vmatmul.mubr.msk.bf16.gmra.mrb[20].mxu0 %vm724_vm2, %v663_v42  ;;  %v684_v42 = vpack.c.bf16 %v589_v40, %v588_v39  ;;  %v628_v39 = vld [vmem:[%s9189_s30 + $0x340] sm:$0xff]  ;;  %v629_v40 = vld [vmem:[%s9189_s30 + $0x348] sm:$0xff] }
  0x4b   : > { %8076 = vmatprep.mubr.msk.bf16.mxu0 %vm724_vm2, %v664_v43  ;;  %v590_v43 = vld [vmem:[%s9189_s30 + $0x210] sm:$0xff] }
  0x4c   : > { %v685_v47 = vpack.c.bf16 %v591_v44, %v590_v43  ;;  %v630_v43 = vld [vmem:[%s9189_s30 + $0x350] sm:$0xff]  ;;  %v631_v44 = vld [vmem:[%s9189_s30 + $0x358] sm:$0xff] }
  0x52   : > { %8077 = vmatmul.mubr.msk.bf16.gmra.mrb[24].mxu0 %vm724_vm2, %v665_v48  ;;  %v686_v48 = vpack.c.bf16 %v593_v46, %v592_v45  ;;  %v632_v45 = vld [vmem:[%s9189_s30 + $0x360] sm:$0xff]  ;;  %v633_v46 = vld [vmem:[%s9189_s30 + $0x368] sm:$0xff] }
  0x53   : > { %8080 = vmatprep.mubr.msk.bf16.mxu0 %vm724_vm2, %v666_v49  ;;  %v594_v49 = vld [vmem:[%s9189_s30 + $0x230] sm:$0xff] }
  0x54   : > { %v687_v53 = vpack.c.bf16 %v595_v50, %v594_v49  ;;  %v634_v49 = vld [vmem:[%s9189_s30 + $0x370] sm:$0xff]  ;;  %v635_v50 = vld [vmem:[%s9189_s30 + $0x378] sm:$0xff] }
  0x5a   : > { %8081 = vmatmul.mubr.msk.bf16.gmra.mrb[28].mxu0 %vm724_vm2, %v667_v54  ;;  %v688_v54 = vpack.c.bf16 %v597_v52, %v596_v51  ;;  %v636_v51 = vld [vmem:[%s9189_s30 + $0x380] sm:$0xff]  ;;  %v637_v52 = vld [vmem:[%s9189_s30 + $0x388] sm:$0xff] }
  0x5b   : > { %8084 = vmatprep.mubr.msk.bf16.mxu0 %vm724_vm2, %v668_v55  ;;  %v598_v55 = vld [vmem:[%s9189_s30 + $0x250] sm:$0xff] }
  0x5c   : > { %v689_v60 = vpack.c.bf16 %v599_v57, %v598_v55  ;;  %v707_v57 = vpack.c.bf16 %v635_v50, %v634_v49 }
  0x62   : > { %8085 = vmatmul.mubr.msk.bf16.gmra.mrb[32].mxu0 %vm724_vm2, %v669_v61  ;;  %v690_v61 = vpack.c.bf16 %v601_v59, %v600_v58 }
  0x63   : > { %8088 = vmatprep.mubr.msk.bf16.mxu0 %vm724_vm2, %v670_v62  ;;  %v602_v62 = vld [vmem:[%s9189_s30 + $0x270] sm:$0xff] }
  0x64   : > { %v691_v2 = vpack.c.bf16 %v603_v63, %v602_v62 }
  0x6a   : > { %8089 = vmatmul.mubr.msk.bf16.gmra.mrb[36].mxu0 %vm724_vm2, %v671_v3  ;;  %v692_v3 = vpack.c.bf16 %v605_v1, %v604_v0 }
  0x6b   : > { %8092 = vmatprep.mubr.msk.bf16.mxu0 %vm724_vm2, %v672_v5  ;;  %v606_v5 = vld [vmem:[%s9189_s30 + $0x290] sm:$0xff] }
  0x6c   : > { %v693_v9 = vpack.c.bf16 %v607_v6, %v606_v5  ;;  %v638_v5 = vld [vmem:[%s9189_s30 + $0x390] sm:$0xff]  ;;  %v639_v6 = vld [vmem:[%s9189_s30 + $0x398] sm:$0xff] }
  0x72   : > { %8093 = vmatmul.mubr.msk.bf16.gmra.mrb[40].mxu0 %vm724_vm2, %v673_v10  ;;  %v694_v10 = vpack.c.bf16 %v609_v8, %v608_v7  ;;  %v640_v8 = vld [vmem:[%s9189_s30 + $0x3a0] sm:$0xff] }
  0x73   : > { %8096 = vmatprep.mubr.msk.bf16.mxu0 %vm724_vm2, %v674_v11  ;;  %v610_v11 = vld [vmem:[%s9189_s30 + $0x2b0] sm:$0xff] }
  0x74   : > { %v695_v15 = vpack.c.bf16 %v611_v12, %v610_v11 }
  0x7a   : > { %8097 = vmatmul.mubr.msk.bf16.gmra.mrb[44].mxu0 %vm724_vm2, %v675_v16  ;;  %v696_v16 = vpack.c.bf16 %v613_v14, %v612_v13  ;;  %v709_v14 = vpack.c.bf16 %v639_v6, %v638_v5 }
  0x7b   : > { %8100 = vmatprep.mubr.msk.bf16.mxu0 %vm724_vm2, %v676_v17  ;;  %v614_v17 = vld [vmem:[%s9189_s30 + $0x2d0] sm:$0xff] }
  0x7c   : > { %v697_v22 = vpack.c.bf16 %v615_v19, %v614_v17 }
  0x82   : > { %8101 = vmatmul.mubr.msk.bf16.gmra.mrb[48].mxu0 %vm724_vm2, %v677_v23  ;;  %v698_v23 = vpack.c.bf16 %v617_v21, %v616_v20 }
  0x83   : > { %8104 = vmatprep.mubr.msk.bf16.mxu0 %vm724_vm2, %v678_v24  ;;  %v618_v24 = vld [vmem:[%s9189_s30 + $0x2f0] sm:$0xff] }
  0x84   : > { %v699_v28 = vpack.c.bf16 %v619_v25, %v618_v24 }
  0x8a   : > { %8105 = vmatmul.mubr.msk.bf16.gmra.mrb[52].mxu0 %vm724_vm2, %v679_v29  ;;  %v700_v29 = vpack.c.bf16 %v621_v27, %v620_v26  ;;  %v642_v26 = vld [vmem:[%s9189_s30 + $0x3b0] sm:$0xff]  ;;  %v643_v27 = vld [vmem:[%s9189_s30 + $0x3b8] sm:$0xff] }
  0x8b   : > { %8108 = vmatprep.mubr.msk.bf16.mxu0 %vm724_vm2, %v680_v30  ;;  %v622_v30 = vld [vmem:[%s9189_s30 + $0x310] sm:$0xff] }
  0x8c   : > { %v701_v34 = vpack.c.bf16 %v623_v31, %v622_v30  ;;  %v645_v30 = vld [vmem:[%s9189_s30 + $0x3c8] sm:$0xff] }
  0x92   : > { %8109 = vmatmul.mubr.msk.bf16.gmra.mrb[56].mxu0 %vm724_vm2, %v681_v35  ;;  %v702_v35 = vpack.c.bf16 %v625_v33, %v624_v32 }
  0x93   : > { %8112 = vmatprep.mubr.msk.bf16.mxu0 %vm724_vm2, %v682_v36  ;;  %v8961_v36 = vld [vmem:[%s11159_s6 + $0x8] sm:$0xff]  }
  0x94   : > { %8312 = vmatprep.subr.bf16.mxu0 %v8961_v36 }
  0x95   : > { %8313 = vmatpush3.bf16.msra.mxu0 %v8961_v36 }
  0x96   : > { %8572 = vmatprep.subr.bf16.mxu0 %v9275_v18  ;;  %v9377_v18 = vld [vmem:[%s11179_s3] ss:$0 sm:$0xff] }
  0x9a   : > { %8113 = vmatmul.mubr.msk.bf16.gmra.mrb[60].mxu0 %vm724_vm2, %v683_v41  ;;  %v703_v41 = vpack.c.bf16 %v627_v38, %v626_v37 }
  0x9b   : > { %8116 = vmatprep.mubr.msk.bf16.mxu0 %vm724_vm2, %v684_v42  ;;  %v704_v42 = vpack.c.bf16 %v629_v40, %v628_v39 }
  0xa2   : > { %8117 = vmatmul.mubr.msk.bf16.gmra.mrb[64].mxu0 %vm724_vm2, %v685_v47  ;;  %v705_v47 = vpack.c.bf16 %v631_v44, %v630_v43  ;;  %v646_v44 = vld [vmem:[%s9189_s30 + $0x3d0] sm:$0xff] }
  0xa3   : > { %8120 = vmatprep.mubr.msk.bf16.mxu0 %vm724_vm2, %v686_v48  ;;  %v706_v48 = vpack.c.bf16 %v633_v46, %v632_v45  ;;  %v647_v45 = vld [vmem:[%s9189_s30 + $0x3d8] sm:$0xff] }
  0xaa   : > { %8121 = vmatmul.mubr.msk.bf16.gmra.mrb[68].mxu0 %vm724_vm2, %v687_v53 }
  0xab   : > { %8124 = vmatprep.mubr.msk.bf16.mxu0 %vm724_vm2, %v688_v54 }
  0xb2   : > { %8125 = vmatmul.mubr.msk.bf16.gmra.mrb[72].mxu0 %vm724_vm2, %v689_v60  ;;  %v708_v60 = vpack.c.bf16 %v637_v52, %v636_v51 }
  0xb3   : > { %8128 = vmatprep.mubr.msk.bf16.mxu0 %vm724_vm2, %v690_v61 }
  0xba   : > { %8129 = vmatmul.mubr.msk.bf16.gmra.mrb[76].mxu0 %vm724_vm2, %v691_v2 }
  0xbb   : > { %8132 = vmatprep.mubr.msk.bf16.mxu0 %vm724_vm2, %v692_v3 }
  0xc2   : > { %8133 = vmatmul.mubr.msk.bf16.gmra.mrb[80].mxu0 %vm724_vm2, %v693_v9  ;;  %v641_v9 = vld [vmem:[%s9189_s30 + $0x3a8] sm:$0xff] }
  0xc3   : > { %8136 = vmatprep.mubr.msk.bf16.mxu0 %vm724_vm2, %v694_v10  ;;  %v710_v17 = vpack.c.bf16 %v641_v9, %v640_v8 }
  0xca   : > { %8137 = vmatmul.mubr.msk.bf16.gmra.mrb[84].mxu0 %vm724_vm2, %v695_v15 }
  0xcb   : > { %8140 = vmatprep.mubr.msk.bf16.mxu0 %vm724_vm2, %v696_v16 }
  0xd2   : > { %8141 = vmatmul.mubr.msk.bf16.gmra.mrb[88].mxu0 %vm724_vm2, %v697_v22 }
  0xd3   : > { %8144 = vmatprep.mubr.msk.bf16.mxu0 %vm724_vm2, %v698_v23 }
  0xda   : > { %8145 = vmatmul.mubr.msk.bf16.gmra.mrb[92].mxu0 %vm724_vm2, %v699_v28 }
  0xdb   : > { %8148 = vmatprep.mubr.msk.bf16.mxu0 %vm724_vm2, %v700_v29  ;;  %v644_v29 = vld [vmem:[%s9189_s30 + $0x3c0] sm:$0xff] }
  0xdc   : > { %v712_v36 = vpack.c.bf16 %v645_v30, %v644_v29 }
  0xe2   : > { %8149 = vmatmul.mubr.msk.bf16.gmra.mrb[96].mxu0 %vm724_vm2, %v701_v34  ;;  %v711_v34 = vpack.c.bf16 %v643_v27, %v642_v26 }
  0xe3   : > { %8152 = vmatprep.mubr.msk.bf16.mxu0 %vm724_vm2, %v702_v35 }
  0xea   : > { %8153 = vmatmul.mubr.msk.bf16.gmra.mrb[100].mxu0 %vm724_vm2, %v703_v41 }
  0xeb   : > { %8156 = vmatprep.mubr.msk.bf16.mxu0 %vm724_vm2, %v704_v42 }
  0xf2   : > { %8157 = vmatmul.mubr.msk.bf16.gmra.mrb[104].mxu0 %vm724_vm2, %v705_v47  ;;  %v648_v47 = vld [vmem:[%s9189_s30 + $0x3e0] sm:$0xff] }
  0xf3   : > { %8160 = vmatprep.mubr.msk.bf16.mxu0 %vm724_vm2, %v706_v48  ;;  %v649_v48 = vld [vmem:[%s9189_s30 + $0x3e8] sm:$0xff] }
  0xf5   : > { %v8054_v53 = vpop.f32.mrb[0].mxu0 }
  0xf6   : > { %v967_v54 = vadd.f32 %v8054_v53, %v9377_v18  ;;  %v958_v55 = vpop.f32.mrb[1].mxu0  ;;  %v713_v53 = vpack.c.bf16 %v647_v45, %v646_v44 }
  0xf7   : > { %v959_v58 = vadd.f32 %v9377_v18, %v958_v55  ;;  %v8055_v59 = vpop.f32.mrb[2].mxu0 }
  0xf8   : > { %v970_v61 = vadd.f32 %v8055_v59, %v9377_v18  ;;  %v961_v62 = vpop.f32.mrb[3].mxu0  ;;  %v1471_v0 = vmax.f32 %v967_v54, 0.0 }
  0xf9   : > { %v962_v63 = vadd.f32 %v9377_v18, %v961_v62  ;;  %v1469_v2 = vmax.f32 %v959_v58, 0.0 }
  0xfa   : > { %v1472_v1 = vmax.f32 %v970_v61, 0.0  ;;  %8161 = vmatmul.mubr.msk.bf16.gmra.mrb[108].mxu0 %vm724_vm2, %v707_v57  ;;  %v714_v57 = vpack.c.bf16 %v649_v48, %v648_v47 }
  0xfb   : > { %v1470_v3 = vmax.f32 %v962_v63, 0.0  ;;  %8164 = vmatprep.mubr.msk.bf16.mxu0 %vm724_vm2, %v708_v60 }
  0xfc   : > { %v1598_v7 = vpack.c.bf16 %v1472_v1, %v1471_v0  ;;  %v650_v1 = vld [vmem:[%s9189_s30 + $0x3f0] sm:$0xff] }
  0xfd   : > { %v8058_v10 = vpop.f32.mrb[4].mxu0  ;;  %v1597_v11 = vpack.c.bf16 %v1470_v3, %v1469_v2  ;;  %v651_v2 = vld [vmem:[%s9189_s30 + $0x3f8] sm:$0xff]  ;;  %s9633_s30 = scalar_lea.vmem %s11180_s1, %s7632_s23  ;;  %s7629_s23 = sshll.u32 %s9146_s22, 7 }
  0xfe   : > { %v983_v12 = vadd.f32 %v8058_v10, %v9377_v18  ;;  %v974_v13 = vpop.f32.mrb[5].mxu0  ;;  %v715_v9 = vpack.c.bf16 %v651_v2, %v650_v1  ;;  %s9044_s22 = smov [#allocation2]  }
  0xff   : > { %v975_v15 = vadd.f32 %v9377_v18, %v974_v13  ;;  %v8059_v16 = vpop.f32.mrb[6].mxu0  ;;  %8182 = vmatprep.mubr.msk.bf16.mxu1 %vm1676_vm3, %v1597_v11  ;;  %s8980_s25 = sshll.u32 %s9044_s22, 4  ;;  %s8981_s25 = int_to_ptr.vmem [resolvable:$false] %s8980_s25 }
 0x100   : > { %v986_v19 = vadd.f32 %v8059_v16, %v9377_v18  ;;  %v977_v20 = vpop.f32.mrb[7].mxu0  ;;  %8183 = vmatmul.mubr.msk.bf16.vlgmr.msra.gmra.mrb[0].mxu1 %vm1676_vm3, %v1598_v7  ;;  %v1475_v22 = vmax.f32 %v983_v12, 0.0  ;;  %s8982_s17 = scalar_lea.vmem %s8981_s25, 256  ;;  %p8983_p0 = scmp.lt.s32.totalorder %s11113_s2, %s8981_s25 }
 0x101   : > { %v978_v21 = vadd.f32 %v9377_v18, %v977_v20  ;;  %8443 = vmatpush3.bf16.msra.mxu1 %v9177_v4  ;;  %v1473_v24 = vmax.f32 %v975_v15, 0.0 }
 0x102   : > { %v1476_v23 = vmax.f32 %v986_v19, 0.0  ;;  %8165 = vmatmul.mubr.msk.bf16.gmra.mrb[112].mxu0 %vm724_vm2, %v709_v14  ;;  %8702 = vmatprep.subr.bf16.mxu1 %v9244_v56 }
 0x103   : > { %v1474_v25 = vmax.f32 %v978_v21, 0.0  ;;  %8168 = vmatprep.mubr.msk.bf16.mxu0 %vm724_vm2, %v710_v17 }
 0x104   : > { %v1600_v28 = vpack.c.bf16 %v1476_v23, %v1475_v22 }
 0x105   : > { %v1599_v31 = vpack.c.bf16 %v1474_v25, %v1473_v24  ;;  %v8062_v32 = vpop.f32.mrb[8].mxu0 }
 0x106   : > { %v999_v33 = vadd.f32 %v8062_v32, %v9377_v18  ;;  %v990_v4 = vpop.f32.mrb[9].mxu0 }
 0x107   : > { %v991_v35 = vadd.f32 %v9377_v18, %v990_v4  ;;  %v8063_v56 = vpop.f32.mrb[10].mxu0  ;;  %8186 = vmatprep.mubr.msk.bf16.mxu1 %vm1676_vm3, %v1599_v31 }
 0x108   : > { %v1002_v37 = vadd.f32 %v8063_v56, %v9377_v18  ;;  %v993_v38 = vpop.f32.mrb[11].mxu0  ;;  %8187 = vmatmul.mubr.msk.bf16.gmra.mrb[4].mxu1 %vm1676_vm3, %v1600_v28  ;;  %v1479_v40 = vmax.f32 %v999_v33, 0.0 }
 0x109   : > { %v994_v39 = vadd.f32 %v9377_v18, %v993_v38  ;;  %v1477_v42 = vmax.f32 %v991_v35, 0.0 }
 0x10a   : > { %v1480_v41 = vmax.f32 %v1002_v37, 0.0  ;;  %8169 = vmatmul.mubr.msk.bf16.gmra.mrb[116].mxu0 %vm724_vm2, %v711_v34 }
 0x10b   : > { %v1478_v43 = vmax.f32 %v994_v39, 0.0  ;;  %8172 = vmatprep.mubr.msk.bf16.mxu0 %vm724_vm2, %v712_v36 }
 0x10c   : > { %v1602_v46 = vpack.c.bf16 %v1480_v41, %v1479_v40 }
 0x10d   : > { %v1601_v49 = vpack.c.bf16 %v1478_v43, %v1477_v42  ;;  %v8066_v50 = vpop.f32.mrb[12].mxu0 }
 0x10e   : > { %v1015_v51 = vadd.f32 %v8066_v50, %v9377_v18  ;;  %v1006_v52 = vpop.f32.mrb[13].mxu0 }
 0x10f   : > { %v1007_v54 = vadd.f32 %v9377_v18, %v1006_v52  ;;  %v8067_v55 = vpop.f32.mrb[14].mxu0  ;;  %8190 = vmatprep.mubr.msk.bf16.mxu1 %vm1676_vm3, %v1601_v49 }
 0x110   : > { %v1018_v58 = vadd.f32 %v8067_v55, %v9377_v18  ;;  %v1009_v59 = vpop.f32.mrb[15].mxu0  ;;  %8191 = vmatmul.mubr.msk.bf16.gmra.mrb[8].mxu1 %vm1676_vm3, %v1602_v46  ;;  %v1483_v61 = vmax.f32 %v1015_v51, 0.0 }
 0x111   : > { %v1010_v60 = vadd.f32 %v9377_v18, %v1009_v59  ;;  %v1481_v63 = vmax.f32 %v1007_v54, 0.0 }
 0x112   : > { %v1484_v62 = vmax.f32 %v1018_v58, 0.0  ;;  %8173 = vmatmul.mubr.msk.bf16.gmra.mrb[120].mxu0 %vm724_vm2, %v713_v53 }
 0x113   : > { %v1482_v0 = vmax.f32 %v1010_v60, 0.0  ;;  %8176 = vmatprep.mubr.msk.bf16.mxu0 %vm724_vm2, %v714_v57 }
 0x114   : > { %v1604_v3 = vpack.c.bf16 %v1484_v62, %v1483_v61 }
 0x115   : > { %v1603_v5 = vpack.c.bf16 %v1482_v0, %v1481_v63  ;;  %v8070_v6 = vpop.f32.mrb[16].mxu0 }
 0x116   : > { %v1031_v7 = vadd.f32 %v8070_v6, %v9377_v18  ;;  %v1022_v8 = vpop.f32.mrb[17].mxu0 }
 0x117   : > { %v1023_v10 = vadd.f32 %v9377_v18, %v1022_v8  ;;  %v8071_v11 = vpop.f32.mrb[18].mxu0  ;;  %8194 = vmatprep.mubr.msk.bf16.mxu1 %vm1676_vm3, %v1603_v5 }
 0x118   : > { %v1034_v12 = vadd.f32 %v8071_v11, %v9377_v18  ;;  %v1025_v13 = vpop.f32.mrb[19].mxu0  ;;  %8195 = vmatmul.mubr.msk.bf16.gmra.mrb[12].mxu1 %vm1676_vm3, %v1604_v3  ;;  %v1487_v15 = vmax.f32 %v1031_v7, 0.0 }
 0x119   : > { %v1026_v14 = vadd.f32 %v9377_v18, %v1025_v13  ;;  %v1485_v17 = vmax.f32 %v1023_v10, 0.0 }
 0x11a   : > { %v1488_v16 = vmax.f32 %v1034_v12, 0.0  ;;  %8177 = vmatmul.mubr.msk.bf16.gmra.mrb[124].mxu0 %vm724_vm2, %v715_v9 }
 0x11b   : > { %v1486_v19 = vmax.f32 %v1026_v14, 0.0 }
 0x11c   : > { %v1606_v20 = vpack.c.bf16 %v1488_v16, %v1487_v15 }
 0x11d   : > { %v1605_v21 = vpack.c.bf16 %v1486_v19, %v1485_v17  ;;  %v8074_v22 = vpop.f32.mrb[20].mxu0 }
 0x11e   : > { %v1047_v23 = vadd.f32 %v8074_v22, %v9377_v18  ;;  %v1038_v24 = vpop.f32.mrb[21].mxu0 }
 0x11f   : > { %v1039_v25 = vadd.f32 %v9377_v18, %v1038_v24  ;;  %v8075_v26 = vpop.f32.mrb[22].mxu0  ;;  %8198 = vmatprep.mubr.msk.bf16.mxu1 %vm1676_vm3, %v1605_v21 }
 0x120   : > { %v1050_v27 = vadd.f32 %v8075_v26, %v9377_v18  ;;  %v1041_v28 = vpop.f32.mrb[23].mxu0  ;;  %8199 = vmatmul.mubr.msk.bf16.gmra.mrb[16].mxu1 %vm1676_vm3, %v1606_v20  ;;  %v1491_v30 = vmax.f32 %v1047_v23, 0.0 }
 0x121   : > { %v1042_v29 = vadd.f32 %v9377_v18, %v1041_v28  ;;  %v1489_v32 = vmax.f32 %v1039_v25, 0.0 }
 0x122   : > { %v1492_v31 = vmax.f32 %v1050_v27, 0.0 }
 0x123   : > { %v1490_v33 = vmax.f32 %v1042_v29, 0.0 }
 0x124   : > { %v1608_v4 = vpack.c.bf16 %v1492_v31, %v1491_v30 }
 0x125   : > { %v1607_v34 = vpack.c.bf16 %v1490_v33, %v1489_v32  ;;  %v8078_v35 = vpop.f32.mrb[24].mxu0 }
 0x126   : > { %v1063_v56 = vadd.f32 %v8078_v35, %v9377_v18  ;;  %v1054_v36 = vpop.f32.mrb[25].mxu0 }
 0x127   : > { %v1055_v37 = vadd.f32 %v9377_v18, %v1054_v36  ;;  %v8079_v38 = vpop.f32.mrb[26].mxu0  ;;  %8202 = vmatprep.mubr.msk.bf16.mxu1 %vm1676_vm3, %v1607_v34 }
 0x128   : > { %v1066_v39 = vadd.f32 %v8079_v38, %v9377_v18  ;;  %v1057_v40 = vpop.f32.mrb[27].mxu0  ;;  %8203 = vmatmul.mubr.msk.bf16.gmra.mrb[20].mxu1 %vm1676_vm3, %v1608_v4  ;;  %v1495_v42 = vmax.f32 %v1063_v56, 0.0 }
 0x129   : > { %v1058_v41 = vadd.f32 %v9377_v18, %v1057_v40  ;;  %v1493_v44 = vmax.f32 %v1055_v37, 0.0 }
 0x12a   : > { %v1496_v43 = vmax.f32 %v1066_v39, 0.0 }
 0x12b   : > { %v1494_v45 = vmax.f32 %v1058_v41, 0.0 }
 0x12c   : > { %v1610_v46 = vpack.c.bf16 %v1496_v43, %v1495_v42 }
 0x12d   : > { %v1609_v47 = vpack.c.bf16 %v1494_v45, %v1493_v44  ;;  %v8082_v48 = vpop.f32.mrb[28].mxu0 }
 0x12e   : > { %v1079_v49 = vadd.f32 %v8082_v48, %v9377_v18  ;;  %v1070_v50 = vpop.f32.mrb[29].mxu0 }
 0x12f   : > { %v1071_v51 = vadd.f32 %v9377_v18, %v1070_v50  ;;  %v8083_v52 = vpop.f32.mrb[30].mxu0  ;;  %8206 = vmatprep.mubr.msk.bf16.mxu1 %vm1676_vm3, %v1609_v47 }
 0x130   : > { %v1082_v53 = vadd.f32 %v8083_v52, %v9377_v18  ;;  %v1073_v54 = vpop.f32.mrb[31].mxu0  ;;  %8207 = vmatmul.mubr.msk.bf16.gmra.mrb[24].mxu1 %vm1676_vm3, %v1610_v46  ;;  %v1499_v57 = vmax.f32 %v1079_v49, 0.0 }
 0x131   : > { %v1074_v55 = vadd.f32 %v9377_v18, %v1073_v54  ;;  %v1497_v59 = vmax.f32 %v1071_v51, 0.0 }
 0x132   : > { %v1500_v58 = vmax.f32 %v1082_v53, 0.0 }
 0x133   : > { %v1498_v60 = vmax.f32 %v1074_v55, 0.0 }
 0x134   : > { %v1612_v61 = vpack.c.bf16 %v1500_v58, %v1499_v57 }
 0x135   : > { %v1611_v62 = vpack.c.bf16 %v1498_v60, %v1497_v59  ;;  %v8086_v63 = vpop.f32.mrb[32].mxu0 }
 0x136   : > { %v1095_v0 = vadd.f32 %v8086_v63, %v9377_v18  ;;  %v1086_v1 = vpop.f32.mrb[33].mxu0 }
 0x137   : > { %v1087_v2 = vadd.f32 %v9377_v18, %v1086_v1  ;;  %v8087_v3 = vpop.f32.mrb[34].mxu0  ;;  %8210 = vmatprep.mubr.msk.bf16.mxu1 %vm1676_vm3, %v1611_v62 }
 0x138   : > { %v1098_v5 = vadd.f32 %v8087_v3, %v9377_v18  ;;  %v1089_v6 = vpop.f32.mrb[35].mxu0  ;;  %8211 = vmatmul.mubr.msk.bf16.gmra.mrb[28].mxu1 %vm1676_vm3, %v1612_v61  ;;  %v1503_v8 = vmax.f32 %v1095_v0, 0.0 }
 0x139   : > { %v1090_v7 = vadd.f32 %v9377_v18, %v1089_v6  ;;  %v1501_v10 = vmax.f32 %v1087_v2, 0.0 }
 0x13a   : > { %v1504_v9 = vmax.f32 %v1098_v5, 0.0 }
 0x13b   : > { %v1502_v11 = vmax.f32 %v1090_v7, 0.0 }
 0x13c   : > { %v1614_v12 = vpack.c.bf16 %v1504_v9, %v1503_v8 }
 0x13d   : > { %v1613_v13 = vpack.c.bf16 %v1502_v11, %v1501_v10  ;;  %v8090_v14 = vpop.f32.mrb[36].mxu0 }
 0x13e   : > { %v1111_v15 = vadd.f32 %v8090_v14, %v9377_v18  ;;  %v1102_v16 = vpop.f32.mrb[37].mxu0 }
 0x13f   : > { %v1103_v17 = vadd.f32 %v9377_v18, %v1102_v16  ;;  %v8091_v19 = vpop.f32.mrb[38].mxu0  ;;  %8214 = vmatprep.mubr.msk.bf16.mxu1 %vm1676_vm3, %v1613_v13 }
 0x140   : > { %v1114_v20 = vadd.f32 %v8091_v19, %v9377_v18  ;;  %v1105_v21 = vpop.f32.mrb[39].mxu0  ;;  %8215 = vmatmul.mubr.msk.bf16.gmra.mrb[32].mxu1 %vm1676_vm3, %v1614_v12  ;;  %v1507_v23 = vmax.f32 %v1111_v15, 0.0 }
 0x141   : > { %v1106_v22 = vadd.f32 %v9377_v18, %v1105_v21  ;;  %v1505_v25 = vmax.f32 %v1103_v17, 0.0 }
 0x142   : > { %v1508_v24 = vmax.f32 %v1114_v20, 0.0 }
 0x143   : > { %v1506_v26 = vmax.f32 %v1106_v22, 0.0 }
 0x144   : > { %v1616_v27 = vpack.c.bf16 %v1508_v24, %v1507_v23 }
 0x145   : > { %v1615_v28 = vpack.c.bf16 %v1506_v26, %v1505_v25  ;;  %v8094_v29 = vpop.f32.mrb[40].mxu0 }
 0x146   : > { %v1127_v30 = vadd.f32 %v8094_v29, %v9377_v18  ;;  %v1118_v31 = vpop.f32.mrb[41].mxu0 }
 0x147   : > { %v1119_v32 = vadd.f32 %v9377_v18, %v1118_v31  ;;  %v8095_v33 = vpop.f32.mrb[42].mxu0  ;;  %8218 = vmatprep.mubr.msk.bf16.mxu1 %vm1676_vm3, %v1615_v28 }
 0x148   : > { %v1130_v4 = vadd.f32 %v8095_v33, %v9377_v18  ;;  %v1121_v34 = vpop.f32.mrb[43].mxu0  ;;  %8219 = vmatmul.mubr.msk.bf16.gmra.mrb[36].mxu1 %vm1676_vm3, %v1616_v27  ;;  %v1511_v56 = vmax.f32 %v1127_v30, 0.0 }
 0x149   : > { %v1122_v35 = vadd.f32 %v9377_v18, %v1121_v34  ;;  %v1509_v37 = vmax.f32 %v1119_v32, 0.0 }
 0x14a   : > { %v1512_v36 = vmax.f32 %v1130_v4, 0.0 }
 0x14b   : > { %v1510_v38 = vmax.f32 %v1122_v35, 0.0 }
 0x14c   : > { %v1618_v39 = vpack.c.bf16 %v1512_v36, %v1511_v56 }
 0x14d   : > { %v1617_v40 = vpack.c.bf16 %v1510_v38, %v1509_v37  ;;  %v8098_v41 = vpop.f32.mrb[44].mxu0 }
 0x14e   : > { %v1143_v42 = vadd.f32 %v8098_v41, %v9377_v18  ;;  %v1134_v43 = vpop.f32.mrb[45].mxu0 }
 0x14f   : > { %v1135_v44 = vadd.f32 %v9377_v18, %v1134_v43  ;;  %v8099_v45 = vpop.f32.mrb[46].mxu0  ;;  %8222 = vmatprep.mubr.msk.bf16.mxu1 %vm1676_vm3, %v1617_v40 }
 0x150   : > { %v1146_v46 = vadd.f32 %v8099_v45, %v9377_v18  ;;  %v1137_v47 = vpop.f32.mrb[47].mxu0  ;;  %8223 = vmatmul.mubr.msk.bf16.gmra.mrb[40].mxu1 %vm1676_vm3, %v1618_v39  ;;  %v1515_v49 = vmax.f32 %v1143_v42, 0.0 }
 0x151   : > { %v1138_v48 = vadd.f32 %v9377_v18, %v1137_v47  ;;  %v1513_v51 = vmax.f32 %v1135_v44, 0.0 }
 0x152   : > { %v1516_v50 = vmax.f32 %v1146_v46, 0.0 }
 0x153   : > { %v1514_v52 = vmax.f32 %v1138_v48, 0.0 }
 0x154   : > { %v1620_v53 = vpack.c.bf16 %v1516_v50, %v1515_v49 }
 0x155   : > { %v1619_v54 = vpack.c.bf16 %v1514_v52, %v1513_v51  ;;  %v8102_v55 = vpop.f32.mrb[48].mxu0 }
 0x156   : > { %v1159_v57 = vadd.f32 %v8102_v55, %v9377_v18  ;;  %v1150_v58 = vpop.f32.mrb[49].mxu0 }
 0x157   : > { %v1151_v59 = vadd.f32 %v9377_v18, %v1150_v58  ;;  %v8103_v60 = vpop.f32.mrb[50].mxu0  ;;  %8226 = vmatprep.mubr.msk.bf16.mxu1 %vm1676_vm3, %v1619_v54 }
 0x158   : > { %v1162_v61 = vadd.f32 %v8103_v60, %v9377_v18  ;;  %v1153_v62 = vpop.f32.mrb[51].mxu0  ;;  %8227 = vmatmul.mubr.msk.bf16.gmra.mrb[44].mxu1 %vm1676_vm3, %v1620_v53  ;;  %v1519_v0 = vmax.f32 %v1159_v57, 0.0 }
 0x159   : > { %v1154_v63 = vadd.f32 %v9377_v18, %v1153_v62  ;;  %v1517_v2 = vmax.f32 %v1151_v59, 0.0 }
 0x15a   : > { %v1520_v1 = vmax.f32 %v1162_v61, 0.0 }
 0x15b   : > { %v1518_v3 = vmax.f32 %v1154_v63, 0.0 }
 0x15c   : > { %v1622_v5 = vpack.c.bf16 %v1520_v1, %v1519_v0 }
 0x15d   : > { %v1621_v6 = vpack.c.bf16 %v1518_v3, %v1517_v2  ;;  %v8106_v7 = vpop.f32.mrb[52].mxu0 }
 0x15e   : > { %v1175_v8 = vadd.f32 %v8106_v7, %v9377_v18  ;;  %v1166_v9 = vpop.f32.mrb[53].mxu0 }
 0x15f   : > { %v1167_v10 = vadd.f32 %v9377_v18, %v1166_v9  ;;  %v8107_v11 = vpop.f32.mrb[54].mxu0  ;;  %8230 = vmatprep.mubr.msk.bf16.mxu1 %vm1676_vm3, %v1621_v6 }
 0x160   : > { %v1178_v12 = vadd.f32 %v8107_v11, %v9377_v18  ;;  %v1169_v13 = vpop.f32.mrb[55].mxu0  ;;  %8231 = vmatmul.mubr.msk.bf16.gmra.mrb[48].mxu1 %vm1676_vm3, %v1622_v5  ;;  %v1523_v15 = vmax.f32 %v1175_v8, 0.0 }
 0x161   : > { %v1170_v14 = vadd.f32 %v9377_v18, %v1169_v13  ;;  %v1521_v17 = vmax.f32 %v1167_v10, 0.0 }
 0x162   : > { %v1524_v16 = vmax.f32 %v1178_v12, 0.0 }
 0x163   : > { %v1522_v19 = vmax.f32 %v1170_v14, 0.0 }
 0x164   : > { %v1624_v20 = vpack.c.bf16 %v1524_v16, %v1523_v15 }
 0x165   : > { %v1623_v21 = vpack.c.bf16 %v1522_v19, %v1521_v17  ;;  %v8110_v22 = vpop.f32.mrb[56].mxu0 }
 0x166   : > { %v1191_v23 = vadd.f32 %v8110_v22, %v9377_v18  ;;  %v1182_v24 = vpop.f32.mrb[57].mxu0 }
 0x167   : > { %v1183_v25 = vadd.f32 %v9377_v18, %v1182_v24  ;;  %v8111_v26 = vpop.f32.mrb[58].mxu0  ;;  %8234 = vmatprep.mubr.msk.bf16.mxu1 %vm1676_vm3, %v1623_v21 }
 0x168   : > { %v1194_v27 = vadd.f32 %v8111_v26, %v9377_v18  ;;  %v1185_v28 = vpop.f32.mrb[59].mxu0  ;;  %8235 = vmatmul.mubr.msk.bf16.gmra.mrb[52].mxu1 %vm1676_vm3, %v1624_v20  ;;  %v1527_v30 = vmax.f32 %v1191_v23, 0.0 }
 0x169   : > { %v1186_v29 = vadd.f32 %v9377_v18, %v1185_v28  ;;  %v1525_v32 = vmax.f32 %v1183_v25, 0.0 }
 0x16a   : > { %v1528_v31 = vmax.f32 %v1194_v27, 0.0 }
 0x16b   : > { %v1526_v33 = vmax.f32 %v1186_v29, 0.0 }
 0x16c   : > { %v1626_v4 = vpack.c.bf16 %v1528_v31, %v1527_v30 }
 0x16d   : > { %v1625_v34 = vpack.c.bf16 %v1526_v33, %v1525_v32  ;;  %v8114_v35 = vpop.f32.mrb[60].mxu0 }
 0x16e   : > { %v1207_v56 = vadd.f32 %v8114_v35, %v9377_v18  ;;  %v1198_v36 = vpop.f32.mrb[61].mxu0 }
 0x16f   : > { %v1199_v37 = vadd.f32 %v9377_v18, %v1198_v36  ;;  %v8115_v38 = vpop.f32.mrb[62].mxu0  ;;  %8238 = vmatprep.mubr.msk.bf16.mxu1 %vm1676_vm3, %v1625_v34 }
 0x170   : > { %v1210_v39 = vadd.f32 %v8115_v38, %v9377_v18  ;;  %v1201_v40 = vpop.f32.mrb[63].mxu0  ;;  %8239 = vmatmul.mubr.msk.bf16.gmra.mrb[56].mxu1 %vm1676_vm3, %v1626_v4  ;;  %v1531_v42 = vmax.f32 %v1207_v56, 0.0 }
 0x171   : > { %v1202_v41 = vadd.f32 %v9377_v18, %v1201_v40  ;;  %v1529_v44 = vmax.f32 %v1199_v37, 0.0 }
 0x172   : > { %v1532_v43 = vmax.f32 %v1210_v39, 0.0 }
 0x173   : > { %v1530_v45 = vmax.f32 %v1202_v41, 0.0 }
 0x174   : > { %v1628_v46 = vpack.c.bf16 %v1532_v43, %v1531_v42 }
 0x175   : > { %v1627_v47 = vpack.c.bf16 %v1530_v45, %v1529_v44  ;;  %v8118_v48 = vpop.f32.mrb[64].mxu0 }
 0x176   : > { %v1223_v49 = vadd.f32 %v8118_v48, %v9377_v18  ;;  %v1214_v50 = vpop.f32.mrb[65].mxu0 }
 0x177   : > { %v1215_v51 = vadd.f32 %v9377_v18, %v1214_v50  ;;  %v8119_v52 = vpop.f32.mrb[66].mxu0  ;;  %8242 = vmatprep.mubr.msk.bf16.mxu1 %vm1676_vm3, %v1627_v47 }
 0x178   : > { %v1226_v53 = vadd.f32 %v8119_v52, %v9377_v18  ;;  %v1217_v54 = vpop.f32.mrb[67].mxu0  ;;  %8243 = vmatmul.mubr.msk.bf16.gmra.mrb[60].mxu1 %vm1676_vm3, %v1628_v46  ;;  %v1535_v57 = vmax.f32 %v1223_v49, 0.0 }
 0x179   : > { %v1218_v55 = vadd.f32 %v9377_v18, %v1217_v54  ;;  %v1533_v59 = vmax.f32 %v1215_v51, 0.0 }
 0x17a   : > { %v1536_v58 = vmax.f32 %v1226_v53, 0.0 }
 0x17b   : > { %v1534_v60 = vmax.f32 %v1218_v55, 0.0 }
 0x17c   : > { %v1630_v61 = vpack.c.bf16 %v1536_v58, %v1535_v57 }
 0x17d   : > { %v1629_v62 = vpack.c.bf16 %v1534_v60, %v1533_v59  ;;  %v8122_v63 = vpop.f32.mrb[68].mxu0 }
 0x17e   : > { %v1239_v0 = vadd.f32 %v8122_v63, %v9377_v18  ;;  %v1230_v1 = vpop.f32.mrb[69].mxu0 }
 0x17f   : > { %v1231_v2 = vadd.f32 %v9377_v18, %v1230_v1  ;;  %v8123_v3 = vpop.f32.mrb[70].mxu0  ;;  %8246 = vmatprep.mubr.msk.bf16.mxu1 %vm1676_vm3, %v1629_v62 }
 0x180   : > { %v1242_v5 = vadd.f32 %v8123_v3, %v9377_v18  ;;  %v1233_v6 = vpop.f32.mrb[71].mxu0  ;;  %8247 = vmatmul.mubr.msk.bf16.gmra.mrb[64].mxu1 %vm1676_vm3, %v1630_v61  ;;  %v1539_v8 = vmax.f32 %v1239_v0, 0.0 }
 0x181   : > { %v1234_v7 = vadd.f32 %v9377_v18, %v1233_v6  ;;  %v1537_v10 = vmax.f32 %v1231_v2, 0.0 }
 0x182   : > { %v1540_v9 = vmax.f32 %v1242_v5, 0.0 }
 0x183   : > { %v1538_v11 = vmax.f32 %v1234_v7, 0.0 }
 0x184   : > { %v1632_v12 = vpack.c.bf16 %v1540_v9, %v1539_v8 }
 0x185   : > { %v1631_v13 = vpack.c.bf16 %v1538_v11, %v1537_v10  ;;  %v8126_v14 = vpop.f32.mrb[72].mxu0 }
 0x186   : > { %v1255_v15 = vadd.f32 %v8126_v14, %v9377_v18  ;;  %v1246_v16 = vpop.f32.mrb[73].mxu0 }
 0x187   : > { %v1247_v17 = vadd.f32 %v9377_v18, %v1246_v16  ;;  %v8127_v19 = vpop.f32.mrb[74].mxu0  ;;  %8250 = vmatprep.mubr.msk.bf16.mxu1 %vm1676_vm3, %v1631_v13 }
 0x188   : > { %v1258_v20 = vadd.f32 %v8127_v19, %v9377_v18  ;;  %v1249_v21 = vpop.f32.mrb[75].mxu0  ;;  %8251 = vmatmul.mubr.msk.bf16.gmra.mrb[68].mxu1 %vm1676_vm3, %v1632_v12  ;;  %v1543_v23 = vmax.f32 %v1255_v15, 0.0 }
 0x189   : > { %v1250_v22 = vadd.f32 %v9377_v18, %v1249_v21  ;;  %v1541_v25 = vmax.f32 %v1247_v17, 0.0 }
 0x18a   : > { %v1544_v24 = vmax.f32 %v1258_v20, 0.0 }
 0x18b   : > { %v1542_v26 = vmax.f32 %v1250_v22, 0.0 }
 0x18c   : > { %v1634_v27 = vpack.c.bf16 %v1544_v24, %v1543_v23 }
 0x18d   : > { %v1633_v28 = vpack.c.bf16 %v1542_v26, %v1541_v25  ;;  %v8130_v29 = vpop.f32.mrb[76].mxu0 }
 0x18e   : > { %v1271_v30 = vadd.f32 %v8130_v29, %v9377_v18  ;;  %v1262_v31 = vpop.f32.mrb[77].mxu0 }
 0x18f   : > { %v1263_v32 = vadd.f32 %v9377_v18, %v1262_v31  ;;  %v8131_v33 = vpop.f32.mrb[78].mxu0  ;;  %8254 = vmatprep.mubr.msk.bf16.mxu1 %vm1676_vm3, %v1633_v28 }
 0x190   : > { %v1274_v4 = vadd.f32 %v8131_v33, %v9377_v18  ;;  %v1265_v34 = vpop.f32.mrb[79].mxu0  ;;  %8255 = vmatmul.mubr.msk.bf16.gmra.mrb[72].mxu1 %vm1676_vm3, %v1634_v27  ;;  %v1547_v56 = vmax.f32 %v1271_v30, 0.0 }
 0x191   : > { %v1266_v35 = vadd.f32 %v9377_v18, %v1265_v34  ;;  %v1545_v37 = vmax.f32 %v1263_v32, 0.0 }
 0x192   : > { %v1548_v36 = vmax.f32 %v1274_v4, 0.0 }
 0x193   : > { %v1546_v38 = vmax.f32 %v1266_v35, 0.0 }
 0x194   : > { %v1636_v39 = vpack.c.bf16 %v1548_v36, %v1547_v56 }
 0x195   : > { %v1635_v40 = vpack.c.bf16 %v1546_v38, %v1545_v37  ;;  %v8134_v41 = vpop.f32.mrb[80].mxu0 }
 0x196   : > { %v1287_v42 = vadd.f32 %v8134_v41, %v9377_v18  ;;  %v1278_v43 = vpop.f32.mrb[81].mxu0 }
 0x197   : > { %v1279_v44 = vadd.f32 %v9377_v18, %v1278_v43  ;;  %v8135_v45 = vpop.f32.mrb[82].mxu0  ;;  %8258 = vmatprep.mubr.msk.bf16.mxu1 %vm1676_vm3, %v1635_v40 }
 0x198   : > { %v1290_v46 = vadd.f32 %v8135_v45, %v9377_v18  ;;  %v1281_v47 = vpop.f32.mrb[83].mxu0  ;;  %8259 = vmatmul.mubr.msk.bf16.gmra.mrb[76].mxu1 %vm1676_vm3, %v1636_v39  ;;  %v1551_v49 = vmax.f32 %v1287_v42, 0.0 }
 0x199   : > { %v1282_v48 = vadd.f32 %v9377_v18, %v1281_v47  ;;  %v1549_v51 = vmax.f32 %v1279_v44, 0.0 }
 0x19a   : > { %v1552_v50 = vmax.f32 %v1290_v46, 0.0 }
 0x19b   : > { %v1550_v52 = vmax.f32 %v1282_v48, 0.0 }
 0x19c   : > { %v1638_v53 = vpack.c.bf16 %v1552_v50, %v1551_v49 }
 0x19d   : > { %v1637_v54 = vpack.c.bf16 %v1550_v52, %v1549_v51  ;;  %v8138_v55 = vpop.f32.mrb[84].mxu0 }
 0x19e   : > { %v1303_v57 = vadd.f32 %v8138_v55, %v9377_v18  ;;  %v1294_v58 = vpop.f32.mrb[85].mxu0 }
 0x19f   : > { %v1295_v59 = vadd.f32 %v9377_v18, %v1294_v58  ;;  %v8139_v60 = vpop.f32.mrb[86].mxu0  ;;  %8262 = vmatprep.mubr.msk.bf16.mxu1 %vm1676_vm3, %v1637_v54 }
 0x1a0   : > { %v1306_v61 = vadd.f32 %v8139_v60, %v9377_v18  ;;  %v1297_v62 = vpop.f32.mrb[87].mxu0  ;;  %8263 = vmatmul.mubr.msk.bf16.gmra.mrb[80].mxu1 %vm1676_vm3, %v1638_v53  ;;  %v1555_v0 = vmax.f32 %v1303_v57, 0.0 }
 0x1a1   : > { %v1298_v63 = vadd.f32 %v9377_v18, %v1297_v62  ;;  %v1553_v2 = vmax.f32 %v1295_v59, 0.0 }
 0x1a2   : > { %v1556_v1 = vmax.f32 %v1306_v61, 0.0 }
 0x1a3   : > { %v1554_v3 = vmax.f32 %v1298_v63, 0.0 }
 0x1a4   : > { %v1640_v5 = vpack.c.bf16 %v1556_v1, %v1555_v0 }
 0x1a5   : > { %v1639_v6 = vpack.c.bf16 %v1554_v3, %v1553_v2  ;;  %v8142_v7 = vpop.f32.mrb[88].mxu0 }
 0x1a6   : > { %v1319_v8 = vadd.f32 %v8142_v7, %v9377_v18  ;;  %v1310_v9 = vpop.f32.mrb[89].mxu0 }
 0x1a7   : > { %v1311_v10 = vadd.f32 %v9377_v18, %v1310_v9  ;;  %v8143_v11 = vpop.f32.mrb[90].mxu0  ;;  %8266 = vmatprep.mubr.msk.bf16.mxu1 %vm1676_vm3, %v1639_v6 }
 0x1a8   : > { %v1322_v12 = vadd.f32 %v8143_v11, %v9377_v18  ;;  %v1313_v13 = vpop.f32.mrb[91].mxu0  ;;  %8267 = vmatmul.mubr.msk.bf16.gmra.mrb[84].mxu1 %vm1676_vm3, %v1640_v5  ;;  %v1559_v15 = vmax.f32 %v1319_v8, 0.0 }
 0x1a9   : > { %v1314_v14 = vadd.f32 %v9377_v18, %v1313_v13  ;;  %v1557_v17 = vmax.f32 %v1311_v10, 0.0 }
 0x1aa   : > { %v1560_v16 = vmax.f32 %v1322_v12, 0.0 }
 0x1ab   : > { %v1558_v19 = vmax.f32 %v1314_v14, 0.0 }
 0x1ac   : > { %v1642_v20 = vpack.c.bf16 %v1560_v16, %v1559_v15 }
 0x1ad   : > { %v1641_v21 = vpack.c.bf16 %v1558_v19, %v1557_v17  ;;  %v8146_v22 = vpop.f32.mrb[92].mxu0 }
 0x1ae   : > { %v1335_v23 = vadd.f32 %v8146_v22, %v9377_v18  ;;  %v1326_v24 = vpop.f32.mrb[93].mxu0 }
 0x1af   : > { %v1327_v25 = vadd.f32 %v9377_v18, %v1326_v24  ;;  %v8147_v26 = vpop.f32.mrb[94].mxu0  ;;  %8270 = vmatprep.mubr.msk.bf16.mxu1 %vm1676_vm3, %v1641_v21 }
 0x1b0   : > { %v1338_v27 = vadd.f32 %v8147_v26, %v9377_v18  ;;  %v1329_v28 = vpop.f32.mrb[95].mxu0  ;;  %8271 = vmatmul.mubr.msk.bf16.gmra.mrb[88].mxu1 %vm1676_vm3, %v1642_v20  ;;  %v1563_v30 = vmax.f32 %v1335_v23, 0.0  ;;  %v9578_v23 = vld [vmem:[%s11158_s5] ss:$0 sm:$0xff] }
 0x1b1   : > { %v1330_v29 = vadd.f32 %v9377_v18, %v1329_v28  ;;  %v1561_v32 = vmax.f32 %v1327_v25, 0.0 }
 0x1b2   : > { %v1564_v31 = vmax.f32 %v1338_v27, 0.0 }
 0x1b3   : > { %v1562_v33 = vmax.f32 %v1330_v29, 0.0 }
 0x1b4   : > { %v1644_v4 = vpack.c.bf16 %v1564_v31, %v1563_v30 }
 0x1b5   : > { %v1643_v34 = vpack.c.bf16 %v1562_v33, %v1561_v32  ;;  %v8150_v35 = vpop.f32.mrb[96].mxu0 }
 0x1b6   : > { %v1351_v56 = vadd.f32 %v8150_v35, %v9377_v18  ;;  %v1342_v36 = vpop.f32.mrb[97].mxu0 }
 0x1b7   : > { %v1343_v37 = vadd.f32 %v9377_v18, %v1342_v36  ;;  %v8151_v38 = vpop.f32.mrb[98].mxu0  ;;  %8274 = vmatprep.mubr.msk.bf16.mxu1 %vm1676_vm3, %v1643_v34 }
 0x1b8   : > { %v1354_v39 = vadd.f32 %v8151_v38, %v9377_v18  ;;  %v1345_v40 = vpop.f32.mrb[99].mxu0  ;;  %8275 = vmatmul.mubr.msk.bf16.gmra.mrb[92].mxu1 %vm1676_vm3, %v1644_v4  ;;  %v1567_v42 = vmax.f32 %v1351_v56, 0.0 }
 0x1b9   : > { %v1346_v41 = vadd.f32 %v9377_v18, %v1345_v40  ;;  %v1565_v44 = vmax.f32 %v1343_v37, 0.0 }
 0x1ba   : > { %v1568_v43 = vmax.f32 %v1354_v39, 0.0 }
 0x1bb   : > { %v1566_v45 = vmax.f32 %v1346_v41, 0.0 }
 0x1bc   : > { %v1646_v46 = vpack.c.bf16 %v1568_v43, %v1567_v42 }
 0x1bd   : > { %v1645_v47 = vpack.c.bf16 %v1566_v45, %v1565_v44  ;;  %v8154_v48 = vpop.f32.mrb[100].mxu0 }
 0x1be   : > { %v1367_v49 = vadd.f32 %v8154_v48, %v9377_v18  ;;  %v1358_v50 = vpop.f32.mrb[101].mxu0 }
 0x1bf   : > { %v1359_v51 = vadd.f32 %v9377_v18, %v1358_v50  ;;  %v8155_v52 = vpop.f32.mrb[102].mxu0  ;;  %8278 = vmatprep.mubr.msk.bf16.mxu1 %vm1676_vm3, %v1645_v47 }
 0x1c0   : > { %v1370_v53 = vadd.f32 %v8155_v52, %v9377_v18  ;;  %v1361_v54 = vpop.f32.mrb[103].mxu0  ;;  %8279 = vmatmul.mubr.msk.bf16.gmra.mrb[96].mxu1 %vm1676_vm3, %v1646_v46  ;;  %v1571_v57 = vmax.f32 %v1367_v49, 0.0 }
 0x1c1   : > { %v1362_v55 = vadd.f32 %v9377_v18, %v1361_v54  ;;  %v1569_v59 = vmax.f32 %v1359_v51, 0.0 }
 0x1c2   : > { %v1572_v58 = vmax.f32 %v1370_v53, 0.0 }
 0x1c3   : > { %v1570_v60 = vmax.f32 %v1362_v55, 0.0 }
 0x1c4   : > { %v1648_v61 = vpack.c.bf16 %v1572_v58, %v1571_v57 }
 0x1c5   : > { %v1647_v62 = vpack.c.bf16 %v1570_v60, %v1569_v59  ;;  %v8158_v63 = vpop.f32.mrb[104].mxu0 }
 0x1c6   : > { %v1383_v0 = vadd.f32 %v8158_v63, %v9377_v18  ;;  %v1374_v1 = vpop.f32.mrb[105].mxu0 }
 0x1c7   : > { %v1375_v2 = vadd.f32 %v9377_v18, %v1374_v1  ;;  %v8159_v3 = vpop.f32.mrb[106].mxu0  ;;  %8282 = vmatprep.mubr.msk.bf16.mxu1 %vm1676_vm3, %v1647_v62 }
 0x1c8   : > { %v1386_v5 = vadd.f32 %v8159_v3, %v9377_v18  ;;  %v1377_v6 = vpop.f32.mrb[107].mxu0  ;;  %8283 = vmatmul.mubr.msk.bf16.gmra.mrb[100].mxu1 %vm1676_vm3, %v1648_v61  ;;  %v1575_v8 = vmax.f32 %v1383_v0, 0.0 }
 0x1c9   : > { %v1378_v7 = vadd.f32 %v9377_v18, %v1377_v6  ;;  %v1573_v10 = vmax.f32 %v1375_v2, 0.0  ;;  %v8963_v6 = vld [vmem:[%s11178_s4] sm:$0xff]   ;;  %s7136_s4 = scalar_lea.sflag [#allocation3], %s506_s16 }
 0x1ca   : > { %v1576_v9 = vmax.f32 %v1386_v5, 0.0 }
 0x1cb   : > { %v1574_v11 = vmax.f32 %v1378_v7, 0.0 }
 0x1cc   : > { %v1650_v12 = vpack.c.bf16 %v1576_v9, %v1575_v8 }
 0x1cd   : > { %v1649_v13 = vpack.c.bf16 %v1574_v11, %v1573_v10  ;;  %v8162_v14 = vpop.f32.mrb[108].mxu0 }
 0x1ce   : > { %v1399_v15 = vadd.f32 %v8162_v14, %v9377_v18  ;;  %v1390_v16 = vpop.f32.mrb[109].mxu0 }
 0x1cf   : > { %v1391_v17 = vadd.f32 %v9377_v18, %v1390_v16  ;;  %v8163_v19 = vpop.f32.mrb[110].mxu0  ;;  %8286 = vmatprep.mubr.msk.bf16.mxu1 %vm1676_vm3, %v1649_v13 }
 0x1d0   : > { %v1402_v20 = vadd.f32 %v8163_v19, %v9377_v18  ;;  %v1393_v21 = vpop.f32.mrb[111].mxu0  ;;  %8287 = vmatmul.mubr.msk.bf16.gmra.mrb[104].mxu1 %vm1676_vm3, %v1650_v12  ;;  %v1579_v24 = vmax.f32 %v1399_v15, 0.0 }
 0x1d1   : > { %v1394_v22 = vadd.f32 %v9377_v18, %v1393_v21  ;;  %v1577_v26 = vmax.f32 %v1391_v17, 0.0 }
 0x1d2   : > { %v1580_v25 = vmax.f32 %v1402_v20, 0.0 }
 0x1d3   : > { %v1578_v27 = vmax.f32 %v1394_v22, 0.0  ;;  %v8184_v28 = vpop.f32.mrb[0].mxu1 }
 0x1d4   : > { %v1652_v29 = vpack.c.bf16 %v1580_v25, %v1579_v24  ;;  %v1912_v30 = vadd.f32 %v8184_v28, %v9578_v23  ;;  %v1903_v31 = vpop.f32.mrb[1].mxu1 }
 0x1d5   : > { %v1651_v32 = vpack.c.bf16 %v1578_v27, %v1577_v26  ;;  %v1904_v33 = vadd.f32 %v9578_v23, %v1903_v31  ;;  %v8166_v4 = vpop.f32.mrb[112].mxu0  ;;  %v8185_v34 = vpop.f32.mrb[2].mxu1 }
 0x1d6   : > { %v1415_v35 = vadd.f32 %v8166_v4, %v9377_v18  ;;  %v1915_v56 = vadd.f32 %v8185_v34, %v9578_v23  ;;  %v1406_v36 = vpop.f32.mrb[113].mxu0  ;;  %v1906_v37 = vpop.f32.mrb[3].mxu1  ;;  %v2416_v41 = vmax.f32 %v1912_v30, 0.0 }
 0x1d7   : > { %v1407_v38 = vadd.f32 %v9377_v18, %v1406_v36  ;;  %v1907_v39 = vadd.f32 %v9578_v23, %v1906_v37  ;;  %v8167_v40 = vpop.f32.mrb[114].mxu0  ;;  %8290 = vmatprep.mubr.msk.bf16.mxu1 %vm1676_vm3, %v1651_v32  ;;  %v2414_v45 = vmax.f32 %v1904_v33, 0.0 }
 0x1d8   : > { %v2417_v42 = vmax.f32 %v1915_v56, 0.0  ;;  %v1418_v43 = vadd.f32 %v8167_v40, %v9377_v18  ;;  %v1409_v44 = vpop.f32.mrb[115].mxu0  ;;  %8291 = vmatmul.mubr.msk.bf16.gmra.mrb[108].mxu1 %vm1676_vm3, %v1652_v29  ;;  %v1583_v48 = vmax.f32 %v1415_v35, 0.0 }
 0x1d9   : > { %v2415_v46 = vmax.f32 %v1907_v39, 0.0  ;;  %v1410_v47 = vadd.f32 %v9377_v18, %v1409_v44  ;;  %v1581_v51 = vmax.f32 %v1407_v38, 0.0  ;;  %v9596_v18 = vld [vmem:[%s11179_s3] ss:$0 sm:$0xff] }
 0x1da   : > { %v2543_v49 = vpack.c.bf16 %v2417_v42, %v2416_v41  ;;  %v1584_v50 = vmax.f32 %v1418_v43, 0.0 }
 0x1db   : > { %v2542_v52 = vpack.c.bf16 %v2415_v46, %v2414_v45  ;;  %v1582_v53 = vmax.f32 %v1410_v47, 0.0  ;;  %v8188_v54 = vpop.f32.mrb[4].mxu1 }
 0x1dc   : > { %v1654_v55 = vpack.c.bf16 %v1584_v50, %v1583_v48  ;;  %v1928_v57 = vadd.f32 %v8188_v54, %v9578_v23  ;;  %v1919_v58 = vpop.f32.mrb[5].mxu1 }
 0x1dd   : > { %v1653_v59 = vpack.c.bf16 %v1582_v53, %v1581_v51  ;;  %v1920_v60 = vadd.f32 %v9578_v23, %v1919_v58  ;;  %v8170_v61 = vpop.f32.mrb[116].mxu0  ;;  %v8189_v62 = vpop.f32.mrb[6].mxu1  ;;  %8314 = vmatprep.mubr.msk.bf16.mxu0 %vm2629_vm4, %v2542_v52 }
 0x1de   : > { %v1431_v63 = vadd.f32 %v9596_v18, %v8170_v61  ;;  %v1931_v0 = vadd.f32 %v8189_v62, %v9578_v23  ;;  %v1422_v1 = vpop.f32.mrb[117].mxu0  ;;  %v1922_v2 = vpop.f32.mrb[7].mxu1  ;;  %8315 = vmatmul.mubr.msk.bf16.vlgmr.msra.gmra.mrb[128].mxu0 %vm2629_vm4, %v2543_v49  ;;  %v2420_v8 = vmax.f32 %v1928_v57, 0.0 }
 0x1df   : > { %v1423_v3 = vadd.f32 %v9596_v18, %v1422_v1  ;;  %v1923_v5 = vadd.f32 %v9578_v23, %v1922_v2  ;;  %8573 = vmatpush3.bf16.msra.mxu0 %v8963_v6  ;;  %v8171_v7 = vpop.f32.mrb[118].mxu0  ;;  %8294 = vmatprep.mubr.msk.bf16.mxu1 %vm1676_vm3, %v1653_v59  ;;  %v2418_v12 = vmax.f32 %v1920_v60, 0.0 }
 0x1e0   : > { %v2421_v9 = vmax.f32 %v1931_v0, 0.0  ;;  %v1434_v10 = vadd.f32 %v9596_v18, %v8171_v7  ;;  %v1425_v11 = vpop.f32.mrb[119].mxu0  ;;  %8295 = vmatmul.mubr.msk.bf16.gmra.mrb[112].mxu1 %vm1676_vm3, %v1654_v55  ;;  %v1587_v15 = vmax.f32 %v1431_v63, 0.0 }
 0x1e1   : > { %v2419_v13 = vmax.f32 %v1923_v5, 0.0  ;;  %v1426_v14 = vadd.f32 %v9596_v18, %v1425_v11  ;;  %v1585_v19 = vmax.f32 %v1423_v3, 0.0 }
 0x1e2   : > { %v2545_v16 = vpack.c.bf16 %v2421_v9, %v2420_v8  ;;  %v1588_v17 = vmax.f32 %v1434_v10, 0.0 }
 0x1e3   : > { %v2544_v20 = vpack.c.bf16 %v2419_v13, %v2418_v12  ;;  %v1586_v21 = vmax.f32 %v1426_v14, 0.0  ;;  %v8192_v22 = vpop.f32.mrb[8].mxu1  ;;  %v3671_v12 = vld [vmem:[%s9633_s30] sm:$0xff]  ;;  %v3672_v13 = vld [vmem:[%s9633_s30 + $0x8] sm:$0xff] }
 0x1e4   : > { %v1656_v24 = vpack.c.bf16 %v1588_v17, %v1587_v15  ;;  %v1944_v25 = vadd.f32 %v8192_v22, %v9578_v23  ;;  %v1935_v26 = vpop.f32.mrb[9].mxu1 }
 0x1e5   : > { %v1655_v27 = vpack.c.bf16 %v1586_v21, %v1585_v19  ;;  %v1936_v28 = vadd.f32 %v9578_v23, %v1935_v26  ;;  %v8174_v29 = vpop.f32.mrb[120].mxu0  ;;  %v8193_v30 = vpop.f32.mrb[10].mxu1  ;;  %8318 = vmatprep.mubr.msk.bf16.mxu0 %vm2629_vm4, %v2544_v20 }
 0x1e6   : > { %v1447_v31 = vadd.f32 %v9596_v18, %v8174_v29  ;;  %v1947_v32 = vadd.f32 %v8193_v30, %v9578_v23  ;;  %v1438_v33 = vpop.f32.mrb[121].mxu0  ;;  %v1938_v4 = vpop.f32.mrb[11].mxu1  ;;  %8319 = vmatmul.mubr.msk.bf16.gmra.mrb[132].mxu0 %vm2629_vm4, %v2545_v16  ;;  %v2424_v36 = vmax.f32 %v1944_v25, 0.0 }
 0x1e7   : > { %v1439_v34 = vadd.f32 %v9596_v18, %v1438_v33  ;;  %v1939_v35 = vadd.f32 %v9578_v23, %v1938_v4  ;;  %v8175_v56 = vpop.f32.mrb[122].mxu0  ;;  %8298 = vmatprep.mubr.msk.bf16.mxu1 %vm1676_vm3, %v1655_v27  ;;  %v2422_v40 = vmax.f32 %v1936_v28, 0.0  ;;  %v3673_v33 = vld [vmem:[%s9633_s30 + $0x10] sm:$0xff]  ;;  %v3674_v4 = vld [vmem:[%s9633_s30 + $0x18] sm:$0xff] }
 0x1e8   : > { %v2425_v37 = vmax.f32 %v1947_v32, 0.0  ;;  %v1450_v38 = vadd.f32 %v9596_v18, %v8175_v56  ;;  %v1441_v39 = vpop.f32.mrb[123].mxu0  ;;  %8299 = vmatmul.mubr.msk.bf16.gmra.mrb[116].mxu1 %vm1676_vm3, %v1656_v24  ;;  %v1591_v43 = vmax.f32 %v1447_v31, 0.0  ;;  %v3676_v56 = vld [vmem:[%s9633_s30 + $0x28] sm:$0xff] }
 0x1e9   : > { %v2423_v41 = vmax.f32 %v1939_v35, 0.0  ;;  %v1442_v42 = vadd.f32 %v9596_v18, %v1441_v39  ;;  %v1589_v46 = vmax.f32 %v1439_v34, 0.0  ;;  %v3675_v35 = vld [vmem:[%s9633_s30 + $0x20] sm:$0xff] }
 0x1ea   : > { %v2547_v44 = vpack.c.bf16 %v2425_v37, %v2424_v36  ;;  %v1592_v45 = vmax.f32 %v1450_v38, 0.0 }
 0x1eb   : > { %v2546_v47 = vpack.c.bf16 %v2423_v41, %v2422_v40  ;;  %v1590_v48 = vmax.f32 %v1442_v42, 0.0  ;;  %v8196_v49 = vpop.f32.mrb[12].mxu1  ;;  %v3800_v40 = vpack.c.bf16 %v3674_v4, %v3673_v33  ;;  %v3686_v33 = vld [vmem:[%s9633_s30 + $0x78] sm:$0xff] }
 0x1ec   : > { %v1658_v50 = vpack.c.bf16 %v1592_v45, %v1591_v43  ;;  %v1960_v51 = vadd.f32 %v8196_v49, %v9578_v23  ;;  %v1951_v52 = vpop.f32.mrb[13].mxu1  ;;  %v3801_v43 = vpack.c.bf16 %v3676_v56, %v3675_v35  ;;  %v3688_v35 = vld [vmem:[%s9633_s30 + $0x88] sm:$0xff] }
 0x1ed   : > { %v1657_v53 = vpack.c.bf16 %v1590_v48, %v1589_v46  ;;  %v1952_v54 = vadd.f32 %v9578_v23, %v1951_v52  ;;  %v8178_v55 = vpop.f32.mrb[124].mxu0  ;;  %v8197_v57 = vpop.f32.mrb[14].mxu1  ;;  %8322 = vmatprep.mubr.msk.bf16.mxu0 %vm2629_vm4, %v2546_v47  ;;  %v3678_v52 = vld [vmem:[%s9633_s30 + $0x38] sm:$0xff] }
 0x1ee   : > { %v1463_v58 = vadd.f32 %v9596_v18, %v8178_v55  ;;  %v1963_v59 = vadd.f32 %v8197_v57, %v9578_v23  ;;  %v1454_v60 = vpop.f32.mrb[125].mxu0  ;;  %v1954_v61 = vpop.f32.mrb[15].mxu1  ;;  %8323 = vmatmul.mubr.msk.bf16.gmra.mrb[136].mxu0 %vm2629_vm4, %v2547_v44  ;;  %v2428_v1 = vmax.f32 %v1960_v51, 0.0  ;;  %v3677_v51 = vld [vmem:[%s9633_s30 + $0x30] sm:$0xff]  ;;  %v3679_v55 = vld [vmem:[%s9633_s30 + $0x40] sm:$0xff]  ;;  %v3680_v57 = vld [vmem:[%s9633_s30 + $0x48] sm:$0xff] }
 0x1ef   : > { %v1455_v62 = vadd.f32 %v9596_v18, %v1454_v60  ;;  %v1955_v63 = vadd.f32 %v9578_v23, %v1954_v61  ;;  %v8179_v0 = vpop.f32.mrb[126].mxu0  ;;  %8302 = vmatprep.mubr.msk.bf16.mxu1 %vm1676_vm3, %v1657_v53  ;;  %v2426_v6 = vmax.f32 %v1952_v54, 0.0  ;;  %v8964_v53 = vld [vmem:[%s11159_s6] sm:$0xff]  }
 0x1f0   : > { %v2429_v2 = vmax.f32 %v1963_v59, 0.0  ;;  %v1466_v3 = vadd.f32 %v9596_v18, %v8179_v0  ;;  %v1457_v5 = vpop.f32.mrb[127].mxu0  ;;  %8303 = vmatmul.mubr.msk.bf16.gmra.mrb[120].mxu1 %vm1676_vm3, %v1658_v50  ;;  %v1595_v9 = vmax.f32 %v1463_v58, 0.0  ;;  %v8965_v58 = vld [vmem:[%s11159_s6 + $0x8] sm:$0xff]  }
 0x1f1   : > { %v2427_v7 = vmax.f32 %v1955_v63, 0.0  ;;  %v1458_v8 = vadd.f32 %v9596_v18, %v1457_v5  ;;  %v1593_v14 = vmax.f32 %v1455_v62, 0.0  ;;  %v3799_v18 = vpack.c.bf16 %v3672_v13, %v3671_v12  ;;  %v3682_v12 = vld [vmem:[%s9633_s30 + $0x58] sm:$0xff] }
 0x1f2   : > { %v2549_v10 = vpack.c.bf16 %v2429_v2, %v2428_v1  ;;  %v1596_v11 = vmax.f32 %v1466_v3, 0.0  ;;  %v3802_v63 = vpack.c.bf16 %v3678_v52, %v3677_v51  ;;  %v3803_v2 = vpack.c.bf16 %v3680_v57, %v3679_v55  ;;  %v3690_v51 = vld [vmem:[%s9633_s30 + $0x98] sm:$0xff] }
 0x1f3   : > { %v2548_v15 = vpack.c.bf16 %v2427_v7, %v2426_v6  ;;  %v1594_v16 = vmax.f32 %v1458_v8, 0.0  ;;  %v8200_v17 = vpop.f32.mrb[16].mxu1 }
 0x1f4   : > { %v1660_v19 = vpack.c.bf16 %v1596_v11, %v1595_v9  ;;  %v1976_v20 = vadd.f32 %v8200_v17, %v9578_v23  ;;  %v1967_v21 = vpop.f32.mrb[17].mxu1  ;;  %v3681_v11 = vld [vmem:[%s9633_s30 + $0x50] sm:$0xff] }
 0x1f5   : > { %v1659_v22 = vpack.c.bf16 %v1594_v16, %v1593_v14  ;;  %v1968_v24 = vadd.f32 %v9578_v23, %v1967_v21  ;;  %v8201_v25 = vpop.f32.mrb[18].mxu1  ;;  %8326 = vmatprep.mubr.msk.bf16.mxu0 %vm2629_vm4, %v2548_v15  ;;  %v3683_v14 = vld [vmem:[%s9633_s30 + $0x60] sm:$0xff]  ;;  %v3684_v15 = vld [vmem:[%s9633_s30 + $0x68] sm:$0xff]  ;;  %v3804_v21 = vpack.c.bf16 %v3682_v12, %v3681_v11 }
 0x1f6   : > { %v1979_v26 = vadd.f32 %v8201_v25, %v9578_v23  ;;  %v1970_v27 = vpop.f32.mrb[19].mxu1  ;;  %8327 = vmatmul.mubr.msk.bf16.gmra.mrb[140].mxu0 %vm2629_vm4, %v2549_v10  ;;  %v2432_v29 = vmax.f32 %v1976_v20, 0.0  ;;  %v3805_v25 = vpack.c.bf16 %v3684_v15, %v3683_v14  ;;  %v3695_v11 = vld [vmem:[%s9633_s30 + $0xc0] sm:$0xff]  ;;  %v3696_v12 = vld [vmem:[%s9633_s30 + $0xc8] sm:$0xff] }
 0x1f7   : > { %v1971_v28 = vadd.f32 %v9578_v23, %v1970_v27  ;;  %8306 = vmatprep.mubr.msk.bf16.mxu1 %vm1676_vm3, %v1659_v22  ;;  %v2430_v31 = vmax.f32 %v1968_v24, 0.0 }
 0x1f8   : > { %v2433_v30 = vmax.f32 %v1979_v26, 0.0  ;;  %8307 = vmatmul.mubr.msk.bf16.gmra.mrb[124].mxu1 %vm1676_vm3, %v1660_v19 }
 0x1f9   : > { %v2431_v32 = vmax.f32 %v1971_v28, 0.0  ;;  %8444 = vmatprep.mubr.msk.bf16.mxu1 %vm724_vm2, %v3799_v18 }
 0x1fa   : > { %v2551_v34 = vpack.c.bf16 %v2433_v30, %v2432_v29 }
 0x1fb   : > { %v2550_v36 = vpack.c.bf16 %v2431_v32, %v2430_v31  ;;  %v8204_v37 = vpop.f32.mrb[20].mxu1  ;;  %v3685_v32 = vld [vmem:[%s9633_s30 + $0x70] sm:$0xff] }
 0x1fc   : > { %v1992_v38 = vadd.f32 %v8204_v37, %v9578_v23  ;;  %v1983_v39 = vpop.f32.mrb[21].mxu1 }
 0x1fd   : > { %v1984_v41 = vadd.f32 %v9578_v23, %v1983_v39  ;;  %v8205_v42 = vpop.f32.mrb[22].mxu1  ;;  %8330 = vmatprep.mubr.msk.bf16.mxu0 %vm2629_vm4, %v2550_v36  ;;  %v3806_v39 = vpack.c.bf16 %v3686_v33, %v3685_v32  ;;  %v3699_v32 = vld [vmem:[%s9633_s30 + $0xe0] sm:$0xff]  ;;  %v3700_v33 = vld [vmem:[%s9633_s30 + $0xe8] sm:$0xff] }
 0x1fe   : > { %v1995_v44 = vadd.f32 %v8205_v42, %v9578_v23  ;;  %v1986_v45 = vpop.f32.mrb[23].mxu1  ;;  %8331 = vmatmul.mubr.msk.bf16.gmra.mrb[144].mxu0 %vm2629_vm4, %v2551_v34  ;;  %v2436_v47 = vmax.f32 %v1992_v38, 0.0  ;;  %v3687_v34 = vld [vmem:[%s9633_s30 + $0x80] sm:$0xff] }
 0x1ff   : > { %v1987_v46 = vadd.f32 %v9578_v23, %v1986_v45  ;;  %v2434_v49 = vmax.f32 %v1984_v41, 0.0  ;;  %v3807_v42 = vpack.c.bf16 %v3688_v35, %v3687_v34 }
 0x200   : > { %v2437_v48 = vmax.f32 %v1995_v44, 0.0  ;;  %8445 = vmatmul.mubr.msk.bf16.vlgmr.msra.gmra.mrb[128].mxu1 %vm724_vm2, %v3800_v40 }
 0x201   : > { %v2435_v50 = vmax.f32 %v1987_v46, 0.0  ;;  %8448 = vmatprep.mubr.msk.bf16.mxu1 %vm724_vm2, %v3801_v43  ;;  %8703 = vmatpush3.bf16.msra.mxu1 %v8964_v53  ;;  %v3691_v53 = vld [vmem:[%s9633_s30 + $0xa0] sm:$0xff] }
 0x202   : > { %v2553_v54 = vpack.c.bf16 %v2437_v48, %v2436_v47  ;;  %8704 = vmatprep.subr.bf16.mxu1 %v8965_v58 }
 0x203   : > { %v2552_v59 = vpack.c.bf16 %v2435_v50, %v2434_v49  ;;  %v8208_v60 = vpop.f32.mrb[24].mxu1  ;;  %v3689_v50 = vld [vmem:[%s9633_s30 + $0x90] sm:$0xff] }
 0x204   : > { %v2008_v61 = vadd.f32 %v8208_v60, %v9578_v23  ;;  %v1999_v62 = vpop.f32.mrb[25].mxu1  ;;  %v3808_v60 = vpack.c.bf16 %v3690_v51, %v3689_v50  ;;  %v3703_v50 = vld [vmem:[%s9633_s30 + $0x100] sm:$0xff]  ;;  %v3704_v51 = vld [vmem:[%s9633_s30 + $0x108] sm:$0xff] }
 0x205   : > { %v2000_v0 = vadd.f32 %v9578_v23, %v1999_v62  ;;  %v8209_v1 = vpop.f32.mrb[26].mxu1  ;;  %8334 = vmatprep.mubr.msk.bf16.mxu0 %vm2629_vm4, %v2552_v59  ;;  %8705 = vmatpush3.bf16.msra.mxu1 %v8965_v58 }
 0x206   : > { %v2011_v3 = vadd.f32 %v8209_v1, %v9578_v23  ;;  %v2002_v5 = vpop.f32.mrb[27].mxu1  ;;  %8335 = vmatmul.mubr.msk.bf16.gmra.mrb[148].mxu0 %vm2629_vm4, %v2553_v54  ;;  %v2440_v7 = vmax.f32 %v2008_v61, 0.0  ;;  %v3692_v54 = vld [vmem:[%s9633_s30 + $0xa8] sm:$0xff] }
 0x207   : > { %v2003_v6 = vadd.f32 %v9578_v23, %v2002_v5  ;;  %v2438_v9 = vmax.f32 %v2000_v0, 0.0 }
 0x208   : > { %v2441_v8 = vmax.f32 %v2011_v3, 0.0  ;;  %8449 = vmatmul.mubr.msk.bf16.gmra.mrb[132].mxu1 %vm724_vm2, %v3802_v63  ;;  %v3809_v63 = vpack.c.bf16 %v3692_v54, %v3691_v53 }
 0x209   : > { %v2439_v10 = vmax.f32 %v2003_v6, 0.0  ;;  %8452 = vmatprep.mubr.msk.bf16.mxu1 %vm724_vm2, %v3803_v2 }
 0x20a   : > { %v2555_v13 = vpack.c.bf16 %v2441_v8, %v2440_v7  ;;  %v3693_v8 = vld [vmem:[%s9633_s30 + $0xb0] sm:$0xff] }
 0x20b   : > { %v2554_v16 = vpack.c.bf16 %v2439_v10, %v2438_v9  ;;  %v8212_v17 = vpop.f32.mrb[28].mxu1  ;;  %v3694_v9 = vld [vmem:[%s9633_s30 + $0xb8] sm:$0xff] }
 0x20c   : > { %v2024_v19 = vadd.f32 %v8212_v17, %v9578_v23  ;;  %v2015_v20 = vpop.f32.mrb[29].mxu1  ;;  %v3810_v17 = vpack.c.bf16 %v3694_v9, %v3693_v8  ;;  %v3707_v8 = vld [vmem:[%s9633_s30 + $0x120] sm:$0xff]  ;;  %v3708_v9 = vld [vmem:[%s9633_s30 + $0x128] sm:$0xff] }
 0x20d   : > { %v2016_v22 = vadd.f32 %v9578_v23, %v2015_v20  ;;  %v8213_v24 = vpop.f32.mrb[30].mxu1  ;;  %8338 = vmatprep.mubr.msk.bf16.mxu0 %vm2629_vm4, %v2554_v16 }
 0x20e   : > { %v2027_v18 = vadd.f32 %v8213_v24, %v9578_v23  ;;  %v2018_v26 = vpop.f32.mrb[31].mxu1  ;;  %8339 = vmatmul.mubr.msk.bf16.gmra.mrb[152].mxu0 %vm2629_vm4, %v2555_v13  ;;  %v2444_v28 = vmax.f32 %v2024_v19, 0.0 }
 0x20f   : > { %v2019_v27 = vadd.f32 %v9578_v23, %v2018_v26  ;;  %v2442_v30 = vmax.f32 %v2016_v22, 0.0 }
 0x210   : > { %v2445_v29 = vmax.f32 %v2027_v18, 0.0  ;;  %8453 = vmatmul.mubr.msk.bf16.gmra.mrb[136].mxu1 %vm724_vm2, %v3804_v21  ;;  %v3811_v21 = vpack.c.bf16 %v3696_v12, %v3695_v11 }
 0x211   : > { %v2443_v31 = vmax.f32 %v2019_v27, 0.0  ;;  %8456 = vmatprep.mubr.msk.bf16.mxu1 %vm724_vm2, %v3805_v25 }
 0x212   : > { %v2557_v4 = vpack.c.bf16 %v2445_v29, %v2444_v28  ;;  %v3697_v29 = vld [vmem:[%s9633_s30 + $0xd0] sm:$0xff] }
 0x213   : > { %v2556_v56 = vpack.c.bf16 %v2443_v31, %v2442_v30  ;;  %v8216_v36 = vpop.f32.mrb[32].mxu1  ;;  %v3698_v30 = vld [vmem:[%s9633_s30 + $0xd8] sm:$0xff] }
 0x214   : > { %v2040_v37 = vadd.f32 %v8216_v36, %v9578_v23  ;;  %v2031_v38 = vpop.f32.mrb[33].mxu1  ;;  %v3812_v36 = vpack.c.bf16 %v3698_v30, %v3697_v29  ;;  %v3711_v29 = vld [vmem:[%s9633_s30 + $0x140] sm:$0xff]  ;;  %v3712_v30 = vld [vmem:[%s9633_s30 + $0x148] sm:$0xff] }
 0x215   : > { %v2032_v40 = vadd.f32 %v9578_v23, %v2031_v38  ;;  %v8217_v41 = vpop.f32.mrb[34].mxu1  ;;  %8342 = vmatprep.mubr.msk.bf16.mxu0 %vm2629_vm4, %v2556_v56 }
 0x216   : > { %v2043_v43 = vadd.f32 %v8217_v41, %v9578_v23  ;;  %v2034_v44 = vpop.f32.mrb[35].mxu1  ;;  %8343 = vmatmul.mubr.msk.bf16.gmra.mrb[156].mxu0 %vm2629_vm4, %v2557_v4  ;;  %v2448_v46 = vmax.f32 %v2040_v37, 0.0 }
 0x217   : > { %v2035_v45 = vadd.f32 %v9578_v23, %v2034_v44  ;;  %v2446_v48 = vmax.f32 %v2032_v40, 0.0 }
 0x218   : > { %v2449_v47 = vmax.f32 %v2043_v43, 0.0  ;;  %8457 = vmatmul.mubr.msk.bf16.gmra.mrb[140].mxu1 %vm724_vm2, %v3806_v39  ;;  %v3813_v39 = vpack.c.bf16 %v3700_v33, %v3699_v32 }
 0x219   : > { %v2447_v49 = vmax.f32 %v2035_v45, 0.0  ;;  %8460 = vmatprep.mubr.msk.bf16.mxu1 %vm724_vm2, %v3807_v42 }
 0x21a   : > { %v2559_v52 = vpack.c.bf16 %v2449_v47, %v2448_v46  ;;  %v3701_v47 = vld [vmem:[%s9633_s30 + $0xf0] sm:$0xff] }
 0x21b   : > { %v2558_v55 = vpack.c.bf16 %v2447_v49, %v2446_v48  ;;  %v8220_v57 = vpop.f32.mrb[36].mxu1  ;;  %v3702_v48 = vld [vmem:[%s9633_s30 + $0xf8] sm:$0xff] }
 0x21c   : > { %v2056_v58 = vadd.f32 %v8220_v57, %v9578_v23  ;;  %v2047_v59 = vpop.f32.mrb[37].mxu1  ;;  %v3814_v57 = vpack.c.bf16 %v3702_v48, %v3701_v47  ;;  %v3715_v47 = vld [vmem:[%s9633_s30 + $0x160] sm:$0xff]  ;;  %v3716_v48 = vld [vmem:[%s9633_s30 + $0x168] sm:$0xff] }
 0x21d   : > { %v2048_v61 = vadd.f32 %v9578_v23, %v2047_v59  ;;  %v8221_v62 = vpop.f32.mrb[38].mxu1  ;;  %8346 = vmatprep.mubr.msk.bf16.mxu0 %vm2629_vm4, %v2558_v55 }
 0x21e   : > { %v2059_v0 = vadd.f32 %v8221_v62, %v9578_v23  ;;  %v2050_v1 = vpop.f32.mrb[39].mxu1  ;;  %8347 = vmatmul.mubr.msk.bf16.gmra.mrb[160].mxu0 %vm2629_vm4, %v2559_v52  ;;  %v2452_v3 = vmax.f32 %v2056_v58, 0.0 }
 0x21f   : > { %v2051_v2 = vadd.f32 %v9578_v23, %v2050_v1  ;;  %v2450_v6 = vmax.f32 %v2048_v61, 0.0 }
 0x220   : > { %v2453_v5 = vmax.f32 %v2059_v0, 0.0  ;;  %8461 = vmatmul.mubr.msk.bf16.gmra.mrb[144].mxu1 %vm724_vm2, %v3808_v60  ;;  %v3815_v60 = vpack.c.bf16 %v3704_v51, %v3703_v50 }
 0x221   : > { %v2451_v7 = vmax.f32 %v2051_v2, 0.0  ;;  %8464 = vmatprep.mubr.msk.bf16.mxu1 %vm724_vm2, %v3809_v63 }
 0x222   : > { %v2561_v10 = vpack.c.bf16 %v2453_v5, %v2452_v3  ;;  %v3705_v5 = vld [vmem:[%s9633_s30 + $0x110] sm:$0xff] }
 0x223   : > { %v2560_v13 = vpack.c.bf16 %v2451_v7, %v2450_v6  ;;  %v8224_v14 = vpop.f32.mrb[40].mxu1  ;;  %v3706_v6 = vld [vmem:[%s9633_s30 + $0x118] sm:$0xff] }
 0x224   : > { %v2072_v15 = vadd.f32 %v8224_v14, %v9578_v23  ;;  %v2063_v16 = vpop.f32.mrb[41].mxu1  ;;  %v3816_v14 = vpack.c.bf16 %v3706_v6, %v3705_v5  ;;  %v3719_v5 = vld [vmem:[%s9633_s30 + $0x180] sm:$0xff]  ;;  %v3720_v6 = vld [vmem:[%s9633_s30 + $0x188] sm:$0xff] }
 0x225   : > { %v2064_v19 = vadd.f32 %v9578_v23, %v2063_v16  ;;  %v8225_v20 = vpop.f32.mrb[42].mxu1  ;;  %8350 = vmatprep.mubr.msk.bf16.mxu0 %vm2629_vm4, %v2560_v13 }
 0x226   : > { %v2075_v22 = vadd.f32 %v8225_v20, %v9578_v23  ;;  %v2066_v24 = vpop.f32.mrb[43].mxu1  ;;  %8351 = vmatmul.mubr.msk.bf16.gmra.mrb[164].mxu0 %vm2629_vm4, %v2561_v10  ;;  %v2456_v18 = vmax.f32 %v2072_v15, 0.0 }
 0x227   : > { %v2067_v25 = vadd.f32 %v9578_v23, %v2066_v24  ;;  %v2454_v27 = vmax.f32 %v2064_v19, 0.0 }
 0x228   : > { %v2457_v26 = vmax.f32 %v2075_v22, 0.0  ;;  %8465 = vmatmul.mubr.msk.bf16.gmra.mrb[148].mxu1 %vm724_vm2, %v3810_v17  ;;  %v3817_v17 = vpack.c.bf16 %v3708_v9, %v3707_v8 }
 0x229   : > { %v2455_v28 = vmax.f32 %v2067_v25, 0.0  ;;  %8468 = vmatprep.mubr.msk.bf16.mxu1 %vm724_vm2, %v3811_v21 }
 0x22a   : > { %v2563_v31 = vpack.c.bf16 %v2457_v26, %v2456_v18  ;;  %v3709_v26 = vld [vmem:[%s9633_s30 + $0x130] sm:$0xff] }
 0x22b   : > { %v2562_v4 = vpack.c.bf16 %v2455_v28, %v2454_v27  ;;  %v8228_v34 = vpop.f32.mrb[44].mxu1  ;;  %v3710_v27 = vld [vmem:[%s9633_s30 + $0x138] sm:$0xff] }
 0x22c   : > { %v2088_v35 = vadd.f32 %v8228_v34, %v9578_v23  ;;  %v2079_v56 = vpop.f32.mrb[45].mxu1  ;;  %v3818_v34 = vpack.c.bf16 %v3710_v27, %v3709_v26  ;;  %v3723_v26 = vld [vmem:[%s9633_s30 + $0x1a0] sm:$0xff]  ;;  %v3724_v27 = vld [vmem:[%s9633_s30 + $0x1a8] sm:$0xff] }
 0x22d   : > { %v2080_v37 = vadd.f32 %v9578_v23, %v2079_v56  ;;  %v8229_v38 = vpop.f32.mrb[46].mxu1  ;;  %8354 = vmatprep.mubr.msk.bf16.mxu0 %vm2629_vm4, %v2562_v4 }
 0x22e   : > { %v2091_v40 = vadd.f32 %v8229_v38, %v9578_v23  ;;  %v2082_v41 = vpop.f32.mrb[47].mxu1  ;;  %8355 = vmatmul.mubr.msk.bf16.gmra.mrb[168].mxu0 %vm2629_vm4, %v2563_v31  ;;  %v2460_v43 = vmax.f32 %v2088_v35, 0.0 }
 0x22f   : > { %v2083_v42 = vadd.f32 %v9578_v23, %v2082_v41  ;;  %v2458_v45 = vmax.f32 %v2080_v37, 0.0 }
 0x230   : > { %v2461_v44 = vmax.f32 %v2091_v40, 0.0  ;;  %8469 = vmatmul.mubr.msk.bf16.gmra.mrb[152].mxu1 %vm724_vm2, %v3812_v36  ;;  %v3819_v36 = vpack.c.bf16 %v3712_v30, %v3711_v29 }
 0x231   : > { %v2459_v46 = vmax.f32 %v2083_v42, 0.0  ;;  %8472 = vmatprep.mubr.msk.bf16.mxu1 %vm724_vm2, %v3813_v39 }
 0x232   : > { %v2565_v49 = vpack.c.bf16 %v2461_v44, %v2460_v43  ;;  %v3713_v44 = vld [vmem:[%s9633_s30 + $0x150] sm:$0xff] }
 0x233   : > { %v2564_v52 = vpack.c.bf16 %v2459_v46, %v2458_v45  ;;  %v8232_v53 = vpop.f32.mrb[48].mxu1  ;;  %v3714_v45 = vld [vmem:[%s9633_s30 + $0x158] sm:$0xff] }
 0x234   : > { %v2104_v54 = vadd.f32 %v8232_v53, %v9578_v23  ;;  %v2095_v55 = vpop.f32.mrb[49].mxu1  ;;  %v3820_v53 = vpack.c.bf16 %v3714_v45, %v3713_v44  ;;  %v3727_v44 = vld [vmem:[%s9633_s30 + $0x1c0] sm:$0xff]  ;;  %v3728_v45 = vld [vmem:[%s9633_s30 + $0x1c8] sm:$0xff] }
 0x235   : > { %v2096_v58 = vadd.f32 %v9578_v23, %v2095_v55  ;;  %v8233_v59 = vpop.f32.mrb[50].mxu1  ;;  %8358 = vmatprep.mubr.msk.bf16.mxu0 %vm2629_vm4, %v2564_v52 }
 0x236   : > { %v2107_v61 = vadd.f32 %v8233_v59, %v9578_v23  ;;  %v2098_v62 = vpop.f32.mrb[51].mxu1  ;;  %8359 = vmatmul.mubr.msk.bf16.gmra.mrb[172].mxu0 %vm2629_vm4, %v2565_v49  ;;  %v2464_v0 = vmax.f32 %v2104_v54, 0.0 }
 0x237   : > { %v2099_v63 = vadd.f32 %v9578_v23, %v2098_v62  ;;  %v2462_v2 = vmax.f32 %v2096_v58, 0.0 }
 0x238   : > { %v2465_v1 = vmax.f32 %v2107_v61, 0.0  ;;  %8473 = vmatmul.mubr.msk.bf16.gmra.mrb[156].mxu1 %vm724_vm2, %v3814_v57  ;;  %v3821_v57 = vpack.c.bf16 %v3716_v48, %v3715_v47 }
 0x239   : > { %v2463_v3 = vmax.f32 %v2099_v63, 0.0  ;;  %8476 = vmatprep.mubr.msk.bf16.mxu1 %vm724_vm2, %v3815_v60 }
 0x23a   : > { %v2567_v7 = vpack.c.bf16 %v2465_v1, %v2464_v0  ;;  %v3717_v1 = vld [vmem:[%s9633_s30 + $0x170] sm:$0xff] }
 0x23b   : > { %v2566_v10 = vpack.c.bf16 %v2463_v3, %v2462_v2  ;;  %v8236_v11 = vpop.f32.mrb[52].mxu1  ;;  %v3718_v2 = vld [vmem:[%s9633_s30 + $0x178] sm:$0xff] }
 0x23c   : > { %v2120_v12 = vadd.f32 %v8236_v11, %v9578_v23  ;;  %v2111_v13 = vpop.f32.mrb[53].mxu1  ;;  %v3822_v11 = vpack.c.bf16 %v3718_v2, %v3717_v1  ;;  %v3731_v1 = vld [vmem:[%s9633_s30 + $0x1e0] sm:$0xff]  ;;  %v3732_v2 = vld [vmem:[%s9633_s30 + $0x1e8] sm:$0xff] }
 0x23d   : > { %v2112_v15 = vadd.f32 %v9578_v23, %v2111_v13  ;;  %v8237_v16 = vpop.f32.mrb[54].mxu1  ;;  %8362 = vmatprep.mubr.msk.bf16.mxu0 %vm2629_vm4, %v2566_v10 }
 0x23e   : > { %v2123_v19 = vadd.f32 %v8237_v16, %v9578_v23  ;;  %v2114_v20 = vpop.f32.mrb[55].mxu1  ;;  %8363 = vmatmul.mubr.msk.bf16.gmra.mrb[176].mxu0 %vm2629_vm4, %v2567_v7  ;;  %v2468_v22 = vmax.f32 %v2120_v12, 0.0 }
 0x23f   : > { %v2115_v21 = vadd.f32 %v9578_v23, %v2114_v20  ;;  %v2466_v25 = vmax.f32 %v2112_v15, 0.0 }
 0x240   : > { %v2469_v24 = vmax.f32 %v2123_v19, 0.0  ;;  %8477 = vmatmul.mubr.msk.bf16.gmra.mrb[160].mxu1 %vm724_vm2, %v3816_v14  ;;  %v3823_v14 = vpack.c.bf16 %v3720_v6, %v3719_v5 }
 0x241   : > { %v2467_v18 = vmax.f32 %v2115_v21, 0.0  ;;  %8480 = vmatprep.mubr.msk.bf16.mxu1 %vm724_vm2, %v3817_v17 }
 0x242   : > { %v2569_v28 = vpack.c.bf16 %v2469_v24, %v2468_v22  ;;  %v3721_v24 = vld [vmem:[%s9633_s30 + $0x190] sm:$0xff] }
 0x243   : > { %v2568_v31 = vpack.c.bf16 %v2467_v18, %v2466_v25  ;;  %v8240_v32 = vpop.f32.mrb[56].mxu1  ;;  %v3722_v25 = vld [vmem:[%s9633_s30 + $0x198] sm:$0xff] }
 0x244   : > { %v2136_v33 = vadd.f32 %v8240_v32, %v9578_v23  ;;  %v2127_v4 = vpop.f32.mrb[57].mxu1  ;;  %v3824_v32 = vpack.c.bf16 %v3722_v25, %v3721_v24  ;;  %v3735_v24 = vld [vmem:[%s9633_s30 + $0x200] sm:$0xff]  ;;  %v3736_v25 = vld [vmem:[%s9633_s30 + $0x208] sm:$0xff] }
 0x245   : > { %v2128_v35 = vadd.f32 %v9578_v23, %v2127_v4  ;;  %v8241_v56 = vpop.f32.mrb[58].mxu1  ;;  %8366 = vmatprep.mubr.msk.bf16.mxu0 %vm2629_vm4, %v2568_v31 }
 0x246   : > { %v2139_v37 = vadd.f32 %v8241_v56, %v9578_v23  ;;  %v2130_v38 = vpop.f32.mrb[59].mxu1  ;;  %8367 = vmatmul.mubr.msk.bf16.gmra.mrb[180].mxu0 %vm2629_vm4, %v2569_v28  ;;  %v2472_v40 = vmax.f32 %v2136_v33, 0.0 }
 0x247   : > { %v2131_v39 = vadd.f32 %v9578_v23, %v2130_v38  ;;  %v2470_v42 = vmax.f32 %v2128_v35, 0.0 }
 0x248   : > { %v2473_v41 = vmax.f32 %v2139_v37, 0.0  ;;  %8481 = vmatmul.mubr.msk.bf16.gmra.mrb[164].mxu1 %vm724_vm2, %v3818_v34  ;;  %v3825_v34 = vpack.c.bf16 %v3724_v27, %v3723_v26 }
 0x249   : > { %v2471_v43 = vmax.f32 %v2131_v39, 0.0  ;;  %8484 = vmatprep.mubr.msk.bf16.mxu1 %vm724_vm2, %v3819_v36 }
 0x24a   : > { %v2571_v46 = vpack.c.bf16 %v2473_v41, %v2472_v40  ;;  %v3725_v41 = vld [vmem:[%s9633_s30 + $0x1b0] sm:$0xff] }
 0x24b   : > { %v2570_v49 = vpack.c.bf16 %v2471_v43, %v2470_v42  ;;  %v8244_v50 = vpop.f32.mrb[60].mxu1  ;;  %v3726_v42 = vld [vmem:[%s9633_s30 + $0x1b8] sm:$0xff] }
 0x24c   : > { %v2152_v51 = vadd.f32 %v8244_v50, %v9578_v23  ;;  %v2143_v52 = vpop.f32.mrb[61].mxu1  ;;  %v3826_v50 = vpack.c.bf16 %v3726_v42, %v3725_v41  ;;  %v3739_v41 = vld [vmem:[%s9633_s30 + $0x220] sm:$0xff]  ;;  %v3740_v42 = vld [vmem:[%s9633_s30 + $0x228] sm:$0xff] }
 0x24d   : > { %v2144_v54 = vadd.f32 %v9578_v23, %v2143_v52  ;;  %v8245_v55 = vpop.f32.mrb[62].mxu1  ;;  %8370 = vmatprep.mubr.msk.bf16.mxu0 %vm2629_vm4, %v2570_v49 }
 0x24e   : > { %v2155_v58 = vadd.f32 %v8245_v55, %v9578_v23  ;;  %v2146_v59 = vpop.f32.mrb[63].mxu1  ;;  %8371 = vmatmul.mubr.msk.bf16.gmra.mrb[184].mxu0 %vm2629_vm4, %v2571_v46  ;;  %v2476_v61 = vmax.f32 %v2152_v51, 0.0 }
 0x24f   : > { %v2147_v60 = vadd.f32 %v9578_v23, %v2146_v59  ;;  %v2474_v63 = vmax.f32 %v2144_v54, 0.0 }
 0x250   : > { %v2477_v62 = vmax.f32 %v2155_v58, 0.0  ;;  %8485 = vmatmul.mubr.msk.bf16.gmra.mrb[168].mxu1 %vm724_vm2, %v3820_v53  ;;  %v3827_v53 = vpack.c.bf16 %v3728_v45, %v3727_v44 }
 0x251   : > { %v2475_v0 = vmax.f32 %v2147_v60, 0.0  ;;  %8488 = vmatprep.mubr.msk.bf16.mxu1 %vm724_vm2, %v3821_v57 }
 0x252   : > { %v2573_v3 = vpack.c.bf16 %v2477_v62, %v2476_v61  ;;  %v3729_v62 = vld [vmem:[%s9633_s30 + $0x1d0] sm:$0xff] }
 0x253   : > { %v2572_v7 = vpack.c.bf16 %v2475_v0, %v2474_v63  ;;  %v8248_v8 = vpop.f32.mrb[64].mxu1  ;;  %v3730_v63 = vld [vmem:[%s9633_s30 + $0x1d8] sm:$0xff] }
 0x254   : > { %v2168_v9 = vadd.f32 %v8248_v8, %v9578_v23  ;;  %v2159_v10 = vpop.f32.mrb[65].mxu1  ;;  %v3828_v8 = vpack.c.bf16 %v3730_v63, %v3729_v62  ;;  %v3743_v62 = vld [vmem:[%s9633_s30 + $0x240] sm:$0xff]  ;;  %v3744_v63 = vld [vmem:[%s9633_s30 + $0x248] sm:$0xff] }
 0x255   : > { %v2160_v12 = vadd.f32 %v9578_v23, %v2159_v10  ;;  %v8249_v13 = vpop.f32.mrb[66].mxu1  ;;  %8374 = vmatprep.mubr.msk.bf16.mxu0 %vm2629_vm4, %v2572_v7 }
 0x256   : > { %v2171_v15 = vadd.f32 %v8249_v13, %v9578_v23  ;;  %v2162_v16 = vpop.f32.mrb[67].mxu1  ;;  %8375 = vmatmul.mubr.msk.bf16.gmra.mrb[188].mxu0 %vm2629_vm4, %v2573_v3  ;;  %v2480_v19 = vmax.f32 %v2168_v9, 0.0 }
 0x257   : > { %v2163_v17 = vadd.f32 %v9578_v23, %v2162_v16  ;;  %v2478_v21 = vmax.f32 %v2160_v12, 0.0 }
 0x258   : > { %v2481_v20 = vmax.f32 %v2171_v15, 0.0  ;;  %8489 = vmatmul.mubr.msk.bf16.gmra.mrb[172].mxu1 %vm724_vm2, %v3822_v11  ;;  %v3829_v11 = vpack.c.bf16 %v3732_v2, %v3731_v1 }
 0x259   : > { %v2479_v22 = vmax.f32 %v2163_v17, 0.0  ;;  %8492 = vmatprep.mubr.msk.bf16.mxu1 %vm724_vm2, %v3823_v14  ;;  %v9838_v14 = vld [vmem:[%s11158_s5] ss:$0 sm:$0xff] }
 0x25a   : > { %v2575_v18 = vpack.c.bf16 %v2481_v20, %v2480_v19 }
 0x25b   : > { %v2574_v28 = vpack.c.bf16 %v2479_v22, %v2478_v21  ;;  %v8252_v29 = vpop.f32.mrb[68].mxu1  ;;  %v3733_v21 = vld [vmem:[%s9633_s30 + $0x1f0] sm:$0xff] }
 0x25c   : > { %v2184_v30 = vadd.f32 %v8252_v29, %v9578_v23  ;;  %v2175_v31 = vpop.f32.mrb[69].mxu1 }
 0x25d   : > { %v2176_v33 = vadd.f32 %v9578_v23, %v2175_v31  ;;  %v8253_v4 = vpop.f32.mrb[70].mxu1  ;;  %8378 = vmatprep.mubr.msk.bf16.mxu0 %vm2629_vm4, %v2574_v28 }
 0x25e   : > { %v2187_v35 = vadd.f32 %v8253_v4, %v9578_v23  ;;  %v2178_v56 = vpop.f32.mrb[71].mxu1  ;;  %8379 = vmatmul.mubr.msk.bf16.gmra.mrb[192].mxu0 %vm2629_vm4, %v2575_v18  ;;  %v2484_v37 = vmax.f32 %v2184_v30, 0.0 }
 0x25f   : > { %v2179_v36 = vadd.f32 %v9578_v23, %v2178_v56  ;;  %v2482_v39 = vmax.f32 %v2176_v33, 0.0 }
 0x260   : > { %v2485_v38 = vmax.f32 %v2187_v35, 0.0  ;;  %8493 = vmatmul.mubr.msk.bf16.gmra.mrb[176].mxu1 %vm724_vm2, %v3824_v32  ;;  %v3831_v32 = vpack.c.bf16 %v3736_v25, %v3735_v24 }
 0x261   : > { %v2483_v40 = vmax.f32 %v2179_v36, 0.0  ;;  %8496 = vmatprep.mubr.msk.bf16.mxu1 %vm724_vm2, %v3825_v34 }
 0x262   : > { %v2577_v43 = vpack.c.bf16 %v2485_v38, %v2484_v37  ;;  %v3737_v38 = vld [vmem:[%s9633_s30 + $0x210] sm:$0xff] }
 0x263   : > { %v2576_v46 = vpack.c.bf16 %v2483_v40, %v2482_v39  ;;  %v8256_v47 = vpop.f32.mrb[72].mxu1  ;;  %v3738_v39 = vld [vmem:[%s9633_s30 + $0x218] sm:$0xff] }
 0x264   : > { %v2200_v48 = vadd.f32 %v8256_v47, %v9578_v23  ;;  %v2191_v49 = vpop.f32.mrb[73].mxu1  ;;  %v3832_v47 = vpack.c.bf16 %v3738_v39, %v3737_v38  ;;  %v3751_v38 = vld [vmem:[%s9633_s30 + $0x280] sm:$0xff]  ;;  %v3752_v39 = vld [vmem:[%s9633_s30 + $0x288] sm:$0xff] }
 0x265   : > { %v2192_v51 = vadd.f32 %v9578_v23, %v2191_v49  ;;  %v8257_v52 = vpop.f32.mrb[74].mxu1  ;;  %8382 = vmatprep.mubr.msk.bf16.mxu0 %vm2629_vm4, %v2576_v46 }
 0x266   : > { %v2203_v54 = vadd.f32 %v8257_v52, %v9578_v23  ;;  %v2194_v55 = vpop.f32.mrb[75].mxu1  ;;  %8383 = vmatmul.mubr.msk.bf16.gmra.mrb[196].mxu0 %vm2629_vm4, %v2577_v43  ;;  %v2488_v58 = vmax.f32 %v2200_v48, 0.0 }
 0x267   : > { %v2195_v57 = vadd.f32 %v9578_v23, %v2194_v55  ;;  %v2486_v60 = vmax.f32 %v2192_v51, 0.0 }
 0x268   : > { %v2489_v59 = vmax.f32 %v2203_v54, 0.0  ;;  %8497 = vmatmul.mubr.msk.bf16.gmra.mrb[180].mxu1 %vm724_vm2, %v3826_v50  ;;  %v3833_v50 = vpack.c.bf16 %v3740_v42, %v3739_v41 }
 0x269   : > { %v2487_v61 = vmax.f32 %v2195_v57, 0.0  ;;  %8500 = vmatprep.mubr.msk.bf16.mxu1 %vm724_vm2, %v3827_v53 }
 0x26a   : > { %v2579_v0 = vpack.c.bf16 %v2489_v59, %v2488_v58  ;;  %v3741_v59 = vld [vmem:[%s9633_s30 + $0x230] sm:$0xff] }
 0x26b   : > { %v2578_v3 = vpack.c.bf16 %v2487_v61, %v2486_v60  ;;  %v8260_v5 = vpop.f32.mrb[76].mxu1  ;;  %v3742_v60 = vld [vmem:[%s9633_s30 + $0x238] sm:$0xff] }
 0x26c   : > { %v2216_v6 = vadd.f32 %v8260_v5, %v9578_v23  ;;  %v2207_v7 = vpop.f32.mrb[77].mxu1  ;;  %v3834_v5 = vpack.c.bf16 %v3742_v60, %v3741_v59  ;;  %v3755_v59 = vld [vmem:[%s9633_s30 + $0x2a0] sm:$0xff]  ;;  %v3756_v60 = vld [vmem:[%s9633_s30 + $0x2a8] sm:$0xff] }
 0x26d   : > { %v2208_v9 = vadd.f32 %v9578_v23, %v2207_v7  ;;  %v8261_v10 = vpop.f32.mrb[78].mxu1  ;;  %8386 = vmatprep.mubr.msk.bf16.mxu0 %vm2629_vm4, %v2578_v3 }
 0x26e   : > { %v2219_v12 = vadd.f32 %v8261_v10, %v9578_v23  ;;  %v2210_v13 = vpop.f32.mrb[79].mxu1  ;;  %8387 = vmatmul.mubr.msk.bf16.gmra.mrb[200].mxu0 %vm2629_vm4, %v2579_v0  ;;  %v2492_v16 = vmax.f32 %v2216_v6, 0.0  ;;  %v3734_v23 = vld [vmem:[%s9633_s30 + $0x1f8] sm:$0xff] }
 0x26f   : > { %v2211_v15 = vadd.f32 %v9838_v14, %v2210_v13  ;;  %v2490_v19 = vmax.f32 %v2208_v9, 0.0  ;;  %v3830_v29 = vpack.c.bf16 %v3734_v23, %v3733_v21  ;;  %v3747_v21 = vld [vmem:[%s9633_s30 + $0x260] sm:$0xff]  ;;  %v3748_v23 = vld [vmem:[%s9633_s30 + $0x268] sm:$0xff] }
 0x270   : > { %v2493_v17 = vmax.f32 %v2219_v12, 0.0  ;;  %8501 = vmatmul.mubr.msk.bf16.gmra.mrb[184].mxu1 %vm724_vm2, %v3828_v8  ;;  %v3835_v8 = vpack.c.bf16 %v3744_v63, %v3743_v62 }
 0x271   : > { %v2491_v20 = vmax.f32 %v2211_v15, 0.0  ;;  %8504 = vmatprep.mubr.msk.bf16.mxu1 %vm724_vm2, %v3829_v11 }
 0x272   : > { %v2581_v22 = vpack.c.bf16 %v2493_v17, %v2492_v16  ;;  %v3745_v17 = vld [vmem:[%s9633_s30 + $0x250] sm:$0xff] }
 0x273   : > { %v2580_v18 = vpack.c.bf16 %v2491_v20, %v2490_v19  ;;  %v8264_v26 = vpop.f32.mrb[80].mxu1  ;;  %v3746_v19 = vld [vmem:[%s9633_s30 + $0x258] sm:$0xff] }
 0x274   : > { %v2232_v27 = vadd.f32 %v9838_v14, %v8264_v26  ;;  %v2223_v28 = vpop.f32.mrb[81].mxu1  ;;  %v3836_v26 = vpack.c.bf16 %v3746_v19, %v3745_v17  ;;  %v3759_v17 = vld [vmem:[%s9633_s30 + $0x2c0] sm:$0xff]  ;;  %v3760_v19 = vld [vmem:[%s9633_s30 + $0x2c8] sm:$0xff] }
 0x275   : > { %v2224_v30 = vadd.f32 %v9838_v14, %v2223_v28  ;;  %v8265_v31 = vpop.f32.mrb[82].mxu1  ;;  %8390 = vmatprep.mubr.msk.bf16.mxu0 %vm2629_vm4, %v2580_v18 }
 0x276   : > { %v2235_v33 = vadd.f32 %v9838_v14, %v8265_v31  ;;  %v2226_v4 = vpop.f32.mrb[83].mxu1  ;;  %8391 = vmatmul.mubr.msk.bf16.gmra.mrb[204].mxu0 %vm2629_vm4, %v2581_v22  ;;  %v2496_v35 = vmax.f32 %v2232_v27, 0.0 }
 0x277   : > { %v2227_v34 = vadd.f32 %v9838_v14, %v2226_v4  ;;  %v2494_v36 = vmax.f32 %v2224_v30, 0.0 }
 0x278   : > { %v2497_v56 = vmax.f32 %v2235_v33, 0.0  ;;  %8505 = vmatmul.mubr.msk.bf16.gmra.mrb[188].mxu1 %vm724_vm2, %v3830_v29  ;;  %v3837_v29 = vpack.c.bf16 %v3748_v23, %v3747_v21 }
 0x279   : > { %v2495_v37 = vmax.f32 %v2227_v34, 0.0  ;;  %8508 = vmatprep.mubr.msk.bf16.mxu1 %vm724_vm2, %v3831_v32 }
 0x27a   : > { %v2583_v40 = vpack.c.bf16 %v2497_v56, %v2496_v35  ;;  %v3749_v56 = vld [vmem:[%s9633_s30 + $0x270] sm:$0xff] }
 0x27b   : > { %v2582_v43 = vpack.c.bf16 %v2495_v37, %v2494_v36  ;;  %v8268_v44 = vpop.f32.mrb[84].mxu1  ;;  %v3750_v36 = vld [vmem:[%s9633_s30 + $0x278] sm:$0xff] }
 0x27c   : > { %v2248_v45 = vadd.f32 %v9838_v14, %v8268_v44  ;;  %v2239_v46 = vpop.f32.mrb[85].mxu1  ;;  %v3838_v44 = vpack.c.bf16 %v3750_v36, %v3749_v56  ;;  %v3763_v56 = vld [vmem:[%s9633_s30 + $0x2e0] sm:$0xff]  ;;  %v3764_v36 = vld [vmem:[%s9633_s30 + $0x2e8] sm:$0xff] }
 0x27d   : > { %v2240_v48 = vadd.f32 %v9838_v14, %v2239_v46  ;;  %v8269_v49 = vpop.f32.mrb[86].mxu1  ;;  %8394 = vmatprep.mubr.msk.bf16.mxu0 %vm2629_vm4, %v2582_v43 }
 0x27e   : > { %v2251_v51 = vadd.f32 %v9838_v14, %v8269_v49  ;;  %v2242_v52 = vpop.f32.mrb[87].mxu1  ;;  %8395 = vmatmul.mubr.msk.bf16.gmra.mrb[208].mxu0 %vm2629_vm4, %v2583_v40  ;;  %v2500_v54 = vmax.f32 %v2248_v45, 0.0 }
 0x27f   : > { %v2243_v53 = vadd.f32 %v9838_v14, %v2242_v52  ;;  %v2498_v57 = vmax.f32 %v2240_v48, 0.0 }
 0x280   : > { %v2501_v55 = vmax.f32 %v2251_v51, 0.0  ;;  %8509 = vmatmul.mubr.msk.bf16.gmra.mrb[192].mxu1 %vm724_vm2, %v3832_v47  ;;  %v3839_v47 = vpack.c.bf16 %v3752_v39, %v3751_v38 }
 0x281   : > { %v2499_v58 = vmax.f32 %v2243_v53, 0.0  ;;  %8512 = vmatprep.mubr.msk.bf16.mxu1 %vm724_vm2, %v3833_v50 }
 0x282   : > { %v2585_v61 = vpack.c.bf16 %v2501_v55, %v2500_v54  ;;  %v3753_v55 = vld [vmem:[%s9633_s30 + $0x290] sm:$0xff] }
 0x283   : > { %v2584_v0 = vpack.c.bf16 %v2499_v58, %v2498_v57  ;;  %v8272_v1 = vpop.f32.mrb[88].mxu1  ;;  %v3754_v57 = vld [vmem:[%s9633_s30 + $0x298] sm:$0xff] }
 0x284   : > { %v2264_v2 = vadd.f32 %v9838_v14, %v8272_v1  ;;  %v2255_v3 = vpop.f32.mrb[89].mxu1  ;;  %v3840_v1 = vpack.c.bf16 %v3754_v57, %v3753_v55  ;;  %v3766_v55 = vld [vmem:[%s9633_s30 + $0x2f8] sm:$0xff] }
 0x285   : > { %v2256_v6 = vadd.f32 %v9838_v14, %v2255_v3  ;;  %v8273_v7 = vpop.f32.mrb[90].mxu1  ;;  %8398 = vmatprep.mubr.msk.bf16.mxu0 %vm2629_vm4, %v2584_v0 }
 0x286   : > { %v2267_v9 = vadd.f32 %v9838_v14, %v8273_v7  ;;  %v2258_v10 = vpop.f32.mrb[91].mxu1  ;;  %8399 = vmatmul.mubr.msk.bf16.gmra.mrb[212].mxu0 %vm2629_vm4, %v2585_v61  ;;  %v2504_v12 = vmax.f32 %v2264_v2, 0.0 }
 0x287   : > { %v2259_v11 = vadd.f32 %v9838_v14, %v2258_v10  ;;  %v2502_v15 = vmax.f32 %v2256_v6, 0.0 }
 0x288   : > { %v2505_v13 = vmax.f32 %v2267_v9, 0.0  ;;  %8513 = vmatmul.mubr.msk.bf16.gmra.mrb[196].mxu1 %vm724_vm2, %v3834_v5  ;;  %v3841_v5 = vpack.c.bf16 %v3756_v60, %v3755_v59  ;;  %v3767_v59 = vld [vmem:[%s9633_s30 + $0x300] sm:$0xff]  ;;  %v3768_v60 = vld [vmem:[%s9633_s30 + $0x308] sm:$0xff] }
 0x289   : > { %v2503_v16 = vmax.f32 %v2259_v11, 0.0  ;;  %8516 = vmatprep.mubr.msk.bf16.mxu1 %vm724_vm2, %v3835_v8 }
 0x28a   : > { %v2587_v20 = vpack.c.bf16 %v2505_v13, %v2504_v12  ;;  %v3757_v13 = vld [vmem:[%s9633_s30 + $0x2b0] sm:$0xff] }
 0x28b   : > { %v2586_v22 = vpack.c.bf16 %v2503_v16, %v2502_v15  ;;  %v8276_v24 = vpop.f32.mrb[92].mxu1  ;;  %v3758_v15 = vld [vmem:[%s9633_s30 + $0x2b8] sm:$0xff] }
 0x28c   : > { %v2280_v25 = vadd.f32 %v9838_v14, %v8276_v24  ;;  %v2271_v18 = vpop.f32.mrb[93].mxu1  ;;  %v3842_v24 = vpack.c.bf16 %v3758_v15, %v3757_v13 }
 0x28d   : > { %v2272_v27 = vadd.f32 %v9838_v14, %v2271_v18  ;;  %v8277_v28 = vpop.f32.mrb[94].mxu1  ;;  %8402 = vmatprep.mubr.msk.bf16.mxu0 %vm2629_vm4, %v2586_v22 }
 0x28e   : > { %v2283_v30 = vadd.f32 %v9838_v14, %v8277_v28  ;;  %v2274_v31 = vpop.f32.mrb[95].mxu1  ;;  %8403 = vmatmul.mubr.msk.bf16.gmra.mrb[216].mxu0 %vm2629_vm4, %v2587_v20  ;;  %v2508_v33 = vmax.f32 %v2280_v25, 0.0 }
 0x28f   : > { %v2275_v32 = vadd.f32 %v9838_v14, %v2274_v31  ;;  %v2506_v34 = vmax.f32 %v2272_v27, 0.0 }
 0x290   : > { %v2509_v4 = vmax.f32 %v2283_v30, 0.0  ;;  %8517 = vmatmul.mubr.msk.bf16.gmra.mrb[200].mxu1 %vm724_vm2, %v3836_v26  ;;  %v3843_v26 = vpack.c.bf16 %v3760_v19, %v3759_v17 }
 0x291   : > { %v2507_v35 = vmax.f32 %v2275_v32, 0.0  ;;  %8520 = vmatprep.mubr.msk.bf16.mxu1 %vm724_vm2, %v3837_v29 }
 0x292   : > { %v2589_v37 = vpack.c.bf16 %v2509_v4, %v2508_v33  ;;  %v3761_v4 = vld [vmem:[%s9633_s30 + $0x2d0] sm:$0xff] }
 0x293   : > { %v2588_v40 = vpack.c.bf16 %v2507_v35, %v2506_v34  ;;  %v8280_v41 = vpop.f32.mrb[96].mxu1  ;;  %v3762_v34 = vld [vmem:[%s9633_s30 + $0x2d8] sm:$0xff] }
 0x294   : > { %v2296_v42 = vadd.f32 %v9838_v14, %v8280_v41  ;;  %v2287_v43 = vpop.f32.mrb[97].mxu1  ;;  %v3844_v41 = vpack.c.bf16 %v3762_v34, %v3761_v4 }
 0x295   : > { %v2288_v45 = vadd.f32 %v9838_v14, %v2287_v43  ;;  %v8281_v46 = vpop.f32.mrb[98].mxu1  ;;  %8406 = vmatprep.mubr.msk.bf16.mxu0 %vm2629_vm4, %v2588_v40 }
 0x296   : > { %v2299_v48 = vadd.f32 %v9838_v14, %v8281_v46  ;;  %v2290_v49 = vpop.f32.mrb[99].mxu1  ;;  %8407 = vmatmul.mubr.msk.bf16.gmra.mrb[220].mxu0 %vm2629_vm4, %v2589_v37  ;;  %v2512_v51 = vmax.f32 %v2296_v42, 0.0 }
 0x297   : > { %v2291_v50 = vadd.f32 %v9838_v14, %v2290_v49  ;;  %v2510_v53 = vmax.f32 %v2288_v45, 0.0 }
 0x298   : > { %v2513_v52 = vmax.f32 %v2299_v48, 0.0  ;;  %8521 = vmatmul.mubr.msk.bf16.gmra.mrb[204].mxu1 %vm724_vm2, %v3838_v44  ;;  %v3845_v44 = vpack.c.bf16 %v3764_v36, %v3763_v56 }
 0x299   : > { %v2511_v54 = vmax.f32 %v2291_v50, 0.0  ;;  %8524 = vmatprep.mubr.msk.bf16.mxu1 %vm724_vm2, %v3839_v47  ;;  %v9941_v50 = vld [vmem:[%s11160_s7] ss:$0 sm:$0xff] }
 0x29a   : > { %v2591_v58 = vpack.c.bf16 %v2513_v52, %v2512_v51 }
 0x29b   : > { %v2590_v61 = vpack.c.bf16 %v2511_v54, %v2510_v53  ;;  %v8284_v62 = vpop.f32.mrb[100].mxu1  ;;  %v3765_v54 = vld [vmem:[%s9633_s30 + $0x2f0] sm:$0xff] }
 0x29c   : > { %v2312_v63 = vadd.f32 %v9838_v14, %v8284_v62  ;;  %v2303_v0 = vpop.f32.mrb[101].mxu1 }
 0x29d   : > { %v2304_v2 = vadd.f32 %v9838_v14, %v2303_v0  ;;  %v8285_v3 = vpop.f32.mrb[102].mxu1  ;;  %8410 = vmatprep.mubr.msk.bf16.mxu0 %vm2629_vm4, %v2590_v61 }
 0x29e   : > { %v2315_v6 = vadd.f32 %v9838_v14, %v8285_v3  ;;  %v2306_v7 = vpop.f32.mrb[103].mxu1  ;;  %8411 = vmatmul.mubr.msk.bf16.gmra.mrb[224].mxu0 %vm2629_vm4, %v2591_v58  ;;  %v2516_v9 = vmax.f32 %v2312_v63, 0.0 }
 0x29f   : > { %v2307_v8 = vadd.f32 %v9838_v14, %v2306_v7  ;;  %v2514_v11 = vmax.f32 %v2304_v2, 0.0 }
 0x2a0   : > { %v2517_v10 = vmax.f32 %v2315_v6, 0.0  ;;  %8525 = vmatmul.mubr.msk.bf16.gmra.mrb[208].mxu1 %vm724_vm2, %v3840_v1 }
 0x2a1   : > { %v2515_v12 = vmax.f32 %v2307_v8, 0.0  ;;  %8528 = vmatprep.mubr.msk.bf16.mxu1 %vm724_vm2, %v3841_v5  ;;  %v3846_v5 = vpack.c.bf16 %v3766_v55, %v3765_v54 }
 0x2a2   : > { %v2593_v16 = vpack.c.bf16 %v2517_v10, %v2516_v9  ;;  %v3847_v10 = vpack.c.bf16 %v3768_v60, %v3767_v59 }
 0x2a3   : > { %v2592_v20 = vpack.c.bf16 %v2515_v12, %v2514_v11  ;;  %v8288_v21 = vpop.f32.mrb[104].mxu1 }
 0x2a4   : > { %v2328_v23 = vadd.f32 %v9838_v14, %v8288_v21  ;;  %v2319_v22 = vpop.f32.mrb[105].mxu1 }
 0x2a5   : > { %v2320_v25 = vadd.f32 %v9838_v14, %v2319_v22  ;;  %v8289_v18 = vpop.f32.mrb[106].mxu1  ;;  %8414 = vmatprep.mubr.msk.bf16.mxu0 %vm2629_vm4, %v2592_v20  ;;  %v3770_v22 = vld [vmem:[%s9633_s30 + $0x318] sm:$0xff] }
 0x2a6   : > { %v2331_v27 = vadd.f32 %v9838_v14, %v8289_v18  ;;  %v2322_v28 = vpop.f32.mrb[107].mxu1  ;;  %8415 = vmatmul.mubr.msk.bf16.gmra.mrb[228].mxu0 %vm2629_vm4, %v2593_v16  ;;  %v2520_v30 = vmax.f32 %v2328_v23, 0.0  ;;  %v3769_v23 = vld [vmem:[%s9633_s30 + $0x310] sm:$0xff] }
 0x2a7   : > { %v2323_v29 = vadd.f32 %v9838_v14, %v2322_v28  ;;  %v2518_v32 = vmax.f32 %v2320_v25, 0.0  ;;  %v3772_v28 = vld [vmem:[%s9633_s30 + $0x328] sm:$0xff] }
 0x2a8   : > { %v2521_v31 = vmax.f32 %v2331_v27, 0.0  ;;  %8529 = vmatmul.mubr.msk.bf16.gmra.mrb[212].mxu1 %vm724_vm2, %v3842_v24  ;;  %v3771_v27 = vld [vmem:[%s9633_s30 + $0x320] sm:$0xff] }
 0x2a9   : > { %v2519_v33 = vmax.f32 %v2323_v29, 0.0  ;;  %8532 = vmatprep.mubr.msk.bf16.mxu1 %vm724_vm2, %v3843_v26 }
 0x2aa   : > { %v2595_v35 = vpack.c.bf16 %v2521_v31, %v2520_v30 }
 0x2ab   : > { %v2594_v37 = vpack.c.bf16 %v2519_v33, %v2518_v32  ;;  %v8292_v38 = vpop.f32.mrb[108].mxu1 }
 0x2ac   : > { %v2344_v39 = vadd.f32 %v9838_v14, %v8292_v38  ;;  %v2335_v40 = vpop.f32.mrb[109].mxu1 }
 0x2ad   : > { %v2336_v42 = vadd.f32 %v9838_v14, %v2335_v40  ;;  %v8293_v43 = vpop.f32.mrb[110].mxu1  ;;  %8418 = vmatprep.mubr.msk.bf16.mxu0 %vm2629_vm4, %v2594_v37  ;;  %v3849_v40 = vpack.c.bf16 %v3772_v28, %v3771_v27 }
 0x2ae   : > { %v2347_v45 = vadd.f32 %v9838_v14, %v8293_v43  ;;  %v2338_v46 = vpop.f32.mrb[111].mxu1  ;;  %8419 = vmatmul.mubr.msk.bf16.gmra.mrb[232].mxu0 %vm2629_vm4, %v2595_v35  ;;  %v2524_v48 = vmax.f32 %v2344_v39, 0.0  ;;  %v3848_v39 = vpack.c.bf16 %v3770_v22, %v3769_v23 }
 0x2af   : > { %v2339_v47 = vadd.f32 %v9838_v14, %v2338_v46  ;;  %v2522_v51 = vmax.f32 %v2336_v42, 0.0 }
 0x2b0   : > { %v2525_v49 = vmax.f32 %v2347_v45, 0.0  ;;  %8533 = vmatmul.mubr.msk.bf16.gmra.mrb[216].mxu1 %vm724_vm2, %v3844_v41 }
 0x2b1   : > { %v2523_v52 = vmax.f32 %v2339_v47, 0.0  ;;  %v8316_v53 = vpop.f32.mrb[128].mxu0  ;;  %8536 = vmatprep.mubr.msk.bf16.mxu1 %vm724_vm2, %v3845_v44 }
 0x2b2   : > { %v2597_v57 = vpack.c.bf16 %v2525_v49, %v2524_v48  ;;  %v2856_v58 = vpop.f32.mrb[129].mxu0  ;;  %v2865_v6 = vadd.f32 %v8316_v53, %v9941_v50 }
 0x2b3   : > { %v2596_v61 = vpack.c.bf16 %v2523_v52, %v2522_v51  ;;  %v2857_v62 = vadd.f32 %v9941_v50, %v2856_v58  ;;  %v8296_v63 = vpop.f32.mrb[112].mxu1  ;;  %v8317_v0 = vpop.f32.mrb[130].mxu0  ;;  %v3774_v58 = vld [vmem:[%s9633_s30 + $0x338] sm:$0xff] }
 0x2b4   : > { %v2360_v1 = vadd.f32 %v9838_v14, %v8296_v63  ;;  %v2351_v2 = vpop.f32.mrb[113].mxu1  ;;  %v2859_v3 = vpop.f32.mrb[131].mxu0  ;;  %v2868_v15 = vadd.f32 %v8317_v0, %v9941_v50  ;;  %v3370_v24 = vsel %vm2629_vm4, %v2865_v6, -inf  ;;  %v3775_v63 = vld [vmem:[%s9633_s30 + $0x340] sm:$0xff]  ;;  %v3776_v0 = vld [vmem:[%s9633_s30 + $0x348] sm:$0xff] }
 0x2b5   : > { %v2352_v7 = vadd.f32 %v9838_v14, %v2351_v2  ;;  %v2860_v8 = vadd.f32 %v9941_v50, %v2859_v3  ;;  %v8297_v9 = vpop.f32.mrb[114].mxu1  ;;  %8422 = vmatprep.mubr.msk.bf16.mxu0 %vm2629_vm4, %v2596_v61  ;;  %v3367_v13 = vsel %vm2629_vm4, %v2857_v62, -inf }
 0x2b6   : > { %v2363_v11 = vadd.f32 %v9838_v14, %v8297_v9  ;;  %v2354_v12 = vpop.f32.mrb[115].mxu1  ;;  %8423 = vmatmul.mubr.msk.bf16.gmra.mrb[236].mxu0 %vm2629_vm4, %v2597_v57  ;;  %v2528_v19 = vmax.f32 %v2360_v1, 0.0  ;;  %v3372_v32 = vsel %vm2629_vm4, %v2868_v15, -inf  ;;  %v3773_v57 = vld [vmem:[%s9633_s30 + $0x330] sm:$0xff] }
 0x2b7   : > { %v3368_v16 = vsel %vm2629_vm4, %v2860_v8, -inf  ;;  %v2355_v17 = vadd.f32 %v9838_v14, %v2354_v12  ;;  %v2526_v25 = vmax.f32 %v2352_v7, 0.0  ;;  %v3850_v15 = vpack.c.bf16 %v3774_v58, %v3773_v57 }
 0x2b8   : > { %v3369_v20 = vmax.f32 %v3367_v13, %v3368_v16  ;;  %v2529_v21 = vmax.f32 %v2363_v11, 0.0  ;;  %8537 = vmatmul.mubr.msk.bf16.gmra.mrb[220].mxu1 %vm724_vm2, %v3846_v5  ;;  %v3851_v16 = vpack.c.bf16 %v3776_v0, %v3775_v63 }
 0x2b9   : > { %v2527_v18 = vmax.f32 %v2355_v17, 0.0  ;;  %v8320_v26 = vpop.f32.mrb[132].mxu0  ;;  %8540 = vmatprep.mubr.msk.bf16.mxu1 %vm724_vm2, %v3847_v10 }
 0x2ba   : > { %v2599_v29 = vpack.c.bf16 %v2529_v21, %v2528_v19  ;;  %v2872_v30 = vpop.f32.mrb[133].mxu0  ;;  %v3371_v31 = vmax.f32 %v3369_v20, %v3370_v24  ;;  %v2881_v41 = vadd.f32 %v8320_v26, %v9941_v50 }
 0x2bb   : > { %v2598_v33 = vpack.c.bf16 %v2527_v18, %v2526_v25  ;;  %v2873_v4 = vadd.f32 %v9941_v50, %v2872_v30  ;;  %v8300_v34 = vpop.f32.mrb[116].mxu1  ;;  %v8321_v35 = vpop.f32.mrb[134].mxu0 }
 0x2bc   : > { %v3373_v56 = vmax.f32 %v3371_v31, %v3372_v32  ;;  %v2376_v36 = vadd.f32 %v9838_v14, %v8300_v34  ;;  %v2367_v37 = vpop.f32.mrb[117].mxu1  ;;  %v2875_v38 = vpop.f32.mrb[135].mxu0  ;;  %v2884_v49 = vadd.f32 %v8321_v35, %v9941_v50  ;;  %v3378_v59 = vsel %vm2629_vm4, %v2881_v41, -inf  ;;  %v3777_v31 = vld [vmem:[%s9633_s30 + $0x350] sm:$0xff]  ;;  %v3778_v32 = vld [vmem:[%s9633_s30 + $0x358] sm:$0xff] }
 0x2bd   : > { %v3374_v42 = vsel %vm2629_vm4, %v2873_v4, -inf  ;;  %v2368_v43 = vadd.f32 %v9838_v14, %v2367_v37  ;;  %v2876_v44 = vadd.f32 %v9941_v50, %v2875_v38  ;;  %v8301_v45 = vpop.f32.mrb[118].mxu1  ;;  %8426 = vmatprep.mubr.msk.bf16.mxu0 %vm2629_vm4, %v2598_v33 }
 0x2be   : > { %v3375_v46 = vmax.f32 %v3373_v56, %v3374_v42  ;;  %v2379_v47 = vadd.f32 %v9838_v14, %v8301_v45  ;;  %v2370_v48 = vpop.f32.mrb[119].mxu1  ;;  %8427 = vmatmul.mubr.msk.bf16.gmra.mrb[240].mxu0 %vm2629_vm4, %v2599_v29  ;;  %v2532_v53 = vmax.f32 %v2376_v36, 0.0  ;;  %v3380_v5 = vsel %vm2629_vm4, %v2884_v49, -inf  ;;  %v3779_v56 = vld [vmem:[%s9633_s30 + $0x360] sm:$0xff]  ;;  %v3780_v36 = vld [vmem:[%s9633_s30 + $0x368] sm:$0xff] }
 0x2bf   : > { %v3376_v51 = vsel %vm2629_vm4, %v2876_v44, -inf  ;;  %v2371_v52 = vadd.f32 %v9838_v14, %v2370_v48  ;;  %v2530_v60 = vmax.f32 %v2368_v43, 0.0  ;;  %v3852_v49 = vpack.c.bf16 %v3778_v32, %v3777_v31 }
 0x2c0   : > { %v3377_v54 = vmax.f32 %v3375_v46, %v3376_v51  ;;  %v2533_v55 = vmax.f32 %v2379_v47, 0.0  ;;  %8541 = vmatmul.mubr.msk.bf16.gmra.mrb[224].mxu1 %vm724_vm2, %v3848_v39  ;;  %v3853_v51 = vpack.c.bf16 %v3780_v36, %v3779_v56 }
 0x2c1   : > { %v2531_v61 = vmax.f32 %v2371_v52, 0.0  ;;  %v8324_v62 = vpop.f32.mrb[136].mxu0  ;;  %8544 = vmatprep.mubr.msk.bf16.mxu1 %vm724_vm2, %v3849_v40 }
 0x2c2   : > { %v3379_v1 = vmax.f32 %v3377_v54, %v3378_v59  ;;  %v2601_v2 = vpack.c.bf16 %v2533_v55, %v2532_v53  ;;  %v2888_v3 = vpop.f32.mrb[137].mxu0  ;;  %v2897_v17 = vadd.f32 %v8324_v62, %v9941_v50 }
 0x2c3   : > { %v2600_v6 = vpack.c.bf16 %v2531_v61, %v2530_v60  ;;  %v2889_v7 = vadd.f32 %v9941_v50, %v2888_v3  ;;  %v8304_v8 = vpop.f32.mrb[120].mxu1  ;;  %v8325_v9 = vpop.f32.mrb[138].mxu0 }
 0x2c4   : > { %v3381_v10 = vmax.f32 %v3379_v1, %v3380_v5  ;;  %v2392_v11 = vadd.f32 %v9838_v14, %v8304_v8  ;;  %v2383_v12 = vpop.f32.mrb[121].mxu1  ;;  %v2891_v13 = vpop.f32.mrb[139].mxu0  ;;  %v2900_v18 = vadd.f32 %v8325_v9, %v9941_v50  ;;  %v3386_v33 = vsel %vm2629_vm4, %v2897_v17, -inf  ;;  %v3781_v8 = vld [vmem:[%s9633_s30 + $0x370] sm:$0xff]  ;;  %v3782_v9 = vld [vmem:[%s9633_s30 + $0x378] sm:$0xff] }
 0x2c5   : > { %v3382_v19 = vsel %vm2629_vm4, %v2889_v7, -inf  ;;  %v2384_v20 = vadd.f32 %v9838_v14, %v2383_v12  ;;  %v2892_v21 = vadd.f32 %v9941_v50, %v2891_v13  ;;  %v8305_v23 = vpop.f32.mrb[122].mxu1  ;;  %8430 = vmatprep.mubr.msk.bf16.mxu0 %vm2629_vm4, %v2600_v6  ;;  %v3783_v13 = vld [vmem:[%s9633_s30 + $0x380] sm:$0xff] }
 0x2c6   : > { %v3383_v22 = vmax.f32 %v3381_v10, %v3382_v19  ;;  %v2395_v24 = vadd.f32 %v9838_v14, %v8305_v23  ;;  %v2386_v25 = vpop.f32.mrb[123].mxu1  ;;  %8431 = vmatmul.mubr.msk.bf16.gmra.mrb[244].mxu0 %vm2629_vm4, %v2601_v2  ;;  %v2536_v28 = vmax.f32 %v2392_v11, 0.0  ;;  %v3388_v40 = vsel %vm2629_vm4, %v2900_v18, -inf  ;;  %v10034_v23 = vld [vmem:[%s11179_s3] ss:$0 sm:$0xff] }
 0x2c7   : > { %v3384_v26 = vsel %vm2629_vm4, %v2892_v21, -inf  ;;  %v2387_v27 = vadd.f32 %v9838_v14, %v2386_v25  ;;  %v2534_v4 = vmax.f32 %v2384_v20, 0.0  ;;  %v3854_v18 = vpack.c.bf16 %v3782_v9, %v3781_v8 }
 0x2c8   : > { %v3385_v29 = vmax.f32 %v3383_v22, %v3384_v26  ;;  %v2537_v30 = vmax.f32 %v2395_v24, 0.0  ;;  %8545 = vmatmul.mubr.msk.bf16.gmra.mrb[228].mxu1 %vm724_vm2, %v3850_v15 }
 0x2c9   : > { %v2535_v34 = vmax.f32 %v2387_v27, 0.0  ;;  %v8328_v35 = vpop.f32.mrb[140].mxu0  ;;  %8548 = vmatprep.mubr.msk.bf16.mxu1 %vm724_vm2, %v3851_v16 }
 0x2ca   : > { %v3387_v37 = vmax.f32 %v3385_v29, %v3386_v33  ;;  %v2603_v38 = vpack.c.bf16 %v2537_v30, %v2536_v28  ;;  %v2904_v39 = vpop.f32.mrb[141].mxu0  ;;  %v2913_v52 = vadd.f32 %v8328_v35, %v9941_v50 }
 0x2cb   : > { %v2602_v41 = vpack.c.bf16 %v2535_v34, %v2534_v4  ;;  %v2905_v42 = vadd.f32 %v9941_v50, %v2904_v39  ;;  %v8308_v43 = vpop.f32.mrb[124].mxu1  ;;  %v8329_v44 = vpop.f32.mrb[142].mxu0  ;;  %v3786_v39 = vld [vmem:[%s9633_s30 + $0x398] sm:$0xff] }
 0x2cc   : > { %v3389_v45 = vmax.f32 %v3387_v37, %v3388_v40  ;;  %v2408_v46 = vadd.f32 %v9838_v14, %v8308_v43  ;;  %v2399_v47 = vpop.f32.mrb[125].mxu1  ;;  %v2907_v48 = vpop.f32.mrb[143].mxu0  ;;  %v2916_v61 = vadd.f32 %v8329_v44, %v9941_v50  ;;  %v3394_v3 = vsel %vm2629_vm4, %v2913_v52, -inf  ;;  %v3787_v44 = vld [vmem:[%s9633_s30 + $0x3a0] sm:$0xff] }
 0x2cd   : > { %v3390_v53 = vsel %vm2629_vm4, %v2905_v42, -inf  ;;  %v2400_v54 = vadd.f32 %v9838_v14, %v2399_v47  ;;  %v2908_v55 = vadd.f32 %v9941_v50, %v2907_v48  ;;  %v8309_v57 = vpop.f32.mrb[126].mxu1  ;;  %8434 = vmatprep.mubr.msk.bf16.mxu0 %vm2629_vm4, %v2602_v41 }
 0x2ce   : > { %v3391_v58 = vmax.f32 %v3389_v45, %v3390_v53  ;;  %v2411_v59 = vadd.f32 %v9838_v14, %v8309_v57  ;;  %v2402_v60 = vpop.f32.mrb[127].mxu1  ;;  %8435 = vmatmul.mubr.msk.bf16.gmra.mrb[248].mxu0 %vm2629_vm4, %v2603_v38  ;;  %v2540_v0 = vmax.f32 %v2408_v46, 0.0  ;;  %v3396_v15 = vsel %vm2629_vm4, %v2916_v61, -inf  ;;  %v3785_v38 = vld [vmem:[%s9633_s30 + $0x390] sm:$0xff]  ;;  %v3788_v45 = vld [vmem:[%s9633_s30 + $0x3a8] sm:$0xff] }
 0x2cf   : > { %v3392_v62 = vsel %vm2629_vm4, %v2908_v55, -inf  ;;  %v2403_v63 = vadd.f32 %v9838_v14, %v2402_v60  ;;  %v2538_v5 = vmax.f32 %v2400_v54, 0.0  ;;  %v3784_v14 = vld [vmem:[%s9633_s30 + $0x388] sm:$0xff]  ;;  %v3856_v60 = vpack.c.bf16 %v3786_v39, %v3785_v38 }
 0x2d0   : > { %v3393_v1 = vmax.f32 %v3391_v58, %v3392_v62  ;;  %v2541_v2 = vmax.f32 %v2411_v59, 0.0  ;;  %8549 = vmatmul.mubr.msk.bf16.gmra.mrb[232].mxu1 %vm724_vm2, %v3852_v49  ;;  %v3855_v30 = vpack.c.bf16 %v3784_v14, %v3783_v13  ;;  %v3857_v61 = vpack.c.bf16 %v3788_v45, %v3787_v44  ;;  %v3789_v13 = vld [vmem:[%s9633_s30 + $0x3b0] sm:$0xff]  ;;  %v3790_v14 = vld [vmem:[%s9633_s30 + $0x3b8] sm:$0xff] }
 0x2d1   : > { %v2539_v6 = vmax.f32 %v2403_v63, 0.0  ;;  %v8332_v7 = vpop.f32.mrb[144].mxu0  ;;  %8552 = vmatprep.mubr.msk.bf16.mxu1 %vm724_vm2, %v3853_v51 }
 0x2d2   : > { %v3395_v10 = vmax.f32 %v3393_v1, %v3394_v3  ;;  %v2605_v11 = vpack.c.bf16 %v2541_v2, %v2540_v0  ;;  %v2920_v12 = vpop.f32.mrb[145].mxu0  ;;  %v2929_v26 = vadd.f32 %v8332_v7, %v9941_v50 }
 0x2d3   : > { %v2604_v16 = vpack.c.bf16 %v2539_v6, %v2538_v5  ;;  %v2921_v17 = vadd.f32 %v9941_v50, %v2920_v12  ;;  %v8333_v19 = vpop.f32.mrb[146].mxu0  ;;  %v8446_v20 = vpop.f32.mrb[128].mxu1 }
 0x2d4   : > { %v10029_v21 = vmax.f32 %v3395_v10, %v3396_v15  ;;  %v4098_v22 = vadd.f32 %v10034_v23, %v8446_v20  ;;  %v2923_v24 = vpop.f32.mrb[147].mxu0  ;;  %v4089_v25 = vpop.f32.mrb[129].mxu1  ;;  %v2932_v4 = vadd.f32 %v8333_v19, %v9941_v50  ;;  %v3407_v40 = vsel %vm2629_vm4, %v2929_v26, -inf  ;;  %v3791_v20 = vld [vmem:[%s9633_s30 + $0x3c0] sm:$0xff] }
 0x2d5   : > { %v2924_v27 = vadd.f32 %v9941_v50, %v2923_v24  ;;  %v4090_v28 = vadd.f32 %v10034_v23, %v4089_v25  ;;  %8438 = vmatprep.mubr.msk.bf16.mxu0 %vm2629_vm4, %v2604_v16  ;;  %v8447_v29 = vpop.f32.mrb[130].mxu1  ;;  %v3404_v33 = vsel %vm2629_vm4, %v2921_v17, -inf }
 0x2d6   : > { %v4101_v31 = vadd.f32 %v10034_v23, %v8447_v29  ;;  %8439 = vmatmul.mubr.msk.bf16.gmra.mrb[252].mxu0 %vm2629_vm4, %v2605_v11  ;;  %v4092_v32 = vpop.f32.mrb[131].mxu1  ;;  %v4602_v56 = vmax.f32 %v4098_v22, 0.0  ;;  %v3409_v49 = vsel %vm2629_vm4, %v2932_v4, -inf  ;;  %v3792_v22 = vld [vmem:[%s9633_s30 + $0x3c8] sm:$0xff] }
 0x2d7   : > { %v3405_v34 = vsel %vm2629_vm4, %v2924_v27, -inf  ;;  %v4093_v35 = vadd.f32 %v10034_v23, %v4092_v32  ;;  %v4600_v41 = vmax.f32 %v4090_v28, 0.0 }
 0x2d8   : > { %v3406_v36 = vmax.f32 %v3404_v33, %v3405_v34  ;;  %v4603_v37 = vmax.f32 %v4101_v31, 0.0  ;;  %8553 = vmatmul.mubr.msk.bf16.gmra.mrb[236].mxu1 %vm724_vm2, %v3854_v18  ;;  %v3858_v34 = vpack.c.bf16 %v3790_v14, %v3789_v13 }
 0x2d9   : > { %v4601_v42 = vmax.f32 %v4093_v35, 0.0  ;;  %v8336_v43 = vpop.f32.mrb[148].mxu0  ;;  %8556 = vmatprep.mubr.msk.bf16.mxu1 %vm724_vm2, %v3855_v30  ;;  %v3859_v35 = vpack.c.bf16 %v3792_v22, %v3791_v20 }
 0x2da   : > { %v3408_v46 = vmax.f32 %v3406_v36, %v3407_v40  ;;  %v4729_v47 = vpack.c.bf16 %v4603_v37, %v4602_v56  ;;  %v2936_v48 = vpop.f32.mrb[149].mxu0  ;;  %v2945_v55 = vadd.f32 %v8336_v43, %v9941_v50 }
 0x2db   : > { %v4728_v51 = vpack.c.bf16 %v4601_v42, %v4600_v41  ;;  %v2937_v52 = vadd.f32 %v9941_v50, %v2936_v48  ;;  %v8337_v53 = vpop.f32.mrb[150].mxu0  ;;  %v8450_v54 = vpop.f32.mrb[132].mxu1 }
 0x2dc   : > { %v3410_v57 = vmax.f32 %v3408_v46, %v3409_v49  ;;  %v2939_v58 = vpop.f32.mrb[151].mxu0  ;;  %v4105_v59 = vpop.f32.mrb[133].mxu1  ;;  %v4114_v63 = vadd.f32 %v10034_v23, %v8450_v54  ;;  %v2948_v7 = vadd.f32 %v8337_v53, %v9941_v50  ;;  %v3415_v15 = vsel %vm2629_vm4, %v2945_v55, -inf  ;;  %v3793_v49 = vld [vmem:[%s9633_s30 + $0x3d0] sm:$0xff] }
 0x2dd   : > { %v3411_v62 = vsel %vm2629_vm4, %v2937_v52, -inf  ;;  %v2940_v0 = vadd.f32 %v9941_v50, %v2939_v58  ;;  %v4106_v1 = vadd.f32 %v10034_v23, %v4105_v59  ;;  %v8451_v2 = vpop.f32.mrb[134].mxu1  ;;  %8574 = vmatprep.mubr.msk.bf16.mxu0 %vm1676_vm3, %v4728_v51  ;;  %v3794_v51 = vld [vmem:[%s9633_s30 + $0x3d8] sm:$0xff]  ;;  %v3796_v58 = vld [vmem:[%s9633_s30 + $0x3e8] sm:$0xff]  ;;  %v3398_v59 = vrot.slane %v10029_v21, 4 }
 0x2de   : > { %v3412_v3 = vmax.f32 %v3410_v57, %v3411_v62  ;;  %v4117_v5 = vadd.f32 %v10034_v23, %v8451_v2  ;;  %v4108_v6 = vpop.f32.mrb[135].mxu1  ;;  %8575 = vmatmul.mubr.msk.bf16.vlgmr.msra.gmra.mrb[0].mxu0 %vm1676_vm3, %v4729_v47  ;;  %v4606_v10 = vmax.f32 %v4114_v63, 0.0  ;;  %v3417_v26 = vsel %vm2629_vm4, %v2948_v7, -inf  ;;  %v3795_v57 = vld [vmem:[%s9633_s30 + $0x3e0] sm:$0xff] }
 0x2df   : > { %v3413_v8 = vsel %vm2629_vm4, %v2940_v0, -inf  ;;  %v4109_v9 = vadd.f32 %v10034_v23, %v4108_v6  ;;  %v4604_v16 = vmax.f32 %v4106_v1, 0.0 }
 0x2e0   : > { %v3414_v11 = vmax.f32 %v3412_v3, %v3413_v8  ;;  %v4607_v12 = vmax.f32 %v4117_v5, 0.0  ;;  %8557 = vmatmul.mubr.msk.bf16.gmra.mrb[240].mxu1 %vm724_vm2, %v3856_v60 }
 0x2e1   : > { %v4605_v17 = vmax.f32 %v4109_v9, 0.0  ;;  %v8340_v19 = vpop.f32.mrb[152].mxu0  ;;  %8560 = vmatprep.mubr.msk.bf16.mxu1 %vm724_vm2, %v3857_v61  ;;  %v3860_v9 = vpack.c.bf16 %v3794_v51, %v3793_v49 }
 0x2e2   : > { %v3416_v24 = vmax.f32 %v3414_v11, %v3415_v15  ;;  %v4731_v25 = vpack.c.bf16 %v4607_v12, %v4606_v10  ;;  %v2952_v18 = vpop.f32.mrb[153].mxu0  ;;  %v2961_v56 = vadd.f32 %v8340_v19, %v9941_v50  ;;  %v3861_v10 = vpack.c.bf16 %v3796_v58, %v3795_v57 }
 0x2e3   : > { %v4730_v27 = vpack.c.bf16 %v4605_v17, %v4604_v16  ;;  %v2953_v28 = vadd.f32 %v9941_v50, %v2952_v18  ;;  %v8341_v29 = vpop.f32.mrb[154].mxu0  ;;  %v8454_v30 = vpop.f32.mrb[136].mxu1  ;;  %v3399_v16 = vmax.f32 %v10029_v21, %v3398_v59 }
 0x2e4   : > { %v3418_v31 = vmax.f32 %v3416_v24, %v3417_v26  ;;  %v4130_v32 = vadd.f32 %v10034_v23, %v8454_v30  ;;  %v2955_v33 = vpop.f32.mrb[155].mxu0  ;;  %v4121_v4 = vpop.f32.mrb[137].mxu1  ;;  %v2964_v43 = vadd.f32 %v8341_v29, %v9941_v50  ;;  %v3423_v52 = vsel %vm2629_vm4, %v2961_v56, -inf }
 0x2e5   : > { %v3419_v36 = vsel %vm2629_vm4, %v2953_v28, -inf  ;;  %v2956_v37 = vadd.f32 %v9941_v50, %v2955_v33  ;;  %v4122_v38 = vadd.f32 %v10034_v23, %v4121_v4  ;;  %v8455_v39 = vpop.f32.mrb[138].mxu1  ;;  %8578 = vmatprep.mubr.msk.bf16.mxu0 %vm1676_vm3, %v4730_v27  ;;  %v3400_v33 = vrot.slane %v3399_v16, 2 }
 0x2e6   : > { %v3420_v40 = vmax.f32 %v3418_v31, %v3419_v36  ;;  %v4133_v41 = vadd.f32 %v10034_v23, %v8455_v39  ;;  %v4124_v42 = vpop.f32.mrb[139].mxu1  ;;  %8579 = vmatmul.mubr.msk.bf16.gmra.mrb[4].mxu0 %vm1676_vm3, %v4731_v25  ;;  %v4610_v46 = vmax.f32 %v4130_v32, 0.0  ;;  %v3425_v63 = vsel %vm2629_vm4, %v2964_v43, -inf  ;;  %v3797_v31 = vld [vmem:[%s9633_s30 + $0x3f0] sm:$0xff]  ;;  %v3798_v32 = vld [vmem:[%s9633_s30 + $0x3f8] sm:$0xff]  ;;  %s8976_s30 = scalar_lea.vmem %s11113_s2, 128 }
 0x2e7   : > { %v3421_v44 = vsel %vm2629_vm4, %v2956_v37, -inf  ;;  %v4125_v45 = vadd.f32 %v10034_v23, %v4124_v42  ;;  %v4608_v53 = vmax.f32 %v4122_v38, 0.0  ;;  %v3401_v49 = vmax.f32 %v3399_v16, %v3400_v33  ;;  %p8977_p11 = scmp.ne.s32.totalorder %s11113_s2, %s8976_s30  ;;  %p8984_p1 = scmp.lt.s32.totalorder %s8982_s17, %s8976_s30 }
 0x2e8   : > { %v3422_v47 = vmax.f32 %v3420_v40, %v3421_v44  ;;  %v4611_v48 = vmax.f32 %v4133_v41, 0.0  ;;  %8561 = vmatmul.mubr.msk.bf16.gmra.mrb[244].mxu1 %vm724_vm2, %v3858_v34  ;;  %v3862_v44 = vpack.c.bf16 %v3798_v32, %v3797_v31 }
 0x2e9   : > { %v4609_v54 = vmax.f32 %v4125_v45, 0.0  ;;  %v8344_v55 = vpop.f32.mrb[156].mxu0  ;;  %8564 = vmatprep.mubr.msk.bf16.mxu1 %vm724_vm2, %v3859_v35  ;;  %p8978_p12 = pnand %p8977_p11, %p9163_p5  ;;  %p8985_p2 = por %p8984_p1, %p8983_p0 }
 0x2ea   : > { %v3424_v60 = vmax.f32 %v3422_v47, %v3423_v52  ;;  %v4733_v61 = vpack.c.bf16 %v4611_v48, %v4610_v46  ;;  %v2968_v62 = vpop.f32.mrb[157].mxu0  ;;  %v2977_v11 = vadd.f32 %v8344_v55, %v9941_v50 }
 0x2eb   : > { %v4732_v0 = vpack.c.bf16 %v4609_v54, %v4608_v53  ;;  %v2969_v1 = vadd.f32 %v9941_v50, %v2968_v62  ;;  %v8345_v2 = vpop.f32.mrb[158].mxu0  ;;  %v8458_v3 = vpop.f32.mrb[140].mxu1  ;;  %p8979_p13 = pneg %p8978_p12 }
 0x2ec   : > { %v3426_v5 = vmax.f32 %v3424_v60, %v3425_v63  ;;  %v4146_v6 = vadd.f32 %v10034_v23, %v8458_v3  ;;  %v2971_v7 = vpop.f32.mrb[159].mxu0  ;;  %v4137_v8 = vpop.f32.mrb[141].mxu1  ;;  %v2980_v22 = vadd.f32 %v8345_v2, %v9941_v50  ;;  %v3431_v21 = vsel %vm2629_vm4, %v2977_v11, -inf }
 0x2ed   : > { %v3427_v12 = vsel %vm2629_vm4, %v2969_v1, -inf  ;;  %v2972_v13 = vadd.f32 %v9941_v50, %v2971_v7  ;;  %v4138_v14 = vadd.f32 %v10034_v23, %v4137_v8  ;;  %v8459_v15 = vpop.f32.mrb[142].mxu1  ;;  %8582 = vmatprep.mubr.msk.bf16.mxu0 %vm1676_vm3, %v4732_v0  ;;  %v3402_v3 = vrot.slane %v3401_v49, 1  ;;  %p8986_p3 = pnand %p8985_p2, %p8979_p13 }
 0x2ee   : > { %v3428_v17 = vmax.f32 %v3426_v5, %v3427_v12  ;;  %v4149_v19 = vadd.f32 %v10034_v23, %v8459_v15  ;;  %v4140_v20 = vpop.f32.mrb[143].mxu1  ;;  %8583 = vmatmul.mubr.msk.bf16.gmra.mrb[8].mxu0 %vm1676_vm3, %v4733_v61  ;;  %v4614_v18 = vmax.f32 %v4146_v6, 0.0  ;;  %v3433_v56 = vsel %vm2629_vm4, %v2980_v22, -inf }
 0x2ef   : > { %v3429_v24 = vsel %vm2629_vm4, %v2972_v13, -inf  ;;  %v4141_v25 = vadd.f32 %v10034_v23, %v4140_v20  ;;  %v4612_v28 = vmax.f32 %v4138_v14, 0.0 }
 0x2f0   : > { %v3430_v26 = vmax.f32 %v3428_v17, %v3429_v24  ;;  %v4615_v27 = vmax.f32 %v4149_v19, 0.0  ;;  %8565 = vmatmul.mubr.msk.bf16.gmra.mrb[248].mxu1 %vm724_vm2, %v3860_v9 }
 0x2f1   : > { %v4613_v29 = vmax.f32 %v4141_v25, 0.0  ;;  %v8348_v30 = vpop.f32.mrb[160].mxu0  ;;  %8568 = vmatprep.mubr.msk.bf16.mxu1 %vm724_vm2, %v3861_v10 }
 0x2f2   : > { %v3432_v4 = vmax.f32 %v3430_v26, %v3431_v21  ;;  %v4735_v34 = vpack.c.bf16 %v4615_v27, %v4614_v18  ;;  %v2984_v35 = vpop.f32.mrb[161].mxu0  ;;  %v2993_v45 = vadd.f32 %v8348_v30, %v9941_v50  ;;  %v3403_v26 = vmax.f32 %v3401_v49, %v3402_v3 }
 0x2f3   : > { %v4734_v36 = vpack.c.bf16 %v4613_v29, %v4612_v28  ;;  %v2985_v37 = vadd.f32 %v9941_v50, %v2984_v35  ;;  %v8349_v38 = vpop.f32.mrb[162].mxu0  ;;  %v8462_v39 = vpop.f32.mrb[144].mxu1 }
 0x2f4   : > { %v3434_v40 = vmax.f32 %v3432_v4, %v3433_v56  ;;  %v4162_v41 = vadd.f32 %v10034_v23, %v8462_v39  ;;  %v2987_v42 = vpop.f32.mrb[163].mxu0  ;;  %v4153_v43 = vpop.f32.mrb[145].mxu1  ;;  %v2996_v55 = vadd.f32 %v8349_v38, %v9941_v50  ;;  %v3444_v63 = vsel %vm2629_vm4, %v2993_v45, -inf }
 0x2f5   : > { %v2988_v46 = vadd.f32 %v9941_v50, %v2987_v42  ;;  %v4154_v47 = vadd.f32 %v10034_v23, %v4153_v43  ;;  %v8463_v48 = vpop.f32.mrb[146].mxu1  ;;  %8586 = vmatprep.mubr.msk.bf16.mxu0 %vm1676_vm3, %v4734_v36  ;;  %v3441_v54 = vsel %vm2629_vm4, %v2985_v37, -inf  ;;  %v3663_v39 = vmax.f32 %v3403_v26, 0.0 }
 0x2f6   : > { %v3435_v51 = vrot.slane %v3434_v40, 4  ;;  %v4165_v52 = vadd.f32 %v10034_v23, %v8463_v48  ;;  %v4156_v53 = vpop.f32.mrb[147].mxu1  ;;  %8587 = vmatmul.mubr.msk.bf16.gmra.mrb[12].mxu0 %vm1676_vm3, %v4735_v34  ;;  %v4618_v60 = vmax.f32 %v4162_v41, 0.0  ;;  %v3446_v9 = vsel %vm2629_vm4, %v2996_v55, -inf }
 0x2f7   : > { %v3442_v57 = vsel %vm2629_vm4, %v2988_v46, -inf  ;;  %v4157_v58 = vadd.f32 %v10034_v23, %v4156_v53  ;;  %v4616_v0 = vmax.f32 %v4154_v47, 0.0 }
 0x2f8   : > { %v3436_v59 = vmax.f32 %v3434_v40, %v3435_v51  ;;  %v3443_v61 = vmax.f32 %v3441_v54, %v3442_v57  ;;  %v4619_v62 = vmax.f32 %v4165_v52, 0.0  ;;  %8569 = vmatmul.mubr.msk.bf16.gmra.mrb[252].mxu1 %vm724_vm2, %v3862_v44 }
 0x2f9   : > { %v4617_v1 = vmax.f32 %v4157_v58, 0.0  ;;  %v8352_v2 = vpop.f32.mrb[164].mxu0 }
 0x2fa   : > { %v3437_v5 = vrot.slane %v3436_v59, 2  ;;  %v3445_v6 = vmax.f32 %v3443_v61, %v3444_v63  ;;  %v4737_v7 = vpack.c.bf16 %v4619_v62, %v4618_v60  ;;  %v3000_v8 = vpop.f32.mrb[165].mxu0  ;;  %v3009_v15 = vadd.f32 %v8352_v2, %v9941_v50 }
 0x2fb   : > { %v4736_v10 = vpack.c.bf16 %v4617_v1, %v4616_v0  ;;  %v3001_v11 = vadd.f32 %v9941_v50, %v3000_v8  ;;  %v8353_v12 = vpop.f32.mrb[166].mxu0  ;;  %v8466_v13 = vpop.f32.mrb[148].mxu1 }
 0x2fc   : > { %v3438_v14 = vmax.f32 %v3436_v59, %v3437_v5  ;;  %v3447_v16 = vmax.f32 %v3445_v6, %v3446_v9  ;;  %v3003_v17 = vpop.f32.mrb[167].mxu0  ;;  %v4169_v19 = vpop.f32.mrb[149].mxu1  ;;  %v4178_v22 = vadd.f32 %v10034_v23, %v8466_v13  ;;  %v3012_v30 = vadd.f32 %v8353_v12, %v9941_v50 }
 0x2fd   : > { %v3448_v20 = vsel %vm2629_vm4, %v3001_v11, -inf  ;;  %v3004_v24 = vadd.f32 %v9941_v50, %v3003_v17  ;;  %v4170_v25 = vadd.f32 %v10034_v23, %v4169_v19  ;;  %v8467_v18 = vpop.f32.mrb[150].mxu1  ;;  %8590 = vmatprep.mubr.msk.bf16.mxu0 %vm1676_vm3, %v4736_v10  ;;  %v3452_v56 = vsel %vm2629_vm4, %v3009_v15, -inf }
 0x2fe   : > { %v3439_v27 = vrot.slane %v3438_v14, 1  ;;  %v3449_v21 = vmax.f32 %v3447_v16, %v3448_v20  ;;  %v4181_v28 = vadd.f32 %v10034_v23, %v8467_v18  ;;  %v4172_v29 = vpop.f32.mrb[151].mxu1  ;;  %8591 = vmatmul.mubr.msk.bf16.gmra.mrb[16].mxu0 %vm1676_vm3, %v4737_v7  ;;  %v4622_v4 = vmax.f32 %v4178_v22, 0.0 }
 0x2ff   : > { %v3450_v31 = vsel %vm2629_vm4, %v3004_v24, -inf  ;;  %v4173_v32 = vadd.f32 %v10034_v23, %v4172_v29  ;;  %v4620_v36 = vmax.f32 %v4170_v25, 0.0  ;;  %v3454_v44 = vsel %vm2629_vm4, %v3012_v30, -inf }
 0x300   : > { %v3440_v33 = vmax.f32 %v3438_v14, %v3439_v27  ;;  %v3451_v34 = vmax.f32 %v3449_v21, %v3450_v31  ;;  %v4623_v35 = vmax.f32 %v4181_v28, 0.0 }
 0x301   : > { %v4621_v37 = vmax.f32 %v4173_v32, 0.0  ;;  %v8356_v38 = vpop.f32.mrb[168].mxu0 }
 0x302   : > { %v3664_v40 = vmax.f32 %v3440_v33, 0.0  ;;  %v3453_v41 = vmax.f32 %v3451_v34, %v3452_v56  ;;  %v4739_v42 = vpack.c.bf16 %v4623_v35, %v4622_v4  ;;  %v3016_v43 = vpop.f32.mrb[169].mxu0  ;;  %v3025_v51 = vadd.f32 %v8356_v38, %v9941_v50 }
 0x303   : > { %v4738_v45 = vpack.c.bf16 %v4621_v37, %v4620_v36  ;;  %v3017_v46 = vadd.f32 %v9941_v50, %v3016_v43  ;;  %v8357_v47 = vpop.f32.mrb[170].mxu0  ;;  %v8470_v48 = vpop.f32.mrb[152].mxu1 }
 0x304   : > { %v10146_v49 = vsel %vm6778_vm5, %v3664_v40, %v3663_v39  ;;  %v3455_v52 = vmax.f32 %v3453_v41, %v3454_v44  ;;  %v3019_v53 = vpop.f32.mrb[171].mxu0  ;;  %v4185_v54 = vpop.f32.mrb[153].mxu1  ;;  %v4194_v57 = vadd.f32 %v10034_v23, %v8470_v48  ;;  %v3028_v0 = vadd.f32 %v8357_v47, %v9941_v50 }
 0x305   : > { %v3456_v55 = vsel %vm2629_vm4, %v3017_v46, -inf  ;;  %v3020_v58 = vadd.f32 %v9941_v50, %v3019_v53  ;;  %v4186_v59 = vadd.f32 %v10034_v23, %v4185_v54  ;;  %v8471_v60 = vpop.f32.mrb[154].mxu1  ;;  %8594 = vmatprep.mubr.msk.bf16.mxu0 %vm1676_vm3, %v4738_v45  ;;  %v3460_v7 = vsel %vm2629_vm4, %v3025_v51, -inf }
 0x306   : > { %v3457_v61 = vmax.f32 %v3455_v52, %v3456_v55  ;;  %v4197_v62 = vadd.f32 %v10034_v23, %v8471_v60  ;;  %v4188_v63 = vpop.f32.mrb[155].mxu1  ;;  %8595 = vmatmul.mubr.msk.bf16.gmra.mrb[20].mxu0 %vm1676_vm3, %v4739_v42  ;;  %v4626_v3 = vmax.f32 %v4194_v57, 0.0  ;;  %v3462_v14 = vsel %vm2629_vm4, %v3028_v0, -inf }
 0x307   : > { %v3458_v1 = vsel %vm2629_vm4, %v3020_v58, -inf  ;;  %v4189_v2 = vadd.f32 %v10034_v23, %v4188_v63  ;;  %v4624_v8 = vmax.f32 %v4186_v59, 0.0 }
 0x308   : > { %v3459_v5 = vmax.f32 %v3457_v61, %v3458_v1  ;;  %v4627_v6 = vmax.f32 %v4197_v62, 0.0 }
 0x309   : > { %v4625_v9 = vmax.f32 %v4189_v2, 0.0  ;;  %v8360_v10 = vpop.f32.mrb[172].mxu0 }
 0x30a   : > { %v3461_v11 = vmax.f32 %v3459_v5, %v3460_v7  ;;  %v4741_v12 = vpack.c.bf16 %v4627_v6, %v4626_v3  ;;  %v3032_v13 = vpop.f32.mrb[173].mxu0  ;;  %v3041_v18 = vadd.f32 %v8360_v10, %v9941_v50 }
 0x30b   : > { %v4740_v15 = vpack.c.bf16 %v4625_v9, %v4624_v8  ;;  %v3033_v16 = vadd.f32 %v9941_v50, %v3032_v13  ;;  %v8361_v17 = vpop.f32.mrb[174].mxu0  ;;  %v8474_v19 = vpop.f32.mrb[156].mxu1 }
 0x30c   : > { %v3463_v20 = vmax.f32 %v3461_v11, %v3462_v14  ;;  %v4210_v22 = vadd.f32 %v10034_v23, %v8474_v19  ;;  %v3035_v24 = vpop.f32.mrb[175].mxu0  ;;  %v4201_v25 = vpop.f32.mrb[157].mxu1  ;;  %v3044_v32 = vadd.f32 %v8361_v17, %v9941_v50  ;;  %v3468_v36 = vsel %vm2629_vm4, %v3041_v18, -inf }
 0x30d   : > { %v3464_v26 = vsel %vm2629_vm4, %v3033_v16, -inf  ;;  %v3036_v27 = vadd.f32 %v9941_v50, %v3035_v24  ;;  %v4202_v21 = vadd.f32 %v10034_v23, %v4201_v25  ;;  %v8475_v28 = vpop.f32.mrb[158].mxu1  ;;  %8598 = vmatprep.mubr.msk.bf16.mxu0 %vm1676_vm3, %v4740_v15 }
 0x30e   : > { %v3465_v29 = vmax.f32 %v3463_v20, %v3464_v26  ;;  %v4213_v30 = vadd.f32 %v10034_v23, %v8475_v28  ;;  %v4204_v31 = vpop.f32.mrb[159].mxu1  ;;  %8599 = vmatmul.mubr.msk.bf16.gmra.mrb[24].mxu0 %vm1676_vm3, %v4741_v12  ;;  %v4630_v34 = vmax.f32 %v4210_v22, 0.0  ;;  %v3470_v43 = vsel %vm2629_vm4, %v3044_v32, -inf  ;;  %v10196_v28 = vld [vmem:[%s11160_s7] ss:$0 sm:$0xff] }
 0x30f   : > { %v3466_v33 = vsel %vm2629_vm4, %v3036_v27, -inf  ;;  %v4205_v4 = vadd.f32 %v10034_v23, %v4204_v31  ;;  %v4628_v37 = vmax.f32 %v4202_v21, 0.0 }
 0x310   : > { %v3467_v35 = vmax.f32 %v3465_v29, %v3466_v33  ;;  %v4631_v56 = vmax.f32 %v4213_v30, 0.0 }
 0x311   : > { %v4629_v38 = vmax.f32 %v4205_v4, 0.0  ;;  %v8364_v39 = vpop.f32.mrb[176].mxu0 }
 0x312   : > { %v3469_v40 = vmax.f32 %v3467_v35, %v3468_v36  ;;  %v4743_v41 = vpack.c.bf16 %v4631_v56, %v4630_v34  ;;  %v3048_v42 = vpop.f32.mrb[177].mxu0  ;;  %v3057_v54 = vadd.f32 %v8364_v39, %v9941_v50 }
 0x313   : > { %v4742_v44 = vpack.c.bf16 %v4629_v38, %v4628_v37  ;;  %v3049_v45 = vadd.f32 %v9941_v50, %v3048_v42  ;;  %v8365_v46 = vpop.f32.mrb[178].mxu0  ;;  %v8478_v47 = vpop.f32.mrb[160].mxu1 }
 0x314   : > { %v3471_v48 = vmax.f32 %v3469_v40, %v3470_v43  ;;  %v4226_v51 = vadd.f32 %v10034_v23, %v8478_v47  ;;  %v3051_v52 = vpop.f32.mrb[179].mxu0  ;;  %v4217_v53 = vpop.f32.mrb[161].mxu1  ;;  %v3060_v63 = vadd.f32 %v8365_v46, %v9941_v50  ;;  %v3481_v7 = vsel %vm2629_vm4, %v3057_v54, -inf }
 0x315   : > { %v3052_v55 = vadd.f32 %v9941_v50, %v3051_v52  ;;  %v4218_v57 = vadd.f32 %v10034_v23, %v4217_v53  ;;  %v8479_v58 = vpop.f32.mrb[162].mxu1  ;;  %8602 = vmatprep.mubr.msk.bf16.mxu0 %vm1676_vm3, %v4742_v44  ;;  %v3478_v62 = vsel %vm2629_vm4, %v3049_v45, -inf }
 0x316   : > { %v3472_v59 = vrot.slane %v3471_v48, 4  ;;  %v4229_v60 = vadd.f32 %v10034_v23, %v8479_v58  ;;  %v4220_v61 = vpop.f32.mrb[163].mxu1  ;;  %8603 = vmatmul.mubr.msk.bf16.gmra.mrb[28].mxu0 %vm1676_vm3, %v4743_v41  ;;  %v4634_v3 = vmax.f32 %v4226_v51, 0.0  ;;  %v3483_v15 = vsel %vm2629_vm4, %v3060_v63, -inf }
 0x317   : > { %v3479_v0 = vsel %vm2629_vm4, %v3052_v55, -inf  ;;  %v4221_v1 = vadd.f32 %v10034_v23, %v4220_v61  ;;  %v4632_v8 = vmax.f32 %v4218_v57, 0.0 }
 0x318   : > { %v3473_v2 = vmax.f32 %v3471_v48, %v3472_v59  ;;  %v3480_v5 = vmax.f32 %v3478_v62, %v3479_v0  ;;  %v4635_v6 = vmax.f32 %v4229_v60, 0.0 }
 0x319   : > { %v4633_v9 = vmax.f32 %v4221_v1, 0.0  ;;  %v8368_v10 = vpop.f32.mrb[180].mxu0 }
 0x31a   : > { %v3474_v11 = vrot.slane %v3473_v2, 2  ;;  %v3482_v12 = vmax.f32 %v3480_v5, %v3481_v7  ;;  %v4745_v13 = vpack.c.bf16 %v4635_v6, %v4634_v3  ;;  %v3064_v14 = vpop.f32.mrb[181].mxu0  ;;  %v3073_v24 = vadd.f32 %v8368_v10, %v9941_v50 }
 0x31b   : > { %v4744_v16 = vpack.c.bf16 %v4633_v9, %v4632_v8  ;;  %v3065_v17 = vadd.f32 %v9941_v50, %v3064_v14  ;;  %v8369_v19 = vpop.f32.mrb[182].mxu0  ;;  %v8482_v20 = vpop.f32.mrb[164].mxu1 }
 0x31c   : > { %v3475_v22 = vmax.f32 %v3473_v2, %v3474_v11  ;;  %v3484_v25 = vmax.f32 %v3482_v12, %v3483_v15  ;;  %v3067_v18 = vpop.f32.mrb[183].mxu0  ;;  %v4233_v26 = vpop.f32.mrb[165].mxu1  ;;  %v4242_v21 = vadd.f32 %v10034_v23, %v8482_v20  ;;  %v3076_v34 = vadd.f32 %v10196_v28, %v8369_v19 }
 0x31d   : > { %v3485_v27 = vsel %vm2629_vm4, %v3065_v17, -inf  ;;  %v3068_v29 = vadd.f32 %v10196_v28, %v3067_v18  ;;  %v4234_v30 = vadd.f32 %v10034_v23, %v4233_v26  ;;  %v8483_v31 = vpop.f32.mrb[166].mxu1  ;;  %8606 = vmatprep.mubr.msk.bf16.mxu0 %vm1676_vm3, %v4744_v16  ;;  %v3489_v40 = vsel %vm2629_vm4, %v3073_v24, -inf }
 0x31e   : > { %v3476_v50 = vrot.slane %v3475_v22, 1  ;;  %v3486_v32 = vmax.f32 %v3484_v25, %v3485_v27  ;;  %v4245_v33 = vadd.f32 %v10034_v23, %v8483_v31  ;;  %v4236_v4 = vpop.f32.mrb[167].mxu1  ;;  %8607 = vmatmul.mubr.msk.bf16.gmra.mrb[32].mxu0 %vm1676_vm3, %v4745_v13  ;;  %v4638_v37 = vmax.f32 %v4242_v21, 0.0 }
 0x31f   : > { %v3487_v35 = vsel %vm2629_vm4, %v3068_v29, -inf  ;;  %v4237_v56 = vadd.f32 %v10034_v23, %v4236_v4  ;;  %v4636_v41 = vmax.f32 %v4234_v30, 0.0  ;;  %v3491_v48 = vsel %vm2629_vm4, %v3076_v34, -inf }
 0x320   : > { %v3477_v36 = vmax.f32 %v3475_v22, %v3476_v50  ;;  %v3488_v38 = vmax.f32 %v3486_v32, %v3487_v35  ;;  %v4639_v39 = vmax.f32 %v4245_v33, 0.0 }
 0x321   : > { %v4637_v42 = vmax.f32 %v4237_v56, 0.0  ;;  %v8372_v43 = vpop.f32.mrb[184].mxu0 }
 0x322   : > { %v3665_v44 = vmax.f32 %v3477_v36, 0.0  ;;  %v3490_v45 = vmax.f32 %v3488_v38, %v3489_v40  ;;  %v4747_v46 = vpack.c.bf16 %v4639_v39, %v4638_v37  ;;  %v3080_v47 = vpop.f32.mrb[185].mxu0  ;;  %v3089_v57 = vadd.f32 %v10196_v28, %v8372_v43 }
 0x323   : > { %v4746_v51 = vpack.c.bf16 %v4637_v42, %v4636_v41  ;;  %v3081_v52 = vadd.f32 %v10196_v28, %v3080_v47  ;;  %v8373_v53 = vpop.f32.mrb[186].mxu0  ;;  %v8486_v54 = vpop.f32.mrb[168].mxu1 }
 0x324   : > { %v10211_v55 = vsel %vm6780_vm6, %v3665_v44, %v10146_v49  ;;  %v3492_v58 = vmax.f32 %v3490_v45, %v3491_v48  ;;  %v3083_v59 = vpop.f32.mrb[187].mxu0  ;;  %v4249_v60 = vpop.f32.mrb[169].mxu1  ;;  %v4258_v62 = vadd.f32 %v10034_v23, %v8486_v54  ;;  %v3092_v5 = vadd.f32 %v10196_v28, %v8373_v53 }
 0x325   : > { %v3493_v61 = vsel %vm2629_vm4, %v3081_v52, -inf  ;;  %v3084_v63 = vadd.f32 %v10196_v28, %v3083_v59  ;;  %v4250_v0 = vadd.f32 %v10034_v23, %v4249_v60  ;;  %v8487_v1 = vpop.f32.mrb[170].mxu1  ;;  %8610 = vmatprep.mubr.msk.bf16.mxu0 %vm1676_vm3, %v4746_v51  ;;  %v3497_v11 = vsel %vm2629_vm4, %v3089_v57, -inf }
 0x326   : > { %v3494_v2 = vmax.f32 %v3492_v58, %v3493_v61  ;;  %v4261_v49 = vadd.f32 %v10034_v23, %v8487_v1  ;;  %v4252_v3 = vpop.f32.mrb[171].mxu1  ;;  %8611 = vmatmul.mubr.msk.bf16.gmra.mrb[36].mxu0 %vm1676_vm3, %v4747_v46  ;;  %v4642_v8 = vmax.f32 %v4258_v62, 0.0  ;;  %v3499_v19 = vsel %vm2629_vm4, %v3092_v5, -inf }
 0x327   : > { %v3495_v6 = vsel %vm2629_vm4, %v3084_v63, -inf  ;;  %v4253_v7 = vadd.f32 %v10034_v23, %v4252_v3  ;;  %v4640_v12 = vmax.f32 %v4250_v0, 0.0 }
 0x328   : > { %v3496_v9 = vmax.f32 %v3494_v2, %v3495_v6  ;;  %v4643_v10 = vmax.f32 %v4261_v49, 0.0 }
 0x329   : > { %v4641_v13 = vmax.f32 %v4253_v7, 0.0  ;;  %v8376_v14 = vpop.f32.mrb[188].mxu0 }
 0x32a   : > { %v3498_v15 = vmax.f32 %v3496_v9, %v3497_v11  ;;  %v4749_v16 = vpack.c.bf16 %v4643_v10, %v4642_v8  ;;  %v3096_v17 = vpop.f32.mrb[189].mxu0  ;;  %v3105_v29 = vadd.f32 %v10196_v28, %v8376_v14 }
 0x32b   : > { %v4748_v20 = vpack.c.bf16 %v4641_v13, %v4640_v12  ;;  %v3097_v22 = vadd.f32 %v10196_v28, %v3096_v17  ;;  %v8377_v24 = vpop.f32.mrb[190].mxu0  ;;  %v8490_v25 = vpop.f32.mrb[172].mxu1 }
 0x32c   : > { %v3500_v18 = vmax.f32 %v3498_v15, %v3499_v19  ;;  %v4274_v26 = vadd.f32 %v10034_v23, %v8490_v25  ;;  %v3099_v27 = vpop.f32.mrb[191].mxu0  ;;  %v4265_v21 = vpop.f32.mrb[173].mxu1  ;;  %v3108_v35 = vadd.f32 %v10196_v28, %v8377_v24  ;;  %v3505_v40 = vsel %vm2629_vm4, %v3105_v29, -inf }
 0x32d   : > { %v3501_v30 = vsel %vm2629_vm4, %v3097_v22, -inf  ;;  %v3100_v31 = vadd.f32 %v10196_v28, %v3099_v27  ;;  %v4266_v50 = vadd.f32 %v10034_v23, %v4265_v21  ;;  %v8491_v32 = vpop.f32.mrb[174].mxu1  ;;  %8614 = vmatprep.mubr.msk.bf16.mxu0 %vm1676_vm3, %v4748_v20 }
 0x32e   : > { %v3502_v33 = vmax.f32 %v3500_v18, %v3501_v30  ;;  %v4277_v4 = vadd.f32 %v10034_v23, %v8491_v32  ;;  %v4268_v34 = vpop.f32.mrb[175].mxu1  ;;  %8615 = vmatmul.mubr.msk.bf16.gmra.mrb[40].mxu0 %vm1676_vm3, %v4749_v16  ;;  %v4646_v37 = vmax.f32 %v4274_v26, 0.0  ;;  %v3507_v47 = vsel %vm2629_vm4, %v3108_v35, -inf }
 0x32f   : > { %v3503_v56 = vsel %vm2629_vm4, %v3100_v31, -inf  ;;  %v4269_v36 = vadd.f32 %v10034_v23, %v4268_v34  ;;  %v4644_v41 = vmax.f32 %v4266_v50, 0.0 }
 0x330   : > { %v3504_v38 = vmax.f32 %v3502_v33, %v3503_v56  ;;  %v4647_v39 = vmax.f32 %v4277_v4, 0.0 }
 0x331   : > { %v4645_v42 = vmax.f32 %v4269_v36, 0.0  ;;  %v8380_v43 = vpop.f32.mrb[192].mxu0 }
 0x332   : > { %v3506_v44 = vmax.f32 %v3504_v38, %v3505_v40  ;;  %v4751_v45 = vpack.c.bf16 %v4647_v39, %v4646_v37  ;;  %v3112_v46 = vpop.f32.mrb[193].mxu0  ;;  %v3121_v60 = vadd.f32 %v10196_v28, %v8380_v43 }
 0x333   : > { %v4750_v48 = vpack.c.bf16 %v4645_v42, %v4644_v41  ;;  %v3113_v51 = vadd.f32 %v10196_v28, %v3112_v46  ;;  %v8381_v52 = vpop.f32.mrb[194].mxu0  ;;  %v8494_v53 = vpop.f32.mrb[176].mxu1 }
 0x334   : > { %v3508_v54 = vmax.f32 %v3506_v44, %v3507_v47  ;;  %v4290_v57 = vadd.f32 %v10034_v23, %v8494_v53  ;;  %v3115_v58 = vpop.f32.mrb[195].mxu0  ;;  %v4281_v59 = vpop.f32.mrb[177].mxu1  ;;  %v3124_v3 = vadd.f32 %v10196_v28, %v8381_v52  ;;  %v3518_v11 = vsel %vm2629_vm4, %v3121_v60, -inf }
 0x335   : > { %v3116_v61 = vadd.f32 %v10196_v28, %v3115_v58  ;;  %v4282_v62 = vadd.f32 %v10034_v23, %v4281_v59  ;;  %v8495_v63 = vpop.f32.mrb[178].mxu1  ;;  %8618 = vmatprep.mubr.msk.bf16.mxu0 %vm1676_vm3, %v4750_v48  ;;  %v3515_v49 = vsel %vm2629_vm4, %v3113_v51, -inf }
 0x336   : > { %v3509_v0 = vrot.slane %v3508_v54, 4  ;;  %v4293_v1 = vadd.f32 %v10034_v23, %v8495_v63  ;;  %v4284_v2 = vpop.f32.mrb[179].mxu1  ;;  %8619 = vmatmul.mubr.msk.bf16.gmra.mrb[44].mxu0 %vm1676_vm3, %v4751_v45  ;;  %v4650_v8 = vmax.f32 %v4290_v57, 0.0  ;;  %v3520_v20 = vsel %vm2629_vm4, %v3124_v3, -inf }
 0x337   : > { %v3516_v5 = vsel %vm2629_vm4, %v3116_v61, -inf  ;;  %v4285_v6 = vadd.f32 %v10034_v23, %v4284_v2  ;;  %v4648_v12 = vmax.f32 %v4282_v62, 0.0  ;;  %v10278_v2 = vld [vmem:[%s11179_s3] ss:$0 sm:$0xff] }
 0x338   : > { %v3510_v7 = vmax.f32 %v3508_v54, %v3509_v0  ;;  %v3517_v9 = vmax.f32 %v3515_v49, %v3516_v5  ;;  %v4651_v10 = vmax.f32 %v4293_v1, 0.0 }
 0x339   : > { %v4649_v13 = vmax.f32 %v4285_v6, 0.0  ;;  %v8384_v14 = vpop.f32.mrb[196].mxu0 }
 0x33a   : > { %v3511_v15 = vrot.slane %v3510_v7, 2  ;;  %v3519_v16 = vmax.f32 %v3517_v9, %v3518_v11  ;;  %v4753_v17 = vpack.c.bf16 %v4651_v10, %v4650_v8  ;;  %v3128_v19 = vpop.f32.mrb[197].mxu0  ;;  %v3137_v27 = vadd.f32 %v10196_v28, %v8384_v14 }
 0x33b   : > { %v4752_v22 = vpack.c.bf16 %v4649_v13, %v4648_v12  ;;  %v3129_v24 = vadd.f32 %v10196_v28, %v3128_v19  ;;  %v8385_v25 = vpop.f32.mrb[198].mxu0  ;;  %v8498_v18 = vpop.f32.mrb[180].mxu1 }
 0x33c   : > { %v3512_v26 = vmax.f32 %v3510_v7, %v3511_v15  ;;  %v3521_v21 = vmax.f32 %v3519_v16, %v3520_v20  ;;  %v3131_v29 = vpop.f32.mrb[199].mxu0  ;;  %v4297_v30 = vpop.f32.mrb[181].mxu1  ;;  %v4306_v50 = vadd.f32 %v10034_v23, %v8498_v18  ;;  %v3140_v37 = vadd.f32 %v10196_v28, %v8385_v25 }
 0x33d   : > { %v3522_v31 = vsel %vm2629_vm4, %v3129_v24, -inf  ;;  %v3132_v32 = vadd.f32 %v10196_v28, %v3131_v29  ;;  %v4298_v33 = vadd.f32 %v10034_v23, %v4297_v30  ;;  %v8499_v4 = vpop.f32.mrb[182].mxu1  ;;  %8622 = vmatprep.mubr.msk.bf16.mxu0 %vm1676_vm3, %v4752_v22  ;;  %v3526_v44 = vsel %vm2629_vm4, %v3137_v27, -inf }
 0x33e   : > { %v3513_v34 = vrot.slane %v3512_v26, 1  ;;  %v3523_v35 = vmax.f32 %v3521_v21, %v3522_v31  ;;  %v4309_v56 = vadd.f32 %v10034_v23, %v8499_v4  ;;  %v4300_v36 = vpop.f32.mrb[183].mxu1  ;;  %8623 = vmatmul.mubr.msk.bf16.gmra.mrb[48].mxu0 %vm1676_vm3, %v4753_v17  ;;  %v4654_v41 = vmax.f32 %v4306_v50, 0.0 }
 0x33f   : > { %v3524_v38 = vsel %vm2629_vm4, %v3132_v32, -inf  ;;  %v4301_v39 = vadd.f32 %v10034_v23, %v4300_v36  ;;  %v4652_v45 = vmax.f32 %v4298_v33, 0.0  ;;  %v3528_v54 = vsel %vm2629_vm4, %v3140_v37, -inf }
 0x340   : > { %v3514_v40 = vmax.f32 %v3512_v26, %v3513_v34  ;;  %v3525_v42 = vmax.f32 %v3523_v35, %v3524_v38  ;;  %v4655_v43 = vmax.f32 %v4309_v56, 0.0 }
 0x341   : > { %v4653_v46 = vmax.f32 %v4301_v39, 0.0  ;;  %v8388_v47 = vpop.f32.mrb[200].mxu0 }
 0x342   : > { %v3666_v48 = vmax.f32 %v3514_v40, 0.0  ;;  %v3527_v51 = vmax.f32 %v3525_v42, %v3526_v44  ;;  %v4755_v52 = vpack.c.bf16 %v4655_v43, %v4654_v41  ;;  %v3144_v53 = vpop.f32.mrb[201].mxu0  ;;  %v3153_v61 = vadd.f32 %v10196_v28, %v8388_v47 }
 0x343   : > { %v4754_v57 = vpack.c.bf16 %v4653_v46, %v4652_v45  ;;  %v3145_v58 = vadd.f32 %v10196_v28, %v3144_v53  ;;  %v8389_v23 = vpop.f32.mrb[202].mxu0  ;;  %v8502_v59 = vpop.f32.mrb[184].mxu1 }
 0x344   : > { %v10271_v60 = vsel %vm6782_vm7, %v3666_v48, %v10211_v55  ;;  %v3529_v62 = vmax.f32 %v3527_v51, %v3528_v54  ;;  %v3147_v63 = vpop.f32.mrb[203].mxu0  ;;  %v4313_v0 = vpop.f32.mrb[185].mxu1  ;;  %v4322_v49 = vadd.f32 %v10278_v2, %v8502_v59  ;;  %v3156_v9 = vadd.f32 %v10196_v28, %v8389_v23 }
 0x345   : > { %v3530_v1 = vsel %vm2629_vm4, %v3145_v58, -inf  ;;  %v3148_v3 = vadd.f32 %v10196_v28, %v3147_v63  ;;  %v4314_v5 = vadd.f32 %v10278_v2, %v4313_v0  ;;  %v8503_v55 = vpop.f32.mrb[186].mxu1  ;;  %8626 = vmatprep.mubr.msk.bf16.mxu0 %vm1676_vm3, %v4754_v57  ;;  %v3534_v15 = vsel %vm2629_vm4, %v3153_v61, -inf }
 0x346   : > { %v3531_v6 = vmax.f32 %v3529_v62, %v3530_v1  ;;  %v4325_v7 = vadd.f32 %v10278_v2, %v8503_v55  ;;  %v4316_v8 = vpop.f32.mrb[187].mxu1  ;;  %8627 = vmatmul.mubr.msk.bf16.gmra.mrb[52].mxu0 %vm1676_vm3, %v4755_v52  ;;  %v4658_v12 = vmax.f32 %v4322_v49, 0.0  ;;  %v3536_v25 = vsel %vm2629_vm4, %v3156_v9, -inf }
 0x347   : > { %v3532_v10 = vsel %vm2629_vm4, %v3148_v3, -inf  ;;  %v4317_v11 = vadd.f32 %v10278_v2, %v4316_v8  ;;  %v4656_v16 = vmax.f32 %v4314_v5, 0.0 }
 0x348   : > { %v3533_v13 = vmax.f32 %v3531_v6, %v3532_v10  ;;  %v4659_v14 = vmax.f32 %v4325_v7, 0.0 }
 0x349   : > { %v4657_v17 = vmax.f32 %v4317_v11, 0.0  ;;  %v8392_v19 = vpop.f32.mrb[204].mxu0 }
 0x34a   : > { %v3535_v20 = vmax.f32 %v3533_v13, %v3534_v15  ;;  %v4757_v22 = vpack.c.bf16 %v4659_v14, %v4658_v12  ;;  %v3160_v24 = vpop.f32.mrb[205].mxu0  ;;  %v3169_v32 = vadd.f32 %v10196_v28, %v8392_v19 }
 0x34b   : > { %v4756_v18 = vpack.c.bf16 %v4657_v17, %v4656_v16  ;;  %v3161_v26 = vadd.f32 %v10196_v28, %v3160_v24  ;;  %v8393_v27 = vpop.f32.mrb[206].mxu0  ;;  %v8506_v21 = vpop.f32.mrb[188].mxu1 }
 0x34c   : > { %v3537_v29 = vmax.f32 %v3535_v20, %v3536_v25  ;;  %v4338_v30 = vadd.f32 %v10278_v2, %v8506_v21  ;;  %v3163_v31 = vpop.f32.mrb[207].mxu0  ;;  %v4329_v50 = vpop.f32.mrb[189].mxu1  ;;  %v3172_v38 = vadd.f32 %v10196_v28, %v8393_v27  ;;  %v3542_v44 = vsel %vm2629_vm4, %v3169_v32, -inf }
 0x34d   : > { %v3538_v33 = vsel %vm2629_vm4, %v3161_v26, -inf  ;;  %v3164_v4 = vadd.f32 %v10196_v28, %v3163_v31  ;;  %v4330_v34 = vadd.f32 %v10278_v2, %v4329_v50  ;;  %v8507_v35 = vpop.f32.mrb[190].mxu1  ;;  %8630 = vmatprep.mubr.msk.bf16.mxu0 %vm1676_vm3, %v4756_v18 }
 0x34e   : > { %v3539_v56 = vmax.f32 %v3537_v29, %v3538_v33  ;;  %v4341_v36 = vadd.f32 %v10278_v2, %v8507_v35  ;;  %v4332_v37 = vpop.f32.mrb[191].mxu1  ;;  %8631 = vmatmul.mubr.msk.bf16.gmra.mrb[56].mxu0 %vm1676_vm3, %v4757_v22  ;;  %v4662_v41 = vmax.f32 %v4338_v30, 0.0  ;;  %v3544_v53 = vsel %vm2629_vm4, %v3172_v38, -inf }
 0x34f   : > { %v3540_v39 = vsel %vm2629_vm4, %v3164_v4, -inf  ;;  %v4333_v40 = vadd.f32 %v10278_v2, %v4332_v37  ;;  %v4660_v45 = vmax.f32 %v4330_v34, 0.0 }
 0x350   : > { %v3541_v42 = vmax.f32 %v3539_v56, %v3540_v39  ;;  %v4663_v43 = vmax.f32 %v4341_v36, 0.0 }
 0x351   : > { %v4661_v46 = vmax.f32 %v4333_v40, 0.0  ;;  %v8396_v47 = vpop.f32.mrb[208].mxu0 }
 0x352   : > { %v3543_v48 = vmax.f32 %v3541_v42, %v3542_v44  ;;  %v4759_v51 = vpack.c.bf16 %v4663_v43, %v4662_v41  ;;  %v3176_v52 = vpop.f32.mrb[209].mxu0  ;;  %v3185_v0 = vadd.f32 %v10196_v28, %v8396_v47 }
 0x353   : > { %v4758_v54 = vpack.c.bf16 %v4661_v46, %v4660_v45  ;;  %v3177_v57 = vadd.f32 %v10196_v28, %v3176_v52  ;;  %v8397_v58 = vpop.f32.mrb[210].mxu0  ;;  %v8510_v23 = vpop.f32.mrb[192].mxu1 }
 0x354   : > { %v3545_v59 = vmax.f32 %v3543_v48, %v3544_v53  ;;  %v4354_v61 = vadd.f32 %v10278_v2, %v8510_v23  ;;  %v3179_v62 = vpop.f32.mrb[211].mxu0  ;;  %v4345_v63 = vpop.f32.mrb[193].mxu1  ;;  %v3188_v8 = vadd.f32 %v10196_v28, %v8397_v58  ;;  %v3555_v15 = vsel %vm2629_vm4, %v3185_v0, -inf }
 0x355   : > { %v3180_v1 = vadd.f32 %v10196_v28, %v3179_v62  ;;  %v4346_v49 = vadd.f32 %v10278_v2, %v4345_v63  ;;  %v8511_v3 = vpop.f32.mrb[194].mxu1  ;;  %8634 = vmatprep.mubr.msk.bf16.mxu0 %vm1676_vm3, %v4758_v54  ;;  %v3552_v7 = vsel %vm2629_vm4, %v3177_v57, -inf }
 0x356   : > { %v3546_v5 = vrot.slane %v3545_v59, 4  ;;  %v4357_v55 = vadd.f32 %v10278_v2, %v8511_v3  ;;  %v4348_v6 = vpop.f32.mrb[195].mxu1  ;;  %8635 = vmatmul.mubr.msk.bf16.gmra.mrb[60].mxu0 %vm1676_vm3, %v4759_v51  ;;  %v4666_v12 = vmax.f32 %v4354_v61, 0.0  ;;  %v3557_v18 = vsel %vm2629_vm4, %v3188_v8, -inf }
 0x357   : > { %v3553_v9 = vsel %vm2629_vm4, %v3180_v1, -inf  ;;  %v4349_v10 = vadd.f32 %v10278_v2, %v4348_v6  ;;  %v4664_v16 = vmax.f32 %v4346_v49, 0.0 }
 0x358   : > { %v3547_v11 = vmax.f32 %v3545_v59, %v3546_v5  ;;  %v3554_v13 = vmax.f32 %v3552_v7, %v3553_v9  ;;  %v4667_v14 = vmax.f32 %v4357_v55, 0.0 }
 0x359   : > { %v4665_v17 = vmax.f32 %v4349_v10, 0.0  ;;  %v8400_v19 = vpop.f32.mrb[212].mxu0 }
 0x35a   : > { %v3548_v20 = vrot.slane %v3547_v11, 2  ;;  %v3556_v22 = vmax.f32 %v3554_v13, %v3555_v15  ;;  %v4761_v24 = vpack.c.bf16 %v4667_v14, %v4666_v12  ;;  %v3192_v25 = vpop.f32.mrb[213].mxu0  ;;  %v3201_v31 = vadd.f32 %v10196_v28, %v8400_v19 }
 0x35b   : > { %v4760_v26 = vpack.c.bf16 %v4665_v17, %v4664_v16  ;;  %v3193_v27 = vadd.f32 %v10196_v28, %v3192_v25  ;;  %v8401_v21 = vpop.f32.mrb[214].mxu0  ;;  %v8514_v29 = vpop.f32.mrb[196].mxu1 }
 0x35c   : > { %v3549_v30 = vmax.f32 %v3547_v11, %v3548_v20  ;;  %v3558_v50 = vmax.f32 %v3556_v22, %v3557_v18  ;;  %v3195_v32 = vpop.f32.mrb[215].mxu0  ;;  %v4361_v33 = vpop.f32.mrb[197].mxu1  ;;  %v4370_v34 = vadd.f32 %v10278_v2, %v8514_v29  ;;  %v3204_v41 = vadd.f32 %v10196_v28, %v8401_v21 }
 0x35d   : > { %v3559_v4 = vsel %vm2629_vm4, %v3193_v27, -inf  ;;  %v3196_v35 = vadd.f32 %v10196_v28, %v3195_v32  ;;  %v4362_v56 = vadd.f32 %v10278_v2, %v4361_v33  ;;  %v8515_v36 = vpop.f32.mrb[198].mxu1  ;;  %8638 = vmatprep.mubr.msk.bf16.mxu0 %vm1676_vm3, %v4760_v26  ;;  %v3563_v48 = vsel %vm2629_vm4, %v3201_v31, -inf }
 0x35e   : > { %v3550_v37 = vrot.slane %v3549_v30, 1  ;;  %v3560_v38 = vmax.f32 %v3558_v50, %v3559_v4  ;;  %v4373_v39 = vadd.f32 %v10278_v2, %v8515_v36  ;;  %v4364_v40 = vpop.f32.mrb[199].mxu1  ;;  %8639 = vmatmul.mubr.msk.bf16.gmra.mrb[64].mxu0 %vm1676_vm3, %v4761_v24  ;;  %v4670_v45 = vmax.f32 %v4370_v34, 0.0 }
 0x35f   : > { %v3561_v42 = vsel %vm2629_vm4, %v3196_v35, -inf  ;;  %v4365_v43 = vadd.f32 %v10278_v2, %v4364_v40  ;;  %v4668_v51 = vmax.f32 %v4362_v56, 0.0  ;;  %v3565_v59 = vsel %vm2629_vm4, %v3204_v41, -inf }
 0x360   : > { %v3551_v44 = vmax.f32 %v3549_v30, %v3550_v37  ;;  %v3562_v46 = vmax.f32 %v3560_v38, %v3561_v42  ;;  %v4671_v47 = vmax.f32 %v4373_v39, 0.0 }
 0x361   : > { %v4669_v52 = vmax.f32 %v4365_v43, 0.0  ;;  %v8404_v53 = vpop.f32.mrb[216].mxu0 }
 0x362   : > { %v3667_v54 = vmax.f32 %v3551_v44, 0.0  ;;  %v3564_v57 = vmax.f32 %v3562_v46, %v3563_v48  ;;  %v4763_v58 = vpack.c.bf16 %v4671_v47, %v4670_v45  ;;  %v3208_v23 = vpop.f32.mrb[217].mxu0  ;;  %v3217_v49 = vadd.f32 %v10196_v28, %v8404_v53 }
 0x363   : > { %v4762_v61 = vpack.c.bf16 %v4669_v52, %v4668_v51  ;;  %v3209_v62 = vadd.f32 %v10196_v28, %v3208_v23  ;;  %v8405_v63 = vpop.f32.mrb[218].mxu0  ;;  %v8518_v0 = vpop.f32.mrb[200].mxu1 }
 0x364   : > { %v10336_v1 = vsel %vm6784_vm8, %v3667_v54, %v10271_v60  ;;  %v3566_v3 = vmax.f32 %v3564_v57, %v3565_v59  ;;  %v3211_v5 = vpop.f32.mrb[219].mxu0  ;;  %v4377_v55 = vpop.f32.mrb[201].mxu1  ;;  %v4386_v7 = vadd.f32 %v10278_v2, %v8518_v0  ;;  %v3220_v13 = vadd.f32 %v10196_v28, %v8405_v63 }
 0x365   : > { %v3567_v6 = vsel %vm2629_vm4, %v3209_v62, -inf  ;;  %v3212_v8 = vadd.f32 %v10196_v28, %v3211_v5  ;;  %v4378_v9 = vadd.f32 %v10278_v2, %v4377_v55  ;;  %v8519_v10 = vpop.f32.mrb[202].mxu1  ;;  %8642 = vmatprep.mubr.msk.bf16.mxu0 %vm1676_vm3, %v4762_v61  ;;  %v3571_v20 = vsel %vm2629_vm4, %v3217_v49, -inf }
 0x366   : > { %v3568_v11 = vmax.f32 %v3566_v3, %v3567_v6  ;;  %v4389_v60 = vadd.f32 %v10278_v2, %v8519_v10  ;;  %v4380_v12 = vpop.f32.mrb[203].mxu1  ;;  %8643 = vmatmul.mubr.msk.bf16.gmra.mrb[68].mxu0 %vm1676_vm3, %v4763_v58  ;;  %v4674_v16 = vmax.f32 %v4386_v7, 0.0  ;;  %v3573_v21 = vsel %vm2629_vm4, %v3220_v13, -inf }
 0x367   : > { %v3569_v14 = vsel %vm2629_vm4, %v3212_v8, -inf  ;;  %v4381_v15 = vadd.f32 %v10278_v2, %v4380_v12  ;;  %v4672_v22 = vmax.f32 %v4378_v9, 0.0 }
 0x368   : > { %v3570_v17 = vmax.f32 %v3568_v11, %v3569_v14  ;;  %v4675_v19 = vmax.f32 %v4389_v60, 0.0 }
 0x369   : > { %v4673_v24 = vmax.f32 %v4381_v15, 0.0  ;;  %v8408_v25 = vpop.f32.mrb[220].mxu0 }
 0x36a   : > { %v3572_v18 = vmax.f32 %v3570_v17, %v3571_v20  ;;  %v4765_v26 = vpack.c.bf16 %v4675_v19, %v4674_v16  ;;  %v3224_v27 = vpop.f32.mrb[221].mxu0  ;;  %v3233_v35 = vadd.f32 %v10196_v28, %v8408_v25 }
 0x36b   : > { %v4764_v29 = vpack.c.bf16 %v4673_v24, %v4672_v22  ;;  %v3225_v30 = vadd.f32 %v10196_v28, %v3224_v27  ;;  %v8409_v31 = vpop.f32.mrb[222].mxu0  ;;  %v8522_v50 = vpop.f32.mrb[204].mxu1 }
 0x36c   : > { %v3574_v32 = vmax.f32 %v3572_v18, %v3573_v21  ;;  %v4402_v33 = vadd.f32 %v10278_v2, %v8522_v50  ;;  %v3227_v4 = vpop.f32.mrb[223].mxu0  ;;  %v4393_v34 = vpop.f32.mrb[205].mxu1  ;;  %v3236_v42 = vadd.f32 %v10196_v28, %v8409_v31  ;;  %v3579_v48 = vsel %vm2629_vm4, %v3233_v35, -inf }
 0x36d   : > { %v3575_v56 = vsel %vm2629_vm4, %v3225_v30, -inf  ;;  %v3228_v36 = vadd.f32 %v10196_v28, %v3227_v4  ;;  %v4394_v37 = vadd.f32 %v10278_v2, %v4393_v34  ;;  %v8523_v38 = vpop.f32.mrb[206].mxu1  ;;  %8646 = vmatprep.mubr.msk.bf16.mxu0 %vm1676_vm3, %v4764_v29 }
 0x36e   : > { %v3576_v39 = vmax.f32 %v3574_v32, %v3575_v56  ;;  %v4405_v40 = vadd.f32 %v10278_v2, %v8523_v38  ;;  %v4396_v41 = vpop.f32.mrb[207].mxu1  ;;  %8647 = vmatmul.mubr.msk.bf16.gmra.mrb[72].mxu0 %vm1676_vm3, %v4765_v26  ;;  %v4678_v45 = vmax.f32 %v4402_v33, 0.0  ;;  %v3581_v23 = vsel %vm2629_vm4, %v3236_v42, -inf }
 0x36f   : > { %v3577_v43 = vsel %vm2629_vm4, %v3228_v36, -inf  ;;  %v4397_v44 = vadd.f32 %v10278_v2, %v4396_v41  ;;  %v4676_v51 = vmax.f32 %v4394_v37, 0.0 }
 0x370   : > { %v3578_v46 = vmax.f32 %v3576_v39, %v3577_v43  ;;  %v4679_v47 = vmax.f32 %v4405_v40, 0.0 }
 0x371   : > { %v4677_v52 = vmax.f32 %v4397_v44, 0.0  ;;  %v8412_v53 = vpop.f32.mrb[224].mxu0 }
 0x372   : > { %v3580_v54 = vmax.f32 %v3578_v46, %v3579_v48  ;;  %v4767_v57 = vpack.c.bf16 %v4679_v47, %v4678_v45  ;;  %v3240_v58 = vpop.f32.mrb[225].mxu0  ;;  %v3249_v55 = vadd.f32 %v10196_v28, %v8412_v53 }
 0x373   : > { %v4766_v59 = vpack.c.bf16 %v4677_v52, %v4676_v51  ;;  %v3241_v61 = vadd.f32 %v10196_v28, %v3240_v58  ;;  %v8413_v62 = vpop.f32.mrb[226].mxu0  ;;  %v8526_v63 = vpop.f32.mrb[208].mxu1 }
 0x374   : > { %v3582_v0 = vmax.f32 %v3580_v54, %v3581_v23  ;;  %v4418_v49 = vadd.f32 %v10278_v2, %v8526_v63  ;;  %v3243_v3 = vpop.f32.mrb[227].mxu0  ;;  %v4409_v5 = vpop.f32.mrb[209].mxu1  ;;  %v3252_v12 = vadd.f32 %v10196_v28, %v8413_v62  ;;  %v3592_v20 = vsel %vm2629_vm4, %v3249_v55, -inf }
 0x375   : > { %v3244_v6 = vadd.f32 %v10196_v28, %v3243_v3  ;;  %v4410_v7 = vadd.f32 %v10278_v2, %v4409_v5  ;;  %v8527_v8 = vpop.f32.mrb[210].mxu1  ;;  %8650 = vmatprep.mubr.msk.bf16.mxu0 %vm1676_vm3, %v4766_v59  ;;  %v3589_v60 = vsel %vm2629_vm4, %v3241_v61, -inf }
 0x376   : > { %v3583_v9 = vrot.slane %v3582_v0, 4  ;;  %v4421_v10 = vadd.f32 %v10278_v2, %v8527_v8  ;;  %v4412_v11 = vpop.f32.mrb[211].mxu1  ;;  %8651 = vmatmul.mubr.msk.bf16.gmra.mrb[76].mxu0 %vm1676_vm3, %v4767_v57  ;;  %v4682_v16 = vmax.f32 %v4418_v49, 0.0  ;;  %v3594_v29 = vsel %vm2629_vm4, %v3252_v12, -inf }
 0x377   : > { %v3590_v13 = vsel %vm2629_vm4, %v3244_v6, -inf  ;;  %v4413_v14 = vadd.f32 %v10278_v2, %v4412_v11  ;;  %v4680_v22 = vmax.f32 %v4410_v7, 0.0 }
 0x378   : > { %v3584_v15 = vmax.f32 %v3582_v0, %v3583_v9  ;;  %v3591_v17 = vmax.f32 %v3589_v60, %v3590_v13  ;;  %v4683_v19 = vmax.f32 %v4421_v10, 0.0 }
 0x379   : > { %v4681_v24 = vmax.f32 %v4413_v14, 0.0  ;;  %v8416_v25 = vpop.f32.mrb[228].mxu0 }
 0x37a   : > { %v3585_v18 = vrot.slane %v3584_v15, 2  ;;  %v3593_v26 = vmax.f32 %v3591_v17, %v3592_v20  ;;  %v4769_v27 = vpack.c.bf16 %v4683_v19, %v4682_v16  ;;  %v3256_v21 = vpop.f32.mrb[229].mxu0  ;;  %v3265_v4 = vadd.f32 %v10196_v28, %v8416_v25 }
 0x37b   : > { %v4768_v30 = vpack.c.bf16 %v4681_v24, %v4680_v22  ;;  %v3257_v31 = vadd.f32 %v10196_v28, %v3256_v21  ;;  %v8417_v50 = vpop.f32.mrb[230].mxu0  ;;  %v8530_v32 = vpop.f32.mrb[212].mxu1 }
 0x37c   : > { %v3586_v33 = vmax.f32 %v3584_v15, %v3585_v18  ;;  %v3595_v34 = vmax.f32 %v3593_v26, %v3594_v29  ;;  %v3259_v35 = vpop.f32.mrb[231].mxu0  ;;  %v4425_v56 = vpop.f32.mrb[213].mxu1  ;;  %v4434_v37 = vadd.f32 %v10278_v2, %v8530_v32  ;;  %v3268_v45 = vadd.f32 %v10196_v28, %v8417_v50 }
 0x37d   : > { %v3596_v36 = vsel %vm2629_vm4, %v3257_v31, -inf  ;;  %v3260_v38 = vadd.f32 %v10196_v28, %v3259_v35  ;;  %v4426_v39 = vadd.f32 %v10278_v2, %v4425_v56  ;;  %v8531_v40 = vpop.f32.mrb[214].mxu1  ;;  %8654 = vmatprep.mubr.msk.bf16.mxu0 %vm1676_vm3, %v4768_v30  ;;  %v3600_v54 = vsel %vm2629_vm4, %v3265_v4, -inf }
 0x37e   : > { %v3587_v41 = vrot.slane %v3586_v33, 1  ;;  %v3597_v42 = vmax.f32 %v3595_v34, %v3596_v36  ;;  %v4437_v43 = vadd.f32 %v10278_v2, %v8531_v40  ;;  %v4428_v44 = vpop.f32.mrb[215].mxu1  ;;  %8655 = vmatmul.mubr.msk.bf16.gmra.mrb[80].mxu0 %vm1676_vm3, %v4769_v27  ;;  %v4686_v51 = vmax.f32 %v4434_v37, 0.0 }
 0x37f   : > { %v3598_v46 = vsel %vm2629_vm4, %v3260_v38, -inf  ;;  %v4429_v47 = vadd.f32 %v10278_v2, %v4428_v44  ;;  %v4684_v57 = vmax.f32 %v4426_v39, 0.0  ;;  %v3602_v0 = vsel %vm2629_vm4, %v3268_v45, -inf }
 0x380   : > { %v3588_v48 = vmax.f32 %v3586_v33, %v3587_v41  ;;  %v3599_v52 = vmax.f32 %v3597_v42, %v3598_v46  ;;  %v4687_v53 = vmax.f32 %v4437_v43, 0.0 }
 0x381   : > { %v4685_v58 = vmax.f32 %v4429_v47, 0.0  ;;  %v8420_v23 = vpop.f32.mrb[232].mxu0 }
 0x382   : > { %v3668_v59 = vmax.f32 %v3588_v48, 0.0  ;;  %v3601_v61 = vmax.f32 %v3599_v52, %v3600_v54  ;;  %v4771_v62 = vpack.c.bf16 %v4687_v53, %v4686_v51  ;;  %v3272_v63 = vpop.f32.mrb[233].mxu0  ;;  %v3281_v7 = vadd.f32 %v10196_v28, %v8420_v23 }
 0x383   : > { %v4770_v49 = vpack.c.bf16 %v4685_v58, %v4684_v57  ;;  %v3273_v3 = vadd.f32 %v10196_v28, %v3272_v63  ;;  %v8421_v5 = vpop.f32.mrb[234].mxu0  ;;  %v8534_v55 = vpop.f32.mrb[216].mxu1 }
 0x384   : > { %v10396_v6 = vsel %vm6786_vm9, %v3668_v59, %v10336_v1  ;;  %v3603_v8 = vmax.f32 %v3601_v61, %v3602_v0  ;;  %v3275_v9 = vpop.f32.mrb[235].mxu0  ;;  %v4441_v10 = vpop.f32.mrb[217].mxu1  ;;  %v4450_v60 = vadd.f32 %v10278_v2, %v8534_v55  ;;  %v3284_v17 = vadd.f32 %v10196_v28, %v8421_v5 }
 0x385   : > { %v3604_v11 = vsel %vm2629_vm4, %v3273_v3, -inf  ;;  %v3276_v12 = vadd.f32 %v10196_v28, %v3275_v9  ;;  %v4442_v13 = vadd.f32 %v10278_v2, %v4441_v10  ;;  %v8535_v14 = vpop.f32.mrb[218].mxu1  ;;  %8658 = vmatprep.mubr.msk.bf16.mxu0 %vm1676_vm3, %v4770_v49  ;;  %v3608_v18 = vsel %vm2629_vm4, %v3281_v7, -inf }
 0x386   : > { %v3605_v15 = vmax.f32 %v3603_v8, %v3604_v11  ;;  %v4453_v1 = vadd.f32 %v10278_v2, %v8535_v14  ;;  %v4444_v16 = vpop.f32.mrb[219].mxu1  ;;  %8659 = vmatmul.mubr.msk.bf16.gmra.mrb[84].mxu0 %vm1676_vm3, %v4771_v62  ;;  %v4690_v22 = vmax.f32 %v4450_v60, 0.0  ;;  %v3610_v50 = vsel %vm2629_vm4, %v3284_v17, -inf }
 0x387   : > { %v3606_v19 = vsel %vm2629_vm4, %v3276_v12, -inf  ;;  %v4445_v20 = vadd.f32 %v10278_v2, %v4444_v16  ;;  %v4688_v26 = vmax.f32 %v4442_v13, 0.0  ;;  %v10437_v16 = vld [vmem:[%s11160_s7] ss:$0 sm:$0xff] }
 0x388   : > { %v3607_v24 = vmax.f32 %v3605_v15, %v3606_v19  ;;  %v4691_v25 = vmax.f32 %v4453_v1, 0.0 }
 0x389   : > { %v4689_v27 = vmax.f32 %v4445_v20, 0.0  ;;  %v8424_v21 = vpop.f32.mrb[236].mxu0 }
 0x38a   : > { %v3609_v29 = vmax.f32 %v3607_v24, %v3608_v18  ;;  %v4773_v30 = vpack.c.bf16 %v4691_v25, %v4690_v22  ;;  %v3288_v31 = vpop.f32.mrb[237].mxu0  ;;  %v3297_v38 = vadd.f32 %v10196_v28, %v8424_v21 }
 0x38b   : > { %v4772_v32 = vpack.c.bf16 %v4689_v27, %v4688_v26  ;;  %v3289_v33 = vadd.f32 %v10196_v28, %v3288_v31  ;;  %v8425_v4 = vpop.f32.mrb[238].mxu0  ;;  %v8538_v34 = vpop.f32.mrb[220].mxu1 }
 0x38c   : > { %v3611_v35 = vmax.f32 %v3609_v29, %v3610_v50  ;;  %v4466_v56 = vadd.f32 %v10278_v2, %v8538_v34  ;;  %v3291_v36 = vpop.f32.mrb[239].mxu0  ;;  %v4457_v37 = vpop.f32.mrb[221].mxu1  ;;  %v3300_v46 = vadd.f32 %v10196_v28, %v8425_v4  ;;  %v3616_v54 = vsel %vm2629_vm4, %v3297_v38, -inf }
 0x38d   : > { %v3612_v39 = vsel %vm2629_vm4, %v3289_v33, -inf  ;;  %v3292_v40 = vadd.f32 %v10196_v28, %v3291_v36  ;;  %v4458_v41 = vadd.f32 %v10278_v2, %v4457_v37  ;;  %v8539_v42 = vpop.f32.mrb[222].mxu1  ;;  %8662 = vmatprep.mubr.msk.bf16.mxu0 %vm1676_vm3, %v4772_v32 }
 0x38e   : > { %v3613_v43 = vmax.f32 %v3611_v35, %v3612_v39  ;;  %v4469_v44 = vadd.f32 %v10278_v2, %v8539_v42  ;;  %v4460_v45 = vpop.f32.mrb[223].mxu1  ;;  %8663 = vmatmul.mubr.msk.bf16.gmra.mrb[88].mxu0 %vm1676_vm3, %v4773_v30  ;;  %v4694_v51 = vmax.f32 %v4466_v56, 0.0  ;;  %v3618_v63 = vsel %vm2629_vm4, %v3300_v46, -inf }
 0x38f   : > { %v3614_v47 = vsel %vm2629_vm4, %v3292_v40, -inf  ;;  %v4461_v48 = vadd.f32 %v10278_v2, %v4460_v45  ;;  %v4692_v57 = vmax.f32 %v4458_v41, 0.0 }
 0x390   : > { %v3615_v52 = vmax.f32 %v3613_v43, %v3614_v47  ;;  %v4695_v53 = vmax.f32 %v4469_v44, 0.0 }
 0x391   : > { %v4693_v58 = vmax.f32 %v4461_v48, 0.0  ;;  %v8428_v23 = vpop.f32.mrb[240].mxu0 }
 0x392   : > { %v3617_v59 = vmax.f32 %v3615_v52, %v3616_v54  ;;  %v4775_v61 = vpack.c.bf16 %v4695_v53, %v4694_v51  ;;  %v3304_v62 = vpop.f32.mrb[241].mxu0  ;;  %v3313_v10 = vadd.f32 %v10196_v28, %v8428_v23 }
 0x393   : > { %v4774_v0 = vpack.c.bf16 %v4693_v58, %v4692_v57  ;;  %v3305_v49 = vadd.f32 %v10196_v28, %v3304_v62  ;;  %v8429_v3 = vpop.f32.mrb[242].mxu0  ;;  %v8542_v5 = vpop.f32.mrb[224].mxu1 }
 0x394   : > { %v3619_v55 = vmax.f32 %v3617_v59, %v3618_v63  ;;  %v4482_v7 = vadd.f32 %v10278_v2, %v8542_v5  ;;  %v3307_v8 = vpop.f32.mrb[243].mxu0  ;;  %v4473_v9 = vpop.f32.mrb[225].mxu1  ;;  %v3629_v18 = vsel %vm2629_vm4, %v3313_v10, -inf }
 0x395   : > { %v3308_v11 = vadd.f32 %v10196_v28, %v3307_v8  ;;  %v4474_v60 = vadd.f32 %v10278_v2, %v4473_v9  ;;  %v8543_v12 = vpop.f32.mrb[226].mxu1  ;;  %8666 = vmatprep.mubr.msk.bf16.mxu0 %vm1676_vm3, %v4774_v0  ;;  %v3626_v1 = vsel %vm2629_vm4, %v3305_v49, -inf  ;;  %v3316_v28 = vadd.f32 %v10437_v16, %v8429_v3 }
 0x396   : > { %v3620_v13 = vrot.slane %v3619_v55, 4  ;;  %v4485_v14 = vadd.f32 %v10278_v2, %v8543_v12  ;;  %v4476_v15 = vpop.f32.mrb[227].mxu1  ;;  %8667 = vmatmul.mubr.msk.bf16.gmra.mrb[92].mxu0 %vm1676_vm3, %v4775_v61  ;;  %v4698_v22 = vmax.f32 %v4482_v7, 0.0 }
 0x397   : > { %v3627_v17 = vsel %vm2629_vm4, %v3308_v11, -inf  ;;  %v4477_v19 = vadd.f32 %v10278_v2, %v4476_v15  ;;  %v4696_v26 = vmax.f32 %v4474_v60, 0.0  ;;  %v3631_v32 = vsel %vm2629_vm4, %v3316_v28, -inf }
 0x398   : > { %v3621_v20 = vmax.f32 %v3619_v55, %v3620_v13  ;;  %v3628_v24 = vmax.f32 %v3626_v1, %v3627_v17  ;;  %v4699_v25 = vmax.f32 %v4485_v14, 0.0 }
 0x399   : > { %v4697_v27 = vmax.f32 %v4477_v19, 0.0  ;;  %v8432_v21 = vpop.f32.mrb[244].mxu0 }
 0x39a   : > { %v3622_v29 = vrot.slane %v3621_v20, 2  ;;  %v3630_v30 = vmax.f32 %v3628_v24, %v3629_v18  ;;  %v4777_v31 = vpack.c.bf16 %v4699_v25, %v4698_v22  ;;  %v3320_v50 = vpop.f32.mrb[245].mxu0  ;;  %v3329_v36 = vadd.f32 %v10437_v16, %v8432_v21 }
 0x39b   : > { %v4776_v33 = vpack.c.bf16 %v4697_v27, %v4696_v26  ;;  %v3321_v4 = vadd.f32 %v10437_v16, %v3320_v50  ;;  %v8433_v34 = vpop.f32.mrb[246].mxu0  ;;  %v8546_v35 = vpop.f32.mrb[228].mxu1 }
 0x39c   : > { %v3623_v56 = vmax.f32 %v3621_v20, %v3622_v29  ;;  %v3632_v37 = vmax.f32 %v3630_v30, %v3631_v32  ;;  %v3323_v38 = vpop.f32.mrb[247].mxu0  ;;  %v4489_v39 = vpop.f32.mrb[229].mxu1  ;;  %v4498_v41 = vadd.f32 %v10278_v2, %v8546_v35  ;;  %v3332_v51 = vadd.f32 %v10437_v16, %v8433_v34 }
 0x39d   : > { %v3633_v40 = vsel %vm2629_vm4, %v3321_v4, -inf  ;;  %v3324_v42 = vadd.f32 %v10437_v16, %v3323_v38  ;;  %v4490_v43 = vadd.f32 %v10278_v2, %v4489_v39  ;;  %v8547_v44 = vpop.f32.mrb[230].mxu1  ;;  %8670 = vmatprep.mubr.msk.bf16.mxu0 %vm1676_vm3, %v4776_v33  ;;  %v3637_v59 = vsel %vm2629_vm4, %v3329_v36, -inf }
 0x39e   : > { %v3624_v45 = vrot.slane %v3623_v56, 1  ;;  %v3634_v46 = vmax.f32 %v3632_v37, %v3633_v40  ;;  %v4501_v47 = vadd.f32 %v10278_v2, %v8547_v44  ;;  %v4492_v48 = vpop.f32.mrb[231].mxu1  ;;  %8671 = vmatmul.mubr.msk.bf16.gmra.mrb[96].mxu0 %vm1676_vm3, %v4777_v31  ;;  %v4702_v57 = vmax.f32 %v4498_v41, 0.0 }
 0x39f   : > { %v3635_v52 = vsel %vm2629_vm4, %v3324_v42, -inf  ;;  %v4493_v53 = vadd.f32 %v10278_v2, %v4492_v48  ;;  %v4700_v61 = vmax.f32 %v4490_v43, 0.0  ;;  %v3639_v55 = vsel %vm2629_vm4, %v3332_v51, -inf }
 0x3a0   : > { %v3625_v54 = vmax.f32 %v3623_v56, %v3624_v45  ;;  %v3636_v58 = vmax.f32 %v3634_v46, %v3635_v52  ;;  %v4703_v23 = vmax.f32 %v4501_v47, 0.0 }
 0x3a1   : > { %v4701_v62 = vmax.f32 %v4493_v53, 0.0  ;;  %v8436_v63 = vpop.f32.mrb[248].mxu0 }
 0x3a2   : > { %v3669_v0 = vmax.f32 %v3625_v54, 0.0  ;;  %v3638_v49 = vmax.f32 %v3636_v58, %v3637_v59  ;;  %v4779_v3 = vpack.c.bf16 %v4703_v23, %v4702_v57  ;;  %v3336_v5 = vpop.f32.mrb[249].mxu0  ;;  %v3345_v11 = vadd.f32 %v10437_v16, %v8436_v63 }
 0x3a3   : > { %v4778_v7 = vpack.c.bf16 %v4701_v62, %v4700_v61  ;;  %v3337_v8 = vadd.f32 %v10437_v16, %v3336_v5  ;;  %v8437_v9 = vpop.f32.mrb[250].mxu0  ;;  %v8550_v10 = vpop.f32.mrb[232].mxu1 }
 0x3a4   : > { %v3640_v60 = vmax.f32 %v3638_v49, %v3639_v55  ;;  %v4514_v12 = vadd.f32 %v10278_v2, %v8550_v10  ;;  %v3339_v13 = vpop.f32.mrb[251].mxu0  ;;  %v4505_v14 = vpop.f32.mrb[233].mxu1  ;;  %v10467_v19 = vsel %vm6788_vm10, %v3669_v0, %v10396_v6  ;;  %v3348_v25 = vadd.f32 %v10437_v16, %v8437_v9 }
 0x3a5   : > { %v3641_v15 = vsel %vm2629_vm4, %v3337_v8, -inf  ;;  %v3340_v1 = vadd.f32 %v10437_v16, %v3339_v13  ;;  %v4506_v28 = vadd.f32 %v10278_v2, %v4505_v14  ;;  %v8551_v17 = vpop.f32.mrb[234].mxu1  ;;  %8674 = vmatprep.mubr.msk.bf16.mxu0 %vm1676_vm3, %v4778_v7  ;;  %v3645_v30 = vsel %vm2629_vm4, %v3345_v11, -inf }
 0x3a6   : > { %v3642_v20 = vmax.f32 %v3640_v60, %v3641_v15  ;;  %v4517_v22 = vadd.f32 %v10278_v2, %v8551_v17  ;;  %v4508_v24 = vpop.f32.mrb[235].mxu1  ;;  %8675 = vmatmul.mubr.msk.bf16.gmra.mrb[100].mxu0 %vm1676_vm3, %v4779_v3  ;;  %v4706_v27 = vmax.f32 %v4514_v12, 0.0  ;;  %v3647_v34 = vsel %vm2629_vm4, %v3348_v25, -inf  ;;  %v10492_v3 = vld [vmem:[%s11158_s5] ss:$0 sm:$0xff] }
 0x3a7   : > { %v3643_v18 = vsel %vm2629_vm4, %v3340_v1, -inf  ;;  %v4509_v26 = vadd.f32 %v10278_v2, %v4508_v24  ;;  %v4704_v31 = vmax.f32 %v4506_v28, 0.0 }
 0x3a8   : > { %v3644_v21 = vmax.f32 %v3642_v20, %v3643_v18  ;;  %v4707_v29 = vmax.f32 %v4517_v22, 0.0 }
 0x3a9   : > { %v4705_v6 = vmax.f32 %v4509_v26, 0.0  ;;  %v8440_v50 = vpop.f32.mrb[252].mxu0 }
 0x3aa   : > { %v3646_v32 = vmax.f32 %v3644_v21, %v3645_v30  ;;  %v4781_v33 = vpack.c.bf16 %v4707_v29, %v4706_v27  ;;  %v3352_v4 = vpop.f32.mrb[253].mxu0  ;;  %v3361_v42 = vadd.f32 %v10437_v16, %v8440_v50 }
 0x3ab   : > { %v4780_v35 = vpack.c.bf16 %v4705_v6, %v4704_v31  ;;  %v3353_v56 = vadd.f32 %v10437_v16, %v3352_v4  ;;  %v8441_v36 = vpop.f32.mrb[254].mxu0  ;;  %v8554_v37 = vpop.f32.mrb[236].mxu1 }
 0x3ac   : > { %v3648_v38 = vmax.f32 %v3646_v32, %v3647_v34  ;;  %v4530_v39 = vadd.f32 %v10278_v2, %v8554_v37  ;;  %v3355_v40 = vpop.f32.mrb[255].mxu0  ;;  %v4521_v41 = vpop.f32.mrb[237].mxu1  ;;  %v3364_v52 = vadd.f32 %v10437_v16, %v8441_v36  ;;  %v3653_v59 = vsel %vm2629_vm4, %v3361_v42, -inf }
 0x3ad   : > { %v3649_v43 = vsel %vm2629_vm4, %v3353_v56, -inf  ;;  %v3356_v44 = vadd.f32 %v10437_v16, %v3355_v40  ;;  %v4522_v45 = vadd.f32 %v10278_v2, %v4521_v41  ;;  %v8555_v46 = vpop.f32.mrb[238].mxu1  ;;  %8678 = vmatprep.mubr.msk.bf16.mxu0 %vm1676_vm3, %v4780_v35 }
 0x3ae   : > { %v3650_v47 = vmax.f32 %v3648_v38, %v3649_v43  ;;  %v4533_v48 = vadd.f32 %v10278_v2, %v8555_v46  ;;  %v4524_v51 = vpop.f32.mrb[239].mxu1  ;;  %8679 = vmatmul.mubr.msk.bf16.gmra.mrb[104].mxu0 %vm1676_vm3, %v4781_v33  ;;  %v4710_v57 = vmax.f32 %v4530_v39, 0.0  ;;  %v3655_v55 = vsel %vm2629_vm4, %v3364_v52, -inf }
 0x3af   : > { %v3651_v53 = vsel %vm2629_vm4, %v3356_v44, -inf  ;;  %v4525_v54 = vadd.f32 %v10278_v2, %v4524_v51  ;;  %v4708_v61 = vmax.f32 %v4522_v45, 0.0 }
 0x3b0   : > { %v3652_v58 = vmax.f32 %v3650_v47, %v3651_v53  ;;  %v4711_v23 = vmax.f32 %v4533_v48, 0.0  ;;  %v10517_v53 = vld [vmem:[%s11179_s3] ss:$0 sm:$0xff]  ;;  %s11111_s3 = scalar_lea.hbm %s11168_s15, %s7629_s23 }
 0x3b1   : > { %v4709_v62 = vmax.f32 %v4525_v54, 0.0  ;;  %v8576_v63 = vpop.f32.mrb[0].mxu0 }
 0x3b2   : > { %v3654_v0 = vmax.f32 %v3652_v58, %v3653_v59  ;;  %v4783_v49 = vpack.c.bf16 %v4711_v23, %v4710_v57  ;;  %v5027_v16 = vadd.f32 %v10492_v3, %v8576_v63  ;;  %v5018_v5 = vpop.f32.mrb[1].mxu0 }
 0x3b3   : > { %v4782_v7 = vpack.c.bf16 %v4709_v62, %v4708_v61  ;;  %v5019_v8 = vadd.f32 %v10492_v3, %v5018_v5  ;;  %v8558_v9 = vpop.f32.mrb[240].mxu1  ;;  %v8577_v10 = vpop.f32.mrb[2].mxu0 }
 0x3b4   : > { %v3656_v11 = vmax.f32 %v3654_v0, %v3655_v55  ;;  %v4546_v60 = vadd.f32 %v10278_v2, %v8558_v9  ;;  %v5030_v12 = vadd.f32 %v10492_v3, %v8577_v10  ;;  %v4537_v13 = vpop.f32.mrb[241].mxu1  ;;  %v5021_v14 = vpop.f32.mrb[3].mxu0  ;;  %v5531_v20 = vmax.f32 %v5027_v16, 0.0 }
 0x3b5   : > { %v4538_v15 = vadd.f32 %v10278_v2, %v4537_v13  ;;  %v5022_v1 = vadd.f32 %v10492_v3, %v5021_v14  ;;  %v8559_v28 = vpop.f32.mrb[242].mxu1  ;;  %8682 = vmatprep.mubr.msk.bf16.mxu0 %vm1676_vm3, %v4782_v7  ;;  %v5529_v18 = vmax.f32 %v5019_v8, 0.0 }
 0x3b6   : > { %v3657_v17 = vrot.slane %v3656_v11, 4  ;;  %v5532_v22 = vmax.f32 %v5030_v12, 0.0  ;;  %v4549_v24 = vadd.f32 %v10278_v2, %v8559_v28  ;;  %v4540_v25 = vpop.f32.mrb[243].mxu1  ;;  %8683 = vmatmul.mubr.msk.bf16.gmra.mrb[108].mxu0 %vm1676_vm3, %v4783_v49  ;;  %v4714_v29 = vmax.f32 %v4546_v60, 0.0 }
 0x3b7   : > { %v5530_v26 = vmax.f32 %v5022_v1, 0.0  ;;  %v4541_v27 = vadd.f32 %v10278_v2, %v4540_v25  ;;  %v4712_v6 = vmax.f32 %v4538_v15, 0.0 }
 0x3b8   : > { %v3658_v21 = vmax.f32 %v3656_v11, %v3657_v17  ;;  %v5658_v30 = vpack.c.bf16 %v5532_v22, %v5531_v20  ;;  %v4715_v31 = vmax.f32 %v4549_v24, 0.0 }
 0x3b9   : > { %v5657_v50 = vpack.c.bf16 %v5530_v26, %v5529_v18  ;;  %v4713_v32 = vmax.f32 %v4541_v27, 0.0  ;;  %v8580_v33 = vpop.f32.mrb[4].mxu0 }
 0x3ba   : > { %v3659_v4 = vrot.slane %v3658_v21, 2  ;;  %v4785_v34 = vpack.c.bf16 %v4715_v31, %v4714_v29  ;;  %v5043_v35 = vadd.f32 %v10492_v3, %v8580_v33  ;;  %v5034_v56 = vpop.f32.mrb[5].mxu0 }
 0x3bb   : > { %v4784_v36 = vpack.c.bf16 %v4713_v32, %v4712_v6  ;;  %v5035_v37 = vadd.f32 %v10492_v3, %v5034_v56  ;;  %v8562_v38 = vpop.f32.mrb[244].mxu1  ;;  %v8581_v39 = vpop.f32.mrb[6].mxu0  ;;  %8706 = vmatprep.mubr.msk.bf16.mxu1 %vm2629_vm4, %v5657_v50 }
 0x3bc   : > { %v3660_v40 = vmax.f32 %v3658_v21, %v3659_v4  ;;  %v4562_v41 = vadd.f32 %v10278_v2, %v8562_v38  ;;  %v5046_v42 = vadd.f32 %v10492_v3, %v8581_v39  ;;  %v4553_v43 = vpop.f32.mrb[245].mxu1  ;;  %v5037_v44 = vpop.f32.mrb[7].mxu0  ;;  %8707 = vmatmul.mubr.msk.bf16.vlgmr.msra.gmra.mrb[0].mxu1 %vm2629_vm4, %v5658_v30  ;;  %v5535_v51 = vmax.f32 %v5043_v35, 0.0 }
 0x3bd   : > { %v4554_v45 = vadd.f32 %v10278_v2, %v4553_v43  ;;  %v5038_v46 = vadd.f32 %v10492_v3, %v5037_v44  ;;  %v8563_v47 = vpop.f32.mrb[246].mxu1  ;;  %8686 = vmatprep.mubr.msk.bf16.mxu0 %vm1676_vm3, %v4784_v36  ;;  %v5533_v58 = vmax.f32 %v5035_v37, 0.0 }
 0x3be   : > { %v3661_v48 = vrot.slane %v3660_v40, 1  ;;  %v5536_v52 = vmax.f32 %v5046_v42, 0.0  ;;  %v4565_v54 = vadd.f32 %v10517_v53, %v8563_v47  ;;  %v4556_v57 = vpop.f32.mrb[247].mxu1  ;;  %8687 = vmatmul.mubr.msk.bf16.gmra.mrb[112].mxu0 %vm1676_vm3, %v4785_v34  ;;  %v4718_v61 = vmax.f32 %v4562_v41, 0.0 }
 0x3bf   : > { %v5534_v2 = vmax.f32 %v5038_v46, 0.0  ;;  %v4557_v23 = vadd.f32 %v10517_v53, %v4556_v57  ;;  %v4716_v0 = vmax.f32 %v4554_v45, 0.0 }
 0x3c0   : > { %v3662_v59 = vmax.f32 %v3660_v40, %v3661_v48  ;;  %v5660_v62 = vpack.c.bf16 %v5536_v52, %v5535_v51  ;;  %v4719_v63 = vmax.f32 %v4565_v54, 0.0 }
 0x3c1   : > { %v5659_v49 = vpack.c.bf16 %v5534_v2, %v5533_v58  ;;  %v4717_v16 = vmax.f32 %v4557_v23, 0.0  ;;  %v8584_v5 = vpop.f32.mrb[8].mxu0 }
 0x3c2   : > { %v3670_v55 = vmax.f32 %v3662_v59, 0.0  ;;  %v4787_v7 = vpack.c.bf16 %v4719_v63, %v4718_v61  ;;  %v5059_v8 = vadd.f32 %v10492_v3, %v8584_v5  ;;  %v5050_v9 = vpop.f32.mrb[9].mxu0 }
 0x3c3   : > { %v4786_v10 = vpack.c.bf16 %v4717_v16, %v4716_v0  ;;  %v5051_v11 = vadd.f32 %v10492_v3, %v5050_v9  ;;  %v8566_v60 = vpop.f32.mrb[248].mxu1  ;;  %v8585_v12 = vpop.f32.mrb[10].mxu0  ;;  %8710 = vmatprep.mubr.msk.bf16.mxu1 %vm2629_vm4, %v5659_v49 }
 0x3c4   : > { %v4578_v13 = vadd.f32 %v10517_v53, %v8566_v60  ;;  %v5062_v14 = vadd.f32 %v10492_v3, %v8585_v12  ;;  %v4569_v15 = vpop.f32.mrb[249].mxu1  ;;  %v5053_v1 = vpop.f32.mrb[11].mxu0  ;;  %8711 = vmatmul.mubr.msk.bf16.gmra.mrb[4].mxu1 %vm2629_vm4, %v5660_v62  ;;  %v10530_v28 = vsel %vm6790_vm11, %v3670_v55, %v10467_v19  ;;  %v5539_v24 = vmax.f32 %v5059_v8, 0.0 }
 0x3c5   : > { %v4570_v17 = vadd.f32 %v10517_v53, %v4569_v15  ;;  %v5054_v20 = vadd.f32 %v10492_v3, %v5053_v1  ;;  %v8567_v22 = vpop.f32.mrb[250].mxu1  ;;  %8690 = vmatprep.mubr.msk.bf16.mxu0 %vm1676_vm3, %v4786_v10  ;;  %v5537_v27 = vmax.f32 %v5051_v11, 0.0 }
 0x3c6   : > { %v5540_v25 = vmax.f32 %v5062_v14, 0.0  ;;  %v4581_v18 = vadd.f32 %v10517_v53, %v8567_v22  ;;  %v4572_v26 = vpop.f32.mrb[251].mxu1  ;;  %8691 = vmatmul.mubr.msk.bf16.gmra.mrb[116].mxu0 %vm1676_vm3, %v4787_v7  ;;  %v4722_v19 = vmax.f32 %v4578_v13, 0.0 }
 0x3c7   : > { %v5538_v21 = vmax.f32 %v5054_v20, 0.0  ;;  %v4573_v29 = vadd.f32 %v10517_v53, %v4572_v26  ;;  %v4720_v6 = vmax.f32 %v4570_v17, 0.0 }
 0x3c8   : > { %v5662_v30 = vpack.c.bf16 %v5540_v25, %v5539_v24  ;;  %v4723_v31 = vmax.f32 %v4581_v18, 0.0 }
 0x3c9   : > { %v5661_v50 = vpack.c.bf16 %v5538_v21, %v5537_v27  ;;  %v4721_v32 = vmax.f32 %v4573_v29, 0.0  ;;  %v8588_v33 = vpop.f32.mrb[12].mxu0 }
 0x3ca   : > { %v4789_v4 = vpack.c.bf16 %v4723_v31, %v4722_v19  ;;  %v5075_v34 = vadd.f32 %v10492_v3, %v8588_v33  ;;  %v5066_v35 = vpop.f32.mrb[13].mxu0 }
 0x3cb   : > { %v4788_v56 = vpack.c.bf16 %v4721_v32, %v4720_v6  ;;  %v5067_v36 = vadd.f32 %v10492_v3, %v5066_v35  ;;  %v8570_v37 = vpop.f32.mrb[252].mxu1  ;;  %v8589_v38 = vpop.f32.mrb[14].mxu0  ;;  %8714 = vmatprep.mubr.msk.bf16.mxu1 %vm2629_vm4, %v5661_v50 }
 0x3cc   : > { %v4594_v39 = vadd.f32 %v10517_v53, %v8570_v37  ;;  %v5078_v40 = vadd.f32 %v10492_v3, %v8589_v38  ;;  %v4585_v41 = vpop.f32.mrb[253].mxu1  ;;  %v5069_v42 = vpop.f32.mrb[15].mxu0  ;;  %8715 = vmatmul.mubr.msk.bf16.gmra.mrb[8].mxu1 %vm2629_vm4, %v5662_v30  ;;  %v5543_v46 = vmax.f32 %v5075_v34, 0.0 }
 0x3cd   : > { %v4586_v43 = vadd.f32 %v10517_v53, %v4585_v41  ;;  %v5070_v44 = vadd.f32 %v10492_v3, %v5069_v42  ;;  %v8571_v45 = vpop.f32.mrb[254].mxu1  ;;  %8694 = vmatprep.mubr.msk.bf16.mxu0 %vm1676_vm3, %v4788_v56  ;;  %v5541_v52 = vmax.f32 %v5067_v36, 0.0 }
 0x3ce   : > { %v5544_v47 = vmax.f32 %v5078_v40, 0.0  ;;  %v4597_v48 = vadd.f32 %v10517_v53, %v8571_v45  ;;  %v4588_v51 = vpop.f32.mrb[255].mxu1  ;;  %8695 = vmatmul.mubr.msk.bf16.gmra.mrb[120].mxu0 %vm1676_vm3, %v4789_v4  ;;  %v4726_v58 = vmax.f32 %v4594_v39, 0.0 }
 0x3cf   : > { %v5542_v54 = vmax.f32 %v5070_v44, 0.0  ;;  %v4589_v57 = vadd.f32 %v10517_v53, %v4588_v51  ;;  %v4724_v59 = vmax.f32 %v4586_v43, 0.0 }
 0x3d0   : > { %v5664_v2 = vpack.c.bf16 %v5544_v47, %v5543_v46  ;;  %v4727_v23 = vmax.f32 %v4597_v48, 0.0 }
 0x3d1   : > { %v5663_v61 = vpack.c.bf16 %v5542_v54, %v5541_v52  ;;  %v4725_v62 = vmax.f32 %v4589_v57, 0.0  ;;  %v8592_v63 = vpop.f32.mrb[16].mxu0 }
 0x3d2   : > { %v4791_v0 = vpack.c.bf16 %v4727_v23, %v4726_v58  ;;  %v5091_v49 = vadd.f32 %v10492_v3, %v8592_v63  ;;  %v5082_v16 = vpop.f32.mrb[17].mxu0 }
 0x3d3   : > { %v4790_v5 = vpack.c.bf16 %v4725_v62, %v4724_v59  ;;  %v5083_v55 = vadd.f32 %v10492_v3, %v5082_v16  ;;  %v8593_v7 = vpop.f32.mrb[18].mxu0  ;;  %8718 = vmatprep.mubr.msk.bf16.mxu1 %vm2629_vm4, %v5663_v61 }
 0x3d4   : > { %v5094_v8 = vadd.f32 %v10492_v3, %v8593_v7  ;;  %v5085_v53 = vpop.f32.mrb[19].mxu0  ;;  %8719 = vmatmul.mubr.msk.bf16.gmra.mrb[12].mxu1 %vm2629_vm4, %v5664_v2  ;;  %v5547_v10 = vmax.f32 %v5091_v49, 0.0 }
 0x3d5   : > { %v5086_v9 = vadd.f32 %v10492_v3, %v5085_v53  ;;  %8698 = vmatprep.mubr.msk.bf16.mxu0 %vm1676_vm3, %v4790_v5  ;;  %v5545_v60 = vmax.f32 %v5083_v55, 0.0 }
 0x3d6   : > { %v5548_v11 = vmax.f32 %v5094_v8, 0.0  ;;  %8699 = vmatmul.mubr.msk.bf16.gmra.mrb[124].mxu0 %vm1676_vm3, %v4791_v0 }
 0x3d7   : > { %v5546_v12 = vmax.f32 %v5086_v9, 0.0 }
 0x3d8   : > { %v5666_v13 = vpack.c.bf16 %v5548_v11, %v5547_v10 }
 0x3d9   : > { %v5665_v14 = vpack.c.bf16 %v5546_v12, %v5545_v60  ;;  %v8596_v15 = vpop.f32.mrb[20].mxu0 }
 0x3da   : > { %v5107_v1 = vadd.f32 %v10492_v3, %v8596_v15  ;;  %v5098_v17 = vpop.f32.mrb[21].mxu0 }
 0x3db   : > { %v5099_v20 = vadd.f32 %v10492_v3, %v5098_v17  ;;  %v8597_v22 = vpop.f32.mrb[22].mxu0  ;;  %8722 = vmatprep.mubr.msk.bf16.mxu1 %vm2629_vm4, %v5665_v14 }
 0x3dc   : > { %v5110_v24 = vadd.f32 %v10492_v3, %v8597_v22  ;;  %v5101_v25 = vpop.f32.mrb[23].mxu0  ;;  %8723 = vmatmul.mubr.msk.bf16.gmra.mrb[16].mxu1 %vm2629_vm4, %v5666_v13  ;;  %v5551_v26 = vmax.f32 %v5107_v1, 0.0 }
 0x3dd   : > { %v5102_v18 = vadd.f32 %v10492_v3, %v5101_v25  ;;  %v5549_v21 = vmax.f32 %v5099_v20, 0.0 }
 0x3de   : > { %v5552_v27 = vmax.f32 %v5110_v24, 0.0 }
 0x3df   : > { %v5550_v29 = vmax.f32 %v5102_v18, 0.0 }
 0x3e0   : > { %v5668_v19 = vpack.c.bf16 %v5552_v27, %v5551_v26 }
 0x3e1   : > { %v5667_v30 = vpack.c.bf16 %v5550_v29, %v5549_v21  ;;  %v8600_v31 = vpop.f32.mrb[24].mxu0 }
 0x3e2   : > { %v5123_v6 = vadd.f32 %v10492_v3, %v8600_v31  ;;  %v5114_v50 = vpop.f32.mrb[25].mxu0 }
 0x3e3   : > { %v5115_v32 = vadd.f32 %v10492_v3, %v5114_v50  ;;  %v8601_v33 = vpop.f32.mrb[26].mxu0  ;;  %8726 = vmatprep.mubr.msk.bf16.mxu1 %vm2629_vm4, %v5667_v30 }
 0x3e4   : > { %v5126_v4 = vadd.f32 %v10492_v3, %v8601_v33  ;;  %v5117_v34 = vpop.f32.mrb[27].mxu0  ;;  %8727 = vmatmul.mubr.msk.bf16.gmra.mrb[20].mxu1 %vm2629_vm4, %v5668_v19  ;;  %v5555_v56 = vmax.f32 %v5123_v6, 0.0 }
 0x3e5   : > { %v5118_v35 = vadd.f32 %v10492_v3, %v5117_v34  ;;  %v5553_v37 = vmax.f32 %v5115_v32, 0.0 }
 0x3e6   : > { %v5556_v36 = vmax.f32 %v5126_v4, 0.0 }
 0x3e7   : > { %v5554_v38 = vmax.f32 %v5118_v35, 0.0 }
 0x3e8   : > { %v5670_v39 = vpack.c.bf16 %v5556_v36, %v5555_v56 }
 0x3e9   : > { %v5669_v40 = vpack.c.bf16 %v5554_v38, %v5553_v37  ;;  %v8604_v41 = vpop.f32.mrb[28].mxu0 }
 0x3ea   : > { %v5139_v42 = vadd.f32 %v10492_v3, %v8604_v41  ;;  %v5130_v43 = vpop.f32.mrb[29].mxu0 }
 0x3eb   : > { %v5131_v44 = vadd.f32 %v10492_v3, %v5130_v43  ;;  %v8605_v45 = vpop.f32.mrb[30].mxu0  ;;  %8730 = vmatprep.mubr.msk.bf16.mxu1 %vm2629_vm4, %v5669_v40 }
 0x3ec   : > { %v5142_v46 = vadd.f32 %v10492_v3, %v8605_v45  ;;  %v5133_v47 = vpop.f32.mrb[31].mxu0  ;;  %8731 = vmatmul.mubr.msk.bf16.gmra.mrb[24].mxu1 %vm2629_vm4, %v5670_v39  ;;  %v5559_v51 = vmax.f32 %v5139_v42, 0.0 }
 0x3ed   : > { %v5134_v48 = vadd.f32 %v10492_v3, %v5133_v47  ;;  %v5557_v54 = vmax.f32 %v5131_v44, 0.0 }
 0x3ee   : > { %v5560_v52 = vmax.f32 %v5142_v46, 0.0 }
 0x3ef   : > { %v5558_v57 = vmax.f32 %v5134_v48, 0.0 }
 0x3f0   : > { %v5672_v58 = vpack.c.bf16 %v5560_v52, %v5559_v51 }
 0x3f1   : > { %v5671_v2 = vpack.c.bf16 %v5558_v57, %v5557_v54  ;;  %v8608_v23 = vpop.f32.mrb[32].mxu0 }
 0x3f2   : > { %v5155_v59 = vadd.f32 %v10492_v3, %v8608_v23  ;;  %v5146_v61 = vpop.f32.mrb[33].mxu0 }
 0x3f3   : > { %v5147_v62 = vadd.f32 %v10492_v3, %v5146_v61  ;;  %v8609_v63 = vpop.f32.mrb[34].mxu0  ;;  %8734 = vmatprep.mubr.msk.bf16.mxu1 %vm2629_vm4, %v5671_v2 }
 0x3f4   : > { %v5158_v0 = vadd.f32 %v10492_v3, %v8609_v63  ;;  %v5149_v49 = vpop.f32.mrb[35].mxu0  ;;  %8735 = vmatmul.mubr.msk.bf16.gmra.mrb[28].mxu1 %vm2629_vm4, %v5672_v58  ;;  %v5563_v5 = vmax.f32 %v5155_v59, 0.0 }
 0x3f5   : > { %v5150_v16 = vadd.f32 %v10492_v3, %v5149_v49  ;;  %v5561_v7 = vmax.f32 %v5147_v62, 0.0 }
 0x3f6   : > { %v5564_v55 = vmax.f32 %v5158_v0, 0.0 }
 0x3f7   : > { %v5562_v8 = vmax.f32 %v5150_v16, 0.0 }
 0x3f8   : > { %v5674_v53 = vpack.c.bf16 %v5564_v55, %v5563_v5 }
 0x3f9   : > { %v5673_v9 = vpack.c.bf16 %v5562_v8, %v5561_v7  ;;  %v8612_v10 = vpop.f32.mrb[36].mxu0 }
 0x3fa   : > { %v5171_v11 = vadd.f32 %v10492_v3, %v8612_v10  ;;  %v5162_v60 = vpop.f32.mrb[37].mxu0 }
 0x3fb   : > { %v5163_v12 = vadd.f32 %v10492_v3, %v5162_v60  ;;  %v8613_v13 = vpop.f32.mrb[38].mxu0  ;;  %8738 = vmatprep.mubr.msk.bf16.mxu1 %vm2629_vm4, %v5673_v9 }
 0x3fc   : > { %v5174_v14 = vadd.f32 %v10492_v3, %v8613_v13  ;;  %v5165_v15 = vpop.f32.mrb[39].mxu0  ;;  %8739 = vmatmul.mubr.msk.bf16.gmra.mrb[32].mxu1 %vm2629_vm4, %v5674_v53  ;;  %v5567_v17 = vmax.f32 %v5171_v11, 0.0 }
 0x3fd   : > { %v5166_v1 = vadd.f32 %v10492_v3, %v5165_v15  ;;  %v5565_v22 = vmax.f32 %v5163_v12, 0.0 }
 0x3fe   : > { %v5568_v20 = vmax.f32 %v5174_v14, 0.0 }
 0x3ff   : > { %v5566_v24 = vmax.f32 %v5166_v1, 0.0 }
 0x400   : > { %v5676_v25 = vpack.c.bf16 %v5568_v20, %v5567_v17 }
 0x401   : > { %v5675_v18 = vpack.c.bf16 %v5566_v24, %v5565_v22  ;;  %v8616_v26 = vpop.f32.mrb[40].mxu0 }
 0x402   : > { %v5187_v27 = vadd.f32 %v10492_v3, %v8616_v26  ;;  %v5178_v21 = vpop.f32.mrb[41].mxu0 }
 0x403   : > { %v5179_v29 = vadd.f32 %v10492_v3, %v5178_v21  ;;  %v8617_v19 = vpop.f32.mrb[42].mxu0  ;;  %8742 = vmatprep.mubr.msk.bf16.mxu1 %vm2629_vm4, %v5675_v18 }
 0x404   : > { %v5190_v30 = vadd.f32 %v10492_v3, %v8617_v19  ;;  %v5181_v31 = vpop.f32.mrb[43].mxu0  ;;  %8743 = vmatmul.mubr.msk.bf16.gmra.mrb[36].mxu1 %vm2629_vm4, %v5676_v25  ;;  %v5571_v50 = vmax.f32 %v5187_v27, 0.0 }
 0x405   : > { %v5182_v6 = vadd.f32 %v10492_v3, %v5181_v31  ;;  %v5569_v33 = vmax.f32 %v5179_v29, 0.0 }
 0x406   : > { %v5572_v32 = vmax.f32 %v5190_v30, 0.0 }
 0x407   : > { %v5570_v4 = vmax.f32 %v5182_v6, 0.0  ;;  %v6766_v6 = vld [vmem:[%s11162_s9] sm:$0xff] }
 0x408   : > { %v5678_v34 = vpack.c.bf16 %v5572_v32, %v5571_v50  ;;  %v6767_v50 = vld [vmem:[%s11162_s9 + $0x8] sm:$0xff]  ;;  %v6762_v32 = vld [vmem:[%s11161_s8] sm:$0xff] }
 0x409   : > { %v5677_v35 = vpack.c.bf16 %v5570_v4, %v5569_v33  ;;  %v8620_v56 = vpop.f32.mrb[44].mxu0 }
 0x40a   : > { %v5203_v36 = vadd.f32 %v10492_v3, %v8620_v56  ;;  %v5194_v37 = vpop.f32.mrb[45].mxu0  ;;  %v6763_v56 = vld [vmem:[%s11161_s8 + $0x8] sm:$0xff] }
 0x40b   : > { %v5195_v38 = vadd.f32 %v10492_v3, %v5194_v37  ;;  %v8621_v39 = vpop.f32.mrb[46].mxu0  ;;  %8746 = vmatprep.mubr.msk.bf16.mxu1 %vm2629_vm4, %v5677_v35  ;;  %v8887_v35 = vpack.c.bf16 %v6767_v50, %v6766_v6 }
 0x40c   : > { %v5206_v40 = vadd.f32 %v10492_v3, %v8621_v39  ;;  %v5197_v41 = vpop.f32.mrb[47].mxu0  ;;  %8747 = vmatmul.mubr.msk.bf16.gmra.mrb[40].mxu1 %vm2629_vm4, %v5678_v34  ;;  %v5575_v43 = vmax.f32 %v5203_v36, 0.0  ;;  %v9041_v34 = vmov 0.0|0.0  }
 0x40d   : > { %v5198_v42 = vadd.f32 %v10492_v3, %v5197_v41  ;;  %v5573_v45 = vmax.f32 %v5195_v38, 0.0  ;;  %8886 = vmatprep.subr.bf16.mxu0 %v9041_v34  ;;  %8892 = vmatprep.subr.bf16.mxu1 %v9041_v34  ;;  %v8893_v38 = vpack.c.bf16 %v6763_v56, %v6762_v32 }
 0x40e   : > { %v5576_v44 = vmax.f32 %v5206_v40, 0.0  ;;  %8888 = vmatpush3.bf16.msra.mxu0 %v8887_v35 }
 0x40f   : > { %v5574_v46 = vmax.f32 %v5198_v42, 0.0  ;;  %8889 = vmatprep.subr.bf16.mxu0 %v9041_v34  ;;  %8894 = vmatpush3.bf16.msra.mxu1 %v8893_v38 }
 0x410   : > { %v5680_v47 = vpack.c.bf16 %v5576_v44, %v5575_v43  ;;  %8895 = vmatprep.subr.bf16.mxu1 %v9041_v34 }
 0x411   : > { %v5679_v48 = vpack.c.bf16 %v5574_v46, %v5573_v45  ;;  %v8624_v51 = vpop.f32.mrb[48].mxu0 }
 0x412   : > { %v5219_v52 = vadd.f32 %v10492_v3, %v8624_v51  ;;  %v5210_v54 = vpop.f32.mrb[49].mxu0 }
 0x413   : > { %v5211_v57 = vadd.f32 %v10492_v3, %v5210_v54  ;;  %v8625_v58 = vpop.f32.mrb[50].mxu0  ;;  %8750 = vmatprep.mubr.msk.bf16.mxu1 %vm2629_vm4, %v5679_v48 }
 0x414   : > { %v5222_v2 = vadd.f32 %v10492_v3, %v8625_v58  ;;  %v5213_v23 = vpop.f32.mrb[51].mxu0  ;;  %8751 = vmatmul.mubr.msk.bf16.gmra.mrb[44].mxu1 %vm2629_vm4, %v5680_v47  ;;  %v5579_v61 = vmax.f32 %v5219_v52, 0.0 }
 0x415   : > { %v5214_v59 = vadd.f32 %v10492_v3, %v5213_v23  ;;  %v5577_v63 = vmax.f32 %v5211_v57, 0.0 }
 0x416   : > { %v5580_v62 = vmax.f32 %v5222_v2, 0.0 }
 0x417   : > { %v5578_v0 = vmax.f32 %v5214_v59, 0.0 }
 0x418   : > { %v5682_v49 = vpack.c.bf16 %v5580_v62, %v5579_v61 }
 0x419   : > { %v5681_v16 = vpack.c.bf16 %v5578_v0, %v5577_v63  ;;  %v8628_v5 = vpop.f32.mrb[52].mxu0 }
 0x41a   : > { %v5235_v55 = vadd.f32 %v10492_v3, %v8628_v5  ;;  %v5226_v7 = vpop.f32.mrb[53].mxu0  ;;  %v6765_v5 = vld [vmem:[%s11161_s8 + $0x18] sm:$0xff] }
 0x41b   : > { %v5227_v8 = vadd.f32 %v10492_v3, %v5226_v7  ;;  %v8629_v53 = vpop.f32.mrb[54].mxu0  ;;  %8754 = vmatprep.mubr.msk.bf16.mxu1 %vm2629_vm4, %v5681_v16  ;;  %v6764_v16 = vld [vmem:[%s11161_s8 + $0x10] sm:$0xff] }
 0x41c   : > { %v5238_v9 = vadd.f32 %v10492_v3, %v8629_v53  ;;  %v5229_v10 = vpop.f32.mrb[55].mxu0  ;;  %8755 = vmatmul.mubr.msk.bf16.gmra.mrb[48].mxu1 %vm2629_vm4, %v5682_v49  ;;  %v5583_v60 = vmax.f32 %v5235_v55, 0.0  ;;  %v8896_v7 = vpack.c.bf16 %v6765_v5, %v6764_v16 }
 0x41d   : > { %v5230_v11 = vadd.f32 %v10492_v3, %v5229_v10  ;;  %v5581_v13 = vmax.f32 %v5227_v8, 0.0 }
 0x41e   : > { %v5584_v12 = vmax.f32 %v5238_v9, 0.0  ;;  %8897 = vmatpush3.bf16.msra.mxu1 %v8896_v7 }
 0x41f   : > { %v5582_v14 = vmax.f32 %v5230_v11, 0.0  ;;  %8910 = vmatprep.subr.bf16.mxu1 %v9041_v34 }
 0x420   : > { %v5684_v15 = vpack.c.bf16 %v5584_v12, %v5583_v60 }
 0x421   : > { %v5683_v1 = vpack.c.bf16 %v5582_v14, %v5581_v13  ;;  %v8632_v17 = vpop.f32.mrb[56].mxu0  ;;  %v9043_v14 = vmov 0.0  }
 0x422   : > { %v5251_v20 = vadd.f32 %v10492_v3, %v8632_v17  ;;  %v5242_v22 = vpop.f32.mrb[57].mxu0  ;;  %8842 = vmatprep.mubr.msk.f32.mxu0 %vm9042_vm12, %v9043_v14 }
 0x423   : > { %v5243_v24 = vadd.f32 %v10492_v3, %v5242_v22  ;;  %v8633_v25 = vpop.f32.mrb[58].mxu0  ;;  %8758 = vmatprep.mubr.msk.bf16.mxu1 %vm2629_vm4, %v5683_v1 }
 0x424   : > { %v5254_v18 = vadd.f32 %v10492_v3, %v8633_v25  ;;  %v5245_v26 = vpop.f32.mrb[59].mxu0  ;;  %8759 = vmatmul.mubr.msk.bf16.gmra.mrb[52].mxu1 %vm2629_vm4, %v5684_v15  ;;  %v5587_v21 = vmax.f32 %v5251_v20, 0.0 }
 0x425   : > { %v5246_v27 = vadd.f32 %v10492_v3, %v5245_v26  ;;  %v5585_v19 = vmax.f32 %v5243_v24, 0.0 }
 0x426   : > { %v5588_v29 = vmax.f32 %v5254_v18, 0.0 }
 0x427   : > { %v5586_v30 = vmax.f32 %v5246_v27, 0.0 }
 0x428   : > { %v5686_v31 = vpack.c.bf16 %v5588_v29, %v5587_v21 }
 0x429   : > { %v5685_v33 = vpack.c.bf16 %v5586_v30, %v5585_v19  ;;  %v8636_v4 = vpop.f32.mrb[60].mxu0 }
 0x42a   : > { %v5267_v36 = vadd.f32 %v10492_v3, %v8636_v4  ;;  %v5258_v37 = vpop.f32.mrb[61].mxu0 }
 0x42b   : > { %v5259_v39 = vadd.f32 %v10492_v3, %v5258_v37  ;;  %v8637_v40 = vpop.f32.mrb[62].mxu0  ;;  %8762 = vmatprep.mubr.msk.bf16.mxu1 %vm2629_vm4, %v5685_v33 }
 0x42c   : > { %v5270_v41 = vadd.f32 %v10492_v3, %v8637_v40  ;;  %v5261_v42 = vpop.f32.mrb[63].mxu0  ;;  %8763 = vmatmul.mubr.msk.bf16.gmra.mrb[56].mxu1 %vm2629_vm4, %v5686_v31  ;;  %v5591_v44 = vmax.f32 %v5267_v36, 0.0 }
 0x42d   : > { %v5262_v43 = vadd.f32 %v10492_v3, %v5261_v42  ;;  %v5589_v46 = vmax.f32 %v5259_v39, 0.0 }
 0x42e   : > { %v5592_v45 = vmax.f32 %v5270_v41, 0.0 }
 0x42f   : > { %v5590_v47 = vmax.f32 %v5262_v43, 0.0 }
 0x430   : > { %v5688_v48 = vpack.c.bf16 %v5592_v45, %v5591_v44 }
 0x431   : > { %v5687_v51 = vpack.c.bf16 %v5590_v47, %v5589_v46  ;;  %v8640_v52 = vpop.f32.mrb[64].mxu0 }
 0x432   : > { %v5283_v54 = vadd.f32 %v10492_v3, %v8640_v52  ;;  %v5274_v57 = vpop.f32.mrb[65].mxu0 }
 0x433   : > { %v5275_v58 = vadd.f32 %v10492_v3, %v5274_v57  ;;  %v8641_v2 = vpop.f32.mrb[66].mxu0  ;;  %8766 = vmatprep.mubr.msk.bf16.mxu1 %vm2629_vm4, %v5687_v51 }
 0x434   : > { %v5286_v23 = vadd.f32 %v10492_v3, %v8641_v2  ;;  %v5277_v59 = vpop.f32.mrb[67].mxu0  ;;  %8767 = vmatmul.mubr.msk.bf16.gmra.mrb[60].mxu1 %vm2629_vm4, %v5688_v48  ;;  %v5595_v62 = vmax.f32 %v5283_v54, 0.0 }
 0x435   : > { %v5278_v61 = vadd.f32 %v10492_v3, %v5277_v59  ;;  %v5593_v0 = vmax.f32 %v5275_v58, 0.0 }
 0x436   : > { %v5596_v63 = vmax.f32 %v5286_v23, 0.0 }
 0x437   : > { %v5594_v49 = vmax.f32 %v5278_v61, 0.0 }
 0x438   : > { %v5690_v55 = vpack.c.bf16 %v5596_v63, %v5595_v62 }
 0x439   : > { %v5689_v8 = vpack.c.bf16 %v5594_v49, %v5593_v0  ;;  %v8644_v53 = vpop.f32.mrb[68].mxu0 }
 0x43a   : > { %v5299_v9 = vadd.f32 %v10492_v3, %v8644_v53  ;;  %v5290_v10 = vpop.f32.mrb[69].mxu0 }
 0x43b   : > { %v5291_v11 = vadd.f32 %v10492_v3, %v5290_v10  ;;  %v8645_v60 = vpop.f32.mrb[70].mxu0  ;;  %8770 = vmatprep.mubr.msk.bf16.mxu1 %vm2629_vm4, %v5689_v8 }
 0x43c   : > { %v5302_v12 = vadd.f32 %v10492_v3, %v8645_v60  ;;  %v5293_v13 = vpop.f32.mrb[71].mxu0  ;;  %8771 = vmatmul.mubr.msk.bf16.gmra.mrb[64].mxu1 %vm2629_vm4, %v5690_v55  ;;  %v5599_v1 = vmax.f32 %v5299_v9, 0.0 }
 0x43d   : > { %v5294_v15 = vadd.f32 %v10492_v3, %v5293_v13  ;;  %v5597_v20 = vmax.f32 %v5291_v11, 0.0 }
 0x43e   : > { %v5600_v17 = vmax.f32 %v5302_v12, 0.0 }
 0x43f   : > { %v5598_v22 = vmax.f32 %v5294_v15, 0.0 }
 0x440   : > { %v5692_v24 = vpack.c.bf16 %v5600_v17, %v5599_v1 }
 0x441   : > { %v5691_v25 = vpack.c.bf16 %v5598_v22, %v5597_v20  ;;  %v8648_v18 = vpop.f32.mrb[72].mxu0 }
 0x442   : > { %v5315_v26 = vadd.f32 %v10492_v3, %v8648_v18  ;;  %v5306_v27 = vpop.f32.mrb[73].mxu0 }
 0x443   : > { %v5307_v21 = vadd.f32 %v10492_v3, %v5306_v27  ;;  %v8649_v29 = vpop.f32.mrb[74].mxu0  ;;  %8774 = vmatprep.mubr.msk.bf16.mxu1 %vm2629_vm4, %v5691_v25 }
 0x444   : > { %v5318_v19 = vadd.f32 %v10492_v3, %v8649_v29  ;;  %v5309_v30 = vpop.f32.mrb[75].mxu0  ;;  %8775 = vmatmul.mubr.msk.bf16.gmra.mrb[68].mxu1 %vm2629_vm4, %v5692_v24  ;;  %v5603_v6 = vmax.f32 %v5315_v26, 0.0 }
 0x445   : > { %v5310_v31 = vadd.f32 %v10492_v3, %v5309_v30  ;;  %v5601_v32 = vmax.f32 %v5307_v21, 0.0 }
 0x446   : > { %v5604_v50 = vmax.f32 %v5318_v19, 0.0 }
 0x447   : > { %v5602_v33 = vmax.f32 %v5310_v31, 0.0 }
 0x448   : > { %v5694_v4 = vpack.c.bf16 %v5604_v50, %v5603_v6 }
 0x449   : > { %v5693_v35 = vpack.c.bf16 %v5602_v33, %v5601_v32  ;;  %v8652_v56 = vpop.f32.mrb[76].mxu0 }
 0x44a   : > { %v5331_v36 = vadd.f32 %v10492_v3, %v8652_v56  ;;  %v5322_v37 = vpop.f32.mrb[77].mxu0 }
 0x44b   : > { %v5323_v38 = vadd.f32 %v10492_v3, %v5322_v37  ;;  %v8653_v39 = vpop.f32.mrb[78].mxu0  ;;  %8778 = vmatprep.mubr.msk.bf16.mxu1 %vm2629_vm4, %v5693_v35 }
 0x44c   : > { %v5334_v40 = vadd.f32 %v10492_v3, %v8653_v39  ;;  %v5325_v41 = vpop.f32.mrb[79].mxu0  ;;  %8779 = vmatmul.mubr.msk.bf16.gmra.mrb[72].mxu1 %vm2629_vm4, %v5694_v4  ;;  %v5607_v43 = vmax.f32 %v5331_v36, 0.0 }
 0x44d   : > { %v5326_v42 = vadd.f32 %v10492_v3, %v5325_v41  ;;  %v5605_v45 = vmax.f32 %v5323_v38, 0.0 }
 0x44e   : > { %v5608_v44 = vmax.f32 %v5334_v40, 0.0 }
 0x44f   : > { %v5606_v46 = vmax.f32 %v5326_v42, 0.0 }
 0x450   : > { %v5696_v47 = vpack.c.bf16 %v5608_v44, %v5607_v43 }
 0x451   : > { %v5695_v48 = vpack.c.bf16 %v5606_v46, %v5605_v45  ;;  %v8656_v51 = vpop.f32.mrb[80].mxu0 }
 0x452   : > { %v5347_v52 = vadd.f32 %v10492_v3, %v8656_v51  ;;  %v5338_v54 = vpop.f32.mrb[81].mxu0 }
 0x453   : > { %v5339_v57 = vadd.f32 %v10492_v3, %v5338_v54  ;;  %v8657_v58 = vpop.f32.mrb[82].mxu0  ;;  %8782 = vmatprep.mubr.msk.bf16.mxu1 %vm2629_vm4, %v5695_v48 }
 0x454   : > { %v5350_v2 = vadd.f32 %v10492_v3, %v8657_v58  ;;  %v5341_v23 = vpop.f32.mrb[83].mxu0  ;;  %8783 = vmatmul.mubr.msk.bf16.gmra.mrb[76].mxu1 %vm2629_vm4, %v5696_v47  ;;  %v5611_v61 = vmax.f32 %v5347_v52, 0.0 }
 0x455   : > { %v5342_v59 = vadd.f32 %v10492_v3, %v5341_v23  ;;  %v5609_v63 = vmax.f32 %v5339_v57, 0.0 }
 0x456   : > { %v5612_v62 = vmax.f32 %v5350_v2, 0.0 }
 0x457   : > { %v5610_v0 = vmax.f32 %v5342_v59, 0.0 }
 0x458   : > { %v5698_v49 = vpack.c.bf16 %v5612_v62, %v5611_v61 }
 0x459   : > { %v5697_v16 = vpack.c.bf16 %v5610_v0, %v5609_v63  ;;  %v8660_v5 = vpop.f32.mrb[84].mxu0 }
 0x45a   : > { %v5363_v55 = vadd.f32 %v10492_v3, %v8660_v5  ;;  %v5354_v7 = vpop.f32.mrb[85].mxu0 }
 0x45b   : > { %v5355_v8 = vadd.f32 %v10492_v3, %v5354_v7  ;;  %v8661_v53 = vpop.f32.mrb[86].mxu0  ;;  %8786 = vmatprep.mubr.msk.bf16.mxu1 %vm2629_vm4, %v5697_v16 }
 0x45c   : > { %v5366_v9 = vadd.f32 %v10492_v3, %v8661_v53  ;;  %v5357_v10 = vpop.f32.mrb[87].mxu0  ;;  %8787 = vmatmul.mubr.msk.bf16.gmra.mrb[80].mxu1 %vm2629_vm4, %v5698_v49  ;;  %v5615_v60 = vmax.f32 %v5363_v55, 0.0 }
 0x45d   : > { %v5358_v11 = vadd.f32 %v10492_v3, %v5357_v10  ;;  %v5613_v13 = vmax.f32 %v5355_v8, 0.0 }
 0x45e   : > { %v5616_v12 = vmax.f32 %v5366_v9, 0.0 }
 0x45f   : > { %v5614_v15 = vmax.f32 %v5358_v11, 0.0 }
 0x460   : > { %v5700_v1 = vpack.c.bf16 %v5616_v12, %v5615_v60 }
 0x461   : > { %v5699_v17 = vpack.c.bf16 %v5614_v15, %v5613_v13  ;;  %v8664_v20 = vpop.f32.mrb[88].mxu0  ;;  %v10712_v15 = vld [vmem:[%s11158_s5] ss:$0 sm:$0xff] }
 0x462   : > { %v5379_v22 = vadd.f32 %v10492_v3, %v8664_v20  ;;  %v5370_v24 = vpop.f32.mrb[89].mxu0 }
 0x463   : > { %v5371_v25 = vadd.f32 %v10492_v3, %v5370_v24  ;;  %v8665_v18 = vpop.f32.mrb[90].mxu0  ;;  %8790 = vmatprep.mubr.msk.bf16.mxu1 %vm2629_vm4, %v5699_v17 }
 0x464   : > { %v5382_v26 = vadd.f32 %v10492_v3, %v8665_v18  ;;  %v5373_v27 = vpop.f32.mrb[91].mxu0  ;;  %8791 = vmatmul.mubr.msk.bf16.gmra.mrb[84].mxu1 %vm2629_vm4, %v5700_v1  ;;  %v5619_v29 = vmax.f32 %v5379_v22, 0.0 }
 0x465   : > { %v5374_v21 = vadd.f32 %v10492_v3, %v5373_v27  ;;  %v5617_v30 = vmax.f32 %v5371_v25, 0.0 }
 0x466   : > { %v5620_v19 = vmax.f32 %v5382_v26, 0.0 }
 0x467   : > { %v5618_v31 = vmax.f32 %v5374_v21, 0.0 }
 0x468   : > { %v5702_v6 = vpack.c.bf16 %v5620_v19, %v5619_v29 }
 0x469   : > { %v5701_v50 = vpack.c.bf16 %v5618_v31, %v5617_v30  ;;  %v8668_v32 = vpop.f32.mrb[92].mxu0 }
 0x46a   : > { %v5395_v33 = vadd.f32 %v10492_v3, %v8668_v32  ;;  %v5386_v4 = vpop.f32.mrb[93].mxu0 }
 0x46b   : > { %v5387_v35 = vadd.f32 %v10492_v3, %v5386_v4  ;;  %v8669_v56 = vpop.f32.mrb[94].mxu0  ;;  %8794 = vmatprep.mubr.msk.bf16.mxu1 %vm2629_vm4, %v5701_v50 }
 0x46c   : > { %v5398_v36 = vadd.f32 %v10492_v3, %v8669_v56  ;;  %v5389_v37 = vpop.f32.mrb[95].mxu0  ;;  %8795 = vmatmul.mubr.msk.bf16.gmra.mrb[88].mxu1 %vm2629_vm4, %v5702_v6  ;;  %v5623_v39 = vmax.f32 %v5395_v33, 0.0 }
 0x46d   : > { %v5390_v38 = vadd.f32 %v10492_v3, %v5389_v37  ;;  %v5621_v41 = vmax.f32 %v5387_v35, 0.0 }
 0x46e   : > { %v5624_v40 = vmax.f32 %v5398_v36, 0.0 }
 0x46f   : > { %v5622_v42 = vmax.f32 %v5390_v38, 0.0 }
 0x470   : > { %v5704_v43 = vpack.c.bf16 %v5624_v40, %v5623_v39 }
 0x471   : > { %v5703_v44 = vpack.c.bf16 %v5622_v42, %v5621_v41  ;;  %v8672_v45 = vpop.f32.mrb[96].mxu0 }
 0x472   : > { %v5411_v46 = vadd.f32 %v10492_v3, %v8672_v45  ;;  %v5402_v47 = vpop.f32.mrb[97].mxu0 }
 0x473   : > { %v5403_v48 = vadd.f32 %v10492_v3, %v5402_v47  ;;  %v8673_v51 = vpop.f32.mrb[98].mxu0  ;;  %8798 = vmatprep.mubr.msk.bf16.mxu1 %vm2629_vm4, %v5703_v44 }
 0x474   : > { %v5414_v52 = vadd.f32 %v10492_v3, %v8673_v51  ;;  %v5405_v54 = vpop.f32.mrb[99].mxu0  ;;  %8799 = vmatmul.mubr.msk.bf16.gmra.mrb[92].mxu1 %vm2629_vm4, %v5704_v43  ;;  %v5627_v58 = vmax.f32 %v5411_v46, 0.0  ;;  %v10729_v43 = vld [vmem:[%s11160_s7] ss:$0 sm:$0xff] }
 0x475   : > { %v5406_v57 = vadd.f32 %v10492_v3, %v5405_v54  ;;  %v5625_v23 = vmax.f32 %v5403_v48, 0.0 }
 0x476   : > { %v5628_v2 = vmax.f32 %v5414_v52, 0.0 }
 0x477   : > { %v5626_v59 = vmax.f32 %v5406_v57, 0.0 }
 0x478   : > { %v5706_v61 = vpack.c.bf16 %v5628_v2, %v5627_v58 }
 0x479   : > { %v5705_v62 = vpack.c.bf16 %v5626_v59, %v5625_v23  ;;  %v8676_v63 = vpop.f32.mrb[100].mxu0 }
 0x47a   : > { %v5427_v0 = vadd.f32 %v10492_v3, %v8676_v63  ;;  %v5418_v49 = vpop.f32.mrb[101].mxu0 }
 0x47b   : > { %v5419_v16 = vadd.f32 %v10492_v3, %v5418_v49  ;;  %v8677_v5 = vpop.f32.mrb[102].mxu0  ;;  %8802 = vmatprep.mubr.msk.bf16.mxu1 %vm2629_vm4, %v5705_v62 }
 0x47c   : > { %v5430_v55 = vadd.f32 %v10492_v3, %v8677_v5  ;;  %v5421_v7 = vpop.f32.mrb[103].mxu0  ;;  %8803 = vmatmul.mubr.msk.bf16.gmra.mrb[96].mxu1 %vm2629_vm4, %v5706_v61  ;;  %v5631_v53 = vmax.f32 %v5427_v0, 0.0 }
 0x47d   : > { %v5422_v8 = vadd.f32 %v10492_v3, %v5421_v7  ;;  %v5629_v10 = vmax.f32 %v5419_v16, 0.0 }
 0x47e   : > { %v5632_v9 = vmax.f32 %v5430_v55, 0.0 }
 0x47f   : > { %v5630_v11 = vmax.f32 %v5422_v8, 0.0 }
 0x480   : > { %v5708_v60 = vpack.c.bf16 %v5632_v9, %v5631_v53 }
 0x481   : > { %v5707_v12 = vpack.c.bf16 %v5630_v11, %v5629_v10  ;;  %v8680_v13 = vpop.f32.mrb[104].mxu0 }
 0x482   : > { %v5443_v1 = vadd.f32 %v10712_v15, %v8680_v13  ;;  %v5434_v17 = vpop.f32.mrb[105].mxu0 }
 0x483   : > { %v5435_v20 = vadd.f32 %v10712_v15, %v5434_v17  ;;  %v8681_v22 = vpop.f32.mrb[106].mxu0  ;;  %8806 = vmatprep.mubr.msk.bf16.mxu1 %vm2629_vm4, %v5707_v12 }
 0x484   : > { %v5446_v3 = vadd.f32 %v10712_v15, %v8681_v22  ;;  %v5437_v24 = vpop.f32.mrb[107].mxu0  ;;  %8807 = vmatmul.mubr.msk.bf16.gmra.mrb[100].mxu1 %vm2629_vm4, %v5708_v60  ;;  %v5635_v18 = vmax.f32 %v5443_v1, 0.0 }
 0x485   : > { %v5438_v25 = vadd.f32 %v10712_v15, %v5437_v24  ;;  %v5633_v27 = vmax.f32 %v5435_v20, 0.0 }
 0x486   : > { %v5636_v26 = vmax.f32 %v5446_v3, 0.0 }
 0x487   : > { %v5634_v21 = vmax.f32 %v5438_v25, 0.0 }
 0x488   : > { %v5710_v29 = vpack.c.bf16 %v5636_v26, %v5635_v18 }
 0x489   : > { %v5709_v19 = vpack.c.bf16 %v5634_v21, %v5633_v27  ;;  %v8684_v30 = vpop.f32.mrb[108].mxu0 }
 0x48a   : > { %v5459_v31 = vadd.f32 %v10712_v15, %v8684_v30  ;;  %v5450_v6 = vpop.f32.mrb[109].mxu0 }
 0x48b   : > { %v5451_v50 = vadd.f32 %v10712_v15, %v5450_v6  ;;  %v8685_v32 = vpop.f32.mrb[110].mxu0  ;;  %8810 = vmatprep.mubr.msk.bf16.mxu1 %vm2629_vm4, %v5709_v19 }
 0x48c   : > { %v5462_v33 = vadd.f32 %v10712_v15, %v8685_v32  ;;  %v5453_v4 = vpop.f32.mrb[111].mxu0  ;;  %8811 = vmatmul.mubr.msk.bf16.gmra.mrb[104].mxu1 %vm2629_vm4, %v5710_v29  ;;  %v5639_v56 = vmax.f32 %v5459_v31, 0.0 }
 0x48d   : > { %v5454_v35 = vadd.f32 %v10712_v15, %v5453_v4  ;;  %v5637_v37 = vmax.f32 %v5451_v50, 0.0 }
 0x48e   : > { %v5640_v36 = vmax.f32 %v5462_v33, 0.0 }
 0x48f   : > { %v5638_v38 = vmax.f32 %v5454_v35, 0.0  ;;  %v8708_v39 = vpop.f32.mrb[0].mxu1 }
 0x490   : > { %v5712_v40 = vpack.c.bf16 %v5640_v36, %v5639_v56  ;;  %v5947_v41 = vpop.f32.mrb[1].mxu1  ;;  %v5956_v52 = vadd.f32 %v10729_v43, %v8708_v39 }
 0x491   : > { %v5711_v42 = vpack.c.bf16 %v5638_v38, %v5637_v37  ;;  %v5948_v44 = vadd.f32 %v10729_v43, %v5947_v41  ;;  %v8688_v45 = vpop.f32.mrb[112].mxu0  ;;  %v8709_v46 = vpop.f32.mrb[2].mxu1 }
 0x492   : > { %v5475_v47 = vadd.f32 %v10712_v15, %v8688_v45  ;;  %v5466_v48 = vpop.f32.mrb[113].mxu0  ;;  %v5950_v51 = vpop.f32.mrb[3].mxu1  ;;  %v5959_v61 = vadd.f32 %v10729_v43, %v8709_v46  ;;  %v6461_v5 = vsel %vm2629_vm4, %v5956_v52, -inf }
 0x493   : > { %v5467_v54 = vadd.f32 %v10712_v15, %v5466_v48  ;;  %v5951_v57 = vadd.f32 %v10729_v43, %v5950_v51  ;;  %v8689_v58 = vpop.f32.mrb[114].mxu0  ;;  %8814 = vmatprep.mubr.msk.bf16.mxu1 %vm2629_vm4, %v5711_v42  ;;  %v6458_v59 = vsel %vm2629_vm4, %v5948_v44, -inf }
 0x494   : > { %v5478_v2 = vadd.f32 %v10712_v15, %v8689_v58  ;;  %v5469_v23 = vpop.f32.mrb[115].mxu0  ;;  %8815 = vmatmul.mubr.msk.bf16.gmra.mrb[108].mxu1 %vm2629_vm4, %v5712_v40  ;;  %v5643_v0 = vmax.f32 %v5475_v47, 0.0  ;;  %v6463_v11 = vsel %vm2629_vm4, %v5959_v61, -inf }
 0x495   : > { %v6459_v62 = vsel %vm2629_vm4, %v5951_v57, -inf  ;;  %v5470_v63 = vadd.f32 %v10712_v15, %v5469_v23  ;;  %v5641_v55 = vmax.f32 %v5467_v54, 0.0 }
 0x496   : > { %v6460_v49 = vmax.f32 %v6458_v59, %v6459_v62  ;;  %v5644_v16 = vmax.f32 %v5478_v2, 0.0 }
 0x497   : > { %v5642_v7 = vmax.f32 %v5470_v63, 0.0  ;;  %v8712_v8 = vpop.f32.mrb[4].mxu1 }
 0x498   : > { %v6462_v53 = vmax.f32 %v6460_v49, %v6461_v5  ;;  %v5714_v9 = vpack.c.bf16 %v5644_v16, %v5643_v0  ;;  %v5963_v10 = vpop.f32.mrb[5].mxu1  ;;  %v5972_v24 = vadd.f32 %v10729_v43, %v8712_v8 }
 0x499   : > { %v5713_v60 = vpack.c.bf16 %v5642_v7, %v5641_v55  ;;  %v5964_v12 = vadd.f32 %v10729_v43, %v5963_v10  ;;  %v8692_v13 = vpop.f32.mrb[116].mxu0  ;;  %v8713_v1 = vpop.f32.mrb[6].mxu1 }
 0x49a   : > { %v6464_v17 = vmax.f32 %v6462_v53, %v6463_v11  ;;  %v5491_v20 = vadd.f32 %v10712_v15, %v8692_v13  ;;  %v5482_v22 = vpop.f32.mrb[117].mxu0  ;;  %v5966_v3 = vpop.f32.mrb[7].mxu1  ;;  %v5975_v30 = vadd.f32 %v10729_v43, %v8713_v1  ;;  %v6469_v4 = vsel %vm2629_vm4, %v5972_v24, -inf }
 0x49b   : > { %v6465_v25 = vsel %vm2629_vm4, %v5964_v12, -inf  ;;  %v5483_v18 = vadd.f32 %v10712_v15, %v5482_v22  ;;  %v5967_v26 = vadd.f32 %v10729_v43, %v5966_v3  ;;  %v8693_v27 = vpop.f32.mrb[118].mxu0  ;;  %8818 = vmatprep.mubr.msk.bf16.mxu1 %vm2629_vm4, %v5713_v60  ;;  %v6768_v60 = vld [vmem:[%s11162_s9 + $0x10] sm:$0xff]  ;;  %v6769_v12 = vld [vmem:[%s11162_s9 + $0x18] sm:$0xff] }
 0x49c   : > { %v6466_v21 = vmax.f32 %v6464_v17, %v6465_v25  ;;  %v5494_v29 = vadd.f32 %v10712_v15, %v8693_v27  ;;  %v5485_v19 = vpop.f32.mrb[119].mxu0  ;;  %8819 = vmatmul.mubr.msk.bf16.gmra.mrb[112].mxu1 %vm2629_vm4, %v5714_v9  ;;  %v5647_v50 = vmax.f32 %v5491_v20, 0.0  ;;  %v6471_v40 = vsel %vm2629_vm4, %v5975_v30, -inf }
 0x49d   : > { %v6467_v31 = vsel %vm2629_vm4, %v5967_v26, -inf  ;;  %v5486_v6 = vadd.f32 %v10712_v15, %v5485_v19  ;;  %v5645_v35 = vmax.f32 %v5483_v18, 0.0  ;;  %v8890_v3 = vpack.c.bf16 %v6769_v12, %v6768_v60 }
 0x49e   : > { %v6468_v32 = vmax.f32 %v6466_v21, %v6467_v31  ;;  %v5648_v33 = vmax.f32 %v5494_v29, 0.0 }
 0x49f   : > { %v5646_v56 = vmax.f32 %v5486_v6, 0.0  ;;  %v8716_v36 = vpop.f32.mrb[8].mxu1  ;;  %8891 = vmatpush3.bf16.msra.mxu0 %v8890_v3 }
 0x4a0   : > { %v6470_v37 = vmax.f32 %v6468_v32, %v6469_v4  ;;  %v5716_v38 = vpack.c.bf16 %v5648_v33, %v5647_v50  ;;  %v5979_v39 = vpop.f32.mrb[9].mxu1  ;;  %v5988_v52 = vadd.f32 %v10729_v43, %v8716_v36  ;;  %8898 = vmatprep.subr.bf16.mxu0 %v9041_v34 }
 0x4a1   : > { %v5715_v41 = vpack.c.bf16 %v5646_v56, %v5645_v35  ;;  %v5980_v42 = vadd.f32 %v10729_v43, %v5979_v39  ;;  %v8696_v44 = vpop.f32.mrb[120].mxu0  ;;  %v8717_v45 = vpop.f32.mrb[10].mxu1 }
 0x4a2   : > { %v6472_v46 = vmax.f32 %v6470_v37, %v6471_v40  ;;  %v5507_v47 = vadd.f32 %v10712_v15, %v8696_v44  ;;  %v5498_v48 = vpop.f32.mrb[121].mxu0  ;;  %v5982_v51 = vpop.f32.mrb[11].mxu1  ;;  %v5991_v62 = vadd.f32 %v10729_v43, %v8717_v45  ;;  %v6477_v55 = vsel %vm2629_vm4, %v5988_v52, -inf }
 0x4a3   : > { %v6473_v54 = vsel %vm2629_vm4, %v5980_v42, -inf  ;;  %v5499_v57 = vadd.f32 %v10712_v15, %v5498_v48  ;;  %v5983_v58 = vadd.f32 %v10729_v43, %v5982_v51  ;;  %v8697_v2 = vpop.f32.mrb[122].mxu0  ;;  %8822 = vmatprep.mubr.msk.bf16.mxu1 %vm2629_vm4, %v5715_v41 }
 0x4a4   : > { %v6474_v23 = vmax.f32 %v6472_v46, %v6473_v54  ;;  %v5510_v59 = vadd.f32 %v10712_v15, %v8697_v2  ;;  %v5501_v61 = vpop.f32.mrb[123].mxu0  ;;  %8823 = vmatmul.mubr.msk.bf16.gmra.mrb[116].mxu1 %vm2629_vm4, %v5716_v38  ;;  %v5651_v49 = vmax.f32 %v5507_v47, 0.0  ;;  %v6479_v13 = vsel %vm2629_vm4, %v5991_v62, -inf }
 0x4a5   : > { %v6475_v63 = vsel %vm2629_vm4, %v5983_v58, -inf  ;;  %v5502_v0 = vadd.f32 %v10712_v15, %v5501_v61  ;;  %v5649_v7 = vmax.f32 %v5499_v57, 0.0 }
 0x4a6   : > { %v6476_v16 = vmax.f32 %v6474_v23, %v6475_v63  ;;  %v5652_v5 = vmax.f32 %v5510_v59, 0.0 }
 0x4a7   : > { %v5650_v8 = vmax.f32 %v5502_v0, 0.0  ;;  %v8720_v53 = vpop.f32.mrb[12].mxu1 }
 0x4a8   : > { %v6478_v9 = vmax.f32 %v6476_v16, %v6477_v55  ;;  %v5718_v10 = vpack.c.bf16 %v5652_v5, %v5651_v49  ;;  %v5995_v11 = vpop.f32.mrb[13].mxu1  ;;  %v6004_v27 = vadd.f32 %v10729_v43, %v8720_v53 }
 0x4a9   : > { %v5717_v1 = vpack.c.bf16 %v5650_v8, %v5649_v7  ;;  %v5996_v17 = vadd.f32 %v10729_v43, %v5995_v11  ;;  %v8700_v20 = vpop.f32.mrb[124].mxu0  ;;  %v8721_v22 = vpop.f32.mrb[14].mxu1 }
 0x4aa   : > { %v6480_v24 = vmax.f32 %v6478_v9, %v6479_v13  ;;  %v5523_v25 = vadd.f32 %v10712_v15, %v8700_v20  ;;  %v5514_v18 = vpop.f32.mrb[125].mxu0  ;;  %v5998_v26 = vpop.f32.mrb[15].mxu1  ;;  %v6007_v32 = vadd.f32 %v10729_v43, %v8721_v22  ;;  %v6485_v37 = vsel %vm2629_vm4, %v6004_v27, -inf }
 0x4ab   : > { %v6481_v21 = vsel %vm2629_vm4, %v5996_v17, -inf  ;;  %v5515_v29 = vadd.f32 %v10712_v15, %v5514_v18  ;;  %v5999_v19 = vadd.f32 %v10729_v43, %v5998_v26  ;;  %v8701_v30 = vpop.f32.mrb[126].mxu0  ;;  %8826 = vmatprep.mubr.msk.bf16.mxu1 %vm2629_vm4, %v5717_v1 }
 0x4ac   : > { %v6482_v31 = vmax.f32 %v6480_v24, %v6481_v21  ;;  %v5526_v6 = vadd.f32 %v10712_v15, %v8701_v30  ;;  %v5517_v50 = vpop.f32.mrb[127].mxu0  ;;  %8827 = vmatmul.mubr.msk.bf16.gmra.mrb[120].mxu1 %vm2629_vm4, %v5718_v10  ;;  %v5655_v35 = vmax.f32 %v5523_v25, 0.0  ;;  %v6487_v45 = vsel %vm2629_vm4, %v6007_v32, -inf }
 0x4ad   : > { %v6483_v33 = vsel %vm2629_vm4, %v5999_v19, -inf  ;;  %v5518_v4 = vadd.f32 %v10712_v15, %v5517_v50  ;;  %v5653_v38 = vmax.f32 %v5515_v29, 0.0 }
 0x4ae   : > { %v6484_v56 = vmax.f32 %v6482_v31, %v6483_v33  ;;  %v5656_v36 = vmax.f32 %v5526_v6, 0.0 }
 0x4af   : > { %v5654_v39 = vmax.f32 %v5518_v4, 0.0  ;;  %v8724_v40 = vpop.f32.mrb[16].mxu1 }
 0x4b0   : > { %v6486_v41 = vmax.f32 %v6484_v56, %v6485_v37  ;;  %v5720_v42 = vpack.c.bf16 %v5656_v36, %v5655_v35  ;;  %v6011_v44 = vpop.f32.mrb[17].mxu1  ;;  %v6020_v15 = vadd.f32 %v10729_v43, %v8724_v40 }
 0x4b1   : > { %v5719_v46 = vpack.c.bf16 %v5654_v39, %v5653_v38  ;;  %v6012_v47 = vadd.f32 %v10729_v43, %v6011_v44  ;;  %v8725_v48 = vpop.f32.mrb[18].mxu1 }
 0x4b2   : > { %v6488_v51 = vmax.f32 %v6486_v41, %v6487_v45  ;;  %v6014_v52 = vpop.f32.mrb[19].mxu1  ;;  %v6023_v58 = vadd.f32 %v10729_v43, %v8725_v48  ;;  %v6498_v59 = vsel %vm2629_vm4, %v6020_v15, -inf }
 0x4b3   : > { %v6015_v54 = vadd.f32 %v10729_v43, %v6014_v52  ;;  %8830 = vmatprep.mubr.msk.bf16.mxu1 %vm2629_vm4, %v5719_v46  ;;  %v6495_v57 = vsel %vm2629_vm4, %v6012_v47, -inf }
 0x4b4   : > { %8831 = vmatmul.mubr.msk.bf16.gmra.mrb[124].mxu1 %vm2629_vm4, %v5720_v42  ;;  %v6500_v0 = vsel %vm2629_vm4, %v6023_v58, -inf  ;;  %v6489_v6 = vrot.slane %v6488_v51, 4 }
 0x4b5   : > { %v6496_v2 = vsel %vm2629_vm4, %v6015_v54, -inf  ;;  %8853 = vmatprep.mubr.msk.f32.mxu1 %vm9042_vm12, %v9043_v14 }
 0x4b6   : > { %v6497_v23 = vmax.f32 %v6495_v57, %v6496_v2  ;;  %v6490_v40 = vmax.f32 %v6488_v51, %v6489_v6 }
 0x4b7   : > { %v8728_v61 = vpop.f32.mrb[20].mxu1 }
 0x4b8   : > { %v6499_v62 = vmax.f32 %v6497_v23, %v6498_v59  ;;  %v6027_v63 = vpop.f32.mrb[21].mxu1  ;;  %v6036_v7 = vadd.f32 %v10729_v43, %v8728_v61  ;;  %v6491_v48 = vrot.slane %v6490_v40, 2 }
 0x4b9   : > { %v6028_v49 = vadd.f32 %v10729_v43, %v6027_v63  ;;  %v8729_v16 = vpop.f32.mrb[22].mxu1 }
 0x4ba   : > { %v6501_v5 = vmax.f32 %v6499_v62, %v6500_v0  ;;  %v6030_v55 = vpop.f32.mrb[23].mxu1  ;;  %v6039_v10 = vadd.f32 %v10729_v43, %v8729_v16  ;;  %v6506_v12 = vsel %vm2629_vm4, %v6036_v7, -inf  ;;  %v6492_v61 = vmax.f32 %v6490_v40, %v6491_v48 }
 0x4bb   : > { %v6502_v8 = vsel %vm2629_vm4, %v6028_v49, -inf  ;;  %v6031_v53 = vadd.f32 %v10729_v43, %v6030_v55 }
 0x4bc   : > { %v6503_v9 = vmax.f32 %v6501_v5, %v6502_v8  ;;  %8854 = vmatmul.mubr.msk.f32.vlgmr.msra.gmra.mrb[128].mxu1 %vm2629_vm4, %v10530_v28  ;;  %v6508_v20 = vsel %vm2629_vm4, %v6039_v10, -inf  ;;  %v6493_v8 = vrot.slane %v6492_v61, 1 }
 0x4bd   : > { %v6504_v11 = vsel %vm2629_vm4, %v6031_v53, -inf  ;;  %8883 = vmatprep.mubr.msk.f32.mxu1 %vm9042_vm12, %v9043_v14 }
 0x4be   : > { %v6505_v60 = vmax.f32 %v6503_v9, %v6504_v11 }
 0x4bf   : > { %v8732_v13 = vpop.f32.mrb[24].mxu1 }
 0x4c0   : > { %v6507_v1 = vmax.f32 %v6505_v60, %v6506_v12  ;;  %v6043_v17 = vpop.f32.mrb[25].mxu1  ;;  %v6052_v25 = vadd.f32 %v10729_v43, %v8732_v13 }
 0x4c1   : > { %v6044_v22 = vadd.f32 %v10729_v43, %v6043_v17  ;;  %v8733_v3 = vpop.f32.mrb[26].mxu1 }
 0x4c2   : > { %v6509_v24 = vmax.f32 %v6507_v1, %v6508_v20  ;;  %v6046_v28 = vpop.f32.mrb[27].mxu1  ;;  %v6055_v21 = vadd.f32 %v10729_v43, %v8733_v3  ;;  %v6514_v30 = vsel %vm2629_vm4, %v6052_v25, -inf }
 0x4c3   : > { %v6510_v18 = vsel %vm2629_vm4, %v6044_v22, -inf  ;;  %v6047_v26 = vadd.f32 %v10729_v43, %v6046_v28 }
 0x4c4   : > { %v6511_v27 = vmax.f32 %v6509_v24, %v6510_v18  ;;  %v6516_v33 = vsel %vm2629_vm4, %v6055_v21, -inf  ;;  %v6494_v24 = vmax.f32 %v6492_v61, %v6493_v8 }
 0x4c5   : > { %v6512_v29 = vsel %vm2629_vm4, %v6047_v26, -inf }
 0x4c6   : > { %v6513_v19 = vmax.f32 %v6511_v27, %v6512_v29 }
 0x4c7   : > { %v8736_v31 = vpop.f32.mrb[28].mxu1 }
 0x4c8   : > { %v6515_v50 = vmax.f32 %v6513_v19, %v6514_v30  ;;  %v6059_v32 = vpop.f32.mrb[29].mxu1  ;;  %v6068_v37 = vadd.f32 %v10729_v43, %v8736_v31  ;;  %v6754_v30 = vmax.f32 %v6494_v24, 0.0 }
 0x4c9   : > { %v6060_v4 = vadd.f32 %v10729_v43, %v6059_v32  ;;  %v8737_v35 = vpop.f32.mrb[30].mxu1 }
 0x4ca   : > { %v6517_v56 = vmax.f32 %v6515_v50, %v6516_v33  ;;  %v6062_v36 = vpop.f32.mrb[31].mxu1  ;;  %v6071_v42 = vadd.f32 %v10729_v43, %v8737_v35  ;;  %v6522_v46 = vsel %vm2629_vm4, %v6068_v37, -inf }
 0x4cb   : > { %v6518_v38 = vsel %vm2629_vm4, %v6060_v4, -inf  ;;  %v6063_v39 = vadd.f32 %v10729_v43, %v6062_v36 }
 0x4cc   : > { %v6519_v41 = vmax.f32 %v6517_v56, %v6518_v38  ;;  %v6524_v54 = vsel %vm2629_vm4, %v6071_v42, -inf }
 0x4cd   : > { %v6520_v44 = vsel %vm2629_vm4, %v6063_v39, -inf }
 0x4ce   : > { %v6521_v45 = vmax.f32 %v6519_v41, %v6520_v44 }
 0x4cf   : > { %v8740_v47 = vpop.f32.mrb[32].mxu1 }
 0x4d0   : > { %v6523_v52 = vmax.f32 %v6521_v45, %v6522_v46  ;;  %v6075_v15 = vpop.f32.mrb[33].mxu1  ;;  %v6084_v51 = vadd.f32 %v10729_v43, %v8740_v47 }
 0x4d1   : > { %v6076_v57 = vadd.f32 %v10729_v43, %v6075_v15  ;;  %v8741_v58 = vpop.f32.mrb[34].mxu1 }
 0x4d2   : > { %v6525_v2 = vmax.f32 %v6523_v52, %v6524_v54  ;;  %v6078_v23 = vpop.f32.mrb[35].mxu1  ;;  %v6087_v0 = vadd.f32 %v10729_v43, %v8741_v58  ;;  %v6535_v55 = vsel %vm2629_vm4, %v6084_v51, -inf }
 0x4d3   : > { %v6079_v59 = vadd.f32 %v10729_v43, %v6078_v23  ;;  %v6532_v63 = vsel %vm2629_vm4, %v6076_v57, -inf }
 0x4d4   : > { %v6526_v62 = vrot.slane %v6525_v2, 4  ;;  %v6537_v11 = vsel %vm2629_vm4, %v6087_v0, -inf }
 0x4d5   : > { %v6533_v49 = vsel %vm2629_vm4, %v6079_v59, -inf }
 0x4d6   : > { %v6527_v16 = vmax.f32 %v6525_v2, %v6526_v62  ;;  %v6534_v5 = vmax.f32 %v6532_v63, %v6533_v49 }
 0x4d7   : > { %v8744_v7 = vpop.f32.mrb[36].mxu1 }
 0x4d8   : > { %v6528_v53 = vrot.slane %v6527_v16, 2  ;;  %v6536_v9 = vmax.f32 %v6534_v5, %v6535_v55  ;;  %v6091_v10 = vpop.f32.mrb[37].mxu1  ;;  %v6100_v20 = vadd.f32 %v10729_v43, %v8744_v7 }
 0x4d9   : > { %v6092_v60 = vadd.f32 %v10729_v43, %v6091_v10  ;;  %v8745_v12 = vpop.f32.mrb[38].mxu1 }
 0x4da   : > { %v6529_v13 = vmax.f32 %v6527_v16, %v6528_v53  ;;  %v6538_v1 = vmax.f32 %v6536_v9, %v6537_v11  ;;  %v6094_v17 = vpop.f32.mrb[39].mxu1  ;;  %v6103_v18 = vadd.f32 %v10729_v43, %v8745_v12  ;;  %v6543_v29 = vsel %vm2629_vm4, %v6100_v20, -inf }
 0x4db   : > { %v6539_v22 = vsel %vm2629_vm4, %v6092_v60, -inf  ;;  %v6095_v3 = vadd.f32 %v10729_v43, %v6094_v17 }
 0x4dc   : > { %v6530_v28 = vrot.slane %v6529_v13, 1  ;;  %v6540_v25 = vmax.f32 %v6538_v1, %v6539_v22  ;;  %v6545_v32 = vsel %vm2629_vm4, %v6103_v18, -inf }
 0x4dd   : > { %v6541_v26 = vsel %vm2629_vm4, %v6095_v3, -inf }
 0x4de   : > { %v6531_v27 = vmax.f32 %v6529_v13, %v6530_v28  ;;  %v6542_v21 = vmax.f32 %v6540_v25, %v6541_v26 }
 0x4df   : > { %v8748_v19 = vpop.f32.mrb[40].mxu1 }
 0x4e0   : > { %v6755_v31 = vmax.f32 %v6531_v27, 0.0  ;;  %v6544_v6 = vmax.f32 %v6542_v21, %v6543_v29  ;;  %v6107_v50 = vpop.f32.mrb[41].mxu1  ;;  %v6116_v37 = vadd.f32 %v10729_v43, %v8748_v19 }
 0x4e1   : > { %v6108_v33 = vadd.f32 %v10729_v43, %v6107_v50  ;;  %v8749_v4 = vpop.f32.mrb[42].mxu1 }
 0x4e2   : > { %v10852_v35 = vsel %vm6778_vm5, %v6755_v31, %v6754_v30  ;;  %v6546_v56 = vmax.f32 %v6544_v6, %v6545_v32  ;;  %v6110_v36 = vpop.f32.mrb[43].mxu1  ;;  %v6119_v41 = vadd.f32 %v10729_v43, %v8749_v4  ;;  %v6551_v45 = vsel %vm2629_vm4, %v6116_v37, -inf }
 0x4e3   : > { %v6547_v38 = vsel %vm2629_vm4, %v6108_v33, -inf  ;;  %v6111_v39 = vadd.f32 %v10729_v43, %v6110_v36 }
 0x4e4   : > { %v6548_v40 = vmax.f32 %v6546_v56, %v6547_v38  ;;  %v6553_v52 = vsel %vm2629_vm4, %v6119_v41, -inf }
 0x4e5   : > { %v6549_v42 = vsel %vm2629_vm4, %v6111_v39, -inf }
 0x4e6   : > { %v6550_v44 = vmax.f32 %v6548_v40, %v6549_v42 }
 0x4e7   : > { %v8752_v46 = vpop.f32.mrb[44].mxu1 }
 0x4e8   : > { %v6552_v47 = vmax.f32 %v6550_v44, %v6551_v45  ;;  %v6123_v48 = vpop.f32.mrb[45].mxu1  ;;  %v6132_v2 = vadd.f32 %v10729_v43, %v8752_v46 }
 0x4e9   : > { %v6124_v15 = vadd.f32 %v10729_v43, %v6123_v48  ;;  %v8753_v54 = vpop.f32.mrb[46].mxu1 }
 0x4ea   : > { %v6554_v57 = vmax.f32 %v6552_v47, %v6553_v52  ;;  %v6126_v58 = vpop.f32.mrb[47].mxu1  ;;  %v6135_v61 = vadd.f32 %v10729_v43, %v8753_v54  ;;  %v6559_v0 = vsel %vm2629_vm4, %v6132_v2, -inf }
 0x4eb   : > { %v6555_v23 = vsel %vm2629_vm4, %v6124_v15, -inf  ;;  %v6127_v51 = vadd.f32 %v10729_v43, %v6126_v58 }
 0x4ec   : > { %v6556_v59 = vmax.f32 %v6554_v57, %v6555_v23  ;;  %v6561_v55 = vsel %vm2629_vm4, %v6135_v61, -inf }
 0x4ed   : > { %v6557_v62 = vsel %vm2629_vm4, %v6127_v51, -inf }
 0x4ee   : > { %v6558_v63 = vmax.f32 %v6556_v59, %v6557_v62 }
 0x4ef   : > { %v8756_v49 = vpop.f32.mrb[48].mxu1 }
 0x4f0   : > { %v6560_v16 = vmax.f32 %v6558_v63, %v6559_v0  ;;  %v6139_v5 = vpop.f32.mrb[49].mxu1  ;;  %v6148_v10 = vadd.f32 %v10729_v43, %v8756_v49 }
 0x4f1   : > { %v6140_v7 = vadd.f32 %v10729_v43, %v6139_v5  ;;  %v8757_v8 = vpop.f32.mrb[50].mxu1 }
 0x4f2   : > { %v6562_v53 = vmax.f32 %v6560_v16, %v6561_v55  ;;  %v6142_v9 = vpop.f32.mrb[51].mxu1  ;;  %v6151_v13 = vadd.f32 %v10729_v43, %v8757_v8  ;;  %v6572_v22 = vsel %vm2629_vm4, %v6148_v10, -inf }
 0x4f3   : > { %v6143_v11 = vadd.f32 %v10729_v43, %v6142_v9  ;;  %v6569_v12 = vsel %vm2629_vm4, %v6140_v7, -inf }
 0x4f4   : > { %v6563_v60 = vrot.slane %v6562_v53, 4  ;;  %v6574_v18 = vsel %vm2629_vm4, %v6151_v13, -inf }
 0x4f5   : > { %v6570_v1 = vsel %vm2629_vm4, %v6143_v11, -inf }
 0x4f6   : > { %v6564_v17 = vmax.f32 %v6562_v53, %v6563_v60  ;;  %v6571_v20 = vmax.f32 %v6569_v12, %v6570_v1 }
 0x4f7   : > { %v8760_v3 = vpop.f32.mrb[52].mxu1 }
 0x4f8   : > { %v6565_v24 = vrot.slane %v6564_v17, 2  ;;  %v6573_v28 = vmax.f32 %v6571_v20, %v6572_v22  ;;  %v6155_v25 = vpop.f32.mrb[53].mxu1  ;;  %v6164_v30 = vadd.f32 %v10729_v43, %v8760_v3 }
 0x4f9   : > { %v6156_v26 = vadd.f32 %v10729_v43, %v6155_v25  ;;  %v8761_v27 = vpop.f32.mrb[54].mxu1 }
 0x4fa   : > { %v6566_v21 = vmax.f32 %v6564_v17, %v6565_v24  ;;  %v6575_v29 = vmax.f32 %v6573_v28, %v6574_v18  ;;  %v6158_v19 = vpop.f32.mrb[55].mxu1  ;;  %v6167_v33 = vadd.f32 %v10729_v43, %v8761_v27  ;;  %v6580_v37 = vsel %vm2629_vm4, %v6164_v30, -inf }
 0x4fb   : > { %v6576_v31 = vsel %vm2629_vm4, %v6156_v26, -inf  ;;  %v6159_v6 = vadd.f32 %v10729_v43, %v6158_v19 }
 0x4fc   : > { %v6567_v50 = vrot.slane %v6566_v21, 1  ;;  %v6577_v32 = vmax.f32 %v6575_v29, %v6576_v31  ;;  %v6582_v42 = vsel %vm2629_vm4, %v6167_v33, -inf }
 0x4fd   : > { %v6578_v4 = vsel %vm2629_vm4, %v6159_v6, -inf }
 0x4fe   : > { %v6568_v56 = vmax.f32 %v6566_v21, %v6567_v50  ;;  %v6579_v36 = vmax.f32 %v6577_v32, %v6578_v4 }
 0x4ff   : > { %v8764_v38 = vpop.f32.mrb[56].mxu1 }
 0x500   : > { %v6756_v39 = vmax.f32 %v6568_v56, 0.0  ;;  %v6581_v40 = vmax.f32 %v6579_v36, %v6580_v37  ;;  %v6171_v41 = vpop.f32.mrb[57].mxu1  ;;  %v6180_v52 = vadd.f32 %v10729_v43, %v8764_v38 }
 0x501   : > { %v6172_v44 = vadd.f32 %v10729_v43, %v6171_v41  ;;  %v8765_v45 = vpop.f32.mrb[58].mxu1 }
 0x502   : > { %v10888_v46 = vsel %vm6780_vm6, %v6756_v39, %v10852_v35  ;;  %v6583_v47 = vmax.f32 %v6581_v40, %v6582_v42  ;;  %v6174_v48 = vpop.f32.mrb[59].mxu1  ;;  %v6183_v58 = vadd.f32 %v10729_v43, %v8765_v45  ;;  %v6588_v51 = vsel %vm2629_vm4, %v6180_v52, -inf }
 0x503   : > { %v6584_v15 = vsel %vm2629_vm4, %v6172_v44, -inf  ;;  %v6175_v54 = vadd.f32 %v10729_v43, %v6174_v48 }
 0x504   : > { %v6585_v57 = vmax.f32 %v6583_v47, %v6584_v15  ;;  %v6590_v62 = vsel %vm2629_vm4, %v6183_v58, -inf }
 0x505   : > { %v6586_v2 = vsel %vm2629_vm4, %v6175_v54, -inf }
 0x506   : > { %v6587_v23 = vmax.f32 %v6585_v57, %v6586_v2 }
 0x507   : > { %v8768_v59 = vpop.f32.mrb[60].mxu1 }
 0x508   : > { %v6589_v61 = vmax.f32 %v6587_v23, %v6588_v51  ;;  %v6187_v35 = vpop.f32.mrb[61].mxu1  ;;  %v6196_v5 = vadd.f32 %v10729_v43, %v8768_v59 }
 0x509   : > { %v6188_v63 = vadd.f32 %v10729_v43, %v6187_v35  ;;  %v8769_v0 = vpop.f32.mrb[62].mxu1 }
 0x50a   : > { %v6591_v49 = vmax.f32 %v6589_v61, %v6590_v62  ;;  %v6190_v16 = vpop.f32.mrb[63].mxu1  ;;  %v6199_v53 = vadd.f32 %v10729_v43, %v8769_v0  ;;  %v6596_v11 = vsel %vm2629_vm4, %v6196_v5, -inf }
 0x50b   : > { %v6592_v55 = vsel %vm2629_vm4, %v6188_v63, -inf  ;;  %v6191_v7 = vadd.f32 %v10729_v43, %v6190_v16 }
 0x50c   : > { %v6593_v8 = vmax.f32 %v6591_v49, %v6592_v55  ;;  %v6598_v1 = vsel %vm2629_vm4, %v6199_v53, -inf }
 0x50d   : > { %v6594_v9 = vsel %vm2629_vm4, %v6191_v7, -inf }
 0x50e   : > { %v6595_v10 = vmax.f32 %v6593_v8, %v6594_v9 }
 0x50f   : > { %v8772_v60 = vpop.f32.mrb[64].mxu1 }
 0x510   : > { %v6597_v12 = vmax.f32 %v6595_v10, %v6596_v11  ;;  %v6203_v13 = vpop.f32.mrb[65].mxu1  ;;  %v6212_v24 = vadd.f32 %v10729_v43, %v8772_v60 }
 0x511   : > { %v6204_v17 = vadd.f32 %v10729_v43, %v6203_v13  ;;  %v8773_v20 = vpop.f32.mrb[66].mxu1 }
 0x512   : > { %v6599_v22 = vmax.f32 %v6597_v12, %v6598_v1  ;;  %v6206_v3 = vpop.f32.mrb[67].mxu1  ;;  %v6215_v26 = vadd.f32 %v10729_v43, %v8773_v20  ;;  %v6609_v19 = vsel %vm2629_vm4, %v6212_v24, -inf }
 0x513   : > { %v6207_v28 = vadd.f32 %v10729_v43, %v6206_v3  ;;  %v6606_v18 = vsel %vm2629_vm4, %v6204_v17, -inf }
 0x514   : > { %v6600_v25 = vrot.slane %v6599_v22, 4  ;;  %v6611_v32 = vsel %vm2629_vm4, %v6215_v26, -inf }
 0x515   : > { %v6607_v27 = vsel %vm2629_vm4, %v6207_v28, -inf }
 0x516   : > { %v6601_v21 = vmax.f32 %v6599_v22, %v6600_v25  ;;  %v6608_v29 = vmax.f32 %v6606_v18, %v6607_v27 }
 0x517   : > { %v8776_v30 = vpop.f32.mrb[68].mxu1 }
 0x518   : > { %v6602_v31 = vrot.slane %v6601_v21, 2  ;;  %v6610_v6 = vmax.f32 %v6608_v29, %v6609_v19  ;;  %v6219_v50 = vpop.f32.mrb[69].mxu1  ;;  %v6228_v38 = vadd.f32 %v10729_v43, %v8776_v30 }
 0x519   : > { %v6220_v33 = vadd.f32 %v10729_v43, %v6219_v50  ;;  %v8777_v4 = vpop.f32.mrb[70].mxu1 }
 0x51a   : > { %v6603_v56 = vmax.f32 %v6601_v21, %v6602_v31  ;;  %v6612_v36 = vmax.f32 %v6610_v6, %v6611_v32  ;;  %v6222_v37 = vpop.f32.mrb[71].mxu1  ;;  %v6231_v44 = vadd.f32 %v10729_v43, %v8777_v4  ;;  %v6617_v52 = vsel %vm2629_vm4, %v6228_v38, -inf }
 0x51b   : > { %v6613_v39 = vsel %vm2629_vm4, %v6220_v33, -inf  ;;  %v6223_v40 = vadd.f32 %v10729_v43, %v6222_v37 }
 0x51c   : > { %v6604_v41 = vrot.slane %v6603_v56, 1  ;;  %v6614_v42 = vmax.f32 %v6612_v36, %v6613_v39  ;;  %v6619_v2 = vsel %vm2629_vm4, %v6231_v44, -inf }
 0x51d   : > { %v6615_v45 = vsel %vm2629_vm4, %v6223_v40, -inf }
 0x51e   : > { %v6605_v47 = vmax.f32 %v6603_v56, %v6604_v41  ;;  %v6616_v48 = vmax.f32 %v6614_v42, %v6615_v45 }
 0x51f   : > { %v8780_v15 = vpop.f32.mrb[72].mxu1 }
 0x520   : > { %v6757_v54 = vmax.f32 %v6605_v47, 0.0  ;;  %v6618_v57 = vmax.f32 %v6616_v48, %v6617_v52  ;;  %v6235_v58 = vpop.f32.mrb[73].mxu1  ;;  %v6244_v62 = vadd.f32 %v10729_v43, %v8780_v15 }
 0x521   : > { %v6236_v23 = vadd.f32 %v10729_v43, %v6235_v58  ;;  %v8781_v51 = vpop.f32.mrb[74].mxu1 }
 0x522   : > { %v10924_v59 = vsel %vm6782_vm7, %v6757_v54, %v10888_v46  ;;  %v6620_v61 = vmax.f32 %v6618_v57, %v6619_v2  ;;  %v6238_v35 = vpop.f32.mrb[75].mxu1  ;;  %v6247_v16 = vadd.f32 %v10729_v43, %v8781_v51  ;;  %v6625_v7 = vsel %vm2629_vm4, %v6244_v62, -inf }
 0x523   : > { %v6621_v63 = vsel %vm2629_vm4, %v6236_v23, -inf  ;;  %v6239_v0 = vadd.f32 %v10729_v43, %v6238_v35 }
 0x524   : > { %v6622_v49 = vmax.f32 %v6620_v61, %v6621_v63  ;;  %v6627_v9 = vsel %vm2629_vm4, %v6247_v16, -inf }
 0x525   : > { %v6623_v5 = vsel %vm2629_vm4, %v6239_v0, -inf }
 0x526   : > { %v6624_v55 = vmax.f32 %v6622_v49, %v6623_v5 }
 0x527   : > { %v8784_v8 = vpop.f32.mrb[76].mxu1 }
 0x528   : > { %v6626_v53 = vmax.f32 %v6624_v55, %v6625_v7  ;;  %v6251_v46 = vpop.f32.mrb[77].mxu1  ;;  %v6260_v13 = vadd.f32 %v10729_v43, %v8784_v8 }
 0x529   : > { %v6252_v10 = vadd.f32 %v10729_v43, %v6251_v46  ;;  %v8785_v11 = vpop.f32.mrb[78].mxu1 }
 0x52a   : > { %v6628_v60 = vmax.f32 %v6626_v53, %v6627_v9  ;;  %v6254_v12 = vpop.f32.mrb[79].mxu1  ;;  %v6263_v22 = vadd.f32 %v10729_v43, %v8785_v11  ;;  %v6633_v28 = vsel %vm2629_vm4, %v6260_v13, -inf }
 0x52b   : > { %v6629_v1 = vsel %vm2629_vm4, %v6252_v10, -inf  ;;  %v6255_v17 = vadd.f32 %v10729_v43, %v6254_v12 }
 0x52c   : > { %v6630_v20 = vmax.f32 %v6628_v60, %v6629_v1  ;;  %v6635_v27 = vsel %vm2629_vm4, %v6263_v22, -inf }
 0x52d   : > { %v6631_v3 = vsel %vm2629_vm4, %v6255_v17, -inf }
 0x52e   : > { %v6632_v24 = vmax.f32 %v6630_v20, %v6631_v3 }
 0x52f   : > { %v8788_v25 = vpop.f32.mrb[80].mxu1 }
 0x530   : > { %v6634_v18 = vmax.f32 %v6632_v24, %v6633_v28  ;;  %v6267_v26 = vpop.f32.mrb[81].mxu1  ;;  %v6276_v31 = vadd.f32 %v10729_v43, %v8788_v25 }
 0x531   : > { %v6268_v21 = vadd.f32 %v10729_v43, %v6267_v26  ;;  %v8789_v29 = vpop.f32.mrb[82].mxu1 }
 0x532   : > { %v6636_v19 = vmax.f32 %v6634_v18, %v6635_v27  ;;  %v6270_v30 = vpop.f32.mrb[83].mxu1  ;;  %v6279_v33 = vadd.f32 %v10729_v43, %v8789_v29  ;;  %v6646_v37 = vsel %vm2629_vm4, %v6276_v31, -inf }
 0x533   : > { %v6271_v6 = vadd.f32 %v10729_v43, %v6270_v30  ;;  %v6643_v32 = vsel %vm2629_vm4, %v6268_v21, -inf }
 0x534   : > { %v6637_v50 = vrot.slane %v6636_v19, 4  ;;  %v6648_v42 = vsel %vm2629_vm4, %v6279_v33, -inf }
 0x535   : > { %v6644_v4 = vsel %vm2629_vm4, %v6271_v6, -inf }
 0x536   : > { %v6638_v56 = vmax.f32 %v6636_v19, %v6637_v50  ;;  %v6645_v36 = vmax.f32 %v6643_v32, %v6644_v4 }
 0x537   : > { %v8792_v38 = vpop.f32.mrb[84].mxu1 }
 0x538   : > { %v6639_v39 = vrot.slane %v6638_v56, 2  ;;  %v6647_v40 = vmax.f32 %v6645_v36, %v6646_v37  ;;  %v6283_v41 = vpop.f32.mrb[85].mxu1  ;;  %v6292_v15 = vadd.f32 %v10729_v43, %v8792_v38 }
 0x539   : > { %v6284_v44 = vadd.f32 %v10729_v43, %v6283_v41  ;;  %v8793_v45 = vpop.f32.mrb[86].mxu1 }
 0x53a   : > { %v6640_v47 = vmax.f32 %v6638_v56, %v6639_v39  ;;  %v6649_v48 = vmax.f32 %v6647_v40, %v6648_v42  ;;  %v6286_v52 = vpop.f32.mrb[87].mxu1  ;;  %v6295_v23 = vadd.f32 %v10729_v43, %v8793_v45  ;;  %v6654_v62 = vsel %vm2629_vm4, %v6292_v15, -inf }
 0x53b   : > { %v6650_v54 = vsel %vm2629_vm4, %v6284_v44, -inf  ;;  %v6287_v57 = vadd.f32 %v10729_v43, %v6286_v52 }
 0x53c   : > { %v6641_v58 = vrot.slane %v6640_v47, 1  ;;  %v6651_v2 = vmax.f32 %v6649_v48, %v6650_v54  ;;  %v6656_v5 = vsel %vm2629_vm4, %v6295_v23, -inf }
 0x53d   : > { %v6652_v51 = vsel %vm2629_vm4, %v6287_v57, -inf }
 0x53e   : > { %v6642_v61 = vmax.f32 %v6640_v47, %v6641_v58  ;;  %v6653_v35 = vmax.f32 %v6651_v2, %v6652_v51 }
 0x53f   : > { %v8796_v63 = vpop.f32.mrb[88].mxu1 }
 0x540   : > { %v6758_v0 = vmax.f32 %v6642_v61, 0.0  ;;  %v6655_v49 = vmax.f32 %v6653_v35, %v6654_v62  ;;  %v6299_v16 = vpop.f32.mrb[89].mxu1  ;;  %v6308_v9 = vadd.f32 %v10729_v43, %v8796_v63  ;;  %v10989_v63 = vld [vmem:[%s11160_s7] ss:$0 sm:$0xff] }
 0x541   : > { %v6300_v55 = vadd.f32 %v10729_v43, %v6299_v16  ;;  %v8797_v7 = vpop.f32.mrb[90].mxu1 }
 0x542   : > { %v10960_v8 = vsel %vm6784_vm8, %v6758_v0, %v10924_v59  ;;  %v6657_v53 = vmax.f32 %v6655_v49, %v6656_v5  ;;  %v6302_v46 = vpop.f32.mrb[91].mxu1  ;;  %v6311_v12 = vadd.f32 %v10729_v43, %v8797_v7  ;;  %v6662_v17 = vsel %vm2629_vm4, %v6308_v9, -inf }
 0x543   : > { %v6658_v10 = vsel %vm2629_vm4, %v6300_v55, -inf  ;;  %v6303_v11 = vadd.f32 %v10729_v43, %v6302_v46 }
 0x544   : > { %v6659_v60 = vmax.f32 %v6657_v53, %v6658_v10  ;;  %v6664_v3 = vsel %vm2629_vm4, %v6311_v12, -inf }
 0x545   : > { %v6660_v13 = vsel %vm2629_vm4, %v6303_v11, -inf }
 0x546   : > { %v6661_v1 = vmax.f32 %v6659_v60, %v6660_v13 }
 0x547   : > { %v8800_v20 = vpop.f32.mrb[92].mxu1 }
 0x548   : > { %v6663_v22 = vmax.f32 %v6661_v1, %v6662_v17  ;;  %v6315_v59 = vpop.f32.mrb[93].mxu1  ;;  %v6324_v26 = vadd.f32 %v10729_v43, %v8800_v20 }
 0x549   : > { %v6316_v24 = vadd.f32 %v10729_v43, %v6315_v59  ;;  %v8801_v28 = vpop.f32.mrb[94].mxu1 }
 0x54a   : > { %v6665_v25 = vmax.f32 %v6663_v22, %v6664_v3  ;;  %v6318_v18 = vpop.f32.mrb[95].mxu1  ;;  %v6327_v19 = vadd.f32 %v10729_v43, %v8801_v28  ;;  %v6670_v6 = vsel %vm2629_vm4, %v6324_v26, -inf }
 0x54b   : > { %v6666_v27 = vsel %vm2629_vm4, %v6316_v24, -inf  ;;  %v6319_v21 = vadd.f32 %v10729_v43, %v6318_v18 }
 0x54c   : > { %v6667_v29 = vmax.f32 %v6665_v25, %v6666_v27  ;;  %v6672_v4 = vsel %vm2629_vm4, %v6327_v19, -inf }
 0x54d   : > { %v6668_v30 = vsel %vm2629_vm4, %v6319_v21, -inf }
 0x54e   : > { %v6669_v31 = vmax.f32 %v6667_v29, %v6668_v30 }
 0x54f   : > { %v8804_v50 = vpop.f32.mrb[96].mxu1 }
 0x550   : > { %v6671_v32 = vmax.f32 %v6669_v31, %v6670_v6  ;;  %v6331_v33 = vpop.f32.mrb[97].mxu1  ;;  %v6340_v39 = vadd.f32 %v10729_v43, %v8804_v50 }
 0x551   : > { %v6332_v56 = vadd.f32 %v10729_v43, %v6331_v33  ;;  %v8805_v36 = vpop.f32.mrb[98].mxu1 }
 0x552   : > { %v6673_v37 = vmax.f32 %v6671_v32, %v6672_v4  ;;  %v6334_v38 = vpop.f32.mrb[99].mxu1  ;;  %v6343_v44 = vadd.f32 %v10729_v43, %v8805_v36  ;;  %v6683_v52 = vsel %vm2629_vm4, %v6340_v39, -inf }
 0x553   : > { %v6335_v40 = vadd.f32 %v10729_v43, %v6334_v38  ;;  %v6680_v42 = vsel %vm2629_vm4, %v6332_v56, -inf }
 0x554   : > { %v6674_v41 = vrot.slane %v6673_v37, 4  ;;  %v6685_v2 = vsel %vm2629_vm4, %v6343_v44, -inf }
 0x555   : > { %v6681_v45 = vsel %vm2629_vm4, %v6335_v40, -inf }
 0x556   : > { %v6675_v47 = vmax.f32 %v6673_v37, %v6674_v41  ;;  %v6682_v48 = vmax.f32 %v6680_v42, %v6681_v45 }
 0x557   : > { %v8808_v15 = vpop.f32.mrb[100].mxu1 }
 0x558   : > { %v6676_v54 = vrot.slane %v6675_v47, 2  ;;  %v6684_v57 = vmax.f32 %v6682_v48, %v6683_v52  ;;  %v6347_v58 = vpop.f32.mrb[101].mxu1  ;;  %v6356_v0 = vadd.f32 %v10989_v63, %v8808_v15 }
 0x559   : > { %v6348_v23 = vadd.f32 %v10729_v43, %v6347_v58  ;;  %v8809_v51 = vpop.f32.mrb[102].mxu1 }
 0x55a   : > { %v6677_v61 = vmax.f32 %v6675_v47, %v6676_v54  ;;  %v6686_v35 = vmax.f32 %v6684_v57, %v6685_v2  ;;  %v6350_v62 = vpop.f32.mrb[103].mxu1  ;;  %v6359_v7 = vadd.f32 %v10989_v63, %v8809_v51  ;;  %v6691_v9 = vsel %vm2629_vm4, %v6356_v0, -inf }
 0x55b   : > { %v6687_v49 = vsel %vm2629_vm4, %v6348_v23, -inf  ;;  %v6351_v16 = vadd.f32 %v10989_v63, %v6350_v62 }
 0x55c   : > { %v6678_v5 = vrot.slane %v6677_v61, 1  ;;  %v6688_v55 = vmax.f32 %v6686_v35, %v6687_v49  ;;  %v6693_v13 = vsel %vm2629_vm4, %v6359_v7, -inf }
 0x55d   : > { %v6689_v43 = vsel %vm2629_vm4, %v6351_v16, -inf }
 0x55e   : > { %v6679_v53 = vmax.f32 %v6677_v61, %v6678_v5  ;;  %v6690_v46 = vmax.f32 %v6688_v55, %v6689_v43 }
 0x55f   : > { %v8812_v10 = vpop.f32.mrb[104].mxu1 }
 0x560   : > { %v6759_v11 = vmax.f32 %v6679_v53, 0.0  ;;  %v6692_v60 = vmax.f32 %v6690_v46, %v6691_v9  ;;  %v6363_v12 = vpop.f32.mrb[105].mxu1  ;;  %v6372_v3 = vadd.f32 %v10989_v63, %v8812_v10 }
 0x561   : > { %v6364_v1 = vadd.f32 %v10989_v63, %v6363_v12  ;;  %v8813_v17 = vpop.f32.mrb[106].mxu1 }
 0x562   : > { %v11001_v20 = vsel %vm6786_vm9, %v6759_v11, %v10960_v8  ;;  %v6694_v22 = vmax.f32 %v6692_v60, %v6693_v13  ;;  %v6366_v59 = vpop.f32.mrb[107].mxu1  ;;  %v6375_v18 = vadd.f32 %v10989_v63, %v8813_v17  ;;  %v6699_v21 = vsel %vm2629_vm4, %v6372_v3, -inf }
 0x563   : > { %v6695_v24 = vsel %vm2629_vm4, %v6364_v1, -inf  ;;  %v6367_v28 = vadd.f32 %v10989_v63, %v6366_v59 }
 0x564   : > { %v6696_v25 = vmax.f32 %v6694_v22, %v6695_v24  ;;  %v6701_v30 = vsel %vm2629_vm4, %v6375_v18, -inf }
 0x565   : > { %v6697_v26 = vsel %vm2629_vm4, %v6367_v28, -inf }
 0x566   : > { %v6698_v27 = vmax.f32 %v6696_v25, %v6697_v26 }
 0x567   : > { %v8816_v29 = vpop.f32.mrb[108].mxu1 }
 0x568   : > { %v6700_v19 = vmax.f32 %v6698_v27, %v6699_v21  ;;  %v6379_v8 = vpop.f32.mrb[109].mxu1  ;;  %v6388_v33 = vadd.f32 %v10989_v63, %v8816_v29 }
 0x569   : > { %v6380_v31 = vadd.f32 %v10989_v63, %v6379_v8  ;;  %v8817_v6 = vpop.f32.mrb[110].mxu1 }
 0x56a   : > { %v6702_v50 = vmax.f32 %v6700_v19, %v6701_v30  ;;  %v6382_v32 = vpop.f32.mrb[111].mxu1  ;;  %v6391_v37 = vadd.f32 %v10989_v63, %v8817_v6  ;;  %v6707_v40 = vsel %vm2629_vm4, %v6388_v33, -inf }
 0x56b   : > { %v6703_v4 = vsel %vm2629_vm4, %v6380_v31, -inf  ;;  %v6383_v56 = vadd.f32 %v10989_v63, %v6382_v32 }
 0x56c   : > { %v6704_v36 = vmax.f32 %v6702_v50, %v6703_v4  ;;  %v6709_v45 = vsel %vm2629_vm4, %v6391_v37, -inf }
 0x56d   : > { %v6705_v38 = vsel %vm2629_vm4, %v6383_v56, -inf }
 0x56e   : > { %v6706_v39 = vmax.f32 %v6704_v36, %v6705_v38 }
 0x56f   : > { %v8820_v41 = vpop.f32.mrb[112].mxu1 }
 0x570   : > { %v6708_v42 = vmax.f32 %v6706_v39, %v6707_v40  ;;  %v6395_v44 = vpop.f32.mrb[113].mxu1  ;;  %v6404_v54 = vadd.f32 %v10989_v63, %v8820_v41 }
 0x571   : > { %v6396_v47 = vadd.f32 %v10989_v63, %v6395_v44  ;;  %v8821_v48 = vpop.f32.mrb[114].mxu1 }
 0x572   : > { %v6710_v52 = vmax.f32 %v6708_v42, %v6709_v45  ;;  %v6398_v15 = vpop.f32.mrb[115].mxu1  ;;  %v6407_v23 = vadd.f32 %v10989_v63, %v8821_v48  ;;  %v6720_v62 = vsel %vm2629_vm4, %v6404_v54, -inf }
 0x573   : > { %v6399_v57 = vadd.f32 %v10989_v63, %v6398_v15  ;;  %v6717_v2 = vsel %vm2629_vm4, %v6396_v47, -inf }
 0x574   : > { %v6711_v58 = vrot.slane %v6710_v52, 4  ;;  %v6722_v55 = vsel %vm2629_vm4, %v6407_v23, -inf }
 0x575   : > { %v6718_v51 = vsel %vm2629_vm4, %v6399_v57, -inf }
 0x576   : > { %v6712_v61 = vmax.f32 %v6710_v52, %v6711_v58  ;;  %v6719_v35 = vmax.f32 %v6717_v2, %v6718_v51 }
 0x577   : > { %v8824_v0 = vpop.f32.mrb[116].mxu1 }
 0x578   : > { %v6713_v49 = vrot.slane %v6712_v61, 2  ;;  %v6721_v16 = vmax.f32 %v6719_v35, %v6720_v62  ;;  %v6411_v5 = vpop.f32.mrb[117].mxu1  ;;  %v6420_v10 = vadd.f32 %v10989_v63, %v8824_v0 }
 0x579   : > { %v6412_v7 = vadd.f32 %v10989_v63, %v6411_v5  ;;  %v8825_v43 = vpop.f32.mrb[118].mxu1  ;;  %v6961_v5 = vld [vmem:[%s11164_s11 + $0x8] sm:$0xff] }
 0x57a   : > { %v6714_v53 = vmax.f32 %v6712_v61, %v6713_v49  ;;  %v6723_v46 = vmax.f32 %v6721_v16, %v6722_v55  ;;  %v6414_v9 = vpop.f32.mrb[119].mxu1  ;;  %v6423_v1 = vadd.f32 %v10989_v63, %v8825_v43  ;;  %v6728_v3 = vsel %vm2629_vm4, %v6420_v10, -inf }
 0x57b   : > { %v6724_v11 = vsel %vm2629_vm4, %v6412_v7, -inf  ;;  %v6415_v60 = vadd.f32 %v10989_v63, %v6414_v9 }
 0x57c   : > { %v6715_v12 = vrot.slane %v6714_v53, 1  ;;  %v6725_v13 = vmax.f32 %v6723_v46, %v6724_v11  ;;  %v6730_v26 = vsel %vm2629_vm4, %v6423_v1, -inf  ;;  %v6963_v46 = vld [vmem:[%s11164_s11 + $0x18] sm:$0xff]  ;;  %v6964_v11 = vld [vmem:[%s11164_s11 + $0x20] sm:$0xff] }
 0x57d   : > { %v6726_v17 = vsel %vm2629_vm4, %v6415_v60, -inf  ;;  %v6965_v60 = vld [vmem:[%s11164_s11 + $0x28] sm:$0xff] }
 0x57e   : > { %v6716_v22 = vmax.f32 %v6714_v53, %v6715_v12  ;;  %v6727_v59 = vmax.f32 %v6725_v13, %v6726_v17  ;;  %v6962_v53 = vld [vmem:[%s11164_s11 + $0x10] sm:$0xff]  ;;  %v8905_v12 = vpack.c.bf16 %v6965_v60, %v6964_v11  ;;  %v6967_v13 = vld [vmem:[%s11164_s11 + $0x38] sm:$0xff]  ;;  %v7050_v17 = vld [vmem:[%s11166_s13] sm:$0xff] }
 0x57f   : > { %v8828_v24 = vpop.f32.mrb[120].mxu1  ;;  %v8902_v10 = vpack.c.bf16 %v6963_v46, %v6962_v53 }
 0x580   : > { %v6760_v28 = vmax.f32 %v6716_v22, 0.0  ;;  %v6729_v25 = vmax.f32 %v6727_v59, %v6728_v3  ;;  %v6427_v18 = vpop.f32.mrb[121].mxu1  ;;  %v6436_v30 = vadd.f32 %v10989_v63, %v8828_v24  ;;  %v7051_v22 = vld [vmem:[%s11166_s13 + $0x8] sm:$0xff]  ;;  %v7623_v24 = vld [vmem:[%s11163_s10] ss:$0 sm:$0xff] }
 0x581   : > { %v6428_v27 = vadd.f32 %v10989_v63, %v6427_v18  ;;  %v8829_v21 = vpop.f32.mrb[122].mxu1  ;;  %v8911_v59 = vpack.c.bf16 %v7051_v22, %v7050_v17 }
 0x582   : > { %v6731_v29 = vmax.f32 %v6729_v25, %v6730_v26  ;;  %v6430_v19 = vpop.f32.mrb[123].mxu1  ;;  %v6789_v8 = vsel %vm6788_vm10, %v6760_v28, %v11001_v20  ;;  %v6439_v32 = vadd.f32 %v10989_v63, %v8829_v21  ;;  %v6736_v56 = vsel %vm2629_vm4, %v6436_v30, -inf }
 0x583   : > { %v6732_v31 = vsel %vm2629_vm4, %v6428_v27, -inf  ;;  %v6431_v6 = vadd.f32 %v10989_v63, %v6430_v19  ;;  %8912 = vmatpush3.bf16.msra.mxu1 %v8911_v59  ;;  %v7052_v27 = vld [vmem:[%s11166_s13 + $0x10] sm:$0xff] }
 0x584   : > { %v6733_v50 = vmax.f32 %v6731_v29, %v6732_v31  ;;  %v6738_v39 = vsel %vm2629_vm4, %v6439_v32, -inf  ;;  %8913 = vmatprep.subr.bf16.mxu1 %v9041_v34  ;;  %v7624_v29 = vld [vmem:[%s11165_s12] ss:$0 sm:$0xff] }
 0x585   : > { %v6734_v33 = vsel %vm2629_vm4, %v6431_v6, -inf  ;;  %v7626_v6 = vld [vmem:[%s11167_s14] ss:$0 sm:$0xff] }
 0x586   : > { %v6735_v4 = vmax.f32 %v6733_v50, %v6734_v33 }
 0x587   : > { %v8832_v36 = vpop.f32.mrb[124].mxu1 }
 0x588   : > { %v6737_v37 = vmax.f32 %v6735_v4, %v6736_v56  ;;  %v6443_v38 = vpop.f32.mrb[125].mxu1  ;;  %v6452_v44 = vadd.f32 %v10989_v63, %v8832_v36 }
 0x589   : > { %v6444_v20 = vadd.f32 %v10989_v63, %v6443_v38  ;;  %v8833_v40 = vpop.f32.mrb[126].mxu1 }
 0x58a   : > { %v6739_v41 = vmax.f32 %v6737_v37, %v6738_v39  ;;  %v6446_v42 = vpop.f32.mrb[127].mxu1  ;;  %v6455_v52 = vadd.f32 %v10989_v63, %v8833_v40  ;;  %v6744_v57 = vsel %vm2629_vm4, %v6452_v44, -inf }
 0x58b   : > { %v6740_v45 = vsel %vm2629_vm4, %v6444_v20, -inf  ;;  %v6447_v47 = vadd.f32 %v10989_v63, %v6446_v42  ;;  %v6960_v63 = vld [vmem:[%s11164_s11] sm:$0xff] }
 0x58c   : > { %v6741_v48 = vmax.f32 %v6739_v41, %v6740_v45  ;;  %v6746_v51 = vsel %vm2629_vm4, %v6455_v52, -inf  ;;  %v8899_v43 = vpack.c.bf16 %v6961_v5, %v6960_v63 }
 0x58d   : > { %v6742_v15 = vsel %vm2629_vm4, %v6447_v47, -inf }
 0x58e   : > { %v6743_v54 = vmax.f32 %v6741_v48, %v6742_v15 }
 0x58f   : > { %v6947_v58 = vpop.f32.mrb[128].mxu1 }
 0x590   : > { %v6745_v2 = vmax.f32 %v6743_v54, %v6744_v57  ;;  %v8855_v23 = vpop.f32.mrb[129].mxu1 }
 0x592   : > { %v6747_v61 = vmax.f32 %v6745_v2, %v6746_v51 }
 0x594   : > { %v6748_v35 = vrot.slane %v6747_v61, 4 }
 0x596   : > { %v6749_v62 = vmax.f32 %v6747_v61, %v6748_v35 }
 0x598   : > { %v6750_v0 = vrot.slane %v6749_v62, 2 }
 0x59a   : > { %v6751_v49 = vmax.f32 %v6749_v62, %v6750_v0 }
 0x59c   : > { %v6752_v16 = vrot.slane %v6751_v49, 1 }
 0x59e   : > { %v6753_v55 = vmax.f32 %v6751_v49, %v6752_v16 }
 0x5a0   : > { %v6761_v7 = vmax.f32 %v6753_v55, 0.0 }
 0x5a2   : > { %v6791_v9 = vsel %vm6790_vm11, %v6761_v7, %v6789_v8 }
 0x5a3   : > { %8843 = vmatmul.mubr.msk.f32.vlgmr.msra.gmra.mrb[128].mxu0 %vm2629_vm4, %v6791_v9 }
 0x5a4   : > { %8900 = vmatpush3.bf16.msra.mxu0 %v8899_v43  ;;  %8872 = vmatprep.mubr.msk.f32.mxu0 %vm9042_vm12, %v9043_v14  ;;  %v6966_v14 = vld [vmem:[%s11164_s11 + $0x30] sm:$0xff] }
 0x5a5   : > { %8901 = vmatprep.subr.bf16.mxu0 %v9041_v34  ;;  %v8908_v1 = vpack.c.bf16 %v6967_v13, %v6966_v14 }
 0x5a8   : > { %8903 = vmatpush3.bf16.msra.mxu0 %v8902_v10 }
 0x5a9   : > { %8904 = vmatprep.subr.bf16.mxu0 %v9041_v34 }
 0x5ac   : > { %8906 = vmatpush3.bf16.msra.mxu0 %v8905_v12 }
 0x5ad   : > { %8907 = vmatprep.subr.bf16.mxu0 %v9041_v34  ;;  %v7053_v34 = vld [vmem:[%s11166_s13 + $0x18] sm:$0xff] }
 0x5ae   : > { %v8914_v21 = vpack.c.bf16 %v7053_v34, %v7052_v27 }
 0x5b0   : > { %8909 = vmatpush3.bf16.msra.mxu0 %v8908_v1  ;;  %8915 = vmatpush3.bf16.msra.mxu1 %v8914_v21 }
 0x676   : > { %v6860_v3 = vpop.f32.mrb[128].mxu0 }
 0x677   : > { %v6948_v28 = vadd.f32 %v6947_v58, %v6860_v3  ;;  %v8844_v25 = vpop.f32.mrb[129].mxu0 }
 0x679   : > { %v6958_v18 = vadd.f32 %v7623_v24, %v6948_v28 }
 0x67b   : > { %v6959_v26 = vmax.f32 %v6958_v18, 0.0 }
 0x67d   : > { %8873 = vmatmul.mubr.msk.f32.vlgmr.msra.gmra.mrb[130].mxu0 %vm6975_vm13, %v6959_v26 }
 0x750   : > { %v7045_v19 = vpop.f32.mrb[130].mxu0 }
 0x751   : > { %v7046_v8 = vadd.f32 %v7624_v29, %v7045_v19  ;;  %v8874_v30 = vpop.f32.mrb[131].mxu0 }
 0x753   : > { %v7049_v31 = vmax.f32 %v7046_v8, 0.0 }
 0x755   : > { %8884 = vmatmul.mubr.msk.f32.vlgmr.msra.gmra.mrb[130].mxu1 %vm2629_vm4, %v7049_v31 }
 0x828   : > { %v7130_v50 = vpop.f32.mrb[130].mxu1 }
 0x829   : > { %v7131_v32 = vadd.f32 %v7626_v6, %v7130_v50  ;;  %v8885_v33 = vpop.f32.mrb[131].mxu1 }
 0x82b   : > { %7134 = vst [vmem:[%s508_s26] sm:$0xff] %v7131_v32 }
 0x82c   : > { %8989 = shalt.err (!%p8986_p3)
}
 0x82d   : > { %s8990_s16 = scalar_lea.hbm %s11111_s3, 128  ;;  %s8994_s0 = scalar_lea.hbm %s11168_s15, 256 }
 0x82e   : > { %p8991_p4 = scmp.ne.s32.totalorder %s11111_s3, %s8990_s16  ;;  %p8995_p9 = scmp.lt.u32.totalorder %s11111_s3, %s11168_s15 }
 0x82f   : > { %p8996_p10 = scmp.lt.u32.totalorder %s8994_s0, %s8990_s16  ;;  %p8998_p12 = scmp.lt.u32.totalorder %s8990_s16, %s11111_s3 }
 0x830   : > { %p8992_p7 = pnand %p8991_p4, %p9163_p5 }
 0x831   : > { %p8997_p11 = por %p8996_p10, %p8995_p9 }
 0x832   : > { %p8993_p8 = pneg %p8992_p7 }
 0x833   : > { %p8999_p13 = por %p8998_p12, %p8997_p11 }
 0x835   : > { %p9000_p0 = pnand %p8999_p13, %p8993_p8 }
 0x837   : > { %9003 = shalt.err (!%p9000_p0)
}
 0x838   : > { %8916 = dma.vmem_to_hbm [thread:$0]  (%p9163_p5), %s11113_s2, 128, %s11111_s3, %s7136_s4  }
 0x839 PF: > { %p8922_p1 = scmp.ge.s32.totalorder %s9038_s21, 2  ;;  %s7161_s30 = sand.u32 1, %s9026_s18  }
 0x83a   : > { %s7162_s25 = scalar_lea.sflag [#allocation3], %s7161_s30 }
 0x83b   : > { %p8919_p2 = pnand %p8922_p1, %p9167_p6 }
 0x83d   : > { %9021 = dma.done.wait (!%p8919_p2), %s7162_s25, 128  }
 0x83e   : > { %9023 = vsyncadd (!%p8919_p2), %s7162_s25, 4294967168  ;;  %p25_p3 = scmp.ge.s32.totalorder %s9150_s24, 4   ;;  %s11181_s18 = smov %s9030_s19 }
 0x83f   : > { %s11182_s19 = smov %s9034_s20  ;;  %s11183_s20 = smov %s9161_s27 }
 0x840   : > { %s11184_s21 = smov %s9150_s24  ;;  %27 = sbr.rel (!%p25_p3) target bundleno = 9 (0x9), region = 118 }
 0x847   :  { %7167 = vsyncpa [#allocation3], 1 }
 0x848   :  { %7169 = vsyncpa [#allocation3 + $0x1], 1 }

</bundles_post_ra>
